<compile_context>
chip_gen: v7x
topology: tpu7x:2x2x1
jax: 0.10.0
libtpu: 0.0.40
codegen_flags: <defaults>
</compile_context>

<pallas_src>
import functools

import jax
import jax.numpy as jnp
from jax import lax
from jax.experimental import pallas as pl
from jax.experimental.pallas import tpu as pltpu


_LEAKY_SLOPE = 0.2
_VMEM_LIMIT = 32 * 1024 * 1024  # safe scoped-VMEM ceiling on v5e / v6e / v7x


def _leaky(x):
    return jnp.where(x > 0, x, _LEAKY_SLOPE * x)


# ---------------------------------------------------------------------------
# In-kernel im2col + matmul helpers
# ---------------------------------------------------------------------------

def _patch_matmul_fold(x_slice_fn, w_ref, KH, KW, TH, W):
    """Fold all taps into a single MXU matmul.

    x_slice_fn(kh, kw) -> (TH, W, Cin) shifted window (sliced from VMEM).
    w_ref: (KH*KW*Cin, Cout).  Returns (TH*W, Cout) f32.
    """
    cols = [x_slice_fn(kh, kw) for kh in range(KH) for kw in range(KW)]
    cin = cols[0].shape[-1]
    patch = jnp.concatenate(cols, axis=-1).reshape(TH * W, KH * KW * cin)
    return jnp.dot(patch, w_ref[...], preferred_element_type=jnp.float32)


def _patch_matmul_loop(x_slice_fn, w_ref, KH, KW, TH, W):
    """Fallback: accumulate one small matmul per tap.  w_ref: (KH*KW, Cin, Cout)."""
    cout = w_ref.shape[-1]
    acc = jnp.zeros((TH * W, cout), jnp.float32)
    t = 0
    for kh in range(KH):
        for kw in range(KW):
            tap = x_slice_fn(kh, kw).reshape(TH * W, -1)
            acc = acc + jnp.dot(tap, w_ref[t], preferred_element_type=jnp.float32)
            t += 1
    return acc


@functools.lru_cache(maxsize=None)
def _fold_supported():
    """One-time probe: does unaligned lane-dim concatenation (tap folding) lower on
    this backend?  If not, silently fall back to per-tap matmul accumulation."""
    TH, W, KH, KW = 8, 16, 3, 3

    def kern(x_ref, w_ref, o_ref):
        def sl(kh, kw):
            return x_ref[kh:kh + TH, kw:kw + W, :]
        o_ref[...] = _patch_matmul_fold(sl, w_ref, KH, KW, TH, W).astype(o_ref.dtype)

    try:
        for cin, cout in ((8, 16), (4, 4)):
            f = pl.pallas_call(
                kern,
                out_shape=jax.ShapeDtypeStruct((TH * W, cout), jnp.float32),
                grid=(1,),
                in_specs=[
                    pl.BlockSpec((TH + KH - 1, W + KW - 1, cin), lambda i: (0, 0, 0)),
                    pl.BlockSpec((KH * KW * cin, cout), lambda i: (0, 0)),
                ],
                out_specs=pl.BlockSpec((TH * W, cout), lambda i: (0, 0)),
                compiler_params=pltpu.CompilerParams(vmem_limit_bytes=_VMEM_LIMIT),
            )
            x = jax.ShapeDtypeStruct((TH + KH - 1, W + KW - 1, cin), jnp.float32)
            w = jax.ShapeDtypeStruct((KH * KW * cin, cout), jnp.float32)
            jax.jit(f).lower(x, w).compile()
        return True
    except Exception:
        return False


# ---------------------------------------------------------------------------
# Tiling helpers (JAX-level glue)
# ---------------------------------------------------------------------------

def _pick_tile_h(H, Wp, Cin, max_tile_h=None):
    """Largest divisor of H keeping one haloed input block within a small VMEM budget
    (or within the explicit cap)."""
    if max_tile_h is None:
        budget = 4 * 1024 * 1024  # per input block, before double buffering
        max_tile_h = max(8, budget // max(1, Wp * Cin * 4))
    cap = min(int(max_tile_h), H)
    for th in range(cap, 0, -1):
        if H % th == 0:
            return th
    return H


def _overlap_row_tiles(x_pad, tile_h, halo):
    """(N, H+halo, Wp, C) -> (N, R, tile_h+halo, Wp, C) overlapping row tiles so plain
    Blocked BlockSpecs can feed haloed tiles (duplicates only the halo rows)."""
    N, Hp, Wp, Cc = x_pad.shape
    R = (Hp - halo) // tile_h
    if R == 1:
        return x_pad[:, None]
    return jnp.stack(
        [x_pad[:, r * tile_h: r * tile_h + tile_h + halo] for r in range(R)], axis=1)


# ---------------------------------------------------------------------------
# Pallas kernels
# ---------------------------------------------------------------------------

def _conv_pallas(x_pad, w_hwio, bias, H_out, W_out, *, relu, tile_h=None):
    """Stride-1 "valid" conv of a pre-padded NHWC input (one fused matmul per tile).

    x_pad:  (N, H_out + KH - 1, W_out + KW - 1, Cin)
    w_hwio: (KH, KW, Cin, Cout);  bias: (Cout,)
    returns (N, H_out, W_out, Cout)
    """
    N = x_pad.shape[0]
    KH, KW, Cin, Cout = w_hwio.shape
    Wp = x_pad.shape[2]
    assert Wp == W_out + KW - 1
    halo = KH - 1
    TH = _pick_tile_h(H_out, Wp, Cin, tile_h)
    R = H_out // TH
    fold = _fold_supported()

    x_tiles = _overlap_row_tiles(x_pad, TH, halo)          # (N, R, TH+halo, Wp, Cin)
    w_arg = (w_hwio.reshape(KH * KW * Cin, Cout) if fold
             else w_hwio.reshape(KH * KW, Cin, Cout))
    b_arg = bias.reshape(1, Cout)
    w_ndim = w_arg.ndim

    def kernel(x_ref, w_ref, b_ref, o_ref):
        def sl(kh, kw):
            return x_ref[0, 0, kh:kh + TH, kw:kw + W_out, :]
        mm = _patch_matmul_fold if fold else _patch_matmul_loop
        acc = mm(sl, w_ref, KH, KW, TH, W_out) + b_ref[...]
        if relu:
            acc = _leaky(acc)
        o_ref[0] = acc.reshape(TH, W_out, Cout).astype(o_ref.dtype)

    return pl.pallas_call(
        kernel,
        out_shape=jax.ShapeDtypeStruct((N, H_out, W_out, Cout), x_pad.dtype),
        grid=(N, R),
        in_specs=[
            pl.BlockSpec((1, 1, TH + halo, Wp, Cin), lambda n, r: (n, r, 0, 0, 0)),
            pl.BlockSpec(w_arg.shape, lambda n, r: (0,) * w_ndim),
            pl.BlockSpec((1, Cout), lambda n, r: (0, 0)),
        ],
        out_specs=pl.BlockSpec((1, TH, W_out, Cout), lambda n, r: (n, r, 0, 0)),
        compiler_params=pltpu.CompilerParams(
            dimension_semantics=("parallel", "parallel"),
            vmem_limit_bytes=_VMEM_LIMIT,
        ),
    )(x_tiles, w_arg, b_arg)


def _conv12_fused_pallas(cat, w1_hwio, b1, w2_hwio, b2, residual, *, tile_h=None):
    """Fused conv1(3x3 + bias + LeakyReLU) -> conv2(3x3 + bias) -> +residual.

    The conv1 activation never leaves VMEM: each row tile recomputes a 1-pixel halo of
    conv1 into a VMEM scratch and applies conv2 on it within the same kernel step.
    """
    N, H, W, Cin = cat.shape
    C = w1_hwio.shape[-1]
    Wp = W + 4
    TH = _pick_tile_h(H, Wp, Cin, tile_h)
    R = H // TH
    TH1, W1 = TH + 2, W + 2           # conv1 halo region held in VMEM scratch
    fold = _fold_supported()

    catp = jnp.pad(cat, ((0, 0), (2, 2), (2, 2), (0, 0)))
    x_tiles = _overlap_row_tiles(catp, TH, 4)              # (N, R, TH+4, W+4, Cin)

    w1_arg = w1_hwio.reshape(9 * Cin, C) if fold else w1_hwio.reshape(9, Cin, C)
    w2_arg = w2_hwio.reshape(9 * C, C) if fold else w2_hwio.reshape(9, C, C)
    b1_arg = b1.reshape(1, C)
    b2_arg = b2.reshape(1, C)
    w1_ndim, w2_ndim = w1_arg.ndim, w2_arg.ndim

    def kernel(x_ref, w1_ref, b1_ref, w2_ref, b2_ref, res_ref, o_ref, y_ref):
        mm = _patch_matmul_fold if fold else _patch_matmul_loop

        # conv1 (+bias +LeakyReLU) over the tile plus a 1-pixel halo.
        def sl1(kh, kw):
            return x_ref[0, 0, kh:kh + TH1, kw:kw + W1, :]
        y = _leaky(mm(sl1, w1_ref, 3, 3, TH1, W1) + b1_ref[...]).reshape(TH1, W1, C)

        # Zero halo positions outside the image: conv2's padding must see zeros,
        # not conv1 evaluated out of bounds.
        r = pl.program_id(1)
        row = r * TH - 1 + lax.broadcasted_iota(jnp.int32, (TH1, W1, 1), 0)
        col = lax.broadcasted_iota(jnp.int32, (TH1, W1, 1), 1) - 1
        valid = (row >= 0) & (row < H) & (col >= 0) & (col < W)
        y_ref[...] = jnp.where(valid, y, 0.0)

        # conv2 (+bias) + residual.
        def sl2(kh, kw):
            return y_ref[kh:kh + TH, kw:kw + W, :]
        out = mm(sl2, w2_ref, 3, 3, TH, W) + b2_ref[...]
        out = out.reshape(TH, W, C) + res_ref[0].astype(jnp.float32)
        o_ref[0] = out.astype(o_ref.dtype)

    return pl.pallas_call(
        kernel,
        out_shape=jax.ShapeDtypeStruct((N, H, W, C), cat.dtype),
        grid=(N, R),
        in_specs=[
            pl.BlockSpec((1, 1, TH + 4, Wp, Cin), lambda n, r: (n, r, 0, 0, 0)),
            pl.BlockSpec(w1_arg.shape, lambda n, r: (0,) * w1_ndim),
            pl.BlockSpec((1, C), lambda n, r: (0, 0)),
            pl.BlockSpec(w2_arg.shape, lambda n, r: (0,) * w2_ndim),
            pl.BlockSpec((1, C), lambda n, r: (0, 0)),
            pl.BlockSpec((1, TH, W, C), lambda n, r: (n, r, 0, 0)),
        ],
        out_specs=pl.BlockSpec((1, TH, W, C), lambda n, r: (n, r, 0, 0)),
        scratch_shapes=[pltpu.VMEM((TH1, W1, C), jnp.float32)],
        compiler_params=pltpu.CompilerParams(
            dimension_semantics=("parallel", "parallel"),
            vmem_limit_bytes=_VMEM_LIMIT,
        ),
    )(x_tiles, w1_arg, b1_arg, w2_arg, b2_arg, residual)


def _conv_us_pallas(x2, w_ph, b_ph, *, tile_h=None):
    """ConvTranspose2d(k=4, s=2, p=1) + LeakyReLU via 2x2 phase decomposition: one 3x3
    "valid" conv on the 1-padded low-res input emits 4*C phase channels, pixel-shuffled
    to full resolution here (no 4x-size zero-dilated intermediate)."""
    N, Hin, Win, _ = x2.shape
    C = w_ph.shape[-1] // 4
    xp = jnp.pad(x2, ((0, 0), (1, 1), (1, 1), (0, 0)))
    ph = _conv_pallas(xp, w_ph, b_ph, Hin, Win, relu=True, tile_h=tile_h)
    ph = ph.reshape(N, Hin, Win, 2, 2, C)                  # (..., ra, rb, c)
    return ph.transpose(0, 1, 3, 2, 4, 5).reshape(N, 2 * Hin, 2 * Win, C)


# ---------------------------------------------------------------------------
# Parameters and forward
# ---------------------------------------------------------------------------

def _phase_decompose_convtranspose(wt, b):
    """PyTorch ConvTranspose2d(k=4, s=2, p=1) weight (Cin, Cout, 4, 4) -> equivalent
    3x3 "valid"-conv weights (3, 3, Cin, 4*Cout) over the 1-padded low-res input; the
    4 output phases are packed along channels as (ra, rb, co)."""
    Cin, Cout = wt.shape[0], wt.shape[1]
    w3 = jnp.zeros((3, 3, Cin, 4 * Cout), wt.dtype)
    for ra in range(2):
        for rb in range(2):
            q0 = (ra * 2 + rb) * Cout
            for sh in range(ra, ra + 2):
                for sw in range(rb, rb + 2):
                    kh = 3 + ra - 2 * sh
                    kw = 3 + rb - 2 * sw
                    w3 = w3.at[sh, sw, :, q0:q0 + Cout].set(wt[:, :, kh, kw])
    return w3, jnp.tile(b, 4)


def init_fmu_params(channel, key):
    """Deterministic synthetic parameters with the same shapes as the PyTorch module."""
    C = channel
    k = jax.random.split(key, 6)
    s = 0.1
    # PyTorch layouts: ConvTranspose2d weight (in, out, kH, kW); Conv2d weight (out, in, kH, kW)
    wt_us = jax.random.normal(k[0], (2 * C, C, 4, 4), jnp.float32) * s
    b_us = jax.random.normal(k[1], (C,), jnp.float32) * s
    w1 = jax.random.normal(k[2], (C, 2 * C, 3, 3), jnp.float32) * s
    b1 = jax.random.normal(k[3], (C,), jnp.float32) * s
    w2 = jax.random.normal(k[4], (C, C, 3, 3), jnp.float32) * s
    b2 = jax.random.normal(k[5], (C,), jnp.float32) * s

    w_us_ph, b_us_ph = _phase_decompose_convtranspose(wt_us, b_us)   # kernel path
    # HWIO weights (also used by the XLA reference); transposed conv as dilated conv.
    w_us_hwio = jnp.transpose(jnp.flip(wt_us, axis=(2, 3)), (2, 3, 0, 1))
    w1_hwio = jnp.transpose(w1, (2, 3, 1, 0))
    w2_hwio = jnp.transpose(w2, (2, 3, 1, 0))
    return dict(
        w_us_ph=w_us_ph, b_us_ph=b_us_ph,
        w1=w1_hwio, b1=b1, w2=w2_hwio, b2=b2,
        w_us_ref=w_us_hwio, b_us=b_us,
    )


def fmu_forward(params, x1, x2, *, tile_h=None):
    """x1: (N, H, W, C), x2: (N, H//2, W//2, 2C) -> (N, H, W, C)."""
    x2u = _conv_us_pallas(x2, params["w_us_ph"], params["b_us_ph"], tile_h=tile_h)
    cat = jnp.concatenate([x1, x2u], axis=-1)
    return _conv12_fused_pallas(cat, params["w1"], params["b1"],
                                params["w2"], params["b2"], x2u, tile_h=tile_h)


def fmu_reference(params, x1, x2):
    """Pure-JAX (XLA conv, high precision) reference for the same NHWC formulation."""
    dn = ("NHWC", "HWIO", "NHWC")
    hp = lax.Precision.HIGHEST
    t = lax.conv_general_dilated(
        x2, params["w_us_ref"], (1, 1), ((2, 2), (2, 2)), lhs_dilation=(2, 2),
        dimension_numbers=dn, precision=hp) + params["b_us"]
    t = _leaky(t)
    cat = jnp.concatenate([x1, t], axis=-1)
    y = lax.conv_general_dilated(cat, params["w1"], (1, 1), ((1, 1), (1, 1)),
                                 dimension_numbers=dn, precision=hp) + params["b1"]
    y = _leaky(y)
    y = lax.conv_general_dilated(y, params["w2"], (1, 1), ((1, 1), (1, 1)),
                                 dimension_numbers=dn, precision=hp) + params["b2"]
    return y + t


if __name__ == "__main__":
    key = jax.random.PRNGKey(0)
    kp, k1, k2 = jax.random.split(key, 3)
    C = 4
    N, H, W = 2, 16, 16

    params = init_fmu_params(C, kp)
    x1 = jax.random.normal(k1, (N, H, W, C), jnp.float32)               # NHWC
    x2 = jax.random.normal(k2, (N, H // 2, W // 2, 2 * C), jnp.float32)

    _fold_supported()  # warm the one-time probe (folded vs per-tap matmul path)

    fwd = jax.jit(fmu_forward, static_argnames=("tile_h",))
    out = fwd(params, x1, x2, tile_h=8)   # tile_h=8 -> 2 row tiles: exercises halo path
    out = jax.block_until_ready(out)

    ref = fmu_reference(params, x1, x2)
    assert out.shape == (N, H, W, C)
    max_err = float(jnp.max(jnp.abs(out - ref)))
    # Kernel matmuls run at default (bf16-pass, f32-accumulate) precision vs the
    # HIGHEST-precision reference, hence the relaxed tolerance.
    assert jnp.allclose(out, ref, atol=2e-2, rtol=2e-2), max_err
    print("KERNEL_OK")
</pallas_src>

<mosaic_0001>
module attributes {stable_mosaic.version = 11 : i64} {
  func.func @kernel(%arg0: i32, %arg1: i32, %arg2: memref<1x1x10x10x8xf32, #tpu.memory_space<vmem>>, %arg3: memref<9x8x16xf32, #tpu.memory_space<vmem>>, %arg4: memref<1x16xf32, #tpu.memory_space<vmem>>, %arg5: memref<1x8x8x16xf32, #tpu.memory_space<vmem>>) attributes {dimension_semantics = [#tpu.dimension_semantics<parallel>, #tpu.dimension_semantics<parallel>], iteration_bounds = array<i64: 2, 1>, scalar_prefetch = 0 : i64, scratch_operands = 0 : i64, tpu.core_type = #tpu.core_type<tc>, window_params = [{transform_indices = @transform_0, window_bounds = array<i64: 1, 1, 10, 10, 8>}, {pipeline_mode = #tpu.pipeline_mode<synchronous>, transform_indices = @transform_1, window_bounds = array<i64: 9, 8, 16>}, {pipeline_mode = #tpu.pipeline_mode<synchronous>, transform_indices = @transform_2, window_bounds = array<i64: 1, 16>}, {transform_indices = @transform_3, window_bounds = array<i64: 1, 8, 8, 16>}]} {
    %cst = arith.constant 0.000000e+00 : f32
    %0 = vector.broadcast %cst : f32 to vector<64x16xf32>
    %c0 = arith.constant 0 : index
    %c0_0 = arith.constant 0 : index
    %c0_1 = arith.constant 0 : index
    %c0_2 = arith.constant 0 : index
    %c0_3 = arith.constant 0 : index
    %1 = vector.load %arg2[%c0, %c0_0, %c0_1, %c0_2, %c0_3] : memref<1x1x10x10x8xf32, #tpu.memory_space<vmem>>, vector<1x1x8x8x8xf32>
    %2 = vector.shape_cast %1 : vector<1x1x8x8x8xf32> to vector<8x8x8xf32>
    %3 = vector.shape_cast %2 : vector<8x8x8xf32> to vector<64x8xf32>
    %c0_4 = arith.constant 0 : index
    %c0_5 = arith.constant 0 : index
    %c0_6 = arith.constant 0 : index
    %4 = vector.load %arg3[%c0_4, %c0_5, %c0_6] : memref<9x8x16xf32, #tpu.memory_space<vmem>>, vector<1x8x16xf32>
    %5 = vector.shape_cast %4 : vector<1x8x16xf32> to vector<8x16xf32>
    %cst_7 = arith.constant dense<0.000000e+00> : vector<64x16xf32>
    %6 = tpu.matmul %3, %5, %cst_7 {dimension_numbers = #tpu.dot_dimension_numbers<[1], [0], [0], [1], [0, 0, 1, 1], [], []>} : vector<64x8xf32>, vector<8x16xf32>, vector<64x16xf32> -> vector<64x16xf32>
    %7 = arith.addf %0, %6 : vector<64x16xf32>
    %c0_8 = arith.constant 0 : index
    %c0_9 = arith.constant 0 : index
    %c0_10 = arith.constant 0 : index
    %c1 = arith.constant 1 : index
    %c0_11 = arith.constant 0 : index
    %8 = vector.load %arg2[%c0_8, %c0_9, %c0_10, %c1, %c0_11] : memref<1x1x10x10x8xf32, #tpu.memory_space<vmem>>, vector<1x1x8x8x8xf32>
    %9 = vector.shape_cast %8 : vector<1x1x8x8x8xf32> to vector<8x8x8xf32>
    %10 = vector.shape_cast %9 : vector<8x8x8xf32> to vector<64x8xf32>
    %c1_12 = arith.constant 1 : index
    %c0_13 = arith.constant 0 : index
    %c0_14 = arith.constant 0 : index
    %11 = vector.load %arg3[%c1_12, %c0_13, %c0_14] : memref<9x8x16xf32, #tpu.memory_space<vmem>>, vector<1x8x16xf32>
    %12 = vector.shape_cast %11 : vector<1x8x16xf32> to vector<8x16xf32>
    %cst_15 = arith.constant dense<0.000000e+00> : vector<64x16xf32>
    %13 = tpu.matmul %10, %12, %cst_15 {dimension_numbers = #tpu.dot_dimension_numbers<[1], [0], [0], [1], [0, 0, 1, 1], [], []>} : vector<64x8xf32>, vector<8x16xf32>, vector<64x16xf32> -> vector<64x16xf32>
    %14 = arith.addf %7, %13 : vector<64x16xf32>
    %c0_16 = arith.constant 0 : index
    %c0_17 = arith.constant 0 : index
    %c0_18 = arith.constant 0 : index
    %c2 = arith.constant 2 : index
    %c0_19 = arith.constant 0 : index
    %15 = vector.load %arg2[%c0_16, %c0_17, %c0_18, %c2, %c0_19] : memref<1x1x10x10x8xf32, #tpu.memory_space<vmem>>, vector<1x1x8x8x8xf32>
    %16 = vector.shape_cast %15 : vector<1x1x8x8x8xf32> to vector<8x8x8xf32>
    %17 = vector.shape_cast %16 : vector<8x8x8xf32> to vector<64x8xf32>
    %c2_20 = arith.constant 2 : index
    %c0_21 = arith.constant 0 : index
    %c0_22 = arith.constant 0 : index
    %18 = vector.load %arg3[%c2_20, %c0_21, %c0_22] : memref<9x8x16xf32, #tpu.memory_space<vmem>>, vector<1x8x16xf32>
    %19 = vector.shape_cast %18 : vector<1x8x16xf32> to vector<8x16xf32>
    %cst_23 = arith.constant dense<0.000000e+00> : vector<64x16xf32>
    %20 = tpu.matmul %17, %19, %cst_23 {dimension_numbers = #tpu.dot_dimension_numbers<[1], [0], [0], [1], [0, 0, 1, 1], [], []>} : vector<64x8xf32>, vector<8x16xf32>, vector<64x16xf32> -> vector<64x16xf32>
    %21 = arith.addf %14, %20 : vector<64x16xf32>
    %c0_24 = arith.constant 0 : index
    %c0_25 = arith.constant 0 : index
    %c1_26 = arith.constant 1 : index
    %c0_27 = arith.constant 0 : index
    %c0_28 = arith.constant 0 : index
    %22 = vector.load %arg2[%c0_24, %c0_25, %c1_26, %c0_27, %c0_28] : memref<1x1x10x10x8xf32, #tpu.memory_space<vmem>>, vector<1x1x8x8x8xf32>
    %23 = vector.shape_cast %22 : vector<1x1x8x8x8xf32> to vector<8x8x8xf32>
    %24 = vector.shape_cast %23 : vector<8x8x8xf32> to vector<64x8xf32>
    %c3 = arith.constant 3 : index
    %c0_29 = arith.constant 0 : index
    %c0_30 = arith.constant 0 : index
    %25 = vector.load %arg3[%c3, %c0_29, %c0_30] : memref<9x8x16xf32, #tpu.memory_space<vmem>>, vector<1x8x16xf32>
    %26 = vector.shape_cast %25 : vector<1x8x16xf32> to vector<8x16xf32>
    %cst_31 = arith.constant dense<0.000000e+00> : vector<64x16xf32>
    %27 = tpu.matmul %24, %26, %cst_31 {dimension_numbers = #tpu.dot_dimension_numbers<[1], [0], [0], [1], [0, 0, 1, 1], [], []>} : vector<64x8xf32>, vector<8x16xf32>, vector<64x16xf32> -> vector<64x16xf32>
    %28 = arith.addf %21, %27 : vector<64x16xf32>
    %c0_32 = arith.constant 0 : index
    %c0_33 = arith.constant 0 : index
    %c1_34 = arith.constant 1 : index
    %c1_35 = arith.constant 1 : index
    %c0_36 = arith.constant 0 : index
    %29 = vector.load %arg2[%c0_32, %c0_33, %c1_34, %c1_35, %c0_36] : memref<1x1x10x10x8xf32, #tpu.memory_space<vmem>>, vector<1x1x8x8x8xf32>
    %30 = vector.shape_cast %29 : vector<1x1x8x8x8xf32> to vector<8x8x8xf32>
    %31 = vector.shape_cast %30 : vector<8x8x8xf32> to vector<64x8xf32>
    %c4 = arith.constant 4 : index
    %c0_37 = arith.constant 0 : index
    %c0_38 = arith.constant 0 : index
    %32 = vector.load %arg3[%c4, %c0_37, %c0_38] : memref<9x8x16xf32, #tpu.memory_space<vmem>>, vector<1x8x16xf32>
    %33 = vector.shape_cast %32 : vector<1x8x16xf32> to vector<8x16xf32>
    %cst_39 = arith.constant dense<0.000000e+00> : vector<64x16xf32>
    %34 = tpu.matmul %31, %33, %cst_39 {dimension_numbers = #tpu.dot_dimension_numbers<[1], [0], [0], [1], [0, 0, 1, 1], [], []>} : vector<64x8xf32>, vector<8x16xf32>, vector<64x16xf32> -> vector<64x16xf32>
    %35 = arith.addf %28, %34 : vector<64x16xf32>
    %c0_40 = arith.constant 0 : index
    %c0_41 = arith.constant 0 : index
    %c1_42 = arith.constant 1 : index
    %c2_43 = arith.constant 2 : index
    %c0_44 = arith.constant 0 : index
    %36 = vector.load %arg2[%c0_40, %c0_41, %c1_42, %c2_43, %c0_44] : memref<1x1x10x10x8xf32, #tpu.memory_space<vmem>>, vector<1x1x8x8x8xf32>
    %37 = vector.shape_cast %36 : vector<1x1x8x8x8xf32> to vector<8x8x8xf32>
    %38 = vector.shape_cast %37 : vector<8x8x8xf32> to vector<64x8xf32>
    %c5 = arith.constant 5 : index
    %c0_45 = arith.constant 0 : index
    %c0_46 = arith.constant 0 : index
    %39 = vector.load %arg3[%c5, %c0_45, %c0_46] : memref<9x8x16xf32, #tpu.memory_space<vmem>>, vector<1x8x16xf32>
    %40 = vector.shape_cast %39 : vector<1x8x16xf32> to vector<8x16xf32>
    %cst_47 = arith.constant dense<0.000000e+00> : vector<64x16xf32>
    %41 = tpu.matmul %38, %40, %cst_47 {dimension_numbers = #tpu.dot_dimension_numbers<[1], [0], [0], [1], [0, 0, 1, 1], [], []>} : vector<64x8xf32>, vector<8x16xf32>, vector<64x16xf32> -> vector<64x16xf32>
    %42 = arith.addf %35, %41 : vector<64x16xf32>
    %c0_48 = arith.constant 0 : index
    %c0_49 = arith.constant 0 : index
    %c2_50 = arith.constant 2 : index
    %c0_51 = arith.constant 0 : index
    %c0_52 = arith.constant 0 : index
    %43 = vector.load %arg2[%c0_48, %c0_49, %c2_50, %c0_51, %c0_52] : memref<1x1x10x10x8xf32, #tpu.memory_space<vmem>>, vector<1x1x8x8x8xf32>
    %44 = vector.shape_cast %43 : vector<1x1x8x8x8xf32> to vector<8x8x8xf32>
    %45 = vector.shape_cast %44 : vector<8x8x8xf32> to vector<64x8xf32>
    %c6 = arith.constant 6 : index
    %c0_53 = arith.constant 0 : index
    %c0_54 = arith.constant 0 : index
    %46 = vector.load %arg3[%c6, %c0_53, %c0_54] : memref<9x8x16xf32, #tpu.memory_space<vmem>>, vector<1x8x16xf32>
    %47 = vector.shape_cast %46 : vector<1x8x16xf32> to vector<8x16xf32>
    %cst_55 = arith.constant dense<0.000000e+00> : vector<64x16xf32>
    %48 = tpu.matmul %45, %47, %cst_55 {dimension_numbers = #tpu.dot_dimension_numbers<[1], [0], [0], [1], [0, 0, 1, 1], [], []>} : vector<64x8xf32>, vector<8x16xf32>, vector<64x16xf32> -> vector<64x16xf32>
    %49 = arith.addf %42, %48 : vector<64x16xf32>
    %c0_56 = arith.constant 0 : index
    %c0_57 = arith.constant 0 : index
    %c2_58 = arith.constant 2 : index
    %c1_59 = arith.constant 1 : index
    %c0_60 = arith.constant 0 : index
    %50 = vector.load %arg2[%c0_56, %c0_57, %c2_58, %c1_59, %c0_60] : memref<1x1x10x10x8xf32, #tpu.memory_space<vmem>>, vector<1x1x8x8x8xf32>
    %51 = vector.shape_cast %50 : vector<1x1x8x8x8xf32> to vector<8x8x8xf32>
    %52 = vector.shape_cast %51 : vector<8x8x8xf32> to vector<64x8xf32>
    %c7 = arith.constant 7 : index
    %c0_61 = arith.constant 0 : index
    %c0_62 = arith.constant 0 : index
    %53 = vector.load %arg3[%c7, %c0_61, %c0_62] : memref<9x8x16xf32, #tpu.memory_space<vmem>>, vector<1x8x16xf32>
    %54 = vector.shape_cast %53 : vector<1x8x16xf32> to vector<8x16xf32>
    %cst_63 = arith.constant dense<0.000000e+00> : vector<64x16xf32>
    %55 = tpu.matmul %52, %54, %cst_63 {dimension_numbers = #tpu.dot_dimension_numbers<[1], [0], [0], [1], [0, 0, 1, 1], [], []>} : vector<64x8xf32>, vector<8x16xf32>, vector<64x16xf32> -> vector<64x16xf32>
    %56 = arith.addf %49, %55 : vector<64x16xf32>
    %c0_64 = arith.constant 0 : index
    %c0_65 = arith.constant 0 : index
    %c2_66 = arith.constant 2 : index
    %c2_67 = arith.constant 2 : index
    %c0_68 = arith.constant 0 : index
    %57 = vector.load %arg2[%c0_64, %c0_65, %c2_66, %c2_67, %c0_68] : memref<1x1x10x10x8xf32, #tpu.memory_space<vmem>>, vector<1x1x8x8x8xf32>
    %58 = vector.shape_cast %57 : vector<1x1x8x8x8xf32> to vector<8x8x8xf32>
    %59 = vector.shape_cast %58 : vector<8x8x8xf32> to vector<64x8xf32>
    %c8 = arith.constant 8 : index
    %c0_69 = arith.constant 0 : index
    %c0_70 = arith.constant 0 : index
    %60 = vector.load %arg3[%c8, %c0_69, %c0_70] : memref<9x8x16xf32, #tpu.memory_space<vmem>>, vector<1x8x16xf32>
    %61 = vector.shape_cast %60 : vector<1x8x16xf32> to vector<8x16xf32>
    %cst_71 = arith.constant dense<0.000000e+00> : vector<64x16xf32>
    %62 = tpu.matmul %59, %61, %cst_71 {dimension_numbers = #tpu.dot_dimension_numbers<[1], [0], [0], [1], [0, 0, 1, 1], [], []>} : vector<64x8xf32>, vector<8x16xf32>, vector<64x16xf32> -> vector<64x16xf32>
    %63 = arith.addf %56, %62 : vector<64x16xf32>
    %c0_72 = arith.constant 0 : index
    %c0_73 = arith.constant 0 : index
    %64 = vector.load %arg4[%c0_72, %c0_73] : memref<1x16xf32, #tpu.memory_space<vmem>>, vector<1x16xf32>
    %65 = vector.broadcast %64 : vector<1x16xf32> to vector<64x16xf32>
    %66 = arith.addf %63, %65 : vector<64x16xf32>
    %cst_74 = arith.constant 0.000000e+00 : f32
    %67 = vector.broadcast %cst_74 : f32 to vector<64x16xf32>
    %68 = arith.cmpf ogt, %66, %67 : vector<64x16xf32>
    %cst_75 = arith.constant 2.000000e-01 : f32
    %69 = vector.broadcast %cst_75 : f32 to vector<64x16xf32>
    %70 = arith.mulf %69, %66 : vector<64x16xf32>
    %71 = arith.select %68, %66, %70 : vector<64x16xi1>, vector<64x16xf32>
    %72 = vector.shape_cast %71 : vector<64x16xf32> to vector<8x8x16xf32>
    %c0_76 = arith.constant 0 : index
    %c0_77 = arith.constant 0 : index
    %c0_78 = arith.constant 0 : index
    %c0_79 = arith.constant 0 : index
    %73 = vector.load %arg5[%c0_76, %c0_77, %c0_78, %c0_79] : memref<1x8x8x16xf32, #tpu.memory_space<vmem>>, vector<1x8x8x16xf32>
    %74 = vector.shape_cast %73 : vector<1x8x8x16xf32> to vector<8x8x16xf32>
    %75 = vector.shape_cast %72 : vector<8x8x16xf32> to vector<1x8x8x16xf32>
    tpu.vector_store %arg5[%c0_76, %c0_77, %c0_78, %c0_79], %75 {strides = array<i32>} : memref<1x8x8x16xf32, #tpu.memory_space<vmem>>, vector<1x8x8x16xf32>,
    return
  }
  func.func @transform_0(%arg0: i32, %arg1: i32) -> (i32, i32, i32, i32, i32) {
    %c0_i32 = arith.constant 0 : i32
    %c0_i32_0 = arith.constant 0 : i32
    %c0_i32_1 = arith.constant 0 : i32
    %c0_i32_2 = arith.constant 0 : i32
    return %arg0, %arg1, %c0_i32, %c0_i32_0, %c0_i32_1 : i32, i32, i32, i32, i32
  }
  func.func @transform_1(%arg0: i32, %arg1: i32) -> (i32, i32, i32) {
    %c0_i32 = arith.constant 0 : i32
    %c0_i32_0 = arith.constant 0 : i32
    %c0_i32_1 = arith.constant 0 : i32
    %c0_i32_2 = arith.constant 0 : i32
    return %c0_i32, %c0_i32_0, %c0_i32_1 : i32, i32, i32
  }
  func.func @transform_2(%arg0: i32, %arg1: i32) -> (i32, i32) {
    %c0_i32 = arith.constant 0 : i32
    %c0_i32_0 = arith.constant 0 : i32
    %c0_i32_1 = arith.constant 0 : i32
    return %c0_i32, %c0_i32_0 : i32, i32
  }
  func.func @transform_3(%arg0: i32, %arg1: i32) -> (i32, i32, i32, i32) {
    %c0_i32 = arith.constant 0 : i32
    %c0_i32_0 = arith.constant 0 : i32
    %c0_i32_1 = arith.constant 0 : i32
    return %arg0, %arg1, %c0_i32, %c0_i32_0 : i32, i32, i32, i32
  }
}

module attributes {stable_mosaic.version = 11 : i64} {
  func.func @kernel(%arg0: i32, %arg1: i32, %arg2: memref<1x1x12x20x8xf32, #tpu.memory_space<vmem>>, %arg3: memref<9x8x4xf32, #tpu.memory_space<vmem>>, %arg4: memref<1x4xf32, #tpu.memory_space<vmem>>, %arg5: memref<9x4x4xf32, #tpu.memory_space<vmem>>, %arg6: memref<1x4xf32, #tpu.memory_space<vmem>>, %arg7: memref<1x8x16x4xf32, #tpu.memory_space<vmem>>, %arg8: memref<1x8x16x4xf32, #tpu.memory_space<vmem>>, %arg9: memref<10x18x4xf32, #tpu.memory_space<vmem>>) attributes {dimension_semantics = [#tpu.dimension_semantics<parallel>, #tpu.dimension_semantics<parallel>], iteration_bounds = array<i64: 2, 2>, scalar_prefetch = 0 : i64, scratch_operands = 1 : i64, tpu.core_type = #tpu.core_type<tc>, window_params = [{transform_indices = @transform_0, window_bounds = array<i64: 1, 1, 12, 20, 8>}, {pipeline_mode = #tpu.pipeline_mode<synchronous>, transform_indices = @transform_1, window_bounds = array<i64: 9, 8, 4>}, {pipeline_mode = #tpu.pipeline_mode<synchronous>, transform_indices = @transform_2, window_bounds = array<i64: 1, 4>}, {pipeline_mode = #tpu.pipeline_mode<synchronous>, transform_indices = @transform_3, window_bounds = array<i64: 9, 4, 4>}, {pipeline_mode = #tpu.pipeline_mode<synchronous>, transform_indices = @transform_4, window_bounds = array<i64: 1, 4>}, {transform_indices = @transform_5, window_bounds = array<i64: 1, 8, 16, 4>}, {transform_indices = @transform_6, window_bounds = array<i64: 1, 8, 16, 4>}]} {
    %cst = arith.constant 0.000000e+00 : f32
    %0 = vector.broadcast %cst : f32 to vector<180x4xf32>
    %c0 = arith.constant 0 : index
    %c0_0 = arith.constant 0 : index
    %c0_1 = arith.constant 0 : index
    %c0_2 = arith.constant 0 : index
    %c0_3 = arith.constant 0 : index
    %1 = vector.load %arg2[%c0, %c0_0, %c0_1, %c0_2, %c0_3] : memref<1x1x12x20x8xf32, #tpu.memory_space<vmem>>, vector<1x1x10x18x8xf32>
    %2 = vector.shape_cast %1 : vector<1x1x10x18x8xf32> to vector<10x18x8xf32>
    %3 = vector.shape_cast %2 : vector<10x18x8xf32> to vector<180x8xf32>
    %c0_4 = arith.constant 0 : index
    %c0_5 = arith.constant 0 : index
    %c0_6 = arith.constant 0 : index
    %4 = vector.load %arg3[%c0_4, %c0_5, %c0_6] : memref<9x8x4xf32, #tpu.memory_space<vmem>>, vector<1x8x4xf32>
    %5 = vector.shape_cast %4 : vector<1x8x4xf32> to vector<8x4xf32>
    %cst_7 = arith.constant dense<0.000000e+00> : vector<180x4xf32>
    %6 = tpu.matmul %3, %5, %cst_7 {dimension_numbers = #tpu.dot_dimension_numbers<[1], [0], [0], [1], [0, 0, 1, 1], [], []>} : vector<180x8xf32>, vector<8x4xf32>, vector<180x4xf32> -> vector<180x4xf32>
    %7 = arith.addf %0, %6 : vector<180x4xf32>
    %c0_8 = arith.constant 0 : index
    %c0_9 = arith.constant 0 : index
    %c0_10 = arith.constant 0 : index
    %c1 = arith.constant 1 : index
    %c0_11 = arith.constant 0 : index
    %8 = vector.load %arg2[%c0_8, %c0_9, %c0_10, %c1, %c0_11] : memref<1x1x12x20x8xf32, #tpu.memory_space<vmem>>, vector<1x1x10x18x8xf32>
    %9 = vector.shape_cast %8 : vector<1x1x10x18x8xf32> to vector<10x18x8xf32>
    %10 = vector.shape_cast %9 : vector<10x18x8xf32> to vector<180x8xf32>
    %c1_12 = arith.constant 1 : index
    %c0_13 = arith.constant 0 : index
    %c0_14 = arith.constant 0 : index
    %11 = vector.load %arg3[%c1_12, %c0_13, %c0_14] : memref<9x8x4xf32, #tpu.memory_space<vmem>>, vector<1x8x4xf32>
    %12 = vector.shape_cast %11 : vector<1x8x4xf32> to vector<8x4xf32>
    %cst_15 = arith.constant dense<0.000000e+00> : vector<180x4xf32>
    %13 = tpu.matmul %10, %12, %cst_15 {dimension_numbers = #tpu.dot_dimension_numbers<[1], [0], [0], [1], [0, 0, 1, 1], [], []>} : vector<180x8xf32>, vector<8x4xf32>, vector<180x4xf32> -> vector<180x4xf32>
    %14 = arith.addf %7, %13 : vector<180x4xf32>
    %c0_16 = arith.constant 0 : index
    %c0_17 = arith.constant 0 : index
    %c0_18 = arith.constant 0 : index
    %c2 = arith.constant 2 : index
    %c0_19 = arith.constant 0 : index
    %15 = vector.load %arg2[%c0_16, %c0_17, %c0_18, %c2, %c0_19] : memref<1x1x12x20x8xf32, #tpu.memory_space<vmem>>, vector<1x1x10x18x8xf32>
    %16 = vector.shape_cast %15 : vector<1x1x10x18x8xf32> to vector<10x18x8xf32>
    %17 = vector.shape_cast %16 : vector<10x18x8xf32> to vector<180x8xf32>
    %c2_20 = arith.constant 2 : index
    %c0_21 = arith.constant 0 : index
    %c0_22 = arith.constant 0 : index
    %18 = vector.load %arg3[%c2_20, %c0_21, %c0_22] : memref<9x8x4xf32, #tpu.memory_space<vmem>>, vector<1x8x4xf32>
    %19 = vector.shape_cast %18 : vector<1x8x4xf32> to vector<8x4xf32>
    %cst_23 = arith.constant dense<0.000000e+00> : vector<180x4xf32>
    %20 = tpu.matmul %17, %19, %cst_23 {dimension_numbers = #tpu.dot_dimension_numbers<[1], [0], [0], [1], [0, 0, 1, 1], [], []>} : vector<180x8xf32>, vector<8x4xf32>, vector<180x4xf32> -> vector<180x4xf32>
    %21 = arith.addf %14, %20 : vector<180x4xf32>
    %c0_24 = arith.constant 0 : index
    %c0_25 = arith.constant 0 : index
    %c1_26 = arith.constant 1 : index
    %c0_27 = arith.constant 0 : index
    %c0_28 = arith.constant 0 : index
    %22 = vector.load %arg2[%c0_24, %c0_25, %c1_26, %c0_27, %c0_28] : memref<1x1x12x20x8xf32, #tpu.memory_space<vmem>>, vector<1x1x10x18x8xf32>
    %23 = vector.shape_cast %22 : vector<1x1x10x18x8xf32> to vector<10x18x8xf32>
    %24 = vector.shape_cast %23 : vector<10x18x8xf32> to vector<180x8xf32>
    %c3 = arith.constant 3 : index
    %c0_29 = arith.constant 0 : index
    %c0_30 = arith.constant 0 : index
    %25 = vector.load %arg3[%c3, %c0_29, %c0_30] : memref<9x8x4xf32, #tpu.memory_space<vmem>>, vector<1x8x4xf32>
    %26 = vector.shape_cast %25 : vector<1x8x4xf32> to vector<8x4xf32>
    %cst_31 = arith.constant dense<0.000000e+00> : vector<180x4xf32>
    %27 = tpu.matmul %24, %26, %cst_31 {dimension_numbers = #tpu.dot_dimension_numbers<[1], [0], [0], [1], [0, 0, 1, 1], [], []>} : vector<180x8xf32>, vector<8x4xf32>, vector<180x4xf32> -> vector<180x4xf32>
    %28 = arith.addf %21, %27 : vector<180x4xf32>
    %c0_32 = arith.constant 0 : index
    %c0_33 = arith.constant 0 : index
    %c1_34 = arith.constant 1 : index
    %c1_35 = arith.constant 1 : index
    %c0_36 = arith.constant 0 : index
    %29 = vector.load %arg2[%c0_32, %c0_33, %c1_34, %c1_35, %c0_36] : memref<1x1x12x20x8xf32, #tpu.memory_space<vmem>>, vector<1x1x10x18x8xf32>
    %30 = vector.shape_cast %29 : vector<1x1x10x18x8xf32> to vector<10x18x8xf32>
    %31 = vector.shape_cast %30 : vector<10x18x8xf32> to vector<180x8xf32>
    %c4 = arith.constant 4 : index
    %c0_37 = arith.constant 0 : index
    %c0_38 = arith.constant 0 : index
    %32 = vector.load %arg3[%c4, %c0_37, %c0_38] : memref<9x8x4xf32, #tpu.memory_space<vmem>>, vector<1x8x4xf32>
    %33 = vector.shape_cast %32 : vector<1x8x4xf32> to vector<8x4xf32>
    %cst_39 = arith.constant dense<0.000000e+00> : vector<180x4xf32>
    %34 = tpu.matmul %31, %33, %cst_39 {dimension_numbers = #tpu.dot_dimension_numbers<[1], [0], [0], [1], [0, 0, 1, 1], [], []>} : vector<180x8xf32>, vector<8x4xf32>, vector<180x4xf32> -> vector<180x4xf32>
    %35 = arith.addf %28, %34 : vector<180x4xf32>
    %c0_40 = arith.constant 0 : index
    %c0_41 = arith.constant 0 : index
    %c1_42 = arith.constant 1 : index
    %c2_43 = arith.constant 2 : index
    %c0_44 = arith.constant 0 : index
    %36 = vector.load %arg2[%c0_40, %c0_41, %c1_42, %c2_43, %c0_44] : memref<1x1x12x20x8xf32, #tpu.memory_space<vmem>>, vector<1x1x10x18x8xf32>
    %37 = vector.shape_cast %36 : vector<1x1x10x18x8xf32> to vector<10x18x8xf32>
    %38 = vector.shape_cast %37 : vector<10x18x8xf32> to vector<180x8xf32>
    %c5 = arith.constant 5 : index
    %c0_45 = arith.constant 0 : index
    %c0_46 = arith.constant 0 : index
    %39 = vector.load %arg3[%c5, %c0_45, %c0_46] : memref<9x8x4xf32, #tpu.memory_space<vmem>>, vector<1x8x4xf32>
    %40 = vector.shape_cast %39 : vector<1x8x4xf32> to vector<8x4xf32>
    %cst_47 = arith.constant dense<0.000000e+00> : vector<180x4xf32>
    %41 = tpu.matmul %38, %40, %cst_47 {dimension_numbers = #tpu.dot_dimension_numbers<[1], [0], [0], [1], [0, 0, 1, 1], [], []>} : vector<180x8xf32>, vector<8x4xf32>, vector<180x4xf32> -> vector<180x4xf32>
    %42 = arith.addf %35, %41 : vector<180x4xf32>
    %c0_48 = arith.constant 0 : index
    %c0_49 = arith.constant 0 : index
    %c2_50 = arith.constant 2 : index
    %c0_51 = arith.constant 0 : index
    %c0_52 = arith.constant 0 : index
    %43 = vector.load %arg2[%c0_48, %c0_49, %c2_50, %c0_51, %c0_52] : memref<1x1x12x20x8xf32, #tpu.memory_space<vmem>>, vector<1x1x10x18x8xf32>
    %44 = vector.shape_cast %43 : vector<1x1x10x18x8xf32> to vector<10x18x8xf32>
    %45 = vector.shape_cast %44 : vector<10x18x8xf32> to vector<180x8xf32>
    %c6 = arith.constant 6 : index
    %c0_53 = arith.constant 0 : index
    %c0_54 = arith.constant 0 : index
    %46 = vector.load %arg3[%c6, %c0_53, %c0_54] : memref<9x8x4xf32, #tpu.memory_space<vmem>>, vector<1x8x4xf32>
    %47 = vector.shape_cast %46 : vector<1x8x4xf32> to vector<8x4xf32>
    %cst_55 = arith.constant dense<0.000000e+00> : vector<180x4xf32>
    %48 = tpu.matmul %45, %47, %cst_55 {dimension_numbers = #tpu.dot_dimension_numbers<[1], [0], [0], [1], [0, 0, 1, 1], [], []>} : vector<180x8xf32>, vector<8x4xf32>, vector<180x4xf32> -> vector<180x4xf32>
    %49 = arith.addf %42, %48 : vector<180x4xf32>
    %c0_56 = arith.constant 0 : index
    %c0_57 = arith.constant 0 : index
    %c2_58 = arith.constant 2 : index
    %c1_59 = arith.constant 1 : index
    %c0_60 = arith.constant 0 : index
    %50 = vector.load %arg2[%c0_56, %c0_57, %c2_58, %c1_59, %c0_60] : memref<1x1x12x20x8xf32, #tpu.memory_space<vmem>>, vector<1x1x10x18x8xf32>
    %51 = vector.shape_cast %50 : vector<1x1x10x18x8xf32> to vector<10x18x8xf32>
    %52 = vector.shape_cast %51 : vector<10x18x8xf32> to vector<180x8xf32>
    %c7 = arith.constant 7 : index
    %c0_61 = arith.constant 0 : index
    %c0_62 = arith.constant 0 : index
    %53 = vector.load %arg3[%c7, %c0_61, %c0_62] : memref<9x8x4xf32, #tpu.memory_space<vmem>>, vector<1x8x4xf32>
    %54 = vector.shape_cast %53 : vector<1x8x4xf32> to vector<8x4xf32>
    %cst_63 = arith.constant dense<0.000000e+00> : vector<180x4xf32>
    %55 = tpu.matmul %52, %54, %cst_63 {dimension_numbers = #tpu.dot_dimension_numbers<[1], [0], [0], [1], [0, 0, 1, 1], [], []>} : vector<180x8xf32>, vector<8x4xf32>, vector<180x4xf32> -> vector<180x4xf32>
    %56 = arith.addf %49, %55 : vector<180x4xf32>
    %c0_64 = arith.constant 0 : index
    %c0_65 = arith.constant 0 : index
    %c2_66 = arith.constant 2 : index
    %c2_67 = arith.constant 2 : index
    %c0_68 = arith.constant 0 : index
    %57 = vector.load %arg2[%c0_64, %c0_65, %c2_66, %c2_67, %c0_68] : memref<1x1x12x20x8xf32, #tpu.memory_space<vmem>>, vector<1x1x10x18x8xf32>
    %58 = vector.shape_cast %57 : vector<1x1x10x18x8xf32> to vector<10x18x8xf32>
    %59 = vector.shape_cast %58 : vector<10x18x8xf32> to vector<180x8xf32>
    %c8 = arith.constant 8 : index
    %c0_69 = arith.constant 0 : index
    %c0_70 = arith.constant 0 : index
    %60 = vector.load %arg3[%c8, %c0_69, %c0_70] : memref<9x8x4xf32, #tpu.memory_space<vmem>>, vector<1x8x4xf32>
    %61 = vector.shape_cast %60 : vector<1x8x4xf32> to vector<8x4xf32>
    %cst_71 = arith.constant dense<0.000000e+00> : vector<180x4xf32>
    %62 = tpu.matmul %59, %61, %cst_71 {dimension_numbers = #tpu.dot_dimension_numbers<[1], [0], [0], [1], [0, 0, 1, 1], [], []>} : vector<180x8xf32>, vector<8x4xf32>, vector<180x4xf32> -> vector<180x4xf32>
    %63 = arith.addf %56, %62 : vector<180x4xf32>
    %c0_72 = arith.constant 0 : index
    %c0_73 = arith.constant 0 : index
    %64 = vector.load %arg4[%c0_72, %c0_73] : memref<1x4xf32, #tpu.memory_space<vmem>>, vector<1x4xf32>
    %65 = vector.broadcast %64 : vector<1x4xf32> to vector<180x4xf32>
    %66 = arith.addf %63, %65 : vector<180x4xf32>
    %cst_74 = arith.constant 0.000000e+00 : f32
    %67 = vector.broadcast %cst_74 : f32 to vector<180x4xf32>
    %68 = arith.cmpf ogt, %66, %67 : vector<180x4xf32>
    %cst_75 = arith.constant 2.000000e-01 : f32
    %69 = vector.broadcast %cst_75 : f32 to vector<180x4xf32>
    %70 = arith.mulf %69, %66 : vector<180x4xf32>
    %71 = arith.select %68, %66, %70 : vector<180x4xi1>, vector<180x4xf32>
    %72 = vector.shape_cast %71 : vector<180x4xf32> to vector<10x18x4xf32>
    %c8_i32 = arith.constant 8 : i32
    %73 = arith.muli %arg1, %c8_i32 : i32
    %c1_i32 = arith.constant 1 : i32
    %74 = arith.subi %73, %c1_i32 : i32
    %75 = tpu.iota {dimensions = array<i32: 0>} : vector<10x18x1xi32>
    %76 = vector.broadcast %74 : i32 to vector<10x18x1xi32>
    %77 = arith.addi %76, %75 : vector<10x18x1xi32>
    %78 = tpu.iota {dimensions = array<i32: 1>} : vector<10x18x1xi32>
    %c1_i32_76 = arith.constant 1 : i32
    %79 = vector.broadcast %c1_i32_76 : i32 to vector<10x18x1xi32>
    %80 = arith.subi %78, %79 : vector<10x18x1xi32>
    %c0_i32 = arith.constant 0 : i32
    %81 = vector.broadcast %c0_i32 : i32 to vector<10x18x1xi32>
    %82 = arith.cmpi sge, %77, %81 : vector<10x18x1xi32>
    %c16_i32 = arith.constant 16 : i32
    %83 = vector.broadcast %c16_i32 : i32 to vector<10x18x1xi32>
    %84 = arith.cmpi slt, %77, %83 : vector<10x18x1xi32>
    %85 = arith.andi %82, %84 : vector<10x18x1xi1>
    %c0_i32_77 = arith.constant 0 : i32
    %86 = vector.broadcast %c0_i32_77 : i32 to vector<10x18x1xi32>
    %87 = arith.cmpi sge, %80, %86 : vector<10x18x1xi32>
    %88 = arith.andi %85, %87 : vector<10x18x1xi1>
    %c16_i32_78 = arith.constant 16 : i32
    %89 = vector.broadcast %c16_i32_78 : i32 to vector<10x18x1xi32>
    %90 = arith.cmpi slt, %80, %89 : vector<10x18x1xi32>
    %91 = arith.andi %88, %90 : vector<10x18x1xi1>
    %cst_79 = arith.constant 0.000000e+00 : f32
    %92 = vector.shape_cast %91 : vector<10x18x1xi1> to vector<10x18x1xi1>
    %93 = vector.broadcast %92 : vector<10x18x1xi1> to vector<10x18x4xi1>
    %94 = vector.broadcast %cst_79 : f32 to vector<10x18x4xf32>
    %95 = arith.select %93, %72, %94 : vector<10x18x4xi1>, vector<10x18x4xf32>
    %c0_80 = arith.constant 0 : index
    %c0_81 = arith.constant 0 : index
    %c0_82 = arith.constant 0 : index
    %96 = vector.load %arg9[%c0_80, %c0_81, %c0_82] : memref<10x18x4xf32, #tpu.memory_space<vmem>>, vector<10x18x4xf32>
    tpu.vector_store %arg9[%c0_80, %c0_81, %c0_82], %95 {strides = array<i32>} : memref<10x18x4xf32, #tpu.memory_space<vmem>>, vector<10x18x4xf32>,
    %cst_83 = arith.constant 0.000000e+00 : f32
    %97 = vector.broadcast %cst_83 : f32 to vector<128x4xf32>
    %c0_84 = arith.constant 0 : index
    %c0_85 = arith.constant 0 : index
    %c0_86 = arith.constant 0 : index
    %98 = vector.load %arg9[%c0_84, %c0_85, %c0_86] : memref<10x18x4xf32, #tpu.memory_space<vmem>>, vector<8x16x4xf32>
    %99 = vector.shape_cast %98 : vector<8x16x4xf32> to vector<128x4xf32>
    %c0_87 = arith.constant 0 : index
    %c0_88 = arith.constant 0 : index
    %c0_89 = arith.constant 0 : index
    %100 = vector.load %arg5[%c0_87, %c0_88, %c0_89] : memref<9x4x4xf32, #tpu.memory_space<vmem>>, vector<1x4x4xf32>
    %101 = vector.shape_cast %100 : vector<1x4x4xf32> to vector<4x4xf32>
    %cst_90 = arith.constant dense<0.000000e+00> : vector<128x4xf32>
    %102 = tpu.matmul %99, %101, %cst_90 {dimension_numbers = #tpu.dot_dimension_numbers<[1], [0], [0], [1], [0, 0, 1, 1], [], []>} : vector<128x4xf32>, vector<4x4xf32>, vector<128x4xf32> -> vector<128x4xf32>
    %103 = arith.addf %97, %102 : vector<128x4xf32>
    %c0_91 = arith.constant 0 : index
    %c1_92 = arith.constant 1 : index
    %c0_93 = arith.constant 0 : index
    %104 = vector.load %arg9[%c0_91, %c1_92, %c0_93] : memref<10x18x4xf32, #tpu.memory_space<vmem>>, vector<8x16x4xf32>
    %105 = vector.shape_cast %104 : vector<8x16x4xf32> to vector<128x4xf32>
    %c1_94 = arith.constant 1 : index
    %c0_95 = arith.constant 0 : index
    %c0_96 = arith.constant 0 : index
    %106 = vector.load %arg5[%c1_94, %c0_95, %c0_96] : memref<9x4x4xf32, #tpu.memory_space<vmem>>, vector<1x4x4xf32>
    %107 = vector.shape_cast %106 : vector<1x4x4xf32> to vector<4x4xf32>
    %cst_97 = arith.constant dense<0.000000e+00> : vector<128x4xf32>
    %108 = tpu.matmul %105, %107, %cst_97 {dimension_numbers = #tpu.dot_dimension_numbers<[1], [0], [0], [1], [0, 0, 1, 1], [], []>} : vector<128x4xf32>, vector<4x4xf32>, vector<128x4xf32> -> vector<128x4xf32>
    %109 = arith.addf %103, %108 : vector<128x4xf32>
    %c0_98 = arith.constant 0 : index
    %c2_99 = arith.constant 2 : index
    %c0_100 = arith.constant 0 : index
    %110 = vector.load %arg9[%c0_98, %c2_99, %c0_100] : memref<10x18x4xf32, #tpu.memory_space<vmem>>, vector<8x16x4xf32>
    %111 = vector.shape_cast %110 : vector<8x16x4xf32> to vector<128x4xf32>
    %c2_101 = arith.constant 2 : index
    %c0_102 = arith.constant 0 : index
    %c0_103 = arith.constant 0 : index
    %112 = vector.load %arg5[%c2_101, %c0_102, %c0_103] : memref<9x4x4xf32, #tpu.memory_space<vmem>>, vector<1x4x4xf32>
    %113 = vector.shape_cast %112 : vector<1x4x4xf32> to vector<4x4xf32>
    %cst_104 = arith.constant dense<0.000000e+00> : vector<128x4xf32>
    %114 = tpu.matmul %111, %113, %cst_104 {dimension_numbers = #tpu.dot_dimension_numbers<[1], [0], [0], [1], [0, 0, 1, 1], [], []>} : vector<128x4xf32>, vector<4x4xf32>, vector<128x4xf32> -> vector<128x4xf32>
    %115 = arith.addf %109, %114 : vector<128x4xf32>
    %c1_105 = arith.constant 1 : index
    %c0_106 = arith.constant 0 : index
    %c0_107 = arith.constant 0 : index
    %116 = vector.load %arg9[%c1_105, %c0_106, %c0_107] : memref<10x18x4xf32, #tpu.memory_space<vmem>>, vector<8x16x4xf32>
    %117 = vector.shape_cast %116 : vector<8x16x4xf32> to vector<128x4xf32>
    %c3_108 = arith.constant 3 : index
    %c0_109 = arith.constant 0 : index
    %c0_110 = arith.constant 0 : index
    %118 = vector.load %arg5[%c3_108, %c0_109, %c0_110] : memref<9x4x4xf32, #tpu.memory_space<vmem>>, vector<1x4x4xf32>
    %119 = vector.shape_cast %118 : vector<1x4x4xf32> to vector<4x4xf32>
    %cst_111 = arith.constant dense<0.000000e+00> : vector<128x4xf32>
    %120 = tpu.matmul %117, %119, %cst_111 {dimension_numbers = #tpu.dot_dimension_numbers<[1], [0], [0], [1], [0, 0, 1, 1], [], []>} : vector<128x4xf32>, vector<4x4xf32>, vector<128x4xf32> -> vector<128x4xf32>
    %121 = arith.addf %115, %120 : vector<128x4xf32>
    %c1_112 = arith.constant 1 : index
    %c1_113 = arith.constant 1 : index
    %c0_114 = arith.constant 0 : index
    %122 = vector.load %arg9[%c1_112, %c1_113, %c0_114] : memref<10x18x4xf32, #tpu.memory_space<vmem>>, vector<8x16x4xf32>
    %123 = vector.shape_cast %122 : vector<8x16x4xf32> to vector<128x4xf32>
    %c4_115 = arith.constant 4 : index
    %c0_116 = arith.constant 0 : index
    %c0_117 = arith.constant 0 : index
    %124 = vector.load %arg5[%c4_115, %c0_116, %c0_117] : memref<9x4x4xf32, #tpu.memory_space<vmem>>, vector<1x4x4xf32>
    %125 = vector.shape_cast %124 : vector<1x4x4xf32> to vector<4x4xf32>
    %cst_118 = arith.constant dense<0.000000e+00> : vector<128x4xf32>
    %126 = tpu.matmul %123, %125, %cst_118 {dimension_numbers = #tpu.dot_dimension_numbers<[1], [0], [0], [1], [0, 0, 1, 1], [], []>} : vector<128x4xf32>, vector<4x4xf32>, vector<128x4xf32> -> vector<128x4xf32>
    %127 = arith.addf %121, %126 : vector<128x4xf32>
    %c1_119 = arith.constant 1 : index
    %c2_120 = arith.constant 2 : index
    %c0_121 = arith.constant 0 : index
    %128 = vector.load %arg9[%c1_119, %c2_120, %c0_121] : memref<10x18x4xf32, #tpu.memory_space<vmem>>, vector<8x16x4xf32>
    %129 = vector.shape_cast %128 : vector<8x16x4xf32> to vector<128x4xf32>
    %c5_122 = arith.constant 5 : index
    %c0_123 = arith.constant 0 : index
    %c0_124 = arith.constant 0 : index
    %130 = vector.load %arg5[%c5_122, %c0_123, %c0_124] : memref<9x4x4xf32, #tpu.memory_space<vmem>>, vector<1x4x4xf32>
    %131 = vector.shape_cast %130 : vector<1x4x4xf32> to vector<4x4xf32>
    %cst_125 = arith.constant dense<0.000000e+00> : vector<128x4xf32>
    %132 = tpu.matmul %129, %131, %cst_125 {dimension_numbers = #tpu.dot_dimension_numbers<[1], [0], [0], [1], [0, 0, 1, 1], [], []>} : vector<128x4xf32>, vector<4x4xf32>, vector<128x4xf32> -> vector<128x4xf32>
    %133 = arith.addf %127, %132 : vector<128x4xf32>
    %c2_126 = arith.constant 2 : index
    %c0_127 = arith.constant 0 : index
    %c0_128 = arith.constant 0 : index
    %134 = vector.load %arg9[%c2_126, %c0_127, %c0_128] : memref<10x18x4xf32, #tpu.memory_space<vmem>>, vector<8x16x4xf32>
    %135 = vector.shape_cast %134 : vector<8x16x4xf32> to vector<128x4xf32>
    %c6_129 = arith.constant 6 : index
    %c0_130 = arith.constant 0 : index
    %c0_131 = arith.constant 0 : index
    %136 = vector.load %arg5[%c6_129, %c0_130, %c0_131] : memref<9x4x4xf32, #tpu.memory_space<vmem>>, vector<1x4x4xf32>
    %137 = vector.shape_cast %136 : vector<1x4x4xf32> to vector<4x4xf32>
    %cst_132 = arith.constant dense<0.000000e+00> : vector<128x4xf32>
    %138 = tpu.matmul %135, %137, %cst_132 {dimension_numbers = #tpu.dot_dimension_numbers<[1], [0], [0], [1], [0, 0, 1, 1], [], []>} : vector<128x4xf32>, vector<4x4xf32>, vector<128x4xf32> -> vector<128x4xf32>
    %139 = arith.addf %133, %138 : vector<128x4xf32>
    %c2_133 = arith.constant 2 : index
    %c1_134 = arith.constant 1 : index
    %c0_135 = arith.constant 0 : index
    %140 = vector.load %arg9[%c2_133, %c1_134, %c0_135] : memref<10x18x4xf32, #tpu.memory_space<vmem>>, vector<8x16x4xf32>
    %141 = vector.shape_cast %140 : vector<8x16x4xf32> to vector<128x4xf32>
    %c7_136 = arith.constant 7 : index
    %c0_137 = arith.constant 0 : index
    %c0_138 = arith.constant 0 : index
    %142 = vector.load %arg5[%c7_136, %c0_137, %c0_138] : memref<9x4x4xf32, #tpu.memory_space<vmem>>, vector<1x4x4xf32>
    %143 = vector.shape_cast %142 : vector<1x4x4xf32> to vector<4x4xf32>
    %cst_139 = arith.constant dense<0.000000e+00> : vector<128x4xf32>
    %144 = tpu.matmul %141, %143, %cst_139 {dimension_numbers = #tpu.dot_dimension_numbers<[1], [0], [0], [1], [0, 0, 1, 1], [], []>} : vector<128x4xf32>, vector<4x4xf32>, vector<128x4xf32> -> vector<128x4xf32>
    %145 = arith.addf %139, %144 : vector<128x4xf32>
    %c2_140 = arith.constant 2 : index
    %c2_141 = arith.constant 2 : index
    %c0_142 = arith.constant 0 : index
    %146 = vector.load %arg9[%c2_140, %c2_141, %c0_142] : memref<10x18x4xf32, #tpu.memory_space<vmem>>, vector<8x16x4xf32>
    %147 = vector.shape_cast %146 : vector<8x16x4xf32> to vector<128x4xf32>
    %c8_143 = arith.constant 8 : index
    %c0_144 = arith.constant 0 : index
    %c0_145 = arith.constant 0 : index
    %148 = vector.load %arg5[%c8_143, %c0_144, %c0_145] : memref<9x4x4xf32, #tpu.memory_space<vmem>>, vector<1x4x4xf32>
    %149 = vector.shape_cast %148 : vector<1x4x4xf32> to vector<4x4xf32>
    %cst_146 = arith.constant dense<0.000000e+00> : vector<128x4xf32>
    %150 = tpu.matmul %147, %149, %cst_146 {dimension_numbers = #tpu.dot_dimension_numbers<[1], [0], [0], [1], [0, 0, 1, 1], [], []>} : vector<128x4xf32>, vector<4x4xf32>, vector<128x4xf32> -> vector<128x4xf32>
    %151 = arith.addf %145, %150 : vector<128x4xf32>
    %c0_147 = arith.constant 0 : index
    %c0_148 = arith.constant 0 : index
    %152 = vector.load %arg6[%c0_147, %c0_148] : memref<1x4xf32, #tpu.memory_space<vmem>>, vector<1x4xf32>
    %153 = vector.broadcast %152 : vector<1x4xf32> to vector<128x4xf32>
    %154 = arith.addf %151, %153 : vector<128x4xf32>
    %155 = vector.shape_cast %154 : vector<128x4xf32> to vector<8x16x4xf32>
    %c0_149 = arith.constant 0 : index
    %c0_150 = arith.constant 0 : index
    %c0_151 = arith.constant 0 : index
    %c0_152 = arith.constant 0 : index
    %156 = vector.load %arg7[%c0_149, %c0_150, %c0_151, %c0_152] : memref<1x8x16x4xf32, #tpu.memory_space<vmem>>, vector<1x8x16x4xf32>
    %157 = vector.shape_cast %156 : vector<1x8x16x4xf32> to vector<8x16x4xf32>
    %158 = arith.addf %155, %157 : vector<8x16x4xf32>
    %c0_153 = arith.constant 0 : index
    %c0_154 = arith.constant 0 : index
    %c0_155 = arith.constant 0 : index
    %c0_156 = arith.constant 0 : index
    %159 = vector.load %arg8[%c0_153, %c0_154, %c0_155, %c0_156] : memref<1x8x16x4xf32, #tpu.memory_space<vmem>>, vector<1x8x16x4xf32>
    %160 = vector.shape_cast %159 : vector<1x8x16x4xf32> to vector<8x16x4xf32>
    %161 = vector.shape_cast %158 : vector<8x16x4xf32> to vector<1x8x16x4xf32>
    tpu.vector_store %arg8[%c0_153, %c0_154, %c0_155, %c0_156], %161 {strides = array<i32>} : memref<1x8x16x4xf32, #tpu.memory_space<vmem>>, vector<1x8x16x4xf32>,
    return
  }
  func.func @transform_0(%arg0: i32, %arg1: i32) -> (i32, i32, i32, i32, i32) {
    %c0_i32 = arith.constant 0 : i32
    %c0_i32_0 = arith.constant 0 : i32
    %c0_i32_1 = arith.constant 0 : i32
    %c0_i32_2 = arith.constant 0 : i32
    return %arg0, %arg1, %c0_i32, %c0_i32_0, %c0_i32_1 : i32, i32, i32, i32, i32
  }
  func.func @transform_1(%arg0: i32, %arg1: i32) -> (i32, i32, i32) {
    %c0_i32 = arith.constant 0 : i32
    %c0_i32_0 = arith.constant 0 : i32
    %c0_i32_1 = arith.constant 0 : i32
    %c0_i32_2 = arith.constant 0 : i32
    return %c0_i32, %c0_i32_0, %c0_i32_1 : i32, i32, i32
  }
  func.func @transform_2(%arg0: i32, %arg1: i32) -> (i32, i32) {
    %c0_i32 = arith.constant 0 : i32
    %c0_i32_0 = arith.constant 0 : i32
    %c0_i32_1 = arith.constant 0 : i32
    return %c0_i32, %c0_i32_0 : i32, i32
  }
  func.func @transform_3(%arg0: i32, %arg1: i32) -> (i32, i32, i32) {
    %c0_i32 = arith.constant 0 : i32
    %c0_i32_0 = arith.constant 0 : i32
    %c0_i32_1 = arith.constant 0 : i32
    %c0_i32_2 = arith.constant 0 : i32
    return %c0_i32, %c0_i32_0, %c0_i32_1 : i32, i32, i32
  }
  func.func @transform_4(%arg0: i32, %arg1: i32) -> (i32, i32) {
    %c0_i32 = arith.constant 0 : i32
    %c0_i32_0 = arith.constant 0 : i32
    %c0_i32_1 = arith.constant 0 : i32
    return %c0_i32, %c0_i32_0 : i32, i32
  }
  func.func @transform_5(%arg0: i32, %arg1: i32) -> (i32, i32, i32, i32) {
    %c0_i32 = arith.constant 0 : i32
    %c0_i32_0 = arith.constant 0 : i32
    %c0_i32_1 = arith.constant 0 : i32
    return %arg0, %arg1, %c0_i32, %c0_i32_0 : i32, i32, i32, i32
  }
  func.func @transform_6(%arg0: i32, %arg1: i32) -> (i32, i32, i32, i32) {
    %c0_i32 = arith.constant 0 : i32
    %c0_i32_0 = arith.constant 0 : i32
    %c0_i32_1 = arith.constant 0 : i32
    return %arg0, %arg1, %c0_i32, %c0_i32_0 : i32, i32, i32, i32
  }
}

</mosaic_0001>

<bundles_post_ra>
// kernel: fmu_forward.2
= control target key start
LH: loop header
LB: loop body
LE: loop exit
PB: predicated region body
PF: predicated region fallthrough
CT: control target
= control target key end

     0   :  { %s2137_s12 = smov 0   ;;  %s2139_s13 = smov 0   ;;  %s2396_s0 = inlined_call_operand.vmem [shape: f32[2,1,10,10,8], index: 0, kind: input, shape index: {}]   ;;  %s2397_s1 = inlined_call_operand.vmem [shape: f32[9,8,16], index: 1, kind: input, shape index: {}]   ;;  %s2398_s2 = inlined_call_operand.vmem [shape: f32[1,16], index: 2, kind: input, shape index: {}]   ;;  %s2399_s3 = inlined_call_operand.vmem [shape: f32[2,8,8,16], index: 3, kind: output, shape index: {}]  }
   0x1   :  { %s2141_s14 = smov 0  }
   0x2 LB: > { %s25_s15 = sadd.s32 1, %s2111_s13  ;;  %p1659_p0 = scmp.ge.s32.totalorder %s2115_s14, 1  ;;  %s2115_s14 = sphi %s2141_s14, %s13_s14   ;;  %s2111_s13 = sphi %s2139_s13, %s2401_s13   ;;  %s2107_s12 = sphi %s2137_s12, %s2400_s12  }
   0x3   : > { %p27_p1 = scmp.ge.s32.totalorder %s25_s15, 2  ;;  %p157_p2 = scmp.lt.s32.totalorder %s2115_s14, 3 }
   0x5   : > { %s2403_s15 = smov (%p27_p1, %s25_s15), 0  ;;  %p158_p3 = pnand %p1659_p0, %p157_p2 }
   0x6   : > { %v1663_v0 = vld [vmem:[%s2397_s1 + $0x8] sm:$0xff] (!%p158_p3)  ;;  %v2161_v1 = vld [vmem:[%s2397_s1 + $0x20] sm:$0xff] (!%p158_p3)  ;;  %p189_p4 = scmp.lt.s32.totalorder (!%p158_p3), %s2107_s12, 1  ;;  %vm227_vm0 = vcmask (!%p158_p3), 64512   ;;  %v1748_v8 = vld [vmem:[%s2397_s1 + $0x30] sm:$0xff] (!%p158_p3)  ;;  %vm1556_vm2 = vcmask (!%p158_p3), 130048  }
   0x7   : > { %161 = sbr.rel (%p158_p3) target bundleno = 309 (0x135), region = 32  ;;  %v216_v2 = vld [vmem:[%s2397_s1] sm:$0xff] (!%p158_p3)  ;;  %1876 = vmatprep.subr.mxu1 (!%p158_p3), %v1663_v0  ;;  %1932 = vmatprep.subr.mxu0 (!%p158_p3), %v2161_v1  ;;  %v1731_v3 = vld [vmem:[%s2397_s1 + $0x28] sm:$0xff] (!%p158_p3)  ;;  %v1680_v9 = vld [vmem:[%s2397_s1 + $0x10] sm:$0xff] (!%p158_p3) }
   0x8   : > { %1877 = vmatpush3.msra.mxu1 (!%p158_p3), %v1663_v0  ;;  %1933 = vmatpush3.msra.mxu0 (!%p158_p3), %v2161_v1  ;;  %v1765_v16 = vld [vmem:[%s2397_s1 + $0x38] sm:$0xff] (!%p158_p3)  ;;  %v1782_v31 = vld [vmem:[%s2397_s1 + $0x40] sm:$0xff] (!%p158_p3) }
   0x9   : > { %1890 = vmatprep.subr.mxu1 (!%p158_p3), %v216_v2  ;;  %1946 = vmatprep.subr.mxu0 (!%p158_p3), %v1731_v3  ;;  %v1697_v25 = vld [vmem:[%s2397_s1 + $0x18] sm:$0xff] (!%p158_p3)  ;;  %v1791_v44 = vld [vmem:[%s2398_s2] ss:$0 sm:$0xff] (!%p158_p3) }
   0xe   : > { %s2405_s12 = smov (!%p189_p4, %s2107_s12), 1 }
   0xf   : > { %s2068_s24 = smul.u32 160, %s2405_s12  ;;  %s1794_s17 = sshll.u32 %s2405_s12, 6 }
  0x10   : > { %s2369_s20 = scalar_lea.vmem %s2399_s3, %s1794_s17 }
  0x11   : > { %s2177_s27 = scalar_lea.vmem %s2396_s0, %s2068_s24 }
  0x12   : > { %v217_v4 = vld [vmem:[%s2177_s27 + $0x1] sm:$0xff]  ;;  %v1706_v5 = vld [vmem:[%s2177_s27 + $0x11] sm:$0xff] }
  0x13   : > { %v2182_v6 = vld [vmem:[%s2177_s27 + $0x21] sm:$0xff]  ;;  %1878 = vmatprep.mubr.msk.f32.mxu1 %vm227_vm0, %v217_v4  ;;  %1934 = vmatprep.mubr.msk.f32.mxu0 %vm227_vm0, %v1706_v5  ;;  %v2187_v7 = vld [vmem:[%s2177_s27 + $0x31] sm:$0xff] }
  0x14   : > { %1879 = vmatmul.mubr.msk.f32.vlgmr.msra.gmra.mrb[0].mxu1 %vm227_vm0, %v1706_v5  ;;  %1935 = vmatmul.mubr.msk.f32.vlgmr.msra.gmra.mrb[0].mxu0 %vm227_vm0, %v2182_v6  ;;  %v2199_v10 = vld [vmem:[%s2177_s27 + $0x41] sm:$0xff]  ;;  %v1723_v11 = vld [vmem:[%s2177_s27 + $0x12] sm:$0xff] }
  0x15   : > { %1891 = vmatpush3.msra.mxu1 %v216_v2  ;;  %1947 = vmatpush3.msra.mxu0 %v1731_v3  ;;  %v2214_v12 = vld [vmem:[%s2177_s27 + $0x51] sm:$0xff]  ;;  %v2217_v13 = vld [vmem:[%s2177_s27 + $0x22] sm:$0xff] }
  0x16   : > { %1881 = vmatprep.mubr.msk.f32.mxu1 %vm227_vm0, %v2182_v6  ;;  %1937 = vmatprep.mubr.msk.f32.mxu0 %vm227_vm0, %v2187_v7  ;;  %v2220_v14 = vld [vmem:[%s2177_s27 + $0x61] sm:$0xff]  ;;  %v2223_v15 = vld [vmem:[%s2177_s27 + $0x32] sm:$0xff] }
  0x17   : > { %1960 = vmatprep.subr.mxu0 %v1748_v8  ;;  %1904 = vmatprep.subr.mxu1 %v1680_v9  ;;  %v2235_v17 = vld [vmem:[%s2177_s27 + $0x71] sm:$0xff]  ;;  %v2238_v18 = vld [vmem:[%s2177_s27 + $0x42] sm:$0xff] }
  0x18   : > { %1882 = vmatmul.mubr.msk.f32.gmra.mrb[2].mxu1 %vm227_vm0, %v2187_v7  ;;  %1938 = vmatmul.mubr.msk.f32.gmra.mrb[2].mxu0 %vm227_vm0, %v2199_v10  ;;  %v208_v19 = vld [vmem:[%s2177_s27] sm:$0xff]  ;;  %v2244_v20 = vld [vmem:[%s2177_s27 + $0x52] sm:$0xff] }
  0x19   : > { %1884 = vmatprep.mubr.msk.f32.mxu1 %vm227_vm0, %v2199_v10  ;;  %1948 = vmatprep.mubr.msk.f32.mxu0 %vm227_vm0, %v1723_v11  ;;  %v209_v21 = vld [vmem:[%s2177_s27 + $0x10] sm:$0xff]  ;;  %v2255_v22 = vld [vmem:[%s2177_s27 + $0x62] sm:$0xff] }
  0x1a   : > { %v210_v23 = vld [vmem:[%s2177_s27 + $0x20] sm:$0xff]  ;;  %v2259_v24 = vld [vmem:[%s2177_s27 + $0x72] sm:$0xff] }
  0x1b   : > { %v211_v26 = vld [vmem:[%s2177_s27 + $0x30] sm:$0xff]  ;;  %v2270_v27 = vld [vmem:[%s2177_s27 + $0x82] sm:$0xff] }
  0x1c   : > { %1885 = vmatmul.mubr.msk.f32.gmra.mrb[4].mxu1 %vm227_vm0, %v2214_v12  ;;  %1949 = vmatmul.mubr.msk.f32.vlgmr.msra.gmra.mrb[0].mxu0 %vm227_vm0, %v2217_v13  ;;  %v212_v28 = vld [vmem:[%s2177_s27 + $0x40] sm:$0xff]  ;;  %v213_v29 = vld [vmem:[%s2177_s27 + $0x50] sm:$0xff] }
  0x1d   : > { %1961 = vmatpush3.msra.mxu0 %v1748_v8  ;;  %1887 = vmatprep.mubr.msk.f32.mxu1 %vm227_vm0, %v2220_v14  ;;  %v214_v30 = vld [vmem:[%s2177_s27 + $0x60] sm:$0xff]  ;;  %v215_v32 = vld [vmem:[%s2177_s27 + $0x70] sm:$0xff] }
  0x1e   : > { %1951 = vmatprep.mubr.msk.f32.mxu0 %vm227_vm0, %v2223_v15  ;;  %1974 = vmatprep.subr.mxu0 %v1765_v16  ;;  %v486_v33 = vld [vmem:[%s2177_s27 + $0x2] sm:$0xff]  ;;  %v1747_v35 = vld [vmem:[%s2177_s27 + $0x90] sm:$0xff] }
  0x1f   : > { %v1746_v34 = vld [vmem:[%s2177_s27 + $0x80] sm:$0xff]  ;;  %v1764_v37 = vld [vmem:[%s2177_s27 + $0x91] sm:$0xff] }
  0x20   : > { %1888 = vmatmul.mubr.msk.f32.gmra.mrb[6].mxu1 %vm227_vm0, %v2235_v17  ;;  %1952 = vmatmul.mubr.msk.f32.gmra.mrb[2].mxu0 %vm227_vm0, %v2238_v18  ;;  %v1763_v36 = vld [vmem:[%s2177_s27 + $0x81] sm:$0xff]  ;;  %v1781_v38 = vld [vmem:[%s2177_s27 + $0x92] sm:$0xff] }
  0x21   : > { %1892 = vmatprep.mubr.msk.f32.mxu1 %vm227_vm0, %v208_v19  ;;  %1954 = vmatprep.mubr.msk.f32.mxu0 %vm227_vm0, %v2244_v20 }
  0x24   : > { %1893 = vmatmul.mubr.msk.f32.vlgmr.msra.gmra.mrb[0].mxu1 %vm227_vm0, %v209_v21  ;;  %1955 = vmatmul.mubr.msk.f32.gmra.mrb[4].mxu0 %vm227_vm0, %v2255_v22 }
  0x25   : > { %1905 = vmatpush3.msra.mxu1 %v1680_v9  ;;  %1895 = vmatprep.mubr.msk.f32.mxu1 %vm227_vm0, %v210_v23 }
  0x26   : > { %1957 = vmatprep.mubr.msk.f32.mxu0 %vm227_vm0, %v2259_v24  ;;  %1918 = vmatprep.subr.mxu1 %v1697_v25 }
  0x28   : > { %1896 = vmatmul.mubr.msk.f32.gmra.mrb[2].mxu1 %vm227_vm0, %v211_v26  ;;  %1958 = vmatmul.mubr.msk.f32.gmra.mrb[6].mxu0 %vm227_vm0, %v2270_v27 }
  0x29   : > { %1898 = vmatprep.mubr.msk.f32.mxu1 %vm227_vm0, %v212_v28  ;;  %1962 = vmatprep.mubr.msk.f32.mxu0 %vm227_vm0, %v210_v23 }
  0x2c   : > { %1899 = vmatmul.mubr.msk.f32.gmra.mrb[4].mxu1 %vm227_vm0, %v213_v29  ;;  %1963 = vmatmul.mubr.msk.f32.vlgmr.msra.gmra.mrb[0].mxu0 %vm227_vm0, %v211_v26 }
  0x2d   : > { %1975 = vmatpush3.msra.mxu0 %v1765_v16  ;;  %1901 = vmatprep.mubr.msk.f32.mxu1 %vm227_vm0, %v214_v30 }
  0x2e   : > { %1965 = vmatprep.mubr.msk.f32.mxu0 %vm227_vm0, %v212_v28  ;;  %1988 = vmatprep.subr.mxu0 %v1782_v31 }
  0x30   : > { %1902 = vmatmul.mubr.msk.f32.gmra.mrb[6].mxu1 %vm227_vm0, %v215_v32  ;;  %1966 = vmatmul.mubr.msk.f32.gmra.mrb[2].mxu0 %vm227_vm0, %v213_v29 }
  0x31   : > { %1906 = vmatprep.mubr.msk.f32.mxu1 %vm227_vm0, %v486_v33  ;;  %1968 = vmatprep.mubr.msk.f32.mxu0 %vm227_vm0, %v214_v30 }
  0x34   : > { %1907 = vmatmul.mubr.msk.f32.vlgmr.msra.gmra.mrb[0].mxu1 %vm227_vm0, %v1723_v11  ;;  %1969 = vmatmul.mubr.msk.f32.gmra.mrb[4].mxu0 %vm227_vm0, %v215_v32 }
  0x35   : > { %1919 = vmatpush3.msra.mxu1 %v1697_v25  ;;  %1909 = vmatprep.mubr.msk.f32.mxu1 %vm227_vm0, %v2217_v13 }
  0x36   : > { %1971 = vmatprep.mubr.msk.f32.mxu0 %vm227_vm0, %v1746_v34  ;;  %2002 = vmatprep.subr.mxu1 %v2161_v1 }
  0x38   : > { %1910 = vmatmul.mubr.msk.f32.gmra.mrb[2].mxu1 %vm227_vm0, %v2223_v15  ;;  %1972 = vmatmul.mubr.msk.f32.gmra.mrb[6].mxu0 %vm227_vm0, %v1747_v35 }
  0x39   : > { %1912 = vmatprep.mubr.msk.f32.mxu1 %vm227_vm0, %v2238_v18  ;;  %1976 = vmatprep.mubr.msk.f32.mxu0 %vm227_vm0, %v2182_v6 }
  0x3c   : > { %1913 = vmatmul.mubr.msk.f32.gmra.mrb[4].mxu1 %vm227_vm0, %v2244_v20  ;;  %1977 = vmatmul.mubr.msk.f32.vlgmr.msra.gmra.mrb[0].mxu0 %vm227_vm0, %v2187_v7 }
  0x3d   : > { %1989 = vmatpush3.msra.mxu0 %v1782_v31  ;;  %1915 = vmatprep.mubr.msk.f32.mxu1 %vm227_vm0, %v2255_v22 }
  0x3e   : > { %1979 = vmatprep.mubr.msk.f32.mxu0 %vm227_vm0, %v2199_v10 }
  0x40   : > { %1916 = vmatmul.mubr.msk.f32.gmra.mrb[6].mxu1 %vm227_vm0, %v2259_v24  ;;  %1980 = vmatmul.mubr.msk.f32.gmra.mrb[2].mxu0 %vm227_vm0, %v2214_v12 }
  0x41   : > { %1920 = vmatprep.mubr.msk.f32.mxu1 %vm227_vm0, %v209_v21  ;;  %1982 = vmatprep.mubr.msk.f32.mxu0 %vm227_vm0, %v2220_v14 }
  0x44   : > { %1921 = vmatmul.mubr.msk.f32.vlgmr.msra.gmra.mrb[0].mxu1 %vm227_vm0, %v210_v23  ;;  %1983 = vmatmul.mubr.msk.f32.gmra.mrb[4].mxu0 %vm227_vm0, %v2235_v17 }
  0x45   : > { %2003 = vmatpush3.msra.mxu1 %v2161_v1  ;;  %1923 = vmatprep.mubr.msk.f32.mxu1 %vm227_vm0, %v211_v26 }
  0x46   : > { %1985 = vmatprep.mubr.msk.f32.mxu0 %vm227_vm0, %v1763_v36 }
  0x48   : > { %1924 = vmatmul.mubr.msk.f32.gmra.mrb[2].mxu1 %vm227_vm0, %v212_v28  ;;  %1986 = vmatmul.mubr.msk.f32.gmra.mrb[6].mxu0 %vm227_vm0, %v1764_v37 }
  0x49   : > { %1926 = vmatprep.mubr.msk.f32.mxu1 %vm227_vm0, %v213_v29  ;;  %1990 = vmatprep.mubr.msk.f32.mxu0 %vm227_vm0, %v2217_v13 }
  0x4c   : > { %1927 = vmatmul.mubr.msk.f32.gmra.mrb[4].mxu1 %vm227_vm0, %v214_v30  ;;  %1991 = vmatmul.mubr.msk.f32.vlgmr.msra.gmra.mrb[0].mxu0 %vm227_vm0, %v2223_v15 }
  0x4d   : > { %1929 = vmatprep.mubr.msk.f32.mxu1 %vm227_vm0, %v215_v32  ;;  %1993 = vmatprep.mubr.msk.f32.mxu0 %vm227_vm0, %v2238_v18 }
  0x50   : > { %1930 = vmatmul.mubr.msk.f32.gmra.mrb[6].mxu1 %vm227_vm0, %v1746_v34  ;;  %1994 = vmatmul.mubr.msk.f32.gmra.mrb[2].mxu0 %vm227_vm0, %v2244_v20 }
  0x51   : > { %1940 = vmatprep.mubr.msk.f32.mxu1 %vm227_vm0, %v2214_v12  ;;  %1996 = vmatprep.mubr.msk.f32.mxu0 %vm227_vm0, %v2255_v22 }
  0x54   : > { %1941 = vmatmul.mubr.msk.f32.vlgmr.msra.gmra.mrb[4].mxu1 %vm227_vm0, %v2220_v14  ;;  %1997 = vmatmul.mubr.msk.f32.gmra.mrb[4].mxu0 %vm227_vm0, %v2259_v24 }
  0x55   : > { %1943 = vmatprep.mubr.msk.f32.mxu1 %vm227_vm0, %v2235_v17  ;;  %1999 = vmatprep.mubr.msk.f32.mxu0 %vm227_vm0, %v2270_v27 }
  0x58   : > { %1944 = vmatmul.mubr.msk.f32.gmra.mrb[6].mxu1 %vm227_vm0, %v1763_v36  ;;  %2000 = vmatmul.mubr.msk.f32.gmra.mrb[6].mxu0 %vm227_vm0, %v1781_v38 }
 0x117   : > { %v1922_v39 = vpop.f32.mrb[0].mxu1 }
 0x118   : > { %v734_v40 = vpop.f32.mrb[1].mxu1 }
 0x11b   : > { %v1925_v41 = vpop.f32.mrb[2].mxu1 }
 0x11c   : > { %v744_v42 = vpop.f32.mrb[3].mxu1 }
 0x11f   : > { %v1992_v43 = vpop.f32.mrb[0].mxu0 }
 0x120   : > { %v2004_v45 = vadd.f32 %v1992_v43, %v1922_v39  ;;  %v1470_v46 = vpop.f32.mrb[1].mxu0 }
 0x121   : > { %v2005_v47 = vadd.f32 %v1470_v46, %v734_v40 }
 0x122   : > { %v1525_v48 = vadd.f32 %v2004_v45, %v1791_v44 }
 0x123   : > { %v1524_v49 = vadd.f32 %v2005_v47, %v1791_v44  ;;  %v1995_v50 = vpop.f32.mrb[2].mxu0 }
 0x124   : > { %vm1533_vm1 = vcmp.gt.f32.partialorder %v1525_v48, 0.0  ;;  %v1541_v51 = vmul.f32 0.2, %v1525_v48  ;;  %v2006_v52 = vadd.f32 %v1995_v50, %v1925_v41  ;;  %v1480_v53 = vpop.f32.mrb[3].mxu0 }
 0x125   : > { %vm1532_vm3 = vcmp.gt.f32.partialorder %v1524_v49, 0.0  ;;  %v1540_v54 = vmul.f32 0.2, %v1524_v49  ;;  %v2007_v55 = vadd.f32 %v1480_v53, %v744_v42 }
 0x126   : > { %v1549_v56 = vsel %vm1533_vm1, %v1525_v48, %v1541_v51  ;;  %v1527_v57 = vadd.f32 %v2006_v52, %v1791_v44 }
 0x127   : > { %1558 = vst.msk [vmem:[%s2369_s20 + $0x8] sm:$0xff] %vm1556_vm2, %v1549_v56  ;;  %v1548_v58 = vsel %vm1532_vm3, %v1524_v49, %v1540_v54  ;;  %v1526_v59 = vadd.f32 %v2007_v55, %v1791_v44  ;;  %v1942_v60 = vpop.f32.mrb[4].mxu1  ;;  %v1998_v61 = vpop.f32.mrb[4].mxu0 }
 0x128   : > { %1557 = vst.msk [vmem:[%s2369_s20] sm:$0xff] %vm1556_vm2, %v1548_v58  ;;  %vm1535_vm4 = vcmp.gt.f32.partialorder %v1527_v57, 0.0  ;;  %v1543_v62 = vmul.f32 0.2, %v1527_v57  ;;  %v2008_v63 = vadd.f32 %v1998_v61, %v1942_v60  ;;  %v901_v0 = vpop.f32.mrb[5].mxu1  ;;  %v1490_v1 = vpop.f32.mrb[5].mxu0 }
 0x129   : > { %vm1534_vm5 = vcmp.gt.f32.partialorder %v1526_v59, 0.0  ;;  %v1542_v2 = vmul.f32 0.2, %v1526_v59  ;;  %v2009_v3 = vadd.f32 %v1490_v1, %v901_v0 }
 0x12a   : > { %v1551_v4 = vsel %vm1535_vm4, %v1527_v57, %v1543_v62  ;;  %v1529_v5 = vadd.f32 %v2008_v63, %v1791_v44 }
 0x12b   : > { %1560 = vst.msk [vmem:[%s2369_s20 + $0x18] sm:$0xff] %vm1556_vm2, %v1551_v4  ;;  %v1550_v6 = vsel %vm1534_vm5, %v1526_v59, %v1542_v2  ;;  %v1528_v7 = vadd.f32 %v2009_v3, %v1791_v44  ;;  %v1945_v8 = vpop.f32.mrb[6].mxu1  ;;  %v2001_v9 = vpop.f32.mrb[6].mxu0 }
 0x12c   : > { %1559 = vst.msk [vmem:[%s2369_s20 + $0x10] sm:$0xff] %vm1556_vm2, %v1550_v6  ;;  %vm1537_vm6 = vcmp.gt.f32.partialorder %v1529_v5, 0.0  ;;  %v1545_v10 = vmul.f32 0.2, %v1529_v5  ;;  %v2010_v11 = vadd.f32 %v2001_v9, %v1945_v8  ;;  %v911_v12 = vpop.f32.mrb[7].mxu1  ;;  %v1500_v13 = vpop.f32.mrb[7].mxu0 }
 0x12d   : > { %vm1536_vm7 = vcmp.gt.f32.partialorder %v1528_v7, 0.0  ;;  %v1544_v14 = vmul.f32 0.2, %v1528_v7  ;;  %v2011_v15 = vadd.f32 %v1500_v13, %v911_v12 }
 0x12e   : > { %v1553_v16 = vsel %vm1537_vm6, %v1529_v5, %v1545_v10  ;;  %v1531_v17 = vadd.f32 %v2010_v11, %v1791_v44 }
 0x12f   : > { %1562 = vst.msk [vmem:[%s2369_s20 + $0x28] sm:$0xff] %vm1556_vm2, %v1553_v16  ;;  %v1552_v18 = vsel %vm1536_vm7, %v1528_v7, %v1544_v14  ;;  %v1530_v19 = vadd.f32 %v2011_v15, %v1791_v44 }
 0x130   : > { %1561 = vst.msk [vmem:[%s2369_s20 + $0x20] sm:$0xff] %vm1556_vm2, %v1552_v18  ;;  %vm1539_vm8 = vcmp.gt.f32.partialorder %v1531_v17, 0.0  ;;  %v1547_v20 = vmul.f32 0.2, %v1531_v17 }
 0x131   : > { %vm1538_vm9 = vcmp.gt.f32.partialorder %v1530_v19, 0.0  ;;  %v1546_v21 = vmul.f32 0.2, %v1530_v19 }
 0x132   : > { %v1555_v22 = vsel %vm1539_vm8, %v1531_v17, %v1547_v20 }
 0x133   : > { %1564 = vst.msk [vmem:[%s2369_s20 + $0x38] sm:$0xff] %vm1556_vm2, %v1555_v22  ;;  %v1554_v23 = vsel %vm1538_vm9, %v1530_v19, %v1546_v21 }
 0x134   : > { %1563 = vst.msk [vmem:[%s2369_s20 + $0x30] sm:$0xff] %vm1556_vm2, %v1554_v23 }
 0x135 PF: > { %s13_s14 = sadd.s32 1, %s2115_s14   ;;  %s2400_s12 = smov %s2111_s13 }
 0x136   : > { %p10_p5 = scmp.ge.s32.totalorder %s13_s14, 4   ;;  %s2401_s13 = smov %s2403_s15 }
 0x138   :  { %12 = sbr.rel (!%p10_p5) target bundleno = 2 (0x2), region = 72 }

// kernel: fmu_forward.3
= control target key start
LH: loop header
LB: loop body
LE: loop exit
PB: predicated region body
PF: predicated region fallthrough
CT: control target
= control target key end

     0   :  { %s15955_s21 = smov 0   ;;  %s15957_s22 = smov 0   ;;  %s20183_s0 = inlined_call_operand.vmem [shape: f32[2,2,12,20,8], index: 0, kind: input, shape index: {}]   ;;  %s20184_s1 = inlined_call_operand.vmem [shape: f32[9,8,4], index: 1, kind: input, shape index: {}]   ;;  %s20185_s2 = inlined_call_operand.vmem [shape: f32[1,4], index: 2, kind: input, shape index: {}]   ;;  %s20186_s3 = inlined_call_operand.vmem [shape: f32[9,4,4], index: 3, kind: input, shape index: {}]   ;;  %s20187_s4 = inlined_call_operand.vmem [shape: f32[1,4], index: 4, kind: input, shape index: {}]   ;;  %s20188_s5 = inlined_call_operand.vmem [shape: f32[2,16,16,4], index: 5, kind: input, shape index: {}]   ;;  %s20189_s6 = inlined_call_operand.vmem [shape: f32[2,16,16,4], index: 6, kind: output, shape index: {}]  }
   0x1   :  { %s15959_s23 = smov 0   ;;  %s15961_s24 = smov 0  }
   0x2   :  { %s15963_s25 = smov 0  }
   0x3 LB: > { %s25_s26 = sadd.s32 1, %s15907_s23  ;;  %s28_s27 = sadd.s32 1, %s15911_s24  ;;  %s15915_s25 = sphi %s15963_s25, %s16_s25   ;;  %s15911_s24 = sphi %s15961_s24, %s20472_s24   ;;  %s15907_s23 = sphi %s15959_s23, %s20471_s23   ;;  %s15903_s22 = sphi %s15957_s22, %s20470_s22   ;;  %s15899_s21 = sphi %s15955_s21, %s20469_s21  }
   0x4   : > { %p26_p0 = scmp.ge.s32.totalorder %s25_s26, 2  ;;  %p13629_p1 = scmp.ge.s32.totalorder %s15915_s25, 1 }
   0x5   : > { %p250_p2 = scmp.lt.s32.totalorder %s15915_s25, 5 }
   0x6   : > { %s20474_s26 = smov (%p26_p0, %s25_s26), 0  ;;  %s20476_s27 = smov (!%p26_p0, %s28_s27), %s15911_s24 }
   0x7   : > { %p251_p3 = pnand %p13629_p1, %p250_p2  ;;  %p30_p4 = scmp.ge.s32.totalorder %s20476_s27, 2 }
   0x9   : > { %s20478_s27 = smov (%p30_p4, %s20476_s27), 0  ;;  %254 = sbr.rel (%p251_p3) target bundleno = 1292 (0x50c), region = 44 }
  0x10   : > { %v13659_v0 = vld [vmem:[%s20184_s1 + $0x8] sm:$0xff]  ;;  %p299_p5 = scmp.lt.s32.totalorder %s15903_s22, 1  ;;  %p301_p6 = scmp.lt.s32.totalorder %s15899_s21, 1  ;;  %v394_v1 = vlaneseq  ;;  %v20190_v2 = vmov 0.0   ;;  %vm15918_vm0 = vmmov 0   ;;  %vm1655_vm1 = vcmask 64512  }
  0x11   : > { %14663 = vmatprep.subr.mxu0 %v20190_v2  ;;  %14665 = vmatprep.mubr.msk.f32.mxu0 %vm15918_vm0, %v20190_v2  ;;  %v15919_v3 = vmov 1983009808   ;;  %v800_v47 = vld [vmem:[%s20184_s1] sm:$0xff]  ;;  %vm11477_vm2 = vcmask 1043456   ;;  %s19190_s19 = sshll.u32 %s15899_s21, 3  ;;  %vm11362_vm9 = vcmask 31744  }
  0x12   : > { %14664 = vmatpush3.msra.mxu0 %v13659_v0  ;;  %s20480_s22 = smov (!%p299_p5, %s15903_s22), 1  ;;  %v392_v4 = vunpack.c.l.s4 %v15919_v3  ;;  %15536 = vmatprep.subr.mxu1 %v20190_v2  ;;  %v15999_v5 = vshrl.u32 %v394_v1, 7  ;;  %s14126_s29 = sadd.s32 4294967295, %s19190_s19  ;;  %vm11365_vm10 = vcmask 25600  }
  0x13   : > { %14734 = vmatprep.subr.mxu0 %v20190_v2  ;;  %s302_s30 = scalar_select %p301_p6, %s15899_s21, 1  ;;  %14881 = vmatprep.mubr.msk.f32.mxu1 %vm15918_vm0, %v20190_v2 }
  0x14   : > { %20245 = vst [vmem:[#allocation3_spill] sm:$0xff] %v15999_v5  ;;  %s15667_s7 = smul.u32 72, %s20480_s22  ;;  %v393_v6 = vunpack.c.0.s8 %v392_v4  ;;  %p311_p7 = scmp.lt.s32.totalorder %s19190_s19, 15 }
  0x15   : > { %s15666_s8 = smul.u32 36, %s302_s30  ;;  %s13633_s28 = sshll.u32 %s20480_s22, 5 }
  0x16   : > { %v16005_v7 = vsub.s32 %v393_v6, %v15999_v5  ;;  %s20482_s19 = smov (!%p311_p7, %s19190_s19), 15 }
  0x17   : > { %s305_s9 = sadd.s32 %s15667_s7, %s15666_s8  ;;  %s13632_s20 = sshll.u32 %s20482_s19, 1 }
  0x18   : > { %s13630_s10 = sshll.u32 %s305_s9, 3 }
  0x19   : > { %s16010_s13 = scalar_lea.vmem %s20183_s0, %s13630_s10 }
  0x1a   : > { %v801_v8 = vld [vmem:[%s16010_s13 + $0x1] sm:$0xff]  ;;  %v802_v9 = vld [vmem:[%s16010_s13 + $0x9] sm:$0xff]  ;;  %v804_v14 = vld [vmem:[%s16010_s13 + $0x19] sm:$0xff] }
  0x1b   : > { %v861_v10 = vcombine.high %v801_v8, %v801_v8  ;;  %v868_v11 = vrot.slane %v801_v8, %v16005_v7  ;;  %v878_v12 = vcombine.high %v802_v9, %v802_v9  ;;  %v885_v13 = vrot.slane %v802_v9, %v16005_v7  ;;  %v805_v15 = vld [vmem:[%s16010_s13 + $0x21] sm:$0xff]  ;;  %v13649_v22 = vld.sshfl [vmem:[%s16010_s13 + $0x11] sm:$0x3 pattern:$0x76325410]  ;;  %v808_v45 = vld [vmem:[%s16010_s13 + $0x39] sm:$0xff] }
  0x1c   : > { %v902_v16 = vcombine.high %v804_v14, %v804_v14  ;;  %v909_v17 = vrot.slane %v804_v14, %v16005_v7  ;;  %v919_v25 = vcombine.high %v805_v15, %v805_v15  ;;  %v926_v26 = vrot.slane %v805_v15, %v16005_v7  ;;  %v807_v32 = vld [vmem:[%s16010_s13 + $0x31] sm:$0xff]  ;;  %v810_v54 = vld [vmem:[%s16010_s13 + $0x49] sm:$0xff] }
  0x1d   : > { %v875_v18 = vrot.slane %v861_v10, %v16005_v7  ;;  %v876_v19 = vcombine.high %v868_v11, %v868_v11  ;;  %v892_v20 = vrot.slane %v878_v12, %v16005_v7  ;;  %v893_v21 = vcombine.high %v885_v13, %v885_v13  ;;  %v13650_v57 = vld.sshfl [vmem:[%s16010_s13 + $0x29] sm:$0x3 pattern:$0x76325410]  ;;  %v811_v8 = vld [vmem:[%s16010_s13 + $0x51] sm:$0xff] }
  0x1e   : > { %v916_v23 = vrot.slane %v902_v16, %v16005_v7  ;;  %v917_v24 = vcombine.high %v909_v17, %v909_v17  ;;  %v1307_v31 = vcombine.low %v13649_v22, %v909_v17  ;;  %v933_v39 = vrot.slane %v919_v25, %v16005_v7  ;;  %v13651_v16 = vld.sshfl [vmem:[%s16010_s13 + $0x41] sm:$0x3 pattern:$0x76325410] }
  0x1f   : > { %v877_v27 = vcombine.high %v875_v18, %v875_v18  ;;  %v1273_v28 = vcombine.low %v868_v11, %v876_v19  ;;  %v894_v29 = vcombine.high %v892_v20, %v892_v20  ;;  %v1290_v30 = vcombine.low %v885_v13, %v893_v21  ;;  %v813_v19 = vld [vmem:[%s16010_s13 + $0x61] sm:$0xff] }
  0x20   : > { %v1308_v36 = vcombine.low %v917_v24, %v916_v23  ;;  %v918_v38 = vcombine.high %v916_v23, %v916_v23  ;;  %v934_v40 = vcombine.high %v926_v26, %v926_v26  ;;  %v950_v43 = vrot.slane %v807_v32, %v16005_v7 }
  0x21   : > { %v1274_v33 = vcombine.low %v875_v18, %v877_v27  ;;  %v1281_v34 = vrot.slane %v1273_v28, %v16005_v7  ;;  %v1291_v35 = vcombine.low %v892_v20, %v894_v29  ;;  %v1298_v37 = vrot.slane %v1290_v30, %v16005_v7 }
  0x22   : > { %v943_v44 = vcombine.high %v807_v32, %v807_v32  ;;  %v1315_v48 = vrot.slane %v1307_v31, %v16005_v7  ;;  %v1322_v49 = vrot.slane %v1308_v36, %v16005_v7  ;;  %v1324_v50 = vcombine.low %v918_v38, %v926_v26  ;;  %v814_v26 = vld [vmem:[%s16010_s13 + $0x69] sm:$0xff] }
  0x23   : > { %v1288_v41 = vrot.slane %v1274_v33, %v16005_v7  ;;  %v1305_v42 = vrot.slane %v1291_v35, %v16005_v7  ;;  %v935_v51 = vcombine.high %v933_v39, %v933_v39  ;;  %v958_v52 = vcombine.high %v950_v43, %v950_v43 }
  0x24   : > { %v957_v53 = vrot.slane %v943_v44, %v16005_v7  ;;  %v1325_v56 = vcombine.low %v934_v40, %v933_v39  ;;  %v967_v58 = vrot.slane %v808_v45, %v16005_v7  ;;  %v960_v59 = vcombine.high %v808_v45, %v808_v45 }
  0x25   : > { %v1289_v46 = vcombine.low %v1281_v34, %v1288_v41  ;;  %v1306_v55 = vcombine.low %v1298_v37, %v1305_v42  ;;  %v984_v60 = vcombine.high %v810_v54, %v810_v54  ;;  %v1323_v61 = vcombine.low %v1315_v48, %v1322_v49  ;;  %v13652_v41 = vld.sshfl [vmem:[%s16010_s13 + $0x59] sm:$0x3 pattern:$0x76325410]  ;;  %v817_v49 = vld [vmem:[%s16010_s13 + $0x81] sm:$0xff] }
  0x26   : > { %v1341_v62 = vcombine.low %v935_v51, %v13650_v57  ;;  %v1342_v63 = vcombine.low %v950_v43, %v958_v52  ;;  %v959_v0 = vcombine.high %v957_v53, %v957_v53  ;;  %v1332_v1 = vrot.slane %v1324_v50, %v16005_v7  ;;  %v816_v42 = vld [vmem:[%s16010_s13 + $0x79] sm:$0xff] }
  0x27   : > { %14666 = vmatmul.mubr.msk.f32.vlgmr.msra.gmra.mrb[0].mxu0 %vm1655_vm1, %v1289_v46  ;;  %v1339_v3 = vrot.slane %v1325_v56, %v16005_v7  ;;  %v975_v4 = vcombine.high %v967_v58, %v967_v58  ;;  %v974_v6 = vrot.slane %v960_v59, %v16005_v7  ;;  %v998_v9 = vrot.slane %v984_v60, %v16005_v7 }
  0x28   : > { %14735 = vmatpush3.msra.mxu0 %v800_v47  ;;  %14668 = vmatprep.mubr.msk.f32.mxu0 %vm15918_vm0, %v20190_v2  ;;  %v1349_v10 = vrot.slane %v1341_v62, %v16005_v7  ;;  %v1356_v11 = vrot.slane %v1342_v63, %v16005_v7  ;;  %v1358_v12 = vcombine.low %v957_v53, %v959_v0 }
  0x29   : > { %14805 = vmatprep.subr.mxu0 %v20190_v2  ;;  %v991_v13 = vrot.slane %v810_v54, %v16005_v7  ;;  %v1340_v14 = vcombine.low %v1332_v1, %v1339_v3  ;;  %v1359_v15 = vcombine.low %v967_v58, %v975_v4  ;;  %v976_v17 = vcombine.high %v974_v6, %v974_v6 }
  0x2a   : > { %v1001_v18 = vcombine.high %v811_v8, %v811_v8  ;;  %v1000_v21 = vcombine.high %v998_v9, %v998_v9  ;;  %v1008_v22 = vrot.slane %v811_v8, %v16005_v7  ;;  %v1357_v23 = vcombine.low %v1349_v10, %v1356_v11  ;;  %v13653_v11 = vld.sshfl [vmem:[%s16010_s13 + $0x71] sm:$0x3 pattern:$0x76325410] }
  0x2b   : > { %14669 = vmatmul.mubr.msk.f32.gmra.mrb[2].mxu0 %vm1655_vm1, %v1306_v55  ;;  %v999_v20 = vcombine.high %v991_v13, %v991_v13  ;;  %v1366_v24 = vrot.slane %v1358_v12, %v16005_v7  ;;  %v1376_v25 = vcombine.low %v13651_v16, %v991_v13  ;;  %v1373_v27 = vrot.slane %v1359_v15, %v16005_v7  ;;  %v819_v55 = vld [vmem:[%s16010_s13 + $0x91] sm:$0xff] }
  0x2c   : > { %14671 = vmatprep.mubr.msk.f32.mxu0 %vm15918_vm0, %v20190_v2  ;;  %v1375_v28 = vcombine.low %v974_v6, %v976_v17  ;;  %v1015_v29 = vrot.slane %v1001_v18, %v16005_v7  ;;  %v1025_v30 = vcombine.high %v813_v19, %v813_v19  ;;  %v1393_v32 = vcombine.low %v1000_v21, %v1008_v22  ;;  %v820_v6 = vld [vmem:[%s16010_s13 + $0x99] sm:$0xff] }
  0x2d   : > { %v1392_v31 = vcombine.low %v999_v20, %v998_v9  ;;  %v1042_v33 = vcombine.high %v814_v26, %v814_v26  ;;  %v1390_v34 = vrot.slane %v1376_v25, %v16005_v7  ;;  %v1016_v35 = vcombine.high %v1008_v22, %v1008_v22  ;;  %v822_v22 = vld [vmem:[%s16010_s13 + $0xa9] sm:$0xff] }
  0x2e   : > { %v1032_v36 = vrot.slane %v813_v19, %v16005_v7  ;;  %v1374_v37 = vcombine.low %v1366_v24, %v1373_v27  ;;  %v1383_v38 = vrot.slane %v1375_v28, %v16005_v7  ;;  %v1017_v39 = vcombine.high %v1015_v29, %v1015_v29  ;;  %v13654_v25 = vld.sshfl [vmem:[%s16010_s13 + $0x89] sm:$0x3 pattern:$0x76325410] }
  0x2f   : > { %14672 = vmatmul.mubr.msk.f32.gmra.mrb[4].mxu0 %vm1655_vm1, %v1323_v61  ;;  %v1039_v40 = vrot.slane %v1025_v30, %v16005_v7  ;;  %v1400_v43 = vrot.slane %v1392_v31, %v16005_v7  ;;  %v1407_v44 = vrot.slane %v1393_v32, %v16005_v7  ;;  %v1049_v45 = vrot.slane %v814_v26, %v16005_v7  ;;  %v823_v26 = vld [vmem:[%s16010_s13 + $0xb1] sm:$0xff]  ;;  %v825_v31 = vld [vmem:[%s16010_s13 + $0xc1] sm:$0xff] }
  0x30   : > { %14674 = vmatprep.mubr.msk.f32.mxu0 %vm15918_vm0, %v20190_v2  ;;  %v1056_v46 = vrot.slane %v1042_v33, %v16005_v7  ;;  %v1409_v47 = vcombine.low %v1016_v35, %v1015_v29  ;;  %v1040_v48 = vcombine.high %v1032_v36, %v1032_v36  ;;  %v1391_v50 = vcombine.low %v1383_v38, %v1390_v34 }
  0x31   : > { %v1410_v51 = vcombine.low %v1017_v39, %v13652_v41  ;;  %v1041_v52 = vcombine.high %v1039_v40, %v1039_v40  ;;  %v1066_v53 = vcombine.high %v816_v42, %v816_v42  ;;  %v1073_v54 = vrot.slane %v816_v42, %v16005_v7 }
  0x32   : > { %v1408_v56 = vcombine.low %v1400_v43, %v1407_v44  ;;  %v1057_v57 = vcombine.high %v1049_v45, %v1049_v45  ;;  %v1058_v58 = vcombine.high %v1056_v46, %v1056_v46  ;;  %v1083_v59 = vcombine.high %v817_v49, %v817_v49 }
  0x33   : > { %14675 = vmatmul.mubr.msk.f32.gmra.mrb[6].mxu0 %vm1655_vm1, %v1340_v14  ;;  %v1417_v60 = vrot.slane %v1409_v47, %v16005_v7  ;;  %v1426_v61 = vcombine.low %v1032_v36, %v1040_v48  ;;  %v1090_v62 = vrot.slane %v817_v49, %v16005_v7  ;;  %v1107_v63 = vcombine.high %v819_v55, %v819_v55  ;;  %v826_v36 = vld [vmem:[%s16010_s13 + $0xc9] sm:$0xff]  ;;  %v13655_v47 = vld.sshfl [vmem:[%s16010_s13 + $0xa1] sm:$0x3 pattern:$0x76325410] }
  0x34   : > { %14677 = vmatprep.mubr.msk.f32.mxu0 %vm15918_vm0, %v20190_v2  ;;  %v1424_v0 = vrot.slane %v1410_v51, %v16005_v7  ;;  %v1427_v1 = vcombine.low %v1039_v40, %v1041_v52  ;;  %v1080_v3 = vrot.slane %v1066_v53, %v16005_v7  ;;  %v1114_v4 = vrot.slane %v819_v55, %v16005_v7 }
  0x35   : > { %v1081_v8 = vcombine.high %v1073_v54, %v1073_v54  ;;  %v1443_v9 = vcombine.low %v1049_v45, %v1057_v57  ;;  %v1444_v10 = vcombine.low %v1056_v46, %v1058_v58  ;;  %v1097_v13 = vrot.slane %v1083_v59, %v16005_v7 }
  0x36   : > { %v1082_v12 = vcombine.high %v1080_v3, %v1080_v3  ;;  %v1434_v14 = vrot.slane %v1426_v61, %v16005_v7  ;;  %v1098_v15 = vcombine.high %v1090_v62, %v1090_v62  ;;  %v1121_v16 = vrot.slane %v1107_v63, %v16005_v7 }
  0x37   : > { %14678 = vmatmul.mubr.msk.f32.gmra.mrb[8].mxu0 %vm1655_vm1, %v1357_v23  ;;  %v1131_v17 = vrot.slane %v820_v6, %v16005_v7  ;;  %v1425_v18 = vcombine.low %v1417_v60, %v1424_v0  ;;  %v1441_v19 = vrot.slane %v1427_v1, %v16005_v7  ;;  %v1099_v20 = vcombine.high %v1097_v13, %v1097_v13 }
  0x38   : > { %14680 = vmatprep.mubr.msk.f32.mxu0 %vm15918_vm0, %v20190_v2  ;;  %v1122_v21 = vcombine.high %v1114_v4, %v1114_v4  ;;  %v1460_v23 = vcombine.low %v13653_v11, %v1073_v54  ;;  %v1461_v24 = vcombine.low %v1081_v8, %v1080_v3  ;;  %v1451_v27 = vrot.slane %v1443_v9, %v16005_v7  ;;  %v828_v3 = vld [vmem:[%s16010_s13 + $0xd9] sm:$0xff] }
  0x39   : > { %v1458_v28 = vrot.slane %v1444_v10, %v16005_v7  ;;  %v1477_v29 = vcombine.low %v1082_v12, %v1090_v62  ;;  %v1124_v30 = vcombine.high %v820_v6, %v820_v6  ;;  %v1478_v32 = vcombine.low %v1098_v15, %v1097_v13 }
  0x3a   : > { %v1123_v33 = vcombine.high %v1121_v16, %v1121_v16  ;;  %v1139_v34 = vcombine.high %v1131_v17, %v1131_v17  ;;  %v1148_v35 = vcombine.high %v822_v22, %v822_v22  ;;  %v1494_v38 = vcombine.low %v1099_v20, %v13654_v25  ;;  %v829_v20 = vld [vmem:[%s16010_s13 + $0xe1] sm:$0xff] }
  0x3b   : > { %14681 = vmatmul.mubr.msk.f32.gmra.mrb[10].mxu0 %vm1655_vm1, %v1374_v37  ;;  %v1442_v37 = vcombine.low %v1434_v14, %v1441_v19  ;;  %v1495_v39 = vcombine.low %v1114_v4, %v1122_v21  ;;  %v1165_v40 = vcombine.high %v823_v26, %v823_v26  ;;  %v1468_v41 = vrot.slane %v1460_v23, %v16005_v7  ;;  %v330_v14 = vld [vmem:[%s16010_s13] sm:$0xff] }
  0x3c   : > { %14683 = vmatprep.mubr.msk.f32.mxu0 %vm15918_vm0, %v20190_v2  ;;  %v1475_v42 = vrot.slane %v1461_v24, %v16005_v7  ;;  %v1155_v43 = vrot.slane %v822_v22, %v16005_v7  ;;  %v1189_v44 = vcombine.high %v825_v31, %v825_v31  ;;  %v1459_v45 = vcombine.low %v1451_v27, %v1458_v28 }
  0x3d   : > { %v1485_v46 = vrot.slane %v1477_v29, %v16005_v7  ;;  %v1138_v48 = vrot.slane %v1124_v30, %v16005_v7  ;;  %v1206_v49 = vcombine.high %v826_v36, %v826_v36  ;;  %v1511_v51 = vcombine.low %v1121_v16, %v1123_v33  ;;  %v13656_v16 = vld.sshfl [vmem:[%s16010_s13 + $0xb9] sm:$0x3 pattern:$0x76325410] }
  0x3e   : > { %v1512_v52 = vcombine.low %v1131_v17, %v1139_v34  ;;  %v1162_v53 = vrot.slane %v1148_v35, %v16005_v7  ;;  %v1502_v54 = vrot.slane %v1494_v38, %v16005_v7  ;;  %v1509_v55 = vrot.slane %v1495_v39, %v16005_v7 }
  0x3f   : > { %14684 = vmatmul.mubr.msk.f32.gmra.mrb[12].mxu0 %vm1655_vm1, %v1391_v50  ;;  %v1492_v50 = vrot.slane %v1478_v32, %v16005_v7  ;;  %v1179_v57 = vrot.slane %v1165_v40, %v16005_v7  ;;  %v1529_v58 = vcombine.low %v13655_v47, %v1155_v43  ;;  %v1172_v59 = vrot.slane %v823_v26, %v16005_v7 }
  0x40   : > { %14686 = vmatprep.mubr.msk.f32.mxu0 %vm15918_vm0, %v20190_v2  ;;  %v1196_v60 = vrot.slane %v825_v31, %v16005_v7  ;;  %v1203_v61 = vrot.slane %v1189_v44, %v16005_v7  ;;  %v1476_v62 = vcombine.low %v1468_v41, %v1475_v42  ;;  %v1140_v63 = vcombine.high %v1138_v48, %v1138_v48  ;;  %v13657_v44 = vld.sshfl [vmem:[%s16010_s13 + $0xd1] sm:$0x3 pattern:$0x76325410] }
  0x41   : > { %v1213_v0 = vrot.slane %v826_v36, %v16005_v7  ;;  %v1220_v1 = vrot.slane %v1206_v49, %v16005_v7  ;;  %v1519_v4 = vrot.slane %v1511_v51, %v16005_v7  ;;  %v1526_v6 = vrot.slane %v1512_v52, %v16005_v7 }
  0x42   : > { %v1164_v8 = vcombine.high %v1162_v53, %v1162_v53  ;;  %v1180_v9 = vcombine.high %v1172_v59, %v1172_v59  ;;  %v1493_v10 = vcombine.low %v1485_v46, %v1492_v50  ;;  %v1510_v11 = vcombine.low %v1502_v54, %v1509_v55 }
  0x43   : > { %14687 = vmatmul.mubr.msk.f32.gmra.mrb[14].mxu0 %vm1655_vm1, %v1408_v56  ;;  %v1163_v56 = vcombine.high %v1155_v43, %v1155_v43  ;;  %v1181_v13 = vcombine.high %v1179_v57, %v1179_v57  ;;  %v1543_v15 = vrot.slane %v1529_v58, %v16005_v7  ;;  %v1204_v17 = vcombine.high %v1196_v60, %v1196_v60 }
  0x44   : > { %14689 = vmatprep.mubr.msk.f32.mxu0 %vm15918_vm0, %v20190_v2  ;;  %v1230_v19 = vcombine.high %v828_v3, %v828_v3  ;;  %v1528_v21 = vcombine.low %v1138_v48, %v1140_v63  ;;  %v1221_v22 = vcombine.high %v1213_v0, %v1213_v0  ;;  %v1222_v23 = vcombine.high %v1220_v1, %v1220_v1 }
  0x45   : > { %v1545_v12 = vcombine.low %v1163_v56, %v1162_v53  ;;  %v1237_v24 = vrot.slane %v828_v3, %v16005_v7  ;;  %v16146_v25 = vcombine.low %v1519_v4, %v1526_v6  ;;  %v1546_v26 = vcombine.low %v1164_v8, %v1172_v59  ;;  %v333_v59 = vld [vmem:[%s16010_s13 + $0x18] sm:$0xff]  ;;  %v334_v6 = vld [vmem:[%s16010_s13 + $0x20] sm:$0xff] }
  0x46   : > { %v1562_v27 = vcombine.low %v1180_v9, %v1179_v57  ;;  %v390_v28 = vcombine.high %v330_v14, %v330_v14  ;;  %v1563_v30 = vcombine.low %v1181_v13, %v13656_v16  ;;  %v1247_v31 = vcombine.high %v829_v20, %v829_v20  ;;  %v13658_v9 = vld.sshfl [vmem:[%s16010_s13 + $0xe9] sm:$0x3 pattern:$0x76325410] }
  0x47   : > { %14690 = vmatmul.mubr.msk.f32.gmra.mrb[16].mxu0 %vm1655_vm1, %v1425_v18  ;;  %v1205_v18 = vcombine.high %v1203_v61, %v1203_v61  ;;  %v1553_v29 = vrot.slane %v1545_v12, %v16005_v7  ;;  %v1254_v32 = vrot.slane %v829_v20, %v16005_v7  ;;  %v1579_v33 = vcombine.low %v1196_v60, %v1204_v17  ;;  %v336_v17 = vld [vmem:[%s16010_s13 + $0x30] sm:$0xff] }
  0x48   : > { %14692 = vmatprep.mubr.msk.f32.mxu0 %vm15918_vm0, %v20190_v2  ;;  %v1244_v35 = vrot.slane %v1230_v19, %v16005_v7  ;;  %v397_v36 = vrot.slane %v330_v14, %v16005_v7  ;;  %v1536_v38 = vrot.slane %v1528_v21, %v16005_v7  ;;  %v1596_v39 = vcombine.low %v1213_v0, %v1221_v22  ;;  %v13639_v20 = vld.sshfl [vmem:[%s16010_s13 + $0x10] sm:$0x3 pattern:$0x76325410]  ;;  %v337_v22 = vld [vmem:[%s16010_s13 + $0x38] sm:$0xff] }
  0x49   : > { %v1580_v34 = vcombine.low %v1203_v61, %v1205_v18  ;;  %v1597_v40 = vcombine.low %v1220_v1, %v1222_v23  ;;  %v1245_v41 = vcombine.high %v1237_v24, %v1237_v24  ;;  %v1560_v42 = vrot.slane %v1546_v26, %v16005_v7 }
  0x4a   : > { %v1570_v43 = vrot.slane %v1562_v27, %v16005_v7  ;;  %v404_v46 = vrot.slane %v390_v28, %v16005_v7  ;;  %v1577_v47 = vrot.slane %v1563_v30, %v16005_v7  ;;  %v1261_v48 = vrot.slane %v1247_v31, %v16005_v7  ;;  %v13780_v30 = vld [vmem:[%s20184_s1 + $0x18] sm:$0xff] }
  0x4b   : > { %14693 = vmatmul.mubr.msk.f32.gmra.mrb[18].mxu0 %vm1655_vm1, %v1442_v37  ;;  %v331_v37 = vld [vmem:[%s16010_s13 + $0x8] sm:$0xff]  ;;  %v1262_v49 = vcombine.high %v1254_v32, %v1254_v32  ;;  %v1587_v51 = vrot.slane %v1579_v33, %v16005_v7  ;;  %v1594_v52 = vrot.slane %v1580_v34, %v16005_v7  ;;  %v405_v53 = vcombine.high %v397_v36, %v397_v36 }
  0x4c   : > { %14695 = vmatprep.mubr.msk.f32.mxu0 %vm15918_vm0, %v20190_v2  ;;  %v407_v50 = vcombine.high %v331_v37, %v331_v37  ;;  %v414_v54 = vrot.slane %v331_v37, %v16005_v7  ;;  %v1604_v55 = vrot.slane %v1596_v39, %v16005_v7  ;;  %v1611_v56 = vrot.slane %v1597_v40, %v16005_v7 }
  0x4d   : > { %v1613_v57 = vcombine.low %v13657_v44, %v1237_v24  ;;  %v1614_v58 = vcombine.low %v1245_v41, %v1244_v35  ;;  %v1544_v60 = vcombine.low %v1536_v38, %v1543_v15  ;;  %v16172_v61 = vcombine.low %v1553_v29, %v1560_v42  ;;  %v339_v24 = vld [vmem:[%s16010_s13 + $0x48] sm:$0xff]  ;;  %15537 = vmatpush3.msra.mxu1 %v13780_v30 }
  0x4e   : > { %v406_v63 = vcombine.high %v404_v46, %v404_v46  ;;  %v16175_v0 = vcombine.low %v1570_v43, %v1577_v47  ;;  %v1631_v1 = vcombine.low %v1262_v49, %v1261_v48  ;;  %v1263_v3 = vcombine.high %v1261_v48, %v1261_v48  ;;  %15018 = vmatprep.subr.mxu1 %v20190_v2 }
  0x4f   : > { %14696 = vmatmul.mubr.msk.f32.gmra.mrb[20].mxu0 %vm1655_vm1, %v1459_v45  ;;  %v1246_v45 = vcombine.high %v1244_v35, %v1244_v35  ;;  %v421_v4 = vrot.slane %v407_v50, %v16005_v7  ;;  %v16181_v8 = vcombine.low %v1587_v51, %v1594_v52  ;;  %v422_v12 = vcombine.high %v414_v54, %v414_v54  ;;  %v340_v50 = vld [vmem:[%s16010_s13 + $0x50] sm:$0xff] }
  0x50   : > { %14698 = vmatprep.mubr.msk.f32.mxu0 %vm15918_vm0, %v20190_v2  ;;  %v16184_v13 = vcombine.low %v1604_v55, %v1611_v56  ;;  %v1621_v14 = vrot.slane %v1613_v57, %v16005_v7  ;;  %v1628_v15 = vrot.slane %v1614_v58, %v16005_v7  ;;  %v438_v16 = vrot.slane %v333_v59, %v16005_v7  ;;  %v342_v56 = vld [vmem:[%s16010_s13 + $0x60] sm:$0xff] }
  0x51   : > { %v1883_v19 = vcombine.low %v404_v46, %v406_v63  ;;  %v448_v21 = vcombine.high %v334_v6, %v334_v6  ;;  %v472_v23 = vcombine.high %v336_v17, %v336_v17  ;;  %v1645_v26 = vrot.slane %v1631_v1, %v16005_v7 }
  0x52   : > { %v16197_v27 = vcombine.low %v1263_v3, %v13658_v9  ;;  %v423_v28 = vcombine.high %v421_v4, %v421_v4  ;;  %v489_v29 = vcombine.high %v337_v22, %v337_v22  ;;  %v446_v34 = vcombine.high %v438_v16, %v438_v16 }
  0x53   : > { %14699 = vmatmul.mubr.msk.f32.gmra.mrb[22].mxu0 %vm1655_vm1, %v1476_v62  ;;  %v1630_v62 = vcombine.low %v1246_v45, %v1254_v32  ;;  %v16205_v32 = vcombine.low %v414_v54, %v422_v12  ;;  %v1916_v35 = vcombine.low %v13639_v20, %v438_v16  ;;  %v513_v37 = vcombine.high %v339_v24, %v339_v24 }
  0x54   : > { %14701 = vmatprep.mubr.msk.f32.mxu0 %vm15918_vm0, %v20190_v2  ;;  %v1897_v38 = vrot.slane %v1883_v19, %v16005_v7  ;;  %v16216_v39 = vrot.slane %v448_v21, %v16005_v7  ;;  %v16219_v40 = vrot.slane %v472_v23, %v16005_v7  ;;  %v16222_v41 = vrot.slane %v337_v22, %v16005_v7 }
  0x55   : > { %v1638_v18 = vrot.slane %v1630_v62, %v16005_v7  ;;  %v16226_v42 = vcombine.low %v1621_v14, %v1628_v15  ;;  %v16231_v45 = vrot.slane %v489_v29, %v16005_v7  ;;  %v1900_v47 = vcombine.low %v421_v4, %v423_v28  ;;  %v343_v4 = vld [vmem:[%s16010_s13 + $0x68] sm:$0xff] }
  0x56   : > { %v16243_v49 = vcombine.high %v16216_v39, %v16216_v39  ;;  %v1907_v51 = vrot.slane %v16205_v32, %v16005_v7  ;;  %v16256_v55 = vrot.slane %v513_v37, %v16005_v7  ;;  %v1924_v58 = vrot.slane %v1916_v35, %v16005_v7 }
  0x57   : > { %14702 = vmatmul.mubr.msk.f32.gmra.mrb[24].mxu0 %vm1655_vm1, %v1493_v10  ;;  %v1882_v10 = vcombine.low %v397_v36, %v405_v53  ;;  %v16212_v36 = vrot.slane %v336_v17, %v16005_v7  ;;  %v16235_v46 = vcombine.low %v1638_v18, %v1645_v26  ;;  %v16249_v53 = vld.sshfl [vmem:[%s16010_s13 + $0x28] sm:$0x3 pattern:$0x76325410]  ;;  %v16275_v63 = vcombine.high %v16231_v45, %v16231_v45 }
  0x58   : > { %14704 = vmatprep.mubr.msk.f32.mxu0 %vm15918_vm0, %v20190_v2  ;;  %v16278_v1 = vrot.slane %v339_v24, %v16005_v7  ;;  %v530_v3 = vcombine.high %v340_v50, %v340_v50  ;;  %v554_v12 = vcombine.high %v342_v56, %v342_v56  ;;  %v16299_v15 = vcombine.high %v16256_v55, %v16256_v55 }
  0x59   : > { %v1890_v31 = vrot.slane %v1882_v10, %v16005_v7  ;;  %v16253_v54 = vcombine.high %v16212_v36, %v16212_v36  ;;  %v16289_v10 = vld.sshfl [vmem:[%s16010_s13 + $0x40] sm:$0x3 pattern:$0x76325410]  ;;  %v16302_v16 = vrot.slane %v340_v50, %v16005_v7  ;;  %v571_v20 = vcombine.high %v343_v4, %v343_v4 }
  0x5a   : > { %v16295_v14 = vcombine.high %v16278_v1, %v16278_v1  ;;  %v1984_v22 = vcombine.low %v16231_v45, %v16275_v63  ;;  %v1985_v23 = vcombine.low %v16289_v10, %v16278_v1  ;;  %v16317_v24 = vrot.slane %v530_v3, %v16005_v7 }
  0x5b   : > { %14705 = vmatmul.mubr.msk.f32.gmra.mrb[26].mxu0 %vm1655_vm1, %v1510_v11  ;;  %v431_v11 = vcombine.high %v333_v59, %v333_v59  ;;  %v16259_v57 = vcombine.low %v1890_v31, %v1897_v38  ;;  %v16264_v59 = vcombine.high %v16219_v40, %v16219_v40  ;;  %v16329_v29 = vrot.slane %v554_v12, %v16005_v7  ;;  %v346_v12 = vld [vmem:[%s16010_s13 + $0x80] sm:$0xff] }
  0x5c   : > { %14707 = vmatprep.mubr.msk.f32.mxu0 %vm15918_vm0, %v20190_v2  ;;  %v2001_v31 = vcombine.low %v16295_v14, %v16256_v55  ;;  %v2002_v32 = vcombine.low %v16299_v15, %v16302_v16  ;;  %v16349_v37 = vcombine.high %v16302_v16, %v16302_v16  ;;  %v16352_v38 = vrot.slane %v571_v20, %v16005_v7  ;;  %v348_v20 = vld [vmem:[%s16010_s13 + $0x90] sm:$0xff] }
  0x5d   : > { %v445_v33 = vrot.slane %v431_v11, %v16005_v7  ;;  %v1951_v11 = vcombine.low %v16212_v36, %v16253_v54  ;;  %v1967_v18 = vcombine.low %v16219_v40, %v16264_v59  ;;  %20246 = vst [vmem:[#allocation4_spill] sm:$0xff] %v16329_v29  ;;  %v16360_v50 = vrot.slane %v1984_v22, %v16005_v7 }
  0x5e   : > { %20248 = vst [vmem:[#allocation6_spill] sm:$0xff] %v16352_v38 }
  0x5f   : > { %14708 = vmatmul.mubr.msk.f32.gmra.mrb[28].mxu0 %vm1655_vm1, %v16146_v25  ;;  %v16209_v25 = vrot.slane %v334_v6, %v16005_v7  ;;  %v447_v44 = vcombine.high %v445_v33, %v445_v33  ;;  %v1917_v52 = vcombine.low %v446_v34, %v445_v33  ;;  %v1914_v6 = vrot.slane %v1900_v47, %v16005_v7 }
  0x60   : > { %14710 = vmatprep.mubr.msk.f32.mxu0 %vm15918_vm0, %v20190_v2  ;;  %v16332_v30 = vrot.slane %v1951_v11, %v16005_v7  ;;  %v16339_v33 = vrot.slane %v343_v4, %v16005_v7  ;;  %v16342_v34 = vrot.slane %v1967_v18, %v16005_v7  ;;  %20249 = vst [vmem:[#allocation7_spill] sm:$0xff] %v16360_v50  ;;  %v16514_v50 = vld.sshfl [vmem:[%s16010_s13 + $0x88] sm:$0x3 pattern:$0x76325410] }
  0x61   : > { %v16239_v48 = vcombine.high %v16209_v25, %v16209_v25  ;;  %v1933_v62 = vcombine.low %v447_v44, %v16209_v25  ;;  %v1931_v17 = vrot.slane %v1917_v52, %v16005_v7  ;;  %v345_v44 = vld [vmem:[%s16010_s13 + $0x78] sm:$0xff]  ;;  %v16357_v47 = vcombine.low %v1907_v51, %v1914_v6  ;;  %20276 = vst [vmem:[#allocation33_spill] sm:$0xff] %v16514_v50 }
  0x62   : > { %20247 = vst [vmem:[#allocation5_spill] sm:$0xff] %v16339_v33  ;;  %v16363_v52 = vrot.slane %v1985_v23, %v16005_v7  ;;  %v16384_v4 = vcombine.high %v16329_v29, %v16329_v29  ;;  %v16387_v6 = vrot.slane %v2001_v31, %v16005_v7  ;;  %v2018_v18 = vcombine.low %v16349_v37, %v16317_v24 }
  0x63   : > { %14711 = vmatmul.mubr.msk.f32.gmra.mrb[30].mxu0 %vm1655_vm1, %v1544_v60  ;;  %v16268_v60 = vcombine.high %v16222_v41, %v16222_v41  ;;  %v1934_v9 = vcombine.low %v16239_v48, %v16216_v39  ;;  %v1941_v21 = vrot.slane %v1933_v62, %v16005_v7  ;;  %v16371_v62 = vcombine.low %v1924_v58, %v1931_v17 }
  0x64   : > { %14713 = vmatprep.mubr.msk.f32.mxu0 %vm15918_vm0, %v20190_v2  ;;  %20250 = vst [vmem:[#allocation8_spill] sm:$0xff] %v16363_v52  ;;  %20253 = vst [vmem:[#allocation11_spill] sm:$0xff] %v16384_v4  ;;  %v16394_v58 = vcombine.high %v16339_v33, %v16339_v33  ;;  %v16415_v23 = vrot.slane %v345_v44, %v16005_v7  ;;  %v636_v31 = vcombine.high %v348_v20, %v348_v20 }
  0x65   : > { %v1968_v19 = vcombine.low %v16222_v41, %v16268_v60  ;;  %v1948_v26 = vrot.slane %v1934_v9, %v16005_v7  ;;  %20254 = vst [vmem:[#allocation12_spill] sm:$0xff] %v16387_v6  ;;  %v16390_v9 = vrot.slane %v2002_v32, %v16005_v7  ;;  %v16425_v17 = vrot.slane %v346_v12, %v16005_v7  ;;  %v352_v6 = vld [vmem:[%s16010_s13 + $0xb0] sm:$0xff] }
  0x66   : > { %20256 = vst [vmem:[#allocation14_spill] sm:$0xff] %v16394_v58  ;;  %20258 = vst [vmem:[#allocation16_spill] sm:$0xff] %v16415_v23  ;;  %v2052_v11 = vcombine.low %v16339_v33, %v16394_v58  ;;  %v16435_v5 = vrot.slane %v2018_v18, %v16005_v7  ;;  %v351_v58 = vld [vmem:[%s16010_s13 + $0xa8] sm:$0xff]  ;;  %v16456_v18 = vcombine.high %v16415_v23, %v16415_v23 }
  0x67   : > { %14714 = vmatmul.mubr.msk.f32.gmra.mrb[32].mxu0 %vm1655_vm1, %v16172_v61  ;;  %v1950_v61 = vcombine.low %v16243_v49, %v16249_v53  ;;  %v16345_v35 = vrot.slane %v1968_v19, %v16005_v7  ;;  %v16373_v3 = vcombine.low %v1941_v21, %v1948_v26  ;;  %20255 = vst [vmem:[#allocation13_spill] sm:$0xff] %v16390_v9  ;;  %v349_v26 = vld [vmem:[%s16010_s13 + $0x98] sm:$0xff]  ;;  %20259 = vst [vmem:[#allocation17_spill] sm:$0xff] %v16425_v17 }
  0x68   : > { %14716 = vmatprep.mubr.msk.f32.mxu0 %vm15918_vm0, %v20190_v2  ;;  %v16405_v19 = vcombine.high %v16352_v38, %v16352_v38  ;;  %v612_v21 = vcombine.high %v346_v12, %v346_v12  ;;  %20261 = vst [vmem:[#allocation19_spill] sm:$0xff] %v16435_v5  ;;  %v16443_v12 = vrot.slane %v348_v20, %v16005_v7  ;;  %20265 = vst [vmem:[#allocation23_spill] sm:$0xff] %v16456_v18 }
  0x69   : > { %v16323_v28 = vrot.slane %v1950_v61, %v16005_v7  ;;  %v595_v61 = vcombine.high %v345_v44, %v345_v44  ;;  %v16446_v44 = vrot.slane %v349_v26, %v16005_v7  ;;  %v16463_v20 = vrot.slane %v636_v31, %v16005_v7 }
  0x6a   : > { %20257 = vst [vmem:[#allocation15_spill] sm:$0xff] %v16405_v19  ;;  %v16478_v33 = vcombine.high %v16425_v17, %v16425_v17  ;;  %v16481_v31 = vrot.slane %v2052_v11, %v16005_v7  ;;  %v16498_v11 = vcombine.high %v16443_v12, %v16443_v12 }
  0x6b   : > { %14717 = vmatmul.mubr.msk.f32.gmra.mrb[34].mxu0 %vm1655_vm1, %v16175_v0  ;;  %v16326_v0 = vrot.slane %v342_v56, %v16005_v7  ;;  %v16367_v56 = vcombine.high %v16317_v24, %v16317_v24  ;;  %v16432_v43 = vrot.slane %v595_v61, %v16005_v7  ;;  %20263 = vst [vmem:[#allocation21_spill] sm:$0xff] %v16446_v44  ;;  %20267 = vst [vmem:[#allocation25_spill] sm:$0xff] %v16463_v20 }
  0x6c   : > { %14719 = vmatprep.mubr.msk.f32.mxu0 %vm15918_vm0, %v20190_v2  ;;  %20272 = vst [vmem:[#allocation29_spill] sm:$0xff] %v16478_v33  ;;  %20274 = vst [vmem:[#allocation31_spill] sm:$0xff] %v16498_v11 }
  0x6d   : > { %v16380_v51 = vcombine.high %v16326_v0, %v16326_v0  ;;  %20260 = vst [vmem:[#allocation18_spill] sm:$0xff] %v16432_v43 }
  0x6f   : > { %14720 = vmatmul.mubr.msk.f32.gmra.mrb[36].mxu0 %vm1655_vm1, %v16181_v8  ;;  %v16376_v8 = vld.sshfl [vmem:[%s16010_s13 + $0x58] sm:$0x3 pattern:$0x76325410]  ;;  %20252 = vst [vmem:[#allocation10_spill] sm:$0xff] %v16380_v51  ;;  %v2035_v32 = vcombine.low %v16326_v0, %v16380_v51 }
  0x70   : > { %14722 = vmatprep.mubr.msk.f32.mxu0 %vm15918_vm0, %v20190_v2  ;;  %20251 = vst [vmem:[#allocation9_spill] sm:$0xff] %v16376_v8  ;;  %v2019_v22 = vcombine.low %v16367_v56, %v16376_v8  ;;  %v16440_v51 = vld.sshfl [vmem:[%s16010_s13 + $0x70] sm:$0x3 pattern:$0x76325410]  ;;  %v16518_v8 = vcombine.high %v16463_v20, %v16463_v20 }
  0x71   : > { %20262 = vst [vmem:[#allocation20_spill] sm:$0xff] %v16440_v51  ;;  %v2069_v9 = vcombine.low %v16440_v51, %v16415_v23  ;;  %v16502_v23 = vcombine.high %v16446_v44, %v16446_v44  ;;  %v2070_v51 = vcombine.low %v16456_v18, %v16432_v43  ;;  %v16533_v18 = vld.sshfl [vmem:[%s16010_s13 + $0xa0] sm:$0x3 pattern:$0x76325410] }
  0x72   : > { %v16452_v61 = vrot.slane %v2019_v22, %v16005_v7  ;;  %20277 = vst [vmem:[#allocation34_spill] sm:$0xff] %v16518_v8  ;;  %20279 = vst [vmem:[#allocation36_spill] sm:$0xff] %v16533_v18 }
  0x73   : > { %14723 = vmatmul.mubr.msk.f32.gmra.mrb[38].mxu0 %vm1655_vm1, %v16184_v13  ;;  %v2036_v13 = vcombine.low %v16329_v29, %v16384_v4  ;;  %v2053_v4 = vcombine.low %v16352_v38, %v16405_v19  ;;  %v16460_v19 = vcombine.high %v16432_v43, %v16432_v43  ;;  %v16474_v38 = vrot.slane %v612_v21, %v16005_v7 }
  0x74   : > { %14725 = vmatprep.mubr.msk.f32.mxu0 %vm15918_vm0, %v20190_v2  ;;  %v653_v2 = vcombine.high %v349_v26, %v349_v26  ;;  %20264 = vst [vmem:[#allocation22_spill] sm:$0xff] %v16452_v61  ;;  %v20268_v26 = vmov 0.0   ;;  %20275 = vst [vmem:[#allocation32_spill] sm:$0xff] %v16502_v23  ;;  %v16527_v43 = vrot.slane %v351_v58, %v16005_v7 }
  0x75   : > { %20266 = vst [vmem:[#allocation24_spill] sm:$0xff] %v16460_v19  ;;  %v16471_v22 = vrot.slane %v2036_v13, %v16005_v7  ;;  %20271 = vst [vmem:[#allocation28_spill] sm:$0xff] %v16474_v38  ;;  %v677_v13 = vcombine.high %v351_v58, %v351_v58  ;;  %v16490_v29 = vrot.slane %v2053_v4, %v16005_v7 }
  0x76   : > { %v16494_v21 = vcombine.high %v16474_v38, %v16474_v38  ;;  %v2086_v52 = vcombine.low %v16460_v19, %v16425_v17  ;;  %v2087_v4 = vcombine.low %v16478_v33, %v16474_v38  ;;  %20278 = vst [vmem:[#allocation35_spill] sm:$0xff] %v16527_v43  ;;  %v694_v17 = vcombine.high %v352_v6, %v352_v6 }
  0x77   : > { %14726 = vmatmul.mubr.msk.f32.gmra.mrb[40].mxu0 %vm1655_vm1, %v16226_v42  ;;  %v16468_v42 = vrot.slane %v2035_v32, %v16005_v7  ;;  %20270 = vst [vmem:[#allocation27_spill] sm:$0xff] %v16471_v22  ;;  %v16486_v32 = vrot.slane %v653_v2, %v16005_v7  ;;  %v354_v2 = vld [vmem:[%s16010_s13 + $0xc0] sm:$0xff]  ;;  %v16530_v19 = vrot.slane %v2069_v9, %v16005_v7 }
  0x78   : > { %14728 = vmatprep.mubr.msk.f32.mxu0 %vm15918_vm0, %v20268_v26  ;;  %v16540_v5 = vrot.slane %v677_v13, %v16005_v7  ;;  %v2103_v58 = vcombine.low %v16494_v21, %v16514_v50  ;;  %v2104_v9 = vcombine.low %v16443_v12, %v16498_v11  ;;  %v2121_v33 = vcombine.low %v16446_v44, %v16502_v23  ;;  %v355_v50 = vld [vmem:[%s16010_s13 + $0xc8] sm:$0xff]  ;;  %v13716_v23 = vld [vmem:[%s20184_s1 + $0x10] sm:$0xff] }
  0x79   : > { %20269 = vst [vmem:[#allocation26_spill] sm:$0xff] %v16468_v42  ;;  %20273 = vst [vmem:[#allocation30_spill] sm:$0xff] %v16486_v32  ;;  %v16537_v61 = vcombine.high %v16486_v32, %v16486_v32  ;;  %v20282_v22 = vrot.slane %v16197_v27, %v16005_v7  ;;  %v16555_v13 = vrot.slane %v2070_v51, %v16005_v7 }
  0x7a   : > { %20281 = vst [vmem:[#allocation38_spill] sm:$0xff] %v16540_v5  ;;  %v16558_v42 = vrot.slane %v2086_v52, %v16005_v7  ;;  %v2120_v38 = vcombine.low %v16463_v20, %v16518_v8  ;;  %v16564_v11 = vcombine.high %v16527_v43, %v16527_v43  ;;  %v16570_v27 = vrot.slane %v2087_v4, %v16005_v7 }
  0x7b   : > { %14729 = vmatmul.mubr.msk.f32.gmra.mrb[42].mxu0 %vm1655_vm1, %v16235_v46  ;;  %20280 = vst [vmem:[#allocation37_spill] sm:$0xff] %v16537_v61  ;;  %v718_v46 = vcombine.high %v354_v2, %v354_v2  ;;  %20283 = vst [vmem:[#allocation39_spill] sm:$0xff] %v16555_v13  ;;  %v2138_v51 = vcombine.low %v16533_v18, %v16527_v43  ;;  %v16575_v52 = vrot.slane %v352_v6, %v16005_v7 }
  0x7c   : > { %14731 = vmatprep.mubr.msk.f32.mxu0 %vm15918_vm0, %v20268_v26  ;;  %20284 = vst [vmem:[#allocation40_spill] sm:$0xff] %v16564_v11  ;;  %v2137_v8 = vcombine.low %v16486_v32, %v16537_v61  ;;  %v16587_v4 = vcombine.high %v16540_v5, %v16540_v5  ;;  %v16590_v44 = vrot.slane %v354_v2, %v16005_v7 }
  0x7d   : > { %20285 = vst [vmem:[#allocation41_spill] sm:$0xff] %v16575_v52  ;;  %v16593_v6 = vrot.slane %v718_v46, %v16005_v7  ;;  %v16599_v43 = vrot.slane %v2104_v9, %v16005_v7  ;;  %v16602_v18 = vrot.slane %v2121_v33, %v16005_v7  ;;  %v735_v61 = vcombine.high %v355_v50, %v355_v50 }
  0x7e   : > { %20287 = vst [vmem:[#allocation43_spill] sm:$0xff] %v16587_v4  ;;  %v16607_v2 = vrot.slane %v2120_v38, %v16005_v7  ;;  %v2154_v46 = vcombine.low %v16564_v11, %v16540_v5  ;;  %v16616_v9 = vrot.slane %v355_v50, %v16005_v7  ;;  %v16623_v33 = vrot.slane %v2138_v51, %v16005_v7 }
  0x7f   : > { %14732 = vmatmul.mubr.msk.f32.gmra.mrb[44].mxu0 %vm1655_vm1, %v20282_v22  ;;  %v16578_v22 = vrot.slane %v694_v17, %v16005_v7  ;;  %20288 = vst [vmem:[#allocation44_spill] sm:$0xff] %v16593_v6  ;;  %v16596_v17 = vrot.slane %v2103_v58, %v16005_v7  ;;  %20289 = vst [vmem:[#allocation45_spill] sm:$0xff] %v16602_v18  ;;  %v16613_v58 = vcombine.high %v16575_v52, %v16575_v52 }
  0x80   : > { %14736 = vmatprep.mubr.msk.f32.mxu0 %vm15918_vm0, %v20268_v26  ;;  %20291 = vst [vmem:[#allocation47_spill] sm:$0xff] %v16616_v9  ;;  %v16630_v5 = vrot.slane %v2137_v8, %v16005_v7  ;;  %v2155_v50 = vcombine.low %v16587_v4, %v16575_v52  ;;  %v16639_v11 = vcombine.high %v16590_v44, %v16590_v44 }
  0x81   : > { %20286 = vst [vmem:[#allocation42_spill] sm:$0xff] %v16578_v22  ;;  %20290 = vst [vmem:[#allocation46_spill] sm:$0xff] %v16613_v58  ;;  %v16627_v38 = vcombine.high %v16578_v22, %v16578_v22  ;;  %v16643_v51 = vcombine.high %v16593_v6, %v16593_v6  ;;  %v16652_v4 = vrot.slane %v735_v61, %v16005_v7 }
  0x82   : > { %20293 = vst [vmem:[#allocation49_spill] sm:$0xff] %v16639_v11  ;;  %v4083_v32 = vcombine.low %v16209_v25, %v16239_v48  ;;  %v16661_v13 = vrot.slane %v2154_v46, %v16005_v7  ;;  %v2171_v8 = vcombine.low %v16613_v58, %v16578_v22  ;;  %v16667_v52 = vcombine.high %v16616_v9, %v16616_v9 }
  0x83   : > { %14737 = vmatmul.mubr.msk.f32.vlgmr.msra.gmra.mrb[46].mxu0 %vm1655_vm1, %v16259_v57  ;;  %20294 = vst [vmem:[#allocation50_spill] sm:$0xff] %v16643_v51  ;;  %v357_v57 = vld [vmem:[%s16010_s13 + $0xd8] sm:$0xff]  ;;  %20295 = vst [vmem:[#allocation51_spill] sm:$0xff] %v16652_v4  ;;  %v4084_v61 = vcombine.low %v16216_v39, %v16243_v49  ;;  %v16680_v22 = vrot.slane %v2155_v50, %v16005_v7  ;;  %v2188_v58 = vcombine.low %v16590_v44, %v16639_v11 }
  0x84   : > { %14806 = vmatpush3.msra.mxu0 %v13716_v23  ;;  %14739 = vmatprep.mubr.msk.f32.mxu0 %vm15918_vm0, %v20268_v26  ;;  %v16635_v23 = vld.sshfl [vmem:[%s16010_s13 + $0xb8] sm:$0x3 pattern:$0x76325410]  ;;  %20296 = vst [vmem:[#allocation52_spill] sm:$0xff] %v16667_v52  ;;  %v759_v48 = vcombine.high %v357_v57, %v357_v57  ;;  %v4091_v46 = vrot.slane %v4083_v32, %v16005_v7 }
  0x85   : > { %20292 = vst [vmem:[#allocation48_spill] sm:$0xff] %v16635_v23  ;;  %14876 = vmatprep.subr.mxu0 %v20268_v26  ;;  %v2172_v25 = vcombine.low %v16627_v38, %v16635_v23  ;;  %20297 = vst [vmem:[#allocation53_spill] sm:$0xff] %v16680_v22  ;;  %v2189_v18 = vcombine.low %v16593_v6, %v16643_v51  ;;  %v16688_v23 = vcombine.high %v16652_v4, %v16652_v4 }
  0x86   : > { %v766_v39 = vrot.slane %v357_v57, %v16005_v7  ;;  %v4098_v49 = vrot.slane %v4084_v61, %v16005_v7  ;;  %v4100_v32 = vcombine.low %v16249_v53, %v16212_v36  ;;  %v16697_v50 = vrot.slane %v2171_v8, %v16005_v7 }
  0x87   : > { %14740 = vmatmul.mubr.msk.f32.gmra.mrb[48].mxu0 %vm1655_vm1, %v16357_v47  ;;  %v358_v47 = vld [vmem:[%s16010_s13 + $0xe0] sm:$0xff]  ;;  %20298 = vst [vmem:[#allocation54_spill] sm:$0xff] %v16688_v23  ;;  %v2205_v20 = vcombine.low %v16616_v9, %v16667_v52  ;;  %v16705_v61 = vrot.slane %v2172_v25, %v16005_v7  ;;  %v773_v36 = vrot.slane %v759_v48, %v16005_v7  ;;  %v16723_v48 = vld.sshfl [vmem:[%s16010_s13 + $0xd0] sm:$0x3 pattern:$0x76325410] }
  0x88   : > { %14742 = vmatprep.mubr.msk.f32.mxu0 %vm15918_vm0, %v20268_v26  ;;  %v776_v51 = vcombine.high %v358_v47, %v358_v47  ;;  %v783_v57 = vrot.slane %v358_v47, %v16005_v7  ;;  %v4099_v53 = vcombine.low %v4091_v46, %v4098_v49  ;;  %v16713_v52 = vrot.slane %v2188_v58, %v16005_v7  ;;  %v2490_v9 = vld [vmem:[%s16010_s13 + $0x2] sm:$0xff] }
  0x89   : > { %v16716_v47 = vrot.slane %v2189_v18, %v16005_v7  ;;  %v4108_v11 = vrot.slane %v4100_v32, %v16005_v7  ;;  %v2206_v25 = vcombine.low %v16652_v4, %v16688_v23  ;;  %v774_v46 = vcombine.high %v766_v39, %v766_v39 }
  0x8a   : > { %v775_v49 = vcombine.high %v773_v36, %v773_v36  ;;  %14882 = vmatmul.mubr.msk.f32.vlgmr.msra.gmra.mrb[0].mxu1 %vm1655_vm1, %v4099_v53  ;;  %v790_v18 = vrot.slane %v776_v51, %v16005_v7  ;;  %v791_v58 = vcombine.high %v783_v57, %v783_v57  ;;  %v4117_v32 = vcombine.low %v16264_v59, %v16222_v41 }
  0x8b   : > { %14743 = vmatmul.mubr.msk.f32.gmra.mrb[50].mxu0 %vm1655_vm1, %v16371_v62  ;;  %v4101_v62 = vcombine.low %v16253_v54, %v16219_v40  ;;  %v2491_v40 = vld [vmem:[%s16010_s13 + $0xa] sm:$0xff]  ;;  %14884 = vmatprep.mubr.msk.f32.mxu1 %vm15918_vm0, %v20268_v26  ;;  %v2187_v53 = vcombine.low %v16697_v50, %v16705_v61  ;;  %v2550_v8 = vcombine.high %v2490_v9, %v2490_v9  ;;  %v20361_v50 = vld [vmem:[#allocation52_spill] sm:$0xff] }
  0x8c   : > { %14745 = vmatprep.mubr.msk.f32.mxu0 %vm15918_vm0, %v20268_v26  ;;  %v2222_v51 = vcombine.low %v16723_v48, %v766_v39  ;;  %v2567_v23 = vcombine.high %v2491_v40, %v2491_v40  ;;  %v4118_v4 = vcombine.low %v16268_v60, %v16231_v45  ;;  %v4125_v6 = vrot.slane %v4117_v32, %v16005_v7 }
  0x8d   : > { %v4115_v54 = vrot.slane %v4101_v62, %v16005_v7  ;;  %v16740_v62 = vrot.slane %v2205_v20, %v16005_v7  ;;  %v2204_v41 = vcombine.low %v16713_v52, %v16716_v47  ;;  %v2223_v59 = vcombine.low %v774_v46, %v773_v36 }
  0x8e   : > { %v2239_v22 = vcombine.low %v775_v49, %v783_v57  ;;  %v4134_v20 = vcombine.low %v16275_v63, %v16289_v10  ;;  %v2240_v39 = vcombine.low %v791_v58, %v790_v18  ;;  %v4132_v45 = vrot.slane %v4118_v4, %v16005_v7 }
  0x8f   : > { %14746 = vmatmul.mubr.msk.f32.gmra.mrb[52].mxu0 %vm1655_vm1, %v16373_v3  ;;  %v4116_v3 = vcombine.low %v4108_v11, %v4115_v54  ;;  %v20299_v11 = vcombine.low %v16323_v28, %v16332_v30  ;;  %v4135_v60 = vcombine.low %v16278_v1, %v16295_v14  ;;  %v792_v57 = vcombine.high %v790_v18, %v790_v18  ;;  %v13648_v30 = vld.sshfl [vmem:[%s16010_s13 + $0xe8] sm:$0x3 pattern:$0x76325410] }
  0x90   : > { %14748 = vmatprep.mubr.msk.f32.mxu0 %vm15918_vm0, %v20268_v26  ;;  %v2557_v63 = vrot.slane %v2490_v9, %v16005_v7  ;;  %v2564_v10 = vrot.slane %v2550_v8, %v16005_v7  ;;  %v4142_v28 = vrot.slane %v4134_v20, %v16005_v7  ;;  %v2574_v36 = vrot.slane %v2491_v40, %v16005_v7  ;;  %v2493_v40 = vld [vmem:[%s16010_s13 + $0x1a] sm:$0xff] }
  0x91   : > { %14885 = vmatmul.mubr.msk.f32.gmra.mrb[2].mxu1 %vm1655_vm1, %v4116_v3  ;;  %v2581_v46 = vrot.slane %v2567_v23, %v16005_v7  ;;  %v4133_v4 = vcombine.low %v4125_v6, %v4132_v45  ;;  %v4149_v49 = vrot.slane %v4135_v60, %v16005_v7  ;;  %v16770_v1 = vrot.slane %v2206_v25, %v16005_v7 }
  0x92   : > { %14887 = vmatprep.mubr.msk.f32.mxu1 %vm15918_vm0, %v20268_v26  ;;  %v2230_v14 = vrot.slane %v2222_v51, %v16005_v7  ;;  %v2237_v54 = vrot.slane %v2223_v59, %v16005_v7  ;;  %v4151_v9 = vcombine.low %v16256_v55, %v16299_v15  ;;  %v20300_v8 = vcombine.low %v16342_v34, %v16345_v35  ;;  %v20301_v59 = vld [vmem:[#allocation9_spill] sm:$0xff] }
  0x93   : > { %14749 = vmatmul.mubr.msk.f32.gmra.mrb[54].mxu0 %vm1655_vm1, %v20299_v11  ;;  %v2247_v23 = vrot.slane %v2239_v22, %v16005_v7  ;;  %v2254_v6 = vrot.slane %v2240_v39, %v16005_v7  ;;  %v4150_v25 = vcombine.low %v4142_v28, %v4149_v49  ;;  %v16786_v18 = vcombine.low %v792_v57, %v13648_v30  ;;  %v20302_v11 = vld [vmem:[#allocation7_spill] sm:$0xff]  ;;  %v20303_v39 = vld [vmem:[#allocation8_spill] sm:$0xff] }
  0x94   : > { %14751 = vmatprep.mubr.msk.f32.mxu0 %vm15918_vm0, %v20268_v26  ;;  %v4152_v55 = vcombine.low %v16302_v16, %v16349_v37  ;;  %v4159_v15 = vrot.slane %v4151_v9, %v16005_v7  ;;  %v2565_v34 = vcombine.high %v2557_v63, %v2557_v63  ;;  %v2566_v35 = vcombine.high %v2564_v10, %v2564_v10  ;;  %v13706_v9 = vld.sshfl [vmem:[%s16010_s13 + $0x12] sm:$0x3 pattern:$0x76325410] }
  0x95   : > { %14888 = vmatmul.mubr.msk.f32.gmra.mrb[4].mxu1 %vm1655_vm1, %v4133_v4  ;;  %v2582_v22 = vcombine.high %v2574_v36, %v2574_v36  ;;  %v2583_v58 = vcombine.high %v2581_v46, %v2581_v46  ;;  %v2591_v32 = vcombine.high %v2493_v40, %v2493_v40  ;;  %v4168_v51 = vcombine.low %v16317_v24, %v16367_v56 }
  0x96   : > { %14890 = vmatprep.mubr.msk.f32.mxu1 %vm15918_vm0, %v20268_v26  ;;  %v4166_v3 = vrot.slane %v4152_v55, %v16005_v7  ;;  %v4169_v20 = vcombine.low %v20301_v59, %v16326_v0  ;;  %v20304_v45 = vcombine.low %v20302_v11, %v20303_v39  ;;  %v2221_v16 = vcombine.low %v16740_v62, %v16770_v1  ;;  %v2494_v0 = vld [vmem:[%s16010_s13 + $0x22] sm:$0xff]  ;;  %v20307_v55 = vld [vmem:[#allocation12_spill] sm:$0xff] }
  0x97   : > { %14752 = vmatmul.mubr.msk.f32.gmra.mrb[56].mxu0 %vm1655_vm1, %v20300_v8  ;;  %v16804_v37 = vcombine.low %v2230_v14, %v2237_v54  ;;  %v2598_v60 = vrot.slane %v2493_v40, %v16005_v7  ;;  %v16810_v24 = vcombine.low %v2247_v23, %v2254_v6  ;;  %v4176_v57 = vrot.slane %v4168_v51, %v16005_v7  ;;  %v16822_v23 = vld [vmem:[%s16010_s13 + $0x32] sm:$0xff]  ;;  %v20306_v40 = vld [vmem:[#allocation10_spill] sm:$0xff] }
  0x98   : > { %14754 = vmatprep.mubr.msk.f32.mxu0 %vm15918_vm0, %v20268_v26  ;;  %v4167_v56 = vcombine.low %v4159_v15, %v4166_v3  ;;  %v2263_v28 = vrot.slane %v16786_v18, %v16005_v7  ;;  %v2962_v30 = vcombine.low %v2557_v63, %v2565_v34  ;;  %v2963_v4 = vcombine.low %v2564_v10, %v2566_v35  ;;  %v20305_v6 = vld [vmem:[#allocation4_spill] sm:$0xff]  ;;  %v20308_v15 = vld [vmem:[#allocation13_spill] sm:$0xff]  ;;  %v20311_v34 = vld [vmem:[#allocation11_spill] sm:$0xff] }
  0x99   : > { %14891 = vmatmul.mubr.msk.f32.gmra.mrb[6].mxu1 %vm1655_vm1, %v4150_v25  ;;  %v4183_v49 = vrot.slane %v4169_v20, %v16005_v7  ;;  %v2979_v14 = vcombine.low %v2574_v36, %v2582_v22  ;;  %v2980_v54 = vcombine.low %v2581_v46, %v2583_v58  ;;  %v2605_v8 = vrot.slane %v2591_v32, %v16005_v7  ;;  %v20310_v46 = vld [vmem:[#allocation5_spill] sm:$0xff]  ;;  %v2512_v1 = vld [vmem:[%s16010_s13 + $0xb2] sm:$0xff]  ;;  %v13713_v18 = vld.sshfl [vmem:[%s16010_s13 + $0xba] sm:$0x3 pattern:$0x76325410] }
  0x9a   : > { %14893 = vmatprep.mubr.msk.f32.mxu1 %vm15918_vm0, %v20268_v26  ;;  %v4185_v25 = vcombine.low %v20306_v40, %v20305_v6  ;;  %v20309_v3 = vcombine.low %v20307_v55, %v20308_v15  ;;  %v2606_v51 = vcombine.high %v2598_v60, %v2598_v60  ;;  %v2608_v63 = vcombine.high %v2494_v0, %v2494_v0  ;;  %v20316_v40 = vld [vmem:[#allocation19_spill] sm:$0xff] }
  0x9b   : > { %14755 = vmatmul.mubr.msk.f32.gmra.mrb[58].mxu0 %vm1655_vm1, %v20304_v45  ;;  %v4184_v10 = vcombine.low %v4176_v57, %v4183_v49  ;;  %v2615_v36 = vrot.slane %v2494_v0, %v16005_v7  ;;  %v4186_v35 = vcombine.low %v20311_v34, %v20310_v46  ;;  %v2970_v58 = vrot.slane %v2962_v30, %v16005_v7  ;;  %v20312_v45 = vld [vmem:[#allocation6_spill] sm:$0xff]  ;;  %v20314_v57 = vld [vmem:[#allocation20_spill] sm:$0xff]  ;;  %v20315_v49 = vld [vmem:[#allocation15_spill] sm:$0xff] }
  0x9c   : > { %14757 = vmatprep.mubr.msk.f32.mxu0 %vm15918_vm0, %v20268_v26  ;;  %v4193_v22 = vrot.slane %v4185_v25, %v16005_v7  ;;  %v2977_v32 = vrot.slane %v2963_v4, %v16005_v7  ;;  %v2996_v59 = vcombine.low %v13706_v9, %v2598_v60  ;;  %v2639_v20 = vrot.slane %v16822_v23, %v16005_v7  ;;  %v20313_v0 = vld [vmem:[#allocation14_spill] sm:$0xff] }
  0x9d   : > { %14894 = vmatmul.mubr.msk.f32.gmra.mrb[8].mxu1 %vm1655_vm1, %v4167_v56  ;;  %v2607_v11 = vcombine.high %v2605_v8, %v2605_v8  ;;  %v4200_v39 = vrot.slane %v4186_v35, %v16005_v7  ;;  %v4202_v56 = vcombine.low %v20313_v0, %v20312_v45  ;;  %v4203_v6 = vcombine.low %v20315_v49, %v20314_v57  ;;  %v20317_v25 = vld [vmem:[#allocation22_spill] sm:$0xff] }
  0x9e   : > { %14896 = vmatprep.mubr.msk.f32.mxu1 %vm15918_vm0, %v20268_v26  ;;  %v20318_v55 = vcombine.low %v20316_v40, %v20317_v25  ;;  %v2987_v30 = vrot.slane %v2979_v14, %v16005_v7  ;;  %v2994_v60 = vrot.slane %v2980_v54, %v16005_v7  ;;  %v2622_v4 = vrot.slane %v2608_v63, %v16005_v7  ;;  %v13707_v0 = vld.sshfl [vmem:[%s16010_s13 + $0x2a] sm:$0x3 pattern:$0x76325410]  ;;  %v20322_v40 = vld [vmem:[#allocation27_spill] sm:$0xff] }
  0x9f   : > { %14758 = vmatmul.mubr.msk.f32.gmra.mrb[60].mxu0 %vm1655_vm1, %v20309_v3  ;;  %v2997_v9 = vcombine.low %v2606_v51, %v2605_v8  ;;  %v2623_v15 = vcombine.high %v2615_v36, %v2615_v36  ;;  %v2497_v3 = vld [vmem:[%s16010_s13 + $0x3a] sm:$0xff]  ;;  %v4201_v46 = vcombine.low %v4193_v22, %v4200_v39  ;;  %v2647_v14 = vcombine.high %v2639_v20, %v2639_v20  ;;  %v20319_v8 = vld [vmem:[#allocation23_spill] sm:$0xff]  ;;  %v20321_v49 = vld [vmem:[#allocation26_spill] sm:$0xff] }
  0xa0   : > { %14760 = vmatprep.mubr.msk.f32.mxu0 %vm15918_vm0, %v20268_v26  ;;  %v2624_v34 = vcombine.high %v2622_v4, %v2622_v4  ;;  %v4210_v54 = vrot.slane %v4202_v56, %v16005_v7  ;;  %v4217_v35 = vrot.slane %v4203_v6, %v16005_v7  ;;  %v16863_v63 = vcombine.low %v2970_v58, %v2977_v32  ;;  %v20320_v51 = vld [vmem:[#allocation16_spill] sm:$0xff]  ;;  %v2499_v58 = vld [vmem:[%s16010_s13 + $0x4a] sm:$0xff] }
  0xa1   : > { %14897 = vmatmul.mubr.msk.f32.gmra.mrb[10].mxu1 %vm1655_vm1, %v4184_v10  ;;  %v3004_v10 = vrot.slane %v2996_v59, %v16005_v7  ;;  %v3013_v45 = vcombine.low %v2607_v11, %v2615_v36  ;;  %v4219_v57 = vcombine.low %v20320_v51, %v20319_v8  ;;  %v20323_v25 = vcombine.low %v20321_v49, %v20322_v40  ;;  %v20324_v11 = vld [vmem:[#allocation24_spill] sm:$0xff]  ;;  %v20325_v56 = vld [vmem:[#allocation18_spill] sm:$0xff] }
  0xa2   : > { %14899 = vmatprep.mubr.msk.f32.mxu1 %vm15918_vm0, %v20268_v26  ;;  %v2632_v22 = vcombine.high %v16822_v23, %v16822_v23  ;;  %v2656_v39 = vrot.slane %v2497_v3, %v16005_v7  ;;  %v4218_v32 = vcombine.low %v4210_v54, %v4217_v35  ;;  %v16880_v36 = vcombine.low %v2987_v30, %v2994_v60  ;;  %v2500_v51 = vld [vmem:[%s16010_s13 + $0x52] sm:$0xff]  ;;  %v20326_v30 = vld [vmem:[#allocation29_spill] sm:$0xff] }
  0xa3   : > { %14761 = vmatmul.mubr.msk.f32.gmra.mrb[62].mxu0 %vm1655_vm1, %v20318_v55  ;;  %v3011_v59 = vrot.slane %v2997_v9, %v16005_v7  ;;  %v4220_v6 = vcombine.low %v20325_v56, %v20324_v11  ;;  %v3014_v23 = vcombine.low %v2623_v15, %v2622_v4  ;;  %v3030_v55 = vcombine.low %v2624_v34, %v13707_v0  ;;  %v20327_v60 = vld [vmem:[#allocation17_spill] sm:$0xff]  ;;  %v20329_v34 = vld [vmem:[#allocation28_spill] sm:$0xff] }
  0xa4   : > { %14763 = vmatprep.mubr.msk.f32.mxu0 %vm15918_vm0, %v20268_v26  ;;  %v3031_v8 = vcombine.low %v2639_v20, %v2647_v14  ;;  %v2649_v54 = vcombine.high %v2497_v3, %v2497_v3  ;;  %v2673_v35 = vcombine.high %v2499_v58, %v2499_v58  ;;  %v4236_v40 = vcombine.low %v20327_v60, %v20326_v30  ;;  %v20330_v11 = vld [vmem:[#allocation33_spill] sm:$0xff] }
  0xa5   : > { %14900 = vmatmul.mubr.msk.f32.gmra.mrb[12].mxu1 %vm1655_vm1, %v4201_v46  ;;  %v4227_v46 = vrot.slane %v4219_v57, %v16005_v7  ;;  %v4234_v49 = vrot.slane %v4220_v6, %v16005_v7  ;;  %v20328_v9 = vcombine.low %v16481_v31, %v16490_v29  ;;  %v2646_v4 = vrot.slane %v2632_v22, %v16005_v7 }
  0xa6   : > { %14902 = vmatprep.mubr.msk.f32.mxu1 %vm15918_vm0, %v20268_v26  ;;  %v2664_v20 = vcombine.high %v2656_v39, %v2656_v39  ;;  %v2690_v15 = vcombine.high %v2500_v51, %v2500_v51  ;;  %v4237_v29 = vcombine.low %v20329_v34, %v16494_v21  ;;  %v3028_v31 = vrot.slane %v3014_v23, %v16005_v7  ;;  %v20331_v21 = vld [vmem:[#allocation39_spill] sm:$0xff] }
  0xa7   : > { %14764 = vmatmul.mubr.msk.f32.gmra.mrb[64].mxu0 %vm1655_vm1, %v20323_v25  ;;  %v3021_v25 = vrot.slane %v3013_v45, %v16005_v7  ;;  %v4235_v3 = vcombine.low %v4227_v46, %v4234_v49  ;;  %v3038_v14 = vrot.slane %v3030_v55, %v16005_v7  ;;  %v3045_v45 = vrot.slane %v3031_v8, %v16005_v7 }
  0xa8   : > { %14766 = vmatprep.mubr.msk.f32.mxu0 %vm15918_vm0, %v20268_v26  ;;  %v4244_v0 = vrot.slane %v4236_v40, %v16005_v7  ;;  %v2663_v57 = vrot.slane %v2649_v54, %v16005_v7  ;;  %v2687_v22 = vrot.slane %v2673_v35, %v16005_v7  ;;  %v4253_v56 = vcombine.low %v20330_v11, %v16443_v12  ;;  %v20334_v35 = vld [vmem:[#allocation31_spill] sm:$0xff]  ;;  %v20339_v11 = vld [vmem:[#allocation32_spill] sm:$0xff] }
  0xa9   : > { %14903 = vmatmul.mubr.msk.f32.gmra.mrb[14].mxu1 %vm1655_vm1, %v4218_v32  ;;  %v4251_v32 = vrot.slane %v4237_v29, %v16005_v7  ;;  %v20332_v6 = vcombine.low %v16530_v19, %v20331_v21  ;;  %v16918_v23 = vcombine.low %v3004_v10, %v3011_v59  ;;  %v2648_v55 = vcombine.high %v2646_v4, %v2646_v4  ;;  %v20333_v59 = vld [vmem:[#allocation25_spill] sm:$0xff] }
  0xaa   : > { %14905 = vmatprep.mubr.msk.f32.mxu1 %vm15918_vm0, %v20268_v26  ;;  %v16920_v8 = vcombine.low %v2656_v39, %v2664_v20  ;;  %v2680_v46 = vrot.slane %v2499_v58, %v16005_v7  ;;  %v2704_v12 = vrot.slane %v2690_v15, %v16005_v7  ;;  %v16929_v54 = vcombine.low %v3021_v25, %v3028_v31  ;;  %v13708_v39 = vld.sshfl [vmem:[%s16010_s13 + $0x42] sm:$0x3 pattern:$0x76325410] }
  0xab   : > { %14767 = vmatmul.mubr.msk.f32.gmra.mrb[66].mxu0 %vm1655_vm1, %v20328_v9  ;;  %v4252_v19 = vcombine.low %v4244_v0, %v4251_v32  ;;  %v16931_v10 = vcombine.low %v3038_v14, %v3045_v45  ;;  %v4254_v49 = vcombine.low %v20334_v35, %v20333_v59  ;;  %v4261_v30 = vrot.slane %v4253_v56, %v16005_v7  ;;  %v2502_v20 = vld [vmem:[%s16010_s13 + $0x62] sm:$0xff] }
  0xac   : > { %14769 = vmatprep.mubr.msk.f32.mxu0 %vm15918_vm0, %v20268_v26  ;;  %v2665_v60 = vcombine.high %v2663_v57, %v2663_v57  ;;  %v2688_v40 = vcombine.high %v2680_v46, %v2680_v46  ;;  %v2689_v58 = vcombine.high %v2687_v22, %v2687_v22  ;;  %v2697_v9 = vrot.slane %v2500_v51, %v16005_v7  ;;  %v20337_v45 = vld [vmem:[#allocation34_spill] sm:$0xff] }
  0xad   : > { %14906 = vmatmul.mubr.msk.f32.gmra.mrb[16].mxu1 %vm1655_vm1, %v4235_v3  ;;  %v20335_v15 = vcombine.low %v16558_v42, %v16570_v27  ;;  %v3047_v25 = vcombine.low %v2646_v4, %v2648_v55  ;;  %v3062_v3 = vrot.slane %v16920_v8, %v16005_v7  ;;  %v4268_v34 = vrot.slane %v4254_v49, %v16005_v7  ;;  %v13709_v42 = vld.sshfl [vmem:[%s16010_s13 + $0x5a] sm:$0x3 pattern:$0x76325410]  ;;  %v20336_v4 = vld [vmem:[#allocation21_spill] sm:$0xff]  ;;  %v20338_v32 = vld [vmem:[#allocation30_spill] sm:$0xff] }
  0xae   : > { %14908 = vmatprep.mubr.msk.f32.mxu1 %vm15918_vm0, %v20268_v26  ;;  %v3065_v29 = vcombine.low %v13708_v39, %v2680_v46  ;;  %v2705_v31 = vcombine.high %v2697_v9, %v2697_v9  ;;  %v2706_v51 = vcombine.high %v2704_v12, %v2704_v12  ;;  %v2714_v27 = vcombine.high %v2502_v20, %v2502_v20  ;;  %v2503_v49 = vld [vmem:[%s16010_s13 + $0x6a] sm:$0xff] }
  0xaf   : > { %14770 = vmatmul.mubr.msk.f32.gmra.mrb[68].mxu0 %vm1655_vm1, %v20332_v6  ;;  %v4269_v14 = vcombine.low %v4261_v30, %v4268_v34  ;;  %v4270_v0 = vcombine.low %v20337_v45, %v20336_v4  ;;  %v4271_v56 = vcombine.low %v20339_v11, %v20338_v32  ;;  %v3064_v21 = vcombine.low %v2663_v57, %v2665_v60  ;;  %v20341_v30 = vld [vmem:[#allocation36_spill] sm:$0xff]  ;;  %v20342_v60 = vld [vmem:[#allocation37_spill] sm:$0xff]  ;;  %v20348_v45 = vld [vmem:[#allocation38_spill] sm:$0xff] }
  0xb0   : > { %14772 = vmatprep.mubr.msk.f32.mxu0 %vm15918_vm0, %v20268_v26  ;;  %v3081_v6 = vcombine.low %v2688_v40, %v2687_v22  ;;  %v3082_v55 = vcombine.low %v2689_v58, %v2697_v9  ;;  %v2721_v8 = vrot.slane %v2502_v20, %v16005_v7  ;;  %v20340_v46 = vcombine.low %v16596_v17, %v16599_v43  ;;  %v20343_v58 = vld [vmem:[#allocation40_spill] sm:$0xff]  ;;  %v20344_v9 = vld [vmem:[#allocation35_spill] sm:$0xff] }
  0xb1   : > { %14909 = vmatmul.mubr.msk.f32.gmra.mrb[18].mxu1 %vm1655_vm1, %v4252_v19  ;;  %v3055_v19 = vrot.slane %v3047_v25, %v16005_v7  ;;  %v4278_v39 = vrot.slane %v4270_v0, %v16005_v7  ;;  %v4285_v59 = vrot.slane %v4271_v56, %v16005_v7  ;;  %v3079_v57 = vrot.slane %v3065_v29, %v16005_v7  ;;  %v20345_v29 = vld [vmem:[#allocation45_spill] sm:$0xff] }
  0xb2   : > { %14911 = vmatprep.mubr.msk.f32.mxu1 %vm15918_vm0, %v20268_v26  ;;  %v3098_v22 = vcombine.low %v2705_v31, %v2704_v12  ;;  %v3099_v35 = vcombine.low %v2706_v51, %v13709_v42  ;;  %v2728_v43 = vrot.slane %v2714_v27, %v16005_v7  ;;  %v4287_v40 = vcombine.low %v20342_v60, %v20341_v30  ;;  %v2505_v56 = vld [vmem:[%s16010_s13 + $0x7a] sm:$0xff]  ;;  %v2506_v60 = vld [vmem:[%s16010_s13 + $0x82] sm:$0xff] }
  0xb3   : > { %14773 = vmatmul.mubr.msk.f32.gmra.mrb[70].mxu0 %vm1655_vm1, %v20335_v15  ;;  %v4286_v17 = vcombine.low %v4278_v39, %v4285_v59  ;;  %v4288_v20 = vcombine.low %v20344_v9, %v20343_v58  ;;  %v3072_v15 = vrot.slane %v3064_v21, %v16005_v7  ;;  %v3089_v25 = vrot.slane %v3081_v6, %v16005_v7  ;;  %v20349_v6 = vld [vmem:[#allocation46_spill] sm:$0xff]  ;;  %v17025_v9 = vld [vmem:[%s16010_s13 + $0x92] sm:$0xff] }
  0xb4   : > { %14775 = vmatprep.mubr.msk.f32.mxu0 %vm15918_vm0, %v20268_v26  ;;  %v3096_v12 = vrot.slane %v3082_v55, %v16005_v7  ;;  %v2729_v34 = vcombine.high %v2721_v8, %v2721_v8  ;;  %v20346_v31 = vcombine.low %v16607_v2, %v20345_v29  ;;  %v2731_v51 = vcombine.high %v2503_v49, %v2503_v49  ;;  %v20347_v2 = vld [vmem:[#allocation43_spill] sm:$0xff]  ;;  %v20350_v55 = vld [vmem:[#allocation41_spill] sm:$0xff] }
  0xb5   : > { %14912 = vmatmul.mubr.msk.f32.gmra.mrb[20].mxu1 %vm1655_vm1, %v4269_v14  ;;  %v4295_v42 = vrot.slane %v4287_v40, %v16005_v7  ;;  %v4302_v27 = vrot.slane %v4288_v20, %v16005_v7  ;;  %v3106_v14 = vrot.slane %v3098_v22, %v16005_v7  ;;  %v3113_v4 = vrot.slane %v3099_v35, %v16005_v7 }
  0xb6   : > { %14914 = vmatprep.mubr.msk.f32.mxu1 %vm15918_vm0, %v20268_v26  ;;  %v4304_v0 = vcombine.low %v20348_v45, %v20347_v2  ;;  %v2730_v32 = vcombine.high %v2728_v43, %v2728_v43  ;;  %v2738_v11 = vrot.slane %v2503_v49, %v16005_v7  ;;  %v16998_v39 = vcombine.low %v3055_v19, %v3062_v3 }
  0xb7   : > { %14776 = vmatmul.mubr.msk.f32.gmra.mrb[72].mxu0 %vm1655_vm1, %v20340_v46  ;;  %v4303_v21 = vcombine.low %v4295_v42, %v4302_v27  ;;  %v4305_v46 = vcombine.low %v20350_v55, %v20349_v6  ;;  %v17000_v59 = vcombine.low %v3072_v15, %v3079_v57  ;;  %v3115_v22 = vcombine.low %v2721_v8, %v2729_v34  ;;  %v13908_v8 = vld [vmem:[%s20184_s1 + $0x28] sm:$0xff]  ;;  %v20353_v15 = vld [vmem:[#allocation48_spill] sm:$0xff]  ;;  %v13710_v55 = vld.sshfl [vmem:[%s16010_s13 + $0x72] sm:$0x3 pattern:$0x76325410] }
  0xb8   : > { %14778 = vmatprep.mubr.msk.f32.mxu0 %vm15918_vm0, %v20268_v26  ;;  %v4312_v35 = vrot.slane %v4304_v0, %v16005_v7  ;;  %v17007_v30 = vcombine.low %v3089_v25, %v3096_v12  ;;  %v2745_v49 = vrot.slane %v2731_v51, %v16005_v7  ;;  %v17018_v19 = vcombine.low %v3106_v14, %v3113_v4  ;;  %v20357_v4 = vld [vmem:[#allocation49_spill] sm:$0xff] }
  0xb9   : > { %14915 = vmatmul.mubr.msk.f32.gmra.mrb[22].mxu1 %vm1655_vm1, %v4286_v17  ;;  %v20351_v17 = vcombine.low %v16630_v5, %v16623_v33  ;;  %v4319_v3 = vrot.slane %v4305_v46, %v16005_v7  ;;  %v2755_v5 = vcombine.high %v2505_v56, %v2505_v56  ;;  %v20352_v33 = vld [vmem:[#allocation42_spill] sm:$0xff]  ;;  %v3116_v40 = vcombine.low %v2728_v43, %v2730_v32 }
  0xba   : > { %14917 = vmatprep.mubr.msk.f32.mxu1 %vm15918_vm0, %v20268_v26  ;;  %v4321_v57 = vcombine.low %v20352_v33, %v16627_v38  ;;  %v2746_v58 = vcombine.high %v2738_v11, %v2738_v11  ;;  %v4322_v25 = vcombine.low %v20353_v15, %v16590_v44  ;;  %15019 = vmatpush3.msra.mxu1 %v13908_v8  ;;  %v20354_v38 = vld [vmem:[#allocation53_spill] sm:$0xff]  ;;  %v20360_v33 = vld [vmem:[#allocation51_spill] sm:$0xff] }
  0xbb   : > { %14779 = vmatmul.mubr.msk.f32.gmra.mrb[74].mxu0 %vm1655_vm1, %v20346_v31  ;;  %v4320_v20 = vcombine.low %v4312_v35, %v4319_v3  ;;  %v3123_v12 = vrot.slane %v3115_v22, %v16005_v7  ;;  %v2762_v34 = vrot.slane %v2505_v56, %v16005_v7  ;;  %v2772_v29 = vcombine.high %v2506_v60, %v2506_v60  ;;  %v20358_v56 = vld [vmem:[#allocation47_spill] sm:$0xff] }
  0xbc   : > { %14781 = vmatprep.mubr.msk.f32.mxu0 %vm15918_vm0, %v20268_v26  ;;  %v4329_v31 = vrot.slane %v4321_v57, %v16005_v7  ;;  %15160 = vmatprep.subr.mxu1 %v20268_v26  ;;  %v20355_v43 = vcombine.low %v16661_v13, %v20354_v38  ;;  %v2747_v51 = vcombine.high %v2745_v49, %v2745_v49  ;;  %v20356_v13 = vld [vmem:[#allocation44_spill] sm:$0xff]  ;;  %v13711_v57 = vld.sshfl [vmem:[%s16010_s13 + $0x8a] sm:$0x3 pattern:$0x76325410] }
  0xbd   : > { %14918 = vmatmul.mubr.msk.f32.gmra.mrb[24].mxu1 %vm1655_vm1, %v4303_v21  ;;  %v2779_v42 = vrot.slane %v2506_v60, %v16005_v7  ;;  %v4336_v44 = vrot.slane %v4322_v25, %v16005_v7  ;;  %v2769_v27 = vrot.slane %v2755_v5, %v16005_v7  ;;  %v2803_v14 = vrot.slane %v17025_v9, %v16005_v7  ;;  %v20359_v21 = vld [vmem:[#allocation50_spill] sm:$0xff] }
  0xbe   : > { %14920 = vmatprep.mubr.msk.f32.mxu1 %vm15918_vm0, %v20268_v26  ;;  %v4338_v2 = vcombine.low %v20357_v4, %v20356_v13  ;;  %v3130_v45 = vrot.slane %v3116_v40, %v16005_v7  ;;  %v17050_v0 = vcombine.low %v2738_v11, %v2746_v58  ;;  %v4339_v6 = vcombine.low %v20359_v21, %v20358_v56  ;;  %v20362_v58 = vld [vmem:[#allocation54_spill] sm:$0xff] }
  0xbf   : > { %14782 = vmatmul.mubr.msk.f32.gmra.mrb[76].mxu0 %vm1655_vm1, %v20351_v17  ;;  %v4337_v32 = vcombine.low %v4329_v31, %v4336_v44  ;;  %v2770_v46 = vcombine.high %v2762_v34, %v2762_v34  ;;  %v2771_v22 = vcombine.high %v2769_v27, %v2769_v27  ;;  %v2786_v35 = vrot.slane %v2772_v29, %v16005_v7  ;;  %v2509_v29 = vld [vmem:[%s16010_s13 + $0x9a] sm:$0xff] }
  0xc0   : > { %14784 = vmatprep.mubr.msk.f32.mxu0 %vm15918_vm0, %v20268_v26  ;;  %v4346_v17 = vrot.slane %v4338_v2, %v16005_v7  ;;  %v3133_v60 = vcombine.low %v2745_v49, %v2747_v51  ;;  %v2787_v11 = vcombine.high %v2779_v42, %v2779_v42  ;;  %v4353_v3 = vrot.slane %v4339_v6, %v16005_v7 }
  0xc1   : > { %14921 = vmatmul.mubr.msk.f32.gmra.mrb[26].mxu1 %vm1655_vm1, %v4320_v20  ;;  %v2788_v8 = vcombine.high %v2786_v35, %v2786_v35  ;;  %v2811_v5 = vcombine.high %v2803_v14, %v2803_v14  ;;  %v4355_v61 = vcombine.low %v20361_v50, %v20360_v33  ;;  %v3149_v49 = vcombine.low %v13710_v55, %v2762_v34 }
  0xc2   : > { %14923 = vmatprep.mubr.msk.f32.mxu1 %vm15918_vm0, %v20268_v26  ;;  %v4354_v40 = vcombine.low %v4346_v17, %v4353_v3  ;;  %v4356_v20 = vcombine.low %v20362_v58, %v16723_v48  ;;  %v3150_v15 = vcombine.low %v2770_v46, %v2769_v27  ;;  %v3166_v25 = vcombine.low %v2771_v22, %v2779_v42 }
  0xc3   : > { %14785 = vmatmul.mubr.msk.f32.gmra.mrb[78].mxu0 %vm1655_vm1, %v20355_v43  ;;  %v2796_v31 = vcombine.high %v17025_v9, %v17025_v9  ;;  %v4363_v38 = vrot.slane %v4355_v61, %v16005_v7  ;;  %v13764_v43 = vld [vmem:[%s16010_s13 + $0xd8] sm:$0xff]  ;;  %v3167_v34 = vcombine.low %v2787_v11, %v2786_v35  ;;  %v3147_v9 = vrot.slane %v3133_v60, %v16005_v7 }
  0xc4   : > { %14787 = vmatprep.mubr.msk.f32.mxu0 %vm15918_vm0, %v20268_v26  ;;  %v4370_v48 = vrot.slane %v4356_v20, %v16005_v7  ;;  %v3183_v51 = vcombine.low %v2788_v8, %v13711_v57  ;;  %v3184_v42 = vcombine.low %v2803_v14, %v2811_v5  ;;  %v2820_v52 = vrot.slane %v2509_v29, %v16005_v7 }
  0xc5   : > { %14924 = vmatmul.mubr.msk.f32.gmra.mrb[28].mxu1 %vm1655_vm1, %v4337_v32  ;;  %v3989_v44 = vrot.slane %v13764_v43, %v16005_v7  ;;  %v3157_v27 = vrot.slane %v3149_v49, %v16005_v7  ;;  %v3164_v13 = vrot.slane %v3150_v15, %v16005_v7  ;;  %v3174_v4 = vrot.slane %v3166_v25, %v16005_v7 }
  0xc6   : > { %14926 = vmatprep.mubr.msk.f32.mxu1 %vm15918_vm0, %v20268_v26  ;;  %v4371_v47 = vcombine.low %v4363_v38, %v4370_v48  ;;  %v2810_v2 = vrot.slane %v2796_v31, %v16005_v7  ;;  %v3181_v14 = vrot.slane %v3167_v34, %v16005_v7  ;;  %v3191_v21 = vrot.slane %v3183_v51, %v16005_v7 }
  0xc7   : > { %14788 = vmatmul.mubr.msk.f32.gmra.mrb[80].mxu0 %vm1655_vm1, %v2187_v53  ;;  %v17069_v53 = vcombine.low %v3123_v12, %v3130_v45  ;;  %v3140_v12 = vrot.slane %v17050_v0, %v16005_v7  ;;  %v13765_v45 = vld [vmem:[%s16010_s13 + $0xe0] sm:$0xff]  ;;  %v2511_v0 = vld [vmem:[%s16010_s13 + $0xaa] sm:$0xff]  ;;  %v3997_v56 = vcombine.high %v3989_v44, %v3989_v44  ;;  %v3198_v6 = vrot.slane %v3184_v42, %v16005_v7 }
  0xc8   : > { %14790 = vmatprep.mubr.msk.f32.mxu0 %vm15918_vm0, %v20268_v26  ;;  %v2813_v55 = vcombine.high %v2509_v29, %v2509_v29  ;;  %v2828_v62 = vcombine.high %v2820_v52, %v2820_v52  ;;  %v3999_v22 = vcombine.high %v13765_v45, %v13765_v45  ;;  %v2812_v17 = vcombine.high %v2810_v2, %v2810_v2 }
  0xc9   : > { %14927 = vmatmul.mubr.msk.f32.gmra.mrb[30].mxu1 %vm1655_vm1, %v4354_v40  ;;  %v4372_v46 = vcombine.low %v3989_v44, %v3997_v56  ;;  %v17114_v35 = vcombine.low %v3140_v12, %v3147_v9  ;;  %v2837_v60 = vcombine.high %v2511_v0, %v2511_v0  ;;  %v4006_v11 = vrot.slane %v13765_v45, %v16005_v7  ;;  %v13767_v40 = vld [vmem:[%s16010_s13 + $0xf0] sm:$0xff]  ;;  %v2514_v44 = vld [vmem:[%s16010_s13 + $0xc2] sm:$0xff] }
  0xca   : > { %14929 = vmatprep.mubr.msk.f32.mxu1 %vm15918_vm0, %v20268_v26  ;;  %v17119_v3 = vcombine.low %v3157_v27, %v3164_v13  ;;  %v4013_v33 = vrot.slane %v3999_v22, %v16005_v7  ;;  %v17125_v50 = vcombine.low %v3174_v4, %v3181_v14  ;;  %v2827_v61 = vrot.slane %v2813_v55, %v16005_v7  ;;  %v2515_v56 = vld [vmem:[%s16010_s13 + $0xca] sm:$0xff] }
  0xcb   : > { %14791 = vmatmul.mubr.msk.f32.gmra.mrb[82].mxu0 %vm1655_vm1, %v2204_v41  ;;  %v3982_v41 = vcombine.high %v13764_v43, %v13764_v43  ;;  %v4380_v5 = vrot.slane %v4372_v46, %v16005_v7  ;;  %v2854_v49 = vcombine.high %v2512_v1, %v2512_v1  ;;  %v4014_v57 = vcombine.high %v4006_v11, %v4006_v11  ;;  %v13778_v43 = vld.sshfl [vmem:[%s16010_s13 + $0xe8] sm:$0x3 pattern:$0x76325410] }
  0xcc   : > { %14793 = vmatprep.mubr.msk.f32.mxu0 %vm15918_vm0, %v20268_v26  ;;  %v17129_v58 = vcombine.low %v3191_v21, %v3198_v6  ;;  %v4015_v15 = vcombine.high %v4013_v33, %v4013_v33  ;;  %v17134_v25 = vcombine.low %v2810_v2, %v2812_v17  ;;  %v17137_v29 = vrot.slane %v2511_v0, %v16005_v7 }
  0xcd   : > { %14930 = vmatmul.mubr.msk.f32.gmra.mrb[32].mxu1 %vm1655_vm1, %v4371_v47  ;;  %v3996_v32 = vrot.slane %v3982_v41, %v16005_v7  ;;  %v2851_v31 = vrot.slane %v2837_v60, %v16005_v7  ;;  %v4389_v38 = vcombine.low %v4006_v11, %v4014_v57  ;;  %v4023_v48 = vcombine.high %v13767_v40, %v13767_v40  ;;  %v13712_v41 = vld.sshfl [vmem:[%s16010_s13 + $0xa2] sm:$0x3 pattern:$0x76325410] }
  0xce   : > { %14932 = vmatprep.mubr.msk.f32.mxu1 %vm15918_vm0, %v20268_v26  ;;  %v4390_v34 = vcombine.low %v4013_v33, %v4015_v15  ;;  %v4030_v9 = vrot.slane %v13767_v40, %v16005_v7  ;;  %v2829_v51 = vcombine.high %v2827_v61, %v2827_v61  ;;  %v2861_v42 = vrot.slane %v2512_v1, %v16005_v7 }
  0xcf   : > { %14794 = vmatmul.mubr.msk.f32.gmra.mrb[84].mxu0 %vm1655_vm1, %v2221_v16  ;;  %v3998_v16 = vcombine.high %v3996_v32, %v3996_v32  ;;  %v4397_v47 = vrot.slane %v4389_v38, %v16005_v7  ;;  %v4037_v27 = vrot.slane %v4023_v48, %v16005_v7  ;;  %v2852_v45 = vcombine.high %v17137_v29, %v17137_v29 }
  0xd0   : > { %14796 = vmatprep.mubr.msk.f32.mxu0 %vm15918_vm0, %v20268_v26  ;;  %v4038_v13 = vcombine.high %v4030_v9, %v4030_v9  ;;  %v4406_v4 = vcombine.low %v13778_v43, %v4030_v9  ;;  %v2853_v14 = vcombine.high %v2851_v31, %v2851_v31  ;;  %v2869_v0 = vcombine.high %v2861_v42, %v2861_v42 }
  0xd1   : > { %v4373_v8 = vcombine.low %v3996_v32, %v3998_v16  ;;  %v13768_v32 = vld [vmem:[%s16010_s13 + $0xf8] sm:$0xff]  ;;  %v3208_v1 = vrot.slane %v17134_v25, %v16005_v7  ;;  %v3218_v16 = vcombine.low %v13712_v41, %v17137_v29  ;;  %v2878_v22 = vcombine.high %v2514_v44, %v2514_v44 }
  0xd2   : > { %v4407_v6 = vcombine.low %v4038_v13, %v4037_v27  ;;  %v4414_v55 = vrot.slane %v4406_v4, %v16005_v7  ;;  %v3217_v17 = vcombine.low %v2827_v61, %v2829_v51  ;;  %v4040_v60 = vcombine.high %v13768_v32, %v13768_v32 }
  0xd3   : > { %14797 = vmatmul.mubr.msk.f32.gmra.mrb[86].mxu0 %vm1655_vm1, %v16804_v37  ;;  %v17131_v37 = vcombine.low %v2820_v52, %v2828_v62  ;;  %v4387_v20 = vrot.slane %v4373_v8, %v16005_v7  ;;  %v2868_v52 = vrot.slane %v2854_v49, %v16005_v7  ;;  %v4039_v62 = vcombine.high %v4037_v27, %v4037_v27  ;;  %v2517_v27 = vld [vmem:[%s16010_s13 + $0xda] sm:$0xff] }
  0xd4   : > { %14799 = vmatprep.mubr.msk.f32.mxu0 %vm15918_vm0, %v20268_v26  ;;  %v4047_v11 = vrot.slane %v13768_v32, %v16005_v7  ;;  %v3234_v8 = vcombine.low %v2852_v45, %v2851_v31  ;;  %v2895_v49 = vcombine.high %v2515_v56, %v2515_v56  ;;  %v4054_v57 = vrot.slane %v4040_v60, %v16005_v7  ;;  %v2518_v60 = vld [vmem:[%s16010_s13 + $0xe2] sm:$0xff] }
  0xd5   : > { %v4388_v12 = vcombine.low %v4380_v5, %v4387_v20  ;;  %v3215_v2 = vrot.slane %v17131_v37, %v16005_v7  ;;  %v2870_v46 = vcombine.high %v2868_v52, %v2868_v52  ;;  %v3235_v5 = vcombine.low %v2853_v14, %v2861_v42  ;;  %v15876_v20 = vld [vmem:[%s20184_s1 + $0x18] sm:$0xff] }
  0xd6   : > { %v3251_v33 = vcombine.low %v2869_v0, %v2868_v52  ;;  %v4055_v40 = vcombine.high %v4047_v11, %v4047_v11  ;;  %v4423_v37 = vcombine.low %v4039_v62, %v4047_v11  ;;  %v2885_v25 = vrot.slane %v2514_v44, %v16005_v7 }
  0xd7   : > { %14800 = vmatmul.mubr.msk.f32.gmra.mrb[88].mxu0 %vm1655_vm1, %v16810_v24  ;;  %14933 = vmatmul.mubr.msk.f32.gmra.mrb[34].mxu1 %vm1655_vm1, %v4388_v12  ;;  %v4404_v24 = vrot.slane %v4390_v34, %v16005_v7  ;;  %v3252_v15 = vcombine.low %v2870_v46, %v13713_v18  ;;  %v2892_v29 = vrot.slane %v2878_v22, %v16005_v7  ;;  %v13868_v12 = vld [vmem:[%s16010_s13 + $0x1a] sm:$0xff] }
  0xd8   : > { %14802 = vmatprep.mubr.msk.f32.mxu0 %vm15918_vm0, %v20268_v26  ;;  %14935 = vmatprep.mubr.msk.f32.mxu1 %vm15918_vm0, %v20268_v26  ;;  %v4424_v31 = vcombine.low %v4055_v40, %v4054_v57  ;;  %v4431_v38 = vrot.slane %v4423_v37, %v16005_v7  ;;  %v4056_v43 = vcombine.high %v4054_v57, %v4054_v57 }
  0xd9   : > { %v4405_v21 = vcombine.low %v4397_v47, %v4404_v24  ;;  %v17193_v34 = vcombine.low %v3208_v1, %v3215_v2  ;;  %v3225_v48 = vrot.slane %v3217_v17, %v16005_v7  ;;  %v3232_v9 = vrot.slane %v3218_v16, %v16005_v7  ;;  %v13869_v1 = vld [vmem:[%s16010_s13 + $0x22] sm:$0xff] }
  0xda   : > { %v2902_v51 = vrot.slane %v2515_v56, %v16005_v7  ;;  %v3242_v42 = vrot.slane %v3234_v8, %v16005_v7  ;;  %v2909_v52 = vrot.slane %v2895_v49, %v16005_v7  ;;  %v4438_v47 = vrot.slane %v4424_v31, %v16005_v7 }
  0xdb   : > { %14803 = vmatmul.mubr.msk.f32.gmra.mrb[90].mxu0 %vm1655_vm1, %v2263_v28  ;;  %14936 = vmatmul.mubr.msk.f32.gmra.mrb[36].mxu1 %vm1655_vm1, %v4405_v21  ;;  %v4421_v28 = vrot.slane %v4407_v6, %v16005_v7  ;;  %v3249_v44 = vrot.slane %v3235_v5, %v16005_v7  ;;  %v3259_v24 = vrot.slane %v3251_v33, %v16005_v7 }
  0xdc   : > { %14807 = vmatprep.mubr.msk.f32.mxu0 %vm15918_vm0, %v20268_v26  ;;  %14938 = vmatprep.mubr.msk.f32.mxu1 %vm15918_vm0, %v20268_v26  ;;  %v5860_v13 = vcombine.high %v13868_v12, %v13868_v12  ;;  %v5867_v4 = vrot.slane %v13868_v12, %v16005_v7  ;;  %v2893_v2 = vcombine.high %v2885_v25, %v2885_v25 }
  0xdd   : > { %v4422_v61 = vcombine.low %v4414_v55, %v4421_v28  ;;  %v2894_v45 = vcombine.high %v2892_v29, %v2892_v29  ;;  %v4439_v14 = vcombine.low %v4431_v38, %v4438_v47  ;;  %v17212_v0 = vcombine.low %v3225_v48, %v3232_v9 }
  0xde   : > { %v2910_v32 = vcombine.high %v2902_v51, %v2902_v51  ;;  %v5874_v56 = vrot.slane %v5860_v13, %v16005_v7  ;;  %v5875_v21 = vcombine.high %v5867_v4, %v5867_v4  ;;  %v2911_v6 = vcombine.high %v2909_v52, %v2909_v52 }
  0xdf   : > { %14808 = vmatmul.mubr.msk.f32.vlgmr.msra.gmra.mrb[92].mxu0 %vm1655_vm1, %v16863_v63  ;;  %v13779_v63 = vld.sshfl [vmem:[%s16010_s13 + $0x100] sm:$0x3 pattern:$0x76325410]  ;;  %14939 = vmatmul.mubr.msk.f32.gmra.mrb[38].mxu1 %vm1655_vm1, %v4422_v61  ;;  %v2919_v55 = vcombine.high %v2517_v27, %v2517_v27  ;;  %v17222_v16 = vcombine.low %v3242_v42, %v3249_v44  ;;  %v3269_v18 = vcombine.low %v2892_v29, %v2894_v45 }
  0xe0   : > { %14877 = vmatpush3.msra.mxu0 %v15876_v20  ;;  %14810 = vmatprep.mubr.msk.f32.mxu0 %vm15918_vm0, %v20268_v26  ;;  %v4440_v41 = vcombine.low %v4056_v43, %v13779_v63  ;;  %v5876_v46 = vcombine.high %v5874_v56, %v5874_v56  ;;  %v6272_v22 = vcombine.low %v5867_v4, %v5875_v21  ;;  %v13740_v43 = vld [vmem:[%s16010_s13 + $0x18] sm:$0xff] }
  0xe1   : > { %14947 = vmatprep.subr.mxu0 %v20268_v26  ;;  %14941 = vmatprep.mubr.msk.f32.mxu1 %vm15918_vm0, %v20268_v26  ;;  %v2926_v28 = vrot.slane %v2517_v27, %v16005_v7  ;;  %v5877_v5 = vcombine.high %v13869_v1, %v13869_v1  ;;  %v5884_v33 = vrot.slane %v13869_v1, %v16005_v7  ;;  %v13898_v27 = vld.sshfl [vmem:[%s16010_s13 + $0x2a] sm:$0x3 pattern:$0x76325410] }
  0xe2   : > { %v4447_v62 = vrot.slane %v4440_v41, %v16005_v7  ;;  %v6273_v11 = vcombine.low %v5874_v56, %v5876_v46  ;;  %v6280_v8 = vrot.slane %v6272_v22, %v16005_v7  ;;  %v3285_v49 = vcombine.low %v2902_v51, %v2910_v32  ;;  %v13804_v22 = vld [vmem:[%s16010_s13 + $0x19] sm:$0xff] }
  0xe3   : > { %14811 = vmatmul.mubr.msk.f32.gmra.mrb[94].mxu0 %vm1655_vm1, %v16880_v36  ;;  %v3266_v36 = vrot.slane %v3252_v15, %v16005_v7  ;;  %14942 = vmatmul.mubr.msk.f32.gmra.mrb[40].mxu1 %vm1655_vm1, %v4439_v14  ;;  %v3286_v61 = vcombine.low %v2909_v52, %v2911_v6  ;;  %v2933_v57 = vrot.slane %v2919_v55, %v16005_v7  ;;  %v13871_v15 = vld [vmem:[%s16010_s13 + $0x32] sm:$0xff] }
  0xe4   : > { %14813 = vmatprep.mubr.msk.f32.mxu0 %vm15918_vm0, %v20268_v26  ;;  %14944 = vmatprep.mubr.msk.f32.mxu1 %vm15918_vm0, %v20268_v26  ;;  %v6287_v40 = vrot.slane %v6273_v11, %v16005_v7  ;;  %v5891_v37 = vrot.slane %v5877_v5, %v16005_v7  ;;  %v5892_v20 = vcombine.high %v5884_v33, %v5884_v33 }
  0xe5   : > { %v17226_v17 = vcombine.low %v3259_v24, %v3266_v36  ;;  %v2934_v29 = vcombine.high %v2926_v28, %v2926_v28  ;;  %v2935_v63 = vcombine.high %v2933_v57, %v2933_v57  ;;  %v2936_v31 = vcombine.high %v2518_v60, %v2518_v60 }
  0xe6   : > { %v2943_v38 = vrot.slane %v2518_v60, %v16005_v7  ;;  %v6288_v12 = vcombine.low %v6280_v8, %v6287_v40  ;;  %v5893_v48 = vcombine.high %v5891_v37, %v5891_v37  ;;  %v6289_v9 = vcombine.low %v5884_v33, %v5892_v20 }
  0xe7   : > { %14814 = vmatmul.mubr.msk.f32.gmra.mrb[96].mxu0 %vm1655_vm1, %v16918_v23  ;;  %v3268_v23 = vcombine.low %v2885_v25, %v2893_v2  ;;  %14945 = vmatmul.mubr.msk.f32.gmra.mrb[42].mxu1 %vm1655_vm1, %v4447_v62  ;;  %v13714_v25 = vld.sshfl [vmem:[%s16010_s13 + $0xd2] sm:$0x3 pattern:$0x76325410]  ;;  %v3283_v51 = vrot.slane %v3269_v18, %v16005_v7  ;;  %v3293_v42 = vrot.slane %v3285_v49, %v16005_v7  ;;  %v13872_v62 = vld [vmem:[%s16010_s13 + $0x3a] sm:$0xff] }
  0xe8   : > { %14816 = vmatprep.mubr.msk.f32.mxu0 %vm15918_vm0, %v20268_v26  ;;  %15020 = vmatprep.mubr.msk.f32.mxu1 %vm15918_vm0, %v20268_v26  ;;  %v3300_v52 = vrot.slane %v3286_v61, %v16005_v7  ;;  %v5901_v47 = vcombine.high %v13871_v15, %v13871_v15  ;;  %v3302_v41 = vcombine.low %v13714_v25, %v2926_v28  ;;  %v13874_v61 = vld [vmem:[%s16010_s13 + $0x4a] sm:$0xff] }
  0xe9   : > { %v6290_v44 = vcombine.low %v5891_v37, %v5893_v48  ;;  %v6297_v24 = vrot.slane %v6289_v9, %v16005_v7  ;;  %v17257_v13 = vcombine.low %v2934_v29, %v2933_v57  ;;  %v5908_v4 = vrot.slane %v13871_v15, %v16005_v7  ;;  %v13805_v37 = vld [vmem:[%s16010_s13 + $0x21] sm:$0xff] }
  0xea   : > { %v5915_v36 = vrot.slane %v5901_v47, %v16005_v7  ;;  %v17264_v2 = vrot.slane %v2936_v31, %v16005_v7  ;;  %v2951_v45 = vcombine.high %v2943_v38, %v2943_v38  ;;  %v17266_v14 = vcombine.low %v2935_v63, %v2943_v38  ;;  %v13899_v38 = vld.sshfl [vmem:[%s16010_s13 + $0x42] sm:$0x3 pattern:$0x76325410] }
  0xeb   : > { %14817 = vmatmul.mubr.msk.f32.gmra.mrb[98].mxu0 %vm1655_vm1, %v16929_v54  ;;  %v3276_v54 = vrot.slane %v3268_v23, %v16005_v7  ;;  %15021 = vmatmul.mubr.msk.f32.vlgmr.msra.gmra.mrb[44].mxu1 %vm1655_vm1, %v6288_v12  ;;  %v6304_v32 = vrot.slane %v6290_v44, %v16005_v7  ;;  %v17273_v21 = vcombine.low %v3293_v42, %v3300_v52 }
  0xec   : > { %14819 = vmatprep.mubr.msk.f32.mxu0 %vm15918_vm0, %v20268_v26  ;;  %15023 = vmatprep.mubr.msk.f32.mxu1 %vm15918_vm0, %v20268_v26  ;;  %v5916_v6 = vcombine.high %v5908_v4, %v5908_v4  ;;  %v6306_v55 = vcombine.low %v13898_v27, %v5908_v4  ;;  %v17279_v1 = vrot.slane %v3302_v41, %v16005_v7 }
  0xed   : > { %v17271_v56 = vcombine.low %v3276_v54, %v3283_v51  ;;  %v3661_v46 = vrot.slane %v13740_v43, %v16005_v7  ;;  %v6305_v23 = vcombine.low %v6297_v24, %v6304_v32  ;;  %v3317_v18 = vrot.slane %v17257_v13, %v16005_v7  ;;  %v13875_v24 = vld [vmem:[%s16010_s13 + $0x52] sm:$0xff] }
  0xee   : > { %v6307_v60 = vcombine.low %v5916_v6, %v5915_v36  ;;  %v6314_v11 = vrot.slane %v6306_v55, %v16005_v7  ;;  %v17288_v8 = vcombine.low %v2951_v45, %v17264_v2  ;;  %v3327_v5 = vrot.slane %v17266_v14, %v16005_v7 }
  0xef   : > { %14820 = vmatmul.mubr.msk.f32.gmra.mrb[100].mxu0 %vm1655_vm1, %v16931_v10  ;;  %v3654_v10 = vcombine.high %v13740_v43, %v13740_v43  ;;  %15024 = vmatmul.mubr.msk.f32.gmra.mrb[46].mxu1 %vm1655_vm1, %v6305_v23  ;;  %v5918_v33 = vcombine.high %v13872_v62, %v13872_v62  ;;  %v5925_v49 = vrot.slane %v13872_v62, %v16005_v7 }
  0xf0   : > { %14822 = vmatprep.mubr.msk.f32.mxu0 %vm15918_vm0, %v20268_v26  ;;  %v2952_v57 = vcombine.high %v17264_v2, %v17264_v2  ;;  %v4757_v40 = vcombine.high %v13804_v22, %v13804_v22  ;;  %15026 = vmatprep.mubr.msk.f32.mxu1 %vm15918_vm0, %v20268_v26  ;;  %v6321_v20 = vrot.slane %v6307_v60, %v16005_v7 }
  0xf1   : > { %v3668_v28 = vrot.slane %v3654_v10, %v16005_v7  ;;  %v3669_v15 = vcombine.high %v3661_v46, %v3661_v46  ;;  %v5932_v54 = vrot.slane %v5918_v33, %v16005_v7  ;;  %v5933_v25 = vcombine.high %v5925_v49, %v5925_v49 }
  0xf2   : > { %v6322_v31 = vcombine.low %v6314_v11, %v6321_v20  ;;  %v5949_v43 = vrot.slane %v13874_v61, %v16005_v7  ;;  %v4774_v48 = vcombine.high %v13805_v37, %v13805_v37  ;;  %v4771_v47 = vrot.slane %v4757_v40, %v16005_v7  ;;  %v13877_v40 = vld [vmem:[%s16010_s13 + $0x62] sm:$0xff]  ;;  %v13807_v20 = vld [vmem:[%s16010_s13 + $0x31] sm:$0xff] }
  0xf3   : > { %14823 = vmatmul.mubr.msk.f32.gmra.mrb[102].mxu0 %vm1655_vm1, %v16998_v39  ;;  %v5917_v39 = vcombine.high %v5915_v36, %v5915_v36  ;;  %v3670_v63 = vcombine.high %v3668_v28, %v3668_v28  ;;  %v6324_v9 = vcombine.low %v5933_v25, %v5932_v54  ;;  %v5934_v42 = vcombine.high %v5932_v54, %v5932_v54  ;;  %v13715_v36 = vld.sshfl [vmem:[%s16010_s13 + $0xea] sm:$0x3 pattern:$0x76325410] }
  0xf4   : > { %14825 = vmatprep.mubr.msk.f32.mxu0 %vm15918_vm0, %v20268_v26  ;;  %v4781_v41 = vrot.slane %v13805_v37, %v16005_v7  ;;  %15027 = vmatmul.mubr.msk.f32.gmra.mrb[48].mxu1 %vm1655_vm1, %v6322_v31  ;;  %v5957_v44 = vcombine.high %v5949_v43, %v5949_v43  ;;  %v4066_v27 = vcombine.low %v3661_v46, %v3669_v15 }
  0xf5   : > { %v6323_v29 = vcombine.low %v5917_v39, %v5925_v49  ;;  %15029 = vmatprep.mubr.msk.f32.mxu1 %vm15918_vm0, %v20268_v26  ;;  %v6338_v10 = vrot.slane %v6324_v9, %v16005_v7  ;;  %v6340_v4 = vcombine.low %v5934_v42, %v13899_v38  ;;  %v5942_v32 = vcombine.high %v13874_v61, %v13874_v61 }
  0xf6   : > { %v6341_v45 = vcombine.low %v5949_v43, %v5957_v44  ;;  %v4788_v55 = vrot.slane %v4774_v48, %v16005_v7  ;;  %v5966_v46 = vrot.slane %v13875_v24, %v16005_v7  ;;  %v4773_v39 = vcombine.high %v4771_v47, %v4771_v47 }
  0xf7   : > { %14826 = vmatmul.mubr.msk.f32.gmra.mrb[104].mxu0 %vm1655_vm1, %v17000_v59  ;;  %v4764_v59 = vrot.slane %v13804_v22, %v16005_v7  ;;  %v6331_v51 = vrot.slane %v6323_v29, %v16005_v7  ;;  %v6348_v22 = vrot.slane %v6340_v4, %v16005_v7  ;;  %v5956_v11 = vrot.slane %v5942_v32, %v16005_v7  ;;  %v13834_v32 = vld.sshfl [vmem:[%s16010_s13 + $0x29] sm:$0x3 pattern:$0x76325410] }
  0xf8   : > { %14828 = vmatprep.mubr.msk.f32.mxu0 %vm15918_vm0, %v20268_v26  ;;  %v6355_v60 = vrot.slane %v6341_v45, %v16005_v7  ;;  %v3334_v33 = vrot.slane %v17288_v8, %v16005_v7  ;;  %v17337_v49 = vcombine.low %v2952_v57, %v13715_v36  ;;  %v5974_v61 = vcombine.high %v5966_v46, %v5966_v46 }
  0xf9   : > { %v4772_v2 = vcombine.high %v4764_v59, %v4764_v59  ;;  %v6339_v62 = vcombine.low %v6331_v51, %v6338_v10  ;;  %v5958_v54 = vcombine.high %v5956_v11, %v5956_v11  ;;  %v4790_v8 = vcombine.high %v4788_v55, %v4788_v55  ;;  %v13808_v10 = vld [vmem:[%s16010_s13 + $0x39] sm:$0xff] }
  0xfa   : > { %v17309_v12 = vpop.f32.mrb[0].mxu0  ;;  %v6356_v15 = vcombine.low %v6348_v22, %v6355_v60  ;;  %v6358_v57 = vcombine.low %v5966_v46, %v5974_v61  ;;  %v5959_v31 = vcombine.high %v13875_v24, %v13875_v24  ;;  %v17353_v43 = vcombine.low %v4771_v47, %v4773_v39 }
  0xfb   : > { %v14667_v52 = vpop.f32.mrb[1].mxu0  ;;  %14829 = vmatmul.mubr.msk.f32.gmra.mrb[106].mxu0 %vm1655_vm1, %v17007_v30  ;;  %v4067_v30 = vcombine.low %v3668_v28, %v3670_v63  ;;  %v4789_v28 = vcombine.high %v4781_v41, %v4781_v41  ;;  %15030 = vmatmul.mubr.msk.f32.gmra.mrb[50].mxu1 %vm1655_vm1, %v6339_v62  ;;  %v17348_v29 = vcombine.low %v4764_v59, %v4772_v2  ;;  %v13900_v63 = vld.sshfl [vmem:[%s16010_s13 + $0x5a] sm:$0x3 pattern:$0x76325410]  ;;  %v13878_v2 = vld [vmem:[%s16010_s13 + $0x6a] sm:$0xff] }
  0xfc   : > { %14831 = vmatprep.mubr.msk.f32.mxu0 %vm15918_vm0, %v20268_v26  ;;  %15032 = vmatprep.mubr.msk.f32.mxu1 %vm15918_vm0, %v20268_v26  ;;  %v6357_v9 = vcombine.low %v5956_v11, %v5958_v54  ;;  %v5990_v51 = vrot.slane %v13877_v40, %v16005_v7  ;;  %v4798_v59 = vcombine.high %v13807_v20, %v13807_v20  ;;  %v13810_v62 = vld [vmem:[%s16010_s13 + $0x49] sm:$0xff] }
  0xfd   : > { %v4081_v37 = vrot.slane %v4067_v30, %v16005_v7  ;;  %v17355_v48 = vcombine.low %v4781_v41, %v4789_v28  ;;  %v17361_v42 = vrot.slane %v13807_v20, %v16005_v7  ;;  %v6372_v52 = vrot.slane %v6358_v57, %v16005_v7 }
  0xfe   : > { %v17324_v6 = vpop.f32.mrb[2].mxu0  ;;  %v6365_v47 = vrot.slane %v6357_v9, %v16005_v7  ;;  %v5973_v41 = vrot.slane %v5959_v31, %v16005_v7  ;;  %v6375_v44 = vcombine.low %v13900_v63, %v5990_v51  ;;  %v5177_v36 = vrot.slane %v17348_v29, %v16005_v7 }
  0xff   : > { %v14670_v23 = vpop.f32.mrb[3].mxu0  ;;  %14832 = vmatmul.mubr.msk.f32.gmra.mrb[108].mxu0 %vm1655_vm1, %v17018_v19  ;;  %v4074_v19 = vrot.slane %v4066_v27, %v16005_v7  ;;  %15033 = vmatmul.mubr.msk.f32.gmra.mrb[52].mxu1 %vm1655_vm1, %v6356_v15  ;;  %v17380_v27 = vcombine.low %v3327_v5, %v3334_v33  ;;  %v5184_v14 = vrot.slane %v17353_v43, %v16005_v7 }
 0x100   : > { %14834 = vmatprep.mubr.msk.f32.mxu0 %vm15918_vm0, %v20268_v26  ;;  %15035 = vmatprep.mubr.msk.f32.mxu1 %vm15918_vm0, %v20268_v26  ;;  %v6373_v5 = vcombine.low %v6365_v47, %v6372_v52  ;;  %v5975_v30 = vcombine.high %v5973_v41, %v5973_v41  ;;  %v5194_v45 = vrot.slane %v17355_v48, %v16005_v7  ;;  %v13811_v52 = vld [vmem:[%s16010_s13 + $0x51] sm:$0xff]  ;;  %v17520_v48 = vld.sshfl [vmem:[%s16010_s13 + $0x59] sm:$0x3 pattern:$0x76325410] }
 0x101   : > { %v5983_v22 = vcombine.high %v13877_v40, %v13877_v40  ;;  %v4815_v46 = vcombine.high %v13808_v10, %v13808_v10  ;;  %v6389_v39 = vrot.slane %v6375_v44, %v16005_v7  ;;  %v5998_v28 = vcombine.high %v5990_v51, %v5990_v51  ;;  %v13901_v44 = vld.sshfl [vmem:[%s16010_s13 + $0x72] sm:$0x3 pattern:$0x76325410] }
 0x102   : > { %v17346_v25 = vpop.f32.mrb[4].mxu0  ;;  %v6374_v23 = vcombine.low %v5973_v41, %v5975_v30  ;;  %v4822_v33 = vrot.slane %v13808_v10, %v16005_v7  ;;  %v6007_v40 = vrot.slane %v13878_v2, %v16005_v7  ;;  %v4846_v20 = vrot.slane %v13810_v62, %v16005_v7 }
 0x103   : > { %v14673_v38 = vpop.f32.mrb[5].mxu0  ;;  %14835 = vmatmul.mubr.msk.f32.gmra.mrb[110].mxu0 %vm1655_vm1, %v17069_v53  ;;  %v17369_v53 = vcombine.low %v17279_v1, %v3317_v18  ;;  %v17384_v1 = vcombine.low %v4074_v19, %v4081_v37  ;;  %v17386_v18 = vcombine.low %v4788_v55, %v4790_v8  ;;  %v4812_v55 = vrot.slane %v4798_v59, %v16005_v7 }
 0x104   : > { %14837 = vmatprep.mubr.msk.f32.mxu0 %vm15918_vm0, %v20268_v26  ;;  %15036 = vmatmul.mubr.msk.f32.gmra.mrb[54].mxu1 %vm1655_vm1, %v6373_v5  ;;  %v5997_v61 = vrot.slane %v5983_v22, %v16005_v7  ;;  %v5203_v37 = vcombine.low %v13834_v32, %v17361_v42  ;;  %v6382_v15 = vrot.slane %v6374_v23, %v16005_v7  ;;  %v13880_v32 = vld [vmem:[%s16010_s13 + $0x7a] sm:$0xff] }
 0x105   : > { %v5201_v11 = vrot.slane %v17386_v18, %v16005_v7  ;;  %15038 = vmatprep.mubr.msk.f32.mxu1 %vm15918_vm0, %v20268_v26  ;;  %v6000_v54 = vcombine.high %v13878_v2, %v13878_v2  ;;  %v4814_v57 = vcombine.high %v4812_v55, %v4812_v55  ;;  %v4829_v38 = vrot.slane %v4815_v46, %v16005_v7 }
 0x106   : > { %v17375_v24 = vpop.f32.mrb[6].mxu0  ;;  %v5999_v63 = vcombine.high %v5997_v61, %v5997_v61  ;;  %v6391_v31 = vcombine.low %v5998_v28, %v5997_v61  ;;  %v6390_v9 = vcombine.low %v6382_v15, %v6389_v39  ;;  %v6015_v10 = vcombine.high %v6007_v40, %v6007_v40 }
 0x107   : > { %v14676_v4 = vpop.f32.mrb[7].mxu0  ;;  %14838 = vmatmul.mubr.msk.f32.gmra.mrb[112].mxu0 %vm1655_vm1, %v17114_v35  ;;  %v4813_v35 = vcombine.high %v17361_v42, %v17361_v42  ;;  %v6014_v51 = vrot.slane %v6000_v54, %v16005_v7  ;;  %v4830_v42 = vcombine.high %v4822_v33, %v4822_v33  ;;  %v4831_v5 = vcombine.high %v4829_v38, %v4829_v38 }
 0x108   : > { %14840 = vmatprep.mubr.msk.f32.mxu0 %vm15918_vm0, %v20268_v26  ;;  %v6392_v47 = vcombine.low %v5999_v63, %v6007_v40  ;;  %v6399_v41 = vrot.slane %v6391_v31, %v16005_v7  ;;  %v4854_v30 = vcombine.high %v4846_v20, %v4846_v20  ;;  %15039 = vmatmul.mubr.msk.f32.gmra.mrb[56].mxu1 %vm1655_vm1, %v6390_v9  ;;  %v13881_v31 = vld [vmem:[%s16010_s13 + $0x82] sm:$0xff] }
 0x109   : > { %v17423_v8 = vcombine.low %v4813_v35, %v4812_v55  ;;  %v6016_v2 = vcombine.high %v6014_v51, %v6014_v51  ;;  %v17439_v55 = vrot.slane %v5203_v37, %v16005_v7  ;;  %v13835_v35 = vld.sshfl [vmem:[%s16010_s13 + $0x41] sm:$0x3 pattern:$0x76325410]  ;;  %15041 = vmatprep.mubr.msk.f32.mxu1 %vm15918_vm0, %v20268_v26  ;;  %v6408_v22 = vcombine.low %v6015_v10, %v6014_v51 }
 0x10a   : > { %v17407_v60 = vpop.f32.mrb[8].mxu0  ;;  %v4863_v23 = vrot.slane %v13811_v52, %v16005_v7  ;;  %v6031_v37 = vrot.slane %v13880_v32, %v16005_v7  ;;  %v5221_v54 = vcombine.low %v4830_v42, %v4829_v38  ;;  %v6041_v10 = vcombine.high %v13881_v31, %v13881_v31 }
 0x10b   : > { %v14679_v19 = vpop.f32.mrb[9].mxu0  ;;  %14841 = vmatmul.mubr.msk.f32.gmra.mrb[114].mxu0 %vm1655_vm1, %v17119_v3  ;;  %v4839_v3 = vcombine.high %v13810_v62, %v13810_v62  ;;  %v6406_v62 = vrot.slane %v6392_v47, %v16005_v7  ;;  %v6409_v39 = vcombine.low %v6016_v2, %v13901_v44  ;;  %v6416_v40 = vrot.slane %v6408_v22, %v16005_v7  ;;  %v13813_v2 = vld [vmem:[%s16010_s13 + $0x61] sm:$0xff] }
 0x10c   : > { %14843 = vmatprep.mubr.msk.f32.mxu0 %vm15918_vm0, %v20268_v26  ;;  %v6024_v19 = vcombine.high %v13880_v32, %v13880_v32  ;;  %v6039_v51 = vcombine.high %v6031_v37, %v6031_v37  ;;  %v5218_v47 = vrot.slane %v17423_v8, %v16005_v7  ;;  %v5235_v8 = vrot.slane %v5221_v54, %v16005_v7 }
 0x10d   : > { %v4853_v46 = vrot.slane %v4839_v3, %v16005_v7  ;;  %v6407_v61 = vcombine.low %v6399_v41, %v6406_v62  ;;  %v6423_v63 = vrot.slane %v6409_v39, %v16005_v7  ;;  %v4856_v3 = vcombine.high %v13811_v52, %v13811_v52 }
 0x10e   : > { %v17427_v59 = vpop.f32.mrb[10].mxu0  ;;  %v6038_v9 = vrot.slane %v6024_v19, %v16005_v7  ;;  %v6425_v44 = vcombine.low %v6031_v37, %v6039_v51  ;;  %v6048_v32 = vrot.slane %v13881_v31, %v16005_v7  ;;  %v17505_v29 = vcombine.low %v5194_v45, %v5201_v11  ;;  %v13814_v45 = vld [vmem:[%s16010_s13 + $0x69] sm:$0xff] }
 0x10f   : > { %v14682_v4 = vpop.f32.mrb[11].mxu0  ;;  %14844 = vmatmul.mubr.msk.f32.gmra.mrb[116].mxu0 %vm1655_vm1, %v17125_v50  ;;  %v17445_v50 = vcombine.low %v4814_v57, %v4822_v33  ;;  %v5237_v33 = vcombine.low %v4831_v5, %v13835_v35  ;;  %v5238_v57 = vcombine.low %v4846_v20, %v4854_v30  ;;  %15042 = vmatmul.mubr.msk.f32.gmra.mrb[58].mxu1 %vm1655_vm1, %v6407_v61  ;;  %v14036_v35 = vld [vmem:[%s20184_s1 + $0x38] sm:$0xff] }
 0x110   : > { %14846 = vmatprep.mubr.msk.f32.mxu0 %vm15918_vm0, %v20268_v26  ;;  %v4871_v20 = vcombine.high %v4863_v23, %v4863_v23  ;;  %15044 = vmatprep.mubr.msk.f32.mxu1 %vm15918_vm0, %v20268_v26  ;;  %v6424_v38 = vcombine.low %v6416_v40, %v6423_v63  ;;  %v4855_v52 = vcombine.high %v4853_v46, %v4853_v46  ;;  %v13816_v63 = vld [vmem:[%s16010_s13 + $0x79] sm:$0xff] }
 0x111   : > { %v6040_v41 = vcombine.high %v6038_v9, %v6038_v9  ;;  %v5245_v5 = vrot.slane %v5237_v33, %v16005_v7  ;;  %v5252_v30 = vrot.slane %v5238_v57, %v16005_v7  ;;  %v4870_v62 = vrot.slane %v4856_v3, %v16005_v7  ;;  %15161 = vmatpush3.msra.mxu1 %v14036_v35 }
 0x112   : > { %v17449_v28 = vpop.f32.mrb[12].mxu0  ;;  %v6433_v22 = vrot.slane %v6425_v44, %v16005_v7  ;;  %v17492_v39 = vcombine.low %v4863_v23, %v4871_v20  ;;  %v6055_v61 = vrot.slane %v6041_v10, %v16005_v7  ;;  %v6056_v40 = vcombine.high %v6048_v32, %v6048_v32  ;;  %v13883_v23 = vld [vmem:[%s16010_s13 + $0x92] sm:$0xff] }
 0x113   : > { %v14685_v15 = vpop.f32.mrb[13].mxu0  ;;  %14847 = vmatmul.mubr.msk.f32.gmra.mrb[118].mxu0 %vm1655_vm1, %v17129_v58  ;;  %v5228_v58 = vrot.slane %v17445_v50, %v16005_v7  ;;  %15045 = vmatmul.mubr.msk.f32.gmra.mrb[60].mxu1 %vm1655_vm1, %v6424_v38  ;;  %v17490_v50 = vcombine.low %v5177_v36, %v5184_v14  ;;  %v17507_v43 = vcombine.low %v4853_v46, %v4855_v52 }
 0x114   : > { %14849 = vmatprep.mubr.msk.f32.mxu0 %vm15918_vm0, %v20268_v26  ;;  %15047 = vmatprep.mubr.msk.f32.mxu1 %vm15918_vm0, %v20268_v26  ;;  %v17510_v36 = vrot.slane %v13813_v2, %v16005_v7  ;;  %v17517_v18 = vcombine.low %v17439_v55, %v5218_v47  ;;  %v4880_v11 = vcombine.high %v13813_v2, %v13813_v2 }
 0x115   : > { %v6057_v46 = vcombine.high %v6055_v61, %v6055_v61  ;;  %v6442_v15 = vcombine.low %v6048_v32, %v6056_v40  ;;  %v17525_v54 = vcombine.low %v5228_v58, %v5235_v8  ;;  %v17527_v33 = vcombine.low %v5245_v5, %v5252_v30 }
 0x116   : > { %v17467_v42 = vpop.f32.mrb[14].mxu0  ;;  %v4872_v57 = vcombine.high %v4870_v62, %v4870_v62  ;;  %v5269_v55 = vrot.slane %v17492_v39, %v16005_v7  ;;  %v6065_v51 = vcombine.high %v13883_v23, %v13883_v23  ;;  %v5262_v58 = vrot.slane %v17507_v43, %v16005_v7  ;;  %v13820_v39 = vld [vmem:[%s16010_s13 + $0x99] sm:$0xff] }
 0x117   : > { %v14688_v4 = vpop.f32.mrb[15].mxu0  ;;  %14850 = vmatmul.mubr.msk.f32.gmra.mrb[120].mxu0 %vm1655_vm1, %v17193_v34  ;;  %v6426_v34 = vcombine.low %v6038_v9, %v6040_v41  ;;  %v6443_v31 = vcombine.low %v6055_v61, %v6057_v46  ;;  %v6450_v3 = vrot.slane %v6442_v15, %v16005_v7  ;;  %v13902_v9 = vld.sshfl [vmem:[%s16010_s13 + $0x8a] sm:$0x3 pattern:$0x76325410]  ;;  %v5272_v20 = vcombine.low %v17520_v48, %v17510_v36  ;;  %v13884_v41 = vld [vmem:[%s16010_s13 + $0x9a] sm:$0xff] }
 0x118   : > { %14852 = vmatprep.mubr.msk.f32.mxu0 %vm15918_vm0, %v20268_v26  ;;  %v4897_v38 = vcombine.high %v13814_v45, %v13814_v45  ;;  %v6072_v52 = vrot.slane %v13883_v23, %v16005_v7  ;;  %v4894_v10 = vrot.slane %v4880_v11, %v16005_v7  ;;  %v6079_v8 = vrot.slane %v6065_v51, %v16005_v7  ;;  %v13817_v23 = vld [vmem:[%s16010_s13 + $0x81] sm:$0xff] }
 0x119   : > { %v6440_v14 = vrot.slane %v6426_v34, %v16005_v7  ;;  %v6457_v4 = vrot.slane %v6443_v31, %v16005_v7  ;;  %v17552_v5 = vcombine.low %v4870_v62, %v4872_v57  ;;  %v4921_v30 = vcombine.high %v13816_v63, %v13816_v63  ;;  %v13886_v31 = vld [vmem:[%s16010_s13 + $0xaa] sm:$0xff] }
 0x11a   : > { %v17497_v19 = vpop.f32.mrb[16].mxu0  ;;  %v6080_v2 = vcombine.high %v6072_v52, %v6072_v52  ;;  %v6459_v32 = vcombine.low %v13902_v9, %v6072_v52  ;;  %v6081_v34 = vcombine.high %v6079_v8, %v6079_v8  ;;  %v4911_v40 = vrot.slane %v4897_v38, %v16005_v7  ;;  %v13903_v38 = vld.sshfl [vmem:[%s16010_s13 + $0xa2] sm:$0x3 pattern:$0x76325410] }
 0x11b   : > { %v14691_v37 = vpop.f32.mrb[17].mxu0  ;;  %14853 = vmatmul.mubr.msk.f32.gmra.mrb[122].mxu0 %vm1655_vm1, %v17212_v0  ;;  %v6441_v0 = vcombine.low %v6433_v22, %v6440_v14  ;;  %v6458_v35 = vcombine.low %v6450_v3, %v6457_v4  ;;  %v6082_v22 = vcombine.high %v13884_v41, %v13884_v41  ;;  %v4928_v14 = vrot.slane %v13816_v63, %v16005_v7 }
 0x11c   : > { %14855 = vmatprep.mubr.msk.f32.mxu0 %vm15918_vm0, %v20268_v26  ;;  %v6460_v37 = vcombine.low %v6080_v2, %v6079_v8  ;;  %v6467_v62 = vrot.slane %v6459_v32, %v16005_v7  ;;  %v4896_v46 = vcombine.high %v4894_v10, %v4894_v10  ;;  %v4904_v15 = vrot.slane %v13814_v45, %v16005_v7  ;;  %v13837_v32 = vld.sshfl [vmem:[%s16010_s13 + $0x71] sm:$0x3 pattern:$0x76325410] }
 0x11d   : > { %15048 = vmatmul.mubr.msk.f32.gmra.mrb[62].mxu1 %vm1655_vm1, %v6441_v0  ;;  %v6089_v57 = vrot.slane %v13884_v41, %v16005_v7  ;;  %v4935_v0 = vrot.slane %v4921_v30, %v16005_v7  ;;  %v4938_v45 = vcombine.high %v13817_v23, %v13817_v23  ;;  %v4913_v41 = vcombine.high %v4911_v40, %v4911_v40 }
 0x11e   : > { %v17534_v47 = vpop.f32.mrb[18].mxu0  ;;  %15050 = vmatprep.mubr.msk.f32.mxu1 %vm15918_vm0, %v20268_v26  ;;  %v6474_v63 = vrot.slane %v6460_v37, %v16005_v7  ;;  %v4912_v3 = vcombine.high %v4904_v15, %v4904_v15  ;;  %v6106_v13 = vcombine.high %v13886_v31, %v13886_v31 }
 0x11f   : > { %v14694_v44 = vpop.f32.mrb[19].mxu0  ;;  %14856 = vmatmul.mubr.msk.f32.gmra.mrb[124].mxu0 %vm1655_vm1, %v17222_v16  ;;  %v4895_v16 = vcombine.high %v17510_v36, %v17510_v36  ;;  %v6097_v9 = vcombine.high %v6089_v57, %v6089_v57  ;;  %v6476_v51 = vcombine.low %v6081_v34, %v6089_v57  ;;  %v6113_v34 = vrot.slane %v13886_v31, %v16005_v7  ;;  %v13887_v57 = vld [vmem:[%s16010_s13 + $0xb2] sm:$0xff] }
 0x120   : > { %14858 = vmatprep.mubr.msk.f32.mxu0 %vm15918_vm0, %v20268_v26  ;;  %v4936_v44 = vcombine.high %v4928_v14, %v4928_v14  ;;  %v6475_v4 = vcombine.low %v6467_v62, %v6474_v63  ;;  %v4937_v37 = vcombine.high %v4935_v0, %v4935_v0  ;;  %v5289_v63 = vcombine.low %v4896_v46, %v4904_v15 }
 0x121   : > { %15051 = vmatmul.mubr.msk.f32.gmra.mrb[64].mxu1 %vm1655_vm1, %v6458_v35  ;;  %v17580_v2 = vcombine.low %v4895_v16, %v4894_v10  ;;  %v6121_v16 = vcombine.high %v6113_v34, %v6113_v34 }
 0x122   : > { %v17556_v61 = vpop.f32.mrb[20].mxu0  ;;  %15053 = vmatprep.mubr.msk.f32.mxu1 %vm15918_vm0, %v20268_v26  ;;  %v5303_v48 = vrot.slane %v5289_v63, %v16005_v7 }
 0x123   : > { %v14697_v11 = vpop.f32.mrb[21].mxu0  ;;  %14859 = vmatmul.mubr.msk.f32.gmra.mrb[126].mxu0 %vm1655_vm1, %v17226_v17  ;;  %v6096_v17 = vrot.slane %v6082_v22, %v16005_v7  ;;  %v6484_v22 = vrot.slane %v6476_v51, %v16005_v7  ;;  %v5306_v51 = vcombine.low %v4913_v41, %v13837_v32  ;;  %v6494_v46 = vcombine.low %v6113_v34, %v6121_v16 }
 0x124   : > { %14861 = vmatprep.mubr.msk.f32.mxu0 %vm15918_vm0, %v20268_v26  ;;  %v4945_v11 = vrot.slane %v13817_v23, %v16005_v7  ;;  %v5296_v36 = vrot.slane %v17580_v2, %v16005_v7  ;;  %v6123_v16 = vcombine.high %v13887_v57, %v13887_v57 }
 0x125   : > { %v6098_v8 = vcombine.high %v6096_v17, %v6096_v17  ;;  %v6477_v35 = vcombine.low %v6097_v9, %v6096_v17  ;;  %15054 = vmatmul.mubr.msk.f32.gmra.mrb[66].mxu1 %vm1655_vm1, %v6475_v4  ;;  %v5305_v9 = vcombine.low %v4912_v3, %v4911_v40  ;;  %v5286_v40 = vrot.slane %v5272_v20, %v16005_v7 }
 0x126   : > { %v17576_v52 = vpop.f32.mrb[22].mxu0  ;;  %15056 = vmatprep.mubr.msk.f32.mxu1 %vm15918_vm0, %v20268_v26  ;;  %v4953_v31 = vcombine.high %v4945_v11, %v4945_v11  ;;  %v6120_v3 = vrot.slane %v6106_v13, %v16005_v7  ;;  %v5320_v32 = vrot.slane %v5306_v51, %v16005_v7 }
 0x127   : > { %v14700_v30 = vpop.f32.mrb[23].mxu0  ;;  %14862 = vmatmul.mubr.msk.f32.gmra.mrb[128].mxu0 %vm1655_vm1, %v17271_v56  ;;  %v6493_v62 = vcombine.low %v6098_v8, %v13903_v38  ;;  %v4952_v56 = vrot.slane %v4938_v45, %v16005_v7  ;;  %v6491_v10 = vrot.slane %v6477_v35, %v16005_v7  ;;  %v6130_v45 = vrot.slane %v13887_v57, %v16005_v7 }
 0x128   : > { %14864 = vmatprep.mubr.msk.f32.mxu0 %vm15918_vm0, %v20268_v26  ;;  %v5322_v30 = vcombine.low %v4928_v14, %v4936_v44  ;;  %v5323_v14 = vcombine.low %v4935_v0, %v4937_v37  ;;  %v6508_v44 = vrot.slane %v6494_v46, %v16005_v7  ;;  %v5313_v13 = vrot.slane %v5305_v9, %v16005_v7 }
 0x129   : > { %v6492_v38 = vcombine.low %v6484_v22, %v6491_v10  ;;  %v6501_v15 = vrot.slane %v6493_v62, %v16005_v7  ;;  %v4954_v41 = vcombine.high %v4952_v56, %v4952_v56  ;;  %v6138_v4 = vcombine.high %v6130_v45, %v6130_v45  ;;  %v13819_v22 = vld [vmem:[%s16010_s13 + $0x91] sm:$0xff]  ;;  %v13904_v10 = vld.sshfl [vmem:[%s16010_s13 + $0xba] sm:$0x3 pattern:$0x76325410] }
 0x12a   : > { %v17594_v17 = vpop.f32.mrb[24].mxu0  ;;  %v6122_v20 = vcombine.high %v6120_v3, %v6120_v3  ;;  %v5330_v35 = vrot.slane %v5322_v30, %v16005_v7  ;;  %v5337_v37 = vrot.slane %v5323_v14, %v16005_v7  ;;  %v17628_v62 = vcombine.low %v4945_v11, %v4953_v31  ;;  %v17669_v14 = vld [vmem:[%s16010_s13 + $0xa9] sm:$0xff] }
 0x12b   : > { %v14703_v23 = vpop.f32.mrb[25].mxu0  ;;  %14865 = vmatmul.mubr.msk.f32.gmra.mrb[130].mxu0 %vm1655_vm1, %v17273_v21  ;;  %v5279_v21 = vrot.slane %v17552_v5, %v16005_v7  ;;  %15057 = vmatmul.mubr.msk.f32.gmra.mrb[68].mxu1 %vm1655_vm1, %v6492_v38  ;;  %v13889_v5 = vld [vmem:[%s16010_s13 + $0xc2] sm:$0xff]  ;;  %v6509_v2 = vcombine.low %v6501_v15, %v6508_v44  ;;  %v6511_v34 = vcombine.low %v6130_v45, %v6138_v4 }
 0x12c   : > { %14867 = vmatprep.mubr.msk.f32.mxu0 %vm15918_vm0, %v20268_v26  ;;  %15059 = vmatprep.mubr.msk.f32.mxu1 %vm15918_vm0, %v20268_v26  ;;  %v6510_v63 = vcombine.low %v6120_v3, %v6122_v20  ;;  %v17639_v9 = vcombine.low %v4952_v56, %v4954_v41  ;;  %v6154_v11 = vrot.slane %v13889_v5, %v16005_v7  ;;  %v13890_v3 = vld [vmem:[%s16010_s13 + $0xca] sm:$0xff] }
 0x12d   : > { %v6525_v51 = vrot.slane %v6511_v34, %v16005_v7  ;;  %v17646_v57 = vcombine.low %v5279_v21, %v5286_v40  ;;  %v4962_v23 = vcombine.high %v13819_v22, %v13819_v22  ;;  %v17655_v56 = vcombine.low %v5296_v36, %v5303_v48 }
 0x12e   : > { %v17611_v8 = vpop.f32.mrb[26].mxu0  ;;  %v6518_v43 = vrot.slane %v6510_v63, %v16005_v7  ;;  %v17657_v38 = vcombine.low %v5313_v13, %v5320_v32  ;;  %v17660_v46 = vrot.slane %v13819_v22, %v16005_v7  ;;  %v6528_v15 = vcombine.low %v13904_v10, %v6154_v11  ;;  %v13838_v22 = vld.sshfl [vmem:[%s16010_s13 + $0x89] sm:$0x3 pattern:$0x76325410] }
 0x12f   : > { %v14706_v0 = vpop.f32.mrb[27].mxu0  ;;  %14868 = vmatmul.mubr.msk.f32.gmra.mrb[132].mxu0 %vm1655_vm1, %v17369_v53  ;;  %v17637_v53 = vcombine.low %v5262_v58, %v5269_v55  ;;  %15060 = vmatmul.mubr.msk.f32.gmra.mrb[70].mxu1 %vm1655_vm1, %v6509_v2  ;;  %v6137_v55 = vrot.slane %v6123_v16, %v16005_v7  ;;  %v17664_v45 = vcombine.low %v5330_v35, %v5337_v37  ;;  %v13844_v16 = vld [vmem:[%s20184_s1 + $0x20] sm:$0xff] }
 0x130   : > { %14870 = vmatprep.mubr.msk.f32.mxu0 %vm15918_vm0, %v20268_v26  ;;  %15062 = vmatprep.mubr.msk.f32.mxu1 %vm15918_vm0, %v20268_v26  ;;  %v5347_v40 = vrot.slane %v17628_v62, %v16005_v7  ;;  %v5354_v21 = vrot.slane %v17639_v9, %v16005_v7  ;;  %v4979_v41 = vcombine.high %v13820_v39, %v13820_v39 }
 0x131   : > { %v6139_v31 = vcombine.high %v6137_v55, %v6137_v55  ;;  %v6147_v44 = vcombine.high %v13889_v5, %v13889_v5  ;;  %v6162_v4 = vcombine.high %v6154_v11, %v6154_v11  ;;  %v4976_v48 = vrot.slane %v4962_v23, %v16005_v7 }
 0x132   : > { %v17644_v30 = vpop.f32.mrb[28].mxu0  ;;  %v4986_v13 = vrot.slane %v13820_v39, %v16005_v7  ;;  %v6542_v0 = vrot.slane %v6528_v15, %v16005_v7  ;;  %v20363_v35 = vrot.slane %v17337_v49, %v16005_v7  ;;  %v5010_v5 = vrot.slane %v17669_v14, %v16005_v7 }
 0x133   : > { %v14709_v58 = vpop.f32.mrb[29].mxu0  ;;  %14871 = vmatmul.mubr.msk.f32.gmra.mrb[134].mxu0 %vm1655_vm1, %v17380_v27  ;;  %v6526_v27 = vcombine.low %v6518_v43, %v6525_v51  ;;  %v6527_v20 = vcombine.low %v6137_v55, %v6139_v31  ;;  %v6161_v2 = vrot.slane %v6147_v44, %v16005_v7  ;;  %v6171_v34 = vrot.slane %v13890_v3, %v16005_v7  ;;  %v17707_v44 = vld [vmem:[%s16010_s13 + $0xb1] sm:$0xff] }
 0x134   : > { %14873 = vmatprep.mubr.msk.f32.mxu0 %vm15918_vm0, %v20268_v26  ;;  %v4977_v37 = vcombine.high %v17660_v46, %v17660_v46  ;;  %v4978_v49 = vcombine.high %v4976_v48, %v4976_v48  ;;  %v6164_v10 = vcombine.high %v13890_v3, %v13890_v3  ;;  %v4993_v51 = vrot.slane %v4979_v41, %v16005_v7 }
 0x135   : > { %15063 = vmatmul.mubr.msk.f32.gmra.mrb[72].mxu1 %vm1655_vm1, %v6526_v27  ;;  %v6535_v63 = vrot.slane %v6527_v20, %v16005_v7  ;;  %v6163_v11 = vcombine.high %v6161_v2, %v6161_v2  ;;  %v6544_v23 = vcombine.low %v6162_v4, %v6161_v2  ;;  %v6179_v39 = vcombine.high %v6171_v34, %v6171_v34  ;;  %v13892_v2 = vld [vmem:[%s16010_s13 + $0xda] sm:$0xff] }
 0x136   : > { %v17674_v36 = vpop.f32.mrb[30].mxu0  ;;  %15065 = vmatprep.mubr.msk.f32.mxu1 %vm15918_vm0, %v20268_v26  ;;  %v5356_v55 = vcombine.low %v13838_v22, %v17660_v46  ;;  %v4994_v58 = vcombine.high %v4986_v13, %v4986_v13  ;;  %v6178_v27 = vrot.slane %v6164_v10, %v16005_v7  ;;  %v4995_v3 = vcombine.high %v4993_v51, %v4993_v51  ;;  %v13839_v46 = vld.sshfl [vmem:[%s16010_s13 + $0xa1] sm:$0x3 pattern:$0x76325410] }
 0x137   : > { %v14712_v32 = vpop.f32.mrb[31].mxu0  ;;  %14874 = vmatmul.mubr.msk.f32.gmra.mrb[136].mxu0 %vm1655_vm1, %v20363_v35  ;;  %v6543_v15 = vcombine.low %v6535_v63, %v6542_v0  ;;  %v5018_v41 = vcombine.high %v5010_v5, %v5010_v5  ;;  %v6545_v4 = vcombine.low %v6163_v11, %v6171_v34  ;;  %v6552_v20 = vrot.slane %v6544_v23, %v16005_v7 }
 0x138   : > { %14878 = vmatprep.mubr.msk.f32.mxu0 %vm15918_vm0, %v20268_v26  ;;  %v13905_v32 = vld.sshfl [vmem:[%s16010_s13 + $0xd2] sm:$0x3 pattern:$0x76325410]  ;;  %v5003_v0 = vcombine.high %v17669_v14, %v17669_v14  ;;  %v6180_v35 = vcombine.high %v6178_v27, %v6178_v27  ;;  %v6561_v22 = vcombine.low %v6179_v39, %v6178_v27  ;;  %v5357_v34 = vcombine.low %v4977_v37, %v4976_v48 }
 0x139   : > { %v17721_v63 = vcombine.low %v4978_v49, %v4986_v13  ;;  %15066 = vmatmul.mubr.msk.f32.gmra.mrb[74].mxu1 %vm1655_vm1, %v6543_v15  ;;  %v6559_v10 = vrot.slane %v6545_v4, %v16005_v7  ;;  %v5374_v11 = vcombine.low %v4994_v58, %v4993_v51  ;;  %v5027_v14 = vrot.slane %v17707_v44, %v16005_v7 }
 0x13a   : > { %v17700_v43 = vpop.f32.mrb[32].mxu0  ;;  %15068 = vmatprep.mubr.msk.f32.mxu1 %vm15918_vm0, %v20268_v26  ;;  %v6562_v23 = vcombine.low %v6180_v35, %v13905_v32  ;;  %v6569_v39 = vrot.slane %v6561_v22, %v16005_v7  ;;  %v5390_v13 = vcombine.low %v4995_v3, %v13839_v46  ;;  %v6188_v49 = vcombine.high %v13892_v2, %v13892_v2 }
 0x13b   : > { %v14715_v31 = vpop.f32.mrb[33].mxu0  ;;  %14879 = vmatmul.mubr.msk.f32.vlgmr.msra.gmra.mrb[138].mxu0 %vm1655_vm1, %v17384_v1  ;;  %v13972_v1 = vld [vmem:[%s20184_s1 + $0x30] sm:$0xff]  ;;  %v6560_v37 = vcombine.low %v6552_v20, %v6559_v10  ;;  %v6195_v15 = vrot.slane %v13892_v2, %v16005_v7  ;;  %v5391_v51 = vcombine.low %v5010_v5, %v5018_v41  ;;  %v5017_v58 = vrot.slane %v5003_v0, %v16005_v7  ;;  %v13825_v0 = vld [vmem:[%s16010_s13 + $0xc1] sm:$0xff] }
 0x13c   : > { %14948 = vmatpush3.msra.mxu0 %v13844_v16  ;;  %14949 = vmatprep.mubr.msk.f32.mxu0 %vm15918_vm0, %v20268_v26  ;;  %v6576_v27 = vrot.slane %v6562_v23, %v16005_v7  ;;  %v13893_v31 = vld [vmem:[%s16010_s13 + $0xe2] sm:$0xff]  ;;  %v5364_v4 = vrot.slane %v5356_v55, %v16005_v7  ;;  %v6202_v3 = vrot.slane %v6188_v49, %v16005_v7 }
 0x13d   : > { %15089 = vmatprep.subr.mxu0 %v20268_v26  ;;  %15069 = vmatmul.mubr.msk.f32.gmra.mrb[76].mxu1 %vm1655_vm1, %v6560_v37  ;;  %v6203_v20 = vcombine.high %v6195_v15, %v6195_v15  ;;  %v5381_v46 = vrot.slane %v17721_v63, %v16005_v7  ;;  %v5388_v5 = vrot.slane %v5374_v11, %v16005_v7  ;;  %v13895_v37 = vld [vmem:[%s16010_s13 + $0xf2] sm:$0xff] }
 0x13e   : > { %v17725_v16 = vpop.f32.mrb[34].mxu0  ;;  %v5035_v41 = vcombine.high %v5027_v14, %v5027_v14  ;;  %15071 = vmatprep.mubr.msk.f32.mxu1 %vm15918_vm0, %v20268_v26  ;;  %v6577_v55 = vcombine.low %v6569_v39, %v6576_v27  ;;  %v5020_v22 = vcombine.high %v17707_v44, %v17707_v44  ;;  %v6204_v2 = vcombine.high %v6202_v3, %v6202_v3 }
 0x13f   : > { %v14718_v48 = vpop.f32.mrb[35].mxu0  ;;  %14950 = vmatmul.mubr.msk.f32.vlgmr.msra.gmra.mrb[140].mxu0 %vm1655_vm1, %v17490_v50  ;;  %v5371_v50 = vrot.slane %v5357_v34, %v16005_v7  ;;  %v6205_v34 = vcombine.high %v13893_v31, %v13893_v31  ;;  %v5398_v63 = vrot.slane %v5390_v13, %v16005_v7  ;;  %v5405_v10 = vrot.slane %v5391_v51, %v16005_v7  ;;  %v13840_v51 = vld.sshfl [vmem:[%s16010_s13 + $0xb9] sm:$0x3 pattern:$0x76325410] }
 0x140   : > { %15090 = vmatpush3.msra.mxu0 %v13972_v1  ;;  %14952 = vmatprep.mubr.msk.f32.mxu0 %vm15918_vm0, %v20268_v26  ;;  %v6578_v1 = vcombine.low %v6195_v15, %v6203_v20  ;;  %v5019_v11 = vcombine.high %v5017_v58, %v5017_v58  ;;  %v6212_v23 = vrot.slane %v13893_v31, %v16005_v7 }
 0x141   : > { %v17762_v39 = vrot.slane %v13825_v0, %v16005_v7  ;;  %15072 = vmatmul.mubr.msk.f32.gmra.mrb[78].mxu1 %vm1655_vm1, %v6577_v55  ;;  %v6219_v48 = vrot.slane %v6205_v34, %v16005_v7  ;;  %v17776_v13 = vcombine.low %v5347_v40, %v5354_v21  ;;  %v17778_v15 = vcombine.low %v5364_v4, %v5371_v50 }
 0x142   : > { %v17744_v32 = vpop.f32.mrb[36].mxu0  ;;  %v6586_v44 = vrot.slane %v6578_v1, %v16005_v7  ;;  %v5044_v27 = vcombine.high %v13825_v0, %v13825_v0  ;;  %15074 = vmatprep.mubr.msk.f32.mxu1 %vm15918_vm0, %v20268_v26  ;;  %v6220_v31 = vcombine.high %v6212_v23, %v6212_v23  ;;  %v5408_v9 = vcombine.low %v5027_v14, %v5035_v41  ;;  %v13906_v41 = vld.sshfl [vmem:[%s16010_s13 + $0xea] sm:$0x3 pattern:$0x76325410] }
 0x143   : > { %v14721_v35 = vpop.f32.mrb[37].mxu0  ;;  %14953 = vmatmul.mubr.msk.f32.gmra.mrb[142].mxu0 %vm1655_vm1, %v17505_v29  ;;  %v6579_v29 = vcombine.low %v6202_v3, %v6204_v2  ;;  %v5034_v20 = vrot.slane %v5020_v22, %v16005_v7  ;;  %v6221_v40 = vcombine.high %v6219_v48, %v6219_v48  ;;  %v17789_v21 = vcombine.low %v5381_v46, %v5388_v5  ;;  %v13826_v2 = vld [vmem:[%s16010_s13 + $0xc9] sm:$0xff] }
 0x144   : > { %14955 = vmatprep.mubr.msk.f32.mxu0 %vm15918_vm0, %v20268_v26  ;;  %v17791_v4 = vcombine.low %v5398_v63, %v5405_v10  ;;  %v6595_v50 = vcombine.low %v6212_v23, %v6220_v31  ;;  %v6229_v0 = vcombine.high %v13895_v37, %v13895_v37  ;;  %v5407_v55 = vcombine.low %v5017_v58, %v5019_v11 }
 0x145   : > { %v6593_v62 = vrot.slane %v6579_v29, %v16005_v7  ;;  %v5425_v35 = vcombine.low %v13840_v51, %v17762_v39  ;;  %v6596_v14 = vcombine.low %v6219_v48, %v6221_v40  ;;  %15231 = vmatprep.subr.mxu0 %v20268_v26  ;;  %v5058_v1 = vrot.slane %v5044_v27, %v16005_v7  ;;  %v13896_v48 = vld [vmem:[%s16010_s13 + $0xfa] sm:$0xff] }
 0x146   : > { %v17768_v49 = vpop.f32.mrb[38].mxu0  ;;  %v6603_v46 = vrot.slane %v6595_v50, %v16005_v7  ;;  %v6236_v5 = vrot.slane %v13895_v37, %v16005_v7  ;;  %v6243_v34 = vrot.slane %v6229_v0, %v16005_v7  ;;  %v5422_v63 = vrot.slane %v5408_v9, %v16005_v7  ;;  %v13828_v27 = vld [vmem:[%s16010_s13 + $0xd9] sm:$0xff] }
 0x147   : > { %v14724_v3 = vpop.f32.mrb[39].mxu0  ;;  %14956 = vmatmul.mubr.msk.f32.gmra.mrb[144].mxu0 %vm1655_vm1, %v17517_v18  ;;  %v6594_v18 = vcombine.low %v6586_v44, %v6593_v62  ;;  %v5036_v10 = vcombine.high %v5034_v20, %v5034_v20  ;;  %v6610_v11 = vrot.slane %v6596_v14, %v16005_v7  ;;  %v5061_v23 = vcombine.high %v13826_v2, %v13826_v2 }
 0x148   : > { %14958 = vmatprep.mubr.msk.f32.mxu0 %vm15918_vm0, %v20268_v26  ;;  %v6244_v29 = vcombine.high %v6236_v5, %v6236_v5  ;;  %v6612_v44 = vcombine.low %v13906_v41, %v6236_v5  ;;  %v17815_v37 = vrot.slane %v5425_v35, %v16005_v7  ;;  %v5059_v51 = vcombine.high %v17762_v39, %v17762_v39  ;;  %v13829_v35 = vld [vmem:[%s16010_s13 + $0xe1] sm:$0xff] }
 0x149   : > { %15075 = vmatmul.mubr.msk.f32.gmra.mrb[80].mxu1 %vm1655_vm1, %v6594_v18  ;;  %v6611_v31 = vcombine.low %v6603_v46, %v6610_v11  ;;  %v5060_v9 = vcombine.high %v5058_v1, %v5058_v1  ;;  %v5068_v62 = vrot.slane %v13826_v2, %v16005_v7  ;;  %v6245_v39 = vcombine.high %v6243_v34, %v6243_v34 }
 0x14a   : > { %v17797_v22 = vpop.f32.mrb[40].mxu0  ;;  %15077 = vmatprep.mubr.msk.f32.mxu1 %vm15918_vm0, %v20268_v26  ;;  %v6613_v40 = vcombine.low %v6244_v29, %v6243_v34  ;;  %v6620_v50 = vrot.slane %v6612_v44, %v16005_v7  ;;  %v6246_v18 = vcombine.high %v13896_v48, %v13896_v48  ;;  %v5075_v14 = vrot.slane %v5061_v23, %v16005_v7 }
 0x14b   : > { %v14727_v58 = vpop.f32.mrb[41].mxu0  ;;  %14959 = vmatmul.mubr.msk.f32.gmra.mrb[146].mxu0 %vm1655_vm1, %v17525_v54  ;;  %v5415_v54 = vrot.slane %v5407_v55, %v16005_v7  ;;  %v17826_v55 = vcombine.low %v5034_v20, %v5036_v10  ;;  %v5085_v2 = vcombine.high %v13828_v27, %v13828_v27  ;;  %v5092_v20 = vrot.slane %v13828_v27, %v16005_v7  ;;  %v13996_v27 = vld [vmem:[%s16010_s13 + $0x31] sm:$0xff] }
 0x14c   : > { %14961 = vmatprep.mubr.msk.f32.mxu0 %vm15918_vm0, %v20268_v26  ;;  %v6627_v41 = vrot.slane %v6613_v40, %v16005_v7  ;;  %v6253_v46 = vrot.slane %v13896_v48, %v16005_v7  ;;  %v6260_v5 = vrot.slane %v6246_v18, %v16005_v7  ;;  %v17845_v10 = vcombine.low %v5060_v9, %v5068_v62  ;;  %v13907_v9 = vld.sshfl [vmem:[%s16010_s13 + $0x102] sm:$0x3 pattern:$0x76325410] }
 0x14d   : > { %15078 = vmatmul.mubr.msk.f32.gmra.mrb[82].mxu1 %vm1655_vm1, %v6611_v31  ;;  %v17843_v58 = vcombine.low %v5415_v54, %v5422_v63  ;;  %v5102_v11 = vcombine.high %v13829_v35, %v13829_v35  ;;  %v5076_v63 = vcombine.high %v5068_v62, %v5068_v62  ;;  %v5077_v54 = vcombine.high %v5075_v14, %v5075_v14  ;;  %v13841_v40 = vld.sshfl [vmem:[%s16010_s13 + $0xd1] sm:$0x3 pattern:$0x76325410] }
 0x14e   : > { %v17820_v3 = vpop.f32.mrb[42].mxu0  ;;  %15080 = vmatprep.mubr.msk.f32.mxu1 %vm15918_vm0, %v20268_v26  ;;  %v6628_v23 = vcombine.low %v6620_v50, %v6627_v41  ;;  %v6261_v44 = vcombine.high %v6253_v46, %v6253_v46  ;;  %v6629_v48 = vcombine.low %v6245_v39, %v6253_v46  ;;  %v5099_v31 = vrot.slane %v5085_v2, %v16005_v7 }
 0x14f   : > { %v14730_v0 = vpop.f32.mrb[43].mxu0  ;;  %14962 = vmatmul.mubr.msk.f32.gmra.mrb[148].mxu0 %vm1655_vm1, %v17527_v33  ;;  %v17836_v33 = vcombine.low %v5059_v51, %v5058_v1  ;;  %v6262_v51 = vcombine.high %v6260_v5, %v6260_v5  ;;  %v5100_v50 = vcombine.high %v5092_v20, %v5092_v20  ;;  %v5109_v2 = vrot.slane %v13829_v35, %v16005_v7 }
 0x150   : > { %14964 = vmatprep.mubr.msk.f32.mxu0 %vm15918_vm0, %v20268_v26  ;;  %v6630_v0 = vcombine.low %v6261_v44, %v6260_v5  ;;  %v6637_v39 = vrot.slane %v6629_v48, %v16005_v7  ;;  %v5116_v41 = vrot.slane %v5102_v11, %v16005_v7  ;;  %v8067_v46 = vcombine.high %v13996_v27, %v13996_v27 }
 0x151   : > { %15081 = vmatmul.mubr.msk.f32.gmra.mrb[84].mxu1 %vm1655_vm1, %v6628_v23  ;;  %v13997_v23 = vld [vmem:[%s16010_s13 + $0x39] sm:$0xff]  ;;  %v6646_v44 = vcombine.low %v6262_v51, %v13907_v9  ;;  %v8074_v48 = vrot.slane %v13996_v27, %v16005_v7  ;;  %v17877_v35 = vcombine.low %v5076_v63, %v5075_v14  ;;  %v17879_v11 = vcombine.low %v5077_v54, %v13841_v40 }
 0x152   : > { %v17841_v34 = vpop.f32.mrb[44].mxu0  ;;  %15083 = vmatprep.mubr.msk.f32.mxu1 %vm15918_vm0, %v20268_v26  ;;  %v6644_v5 = vrot.slane %v6630_v0, %v16005_v7  ;;  %v5101_v62 = vcombine.high %v5099_v31, %v5099_v31  ;;  %v5117_v51 = vcombine.high %v5109_v2, %v5109_v2  ;;  %v5118_v9 = vcombine.high %v5116_v41, %v5116_v41 }
 0x153   : > { %20364 = vst [vmem:[#allocation9_spill] sm:$0xff] %v17841_v34  ;;  %v14733_v29 = vpop.f32.mrb[45].mxu0  ;;  %14965 = vmatmul.mubr.msk.f32.gmra.mrb[150].mxu0 %vm1655_vm1, %v17637_v53  ;;  %v8091_v34 = vrot.slane %v13997_v23, %v16005_v7 }
 0x154   : > { %14967 = vmatprep.mubr.msk.f32.mxu0 %vm15918_vm0, %v20268_v26  ;;  %v6645_v1 = vcombine.low %v6637_v39, %v6644_v5  ;;  %v5476_v40 = vcombine.low %v5099_v31, %v5101_v62  ;;  %v5466_v5 = vrot.slane %v17877_v35, %v16005_v7  ;;  %v5473_v31 = vrot.slane %v17879_v11, %v16005_v7  ;;  %v13999_v35 = vld [vmem:[%s16010_s13 + $0x49] sm:$0xff] }
 0x155   : > { %v5492_v62 = vcombine.low %v5109_v2, %v5117_v51 }
 0x156   : > { %v2376_v18 = vpop.f32.mrb[46].mxu0  ;;  %15084 = vmatmul.mubr.msk.f32.gmra.mrb[86].mxu1 %vm1655_vm1, %v6645_v1 }
 0x157   : > { %v17869_v29 = vadd.f32 %v2376_v18, %v17309_v12  ;;  %v14738_v53 = vpop.f32.mrb[47].mxu0  ;;  %14968 = vmatmul.mubr.msk.f32.gmra.mrb[152].mxu0 %vm1655_vm1, %v17646_v57  ;;  %v8081_v12 = vrot.slane %v8067_v46, %v16005_v7  ;;  %v17882_v18 = vcombine.low %v5092_v20, %v5100_v50  ;;  %v8082_v57 = vcombine.high %v8074_v48, %v8074_v48 }
 0x158   : > { %14970 = vmatprep.mubr.msk.f32.mxu0 %vm15918_vm0, %v20268_v26  ;;  %v13831_v53 = vld [vmem:[%s16010_s13 + $0xf1] sm:$0xff]  ;;  %v6653_v20 = vrot.slane %v6646_v44, %v16005_v7  ;;  %15086 = vmatprep.mubr.msk.f32.mxu1 %vm15918_vm0, %v20268_v26  ;;  %v8099_v46 = vcombine.high %v8091_v34, %v8091_v34 }
 0x159   : > { %20365 = vst [vmem:[#allocation7_spill] sm:$0xff] %v17869_v29  ;;  %v8084_v29 = vcombine.high %v13997_v23, %v13997_v23  ;;  %v8083_v27 = vcombine.high %v8081_v12, %v8081_v12  ;;  %v8479_v54 = vcombine.low %v8074_v48, %v8082_v57  ;;  %v5126_v50 = vcombine.high %v13831_v53, %v13831_v53 }
 0x15a   : > { %v2381_v0 = vpop.f32.mrb[48].mxu0  ;;  %15087 = vmatmul.mubr.msk.f32.gmra.mrb[88].mxu1 %vm1655_vm1, %v6653_v20  ;;  %v5483_v2 = vrot.slane %v17882_v18, %v16005_v7  ;;  %v8496_v11 = vcombine.low %v8091_v34, %v8099_v46  ;;  %v5490_v57 = vrot.slane %v5476_v40, %v16005_v7  ;;  %v5500_v18 = vrot.slane %v5492_v62, %v16005_v7  ;;  %v14026_v20 = vld.sshfl [vmem:[%s16010_s13 + $0x41] sm:$0x3 pattern:$0x76325410] }
 0x15b   : > { %v17887_v14 = vadd.f32 %v2381_v0, %v17324_v6  ;;  %v14741_v63 = vpop.f32.mrb[49].mxu0  ;;  %14971 = vmatmul.mubr.msk.f32.gmra.mrb[154].mxu0 %vm1655_vm1, %v17655_v56  ;;  %v8480_v39 = vcombine.low %v8081_v12, %v8083_v27  ;;  %v17898_v6 = vrot.slane %v13831_v53, %v16005_v7  ;;  %v8487_v56 = vrot.slane %v8479_v54, %v16005_v7 }
 0x15c   : > { %14973 = vmatprep.mubr.msk.f32.mxu0 %vm15918_vm0, %v20268_v26  ;;  %v8098_v1 = vrot.slane %v8084_v29, %v16005_v7  ;;  %v5493_v29 = vcombine.low %v5116_v41, %v5118_v9  ;;  %15162 = vmatprep.mubr.msk.f32.mxu1 %vm15918_vm0, %v20268_v26  ;;  %v17923_v41 = vrot.slane %v5126_v50, %v16005_v7 }
 0x15d   : > { %v8494_v44 = vrot.slane %v8480_v39, %v16005_v7  ;;  %v5141_v0 = vcombine.high %v17898_v6, %v17898_v6  ;;  %v17927_v9 = vpop.f32.mrb[0].mxu1  ;;  %v8504_v63 = vrot.slane %v8496_v11, %v16005_v7  ;;  %v8108_v54 = vcombine.high %v13999_v35, %v13999_v35 }
 0x15e   : > { %v2386_v23 = vpop.f32.mrb[50].mxu0  ;;  %v8100_v53 = vcombine.high %v8098_v1, %v8098_v1  ;;  %v8115_v34 = vrot.slane %v13999_v35, %v16005_v7  ;;  %v14883_v40 = vpop.f32.mrb[1].mxu1  ;;  %v20367_v35 = vrot.slane %v17845_v10, %v16005_v7 }
 0x15f   : > { %v17908_v48 = vadd.f32 %v2386_v23, %v17346_v25  ;;  %v14744_v12 = vpop.f32.mrb[51].mxu0  ;;  %14974 = vmatmul.mubr.msk.f32.gmra.mrb[156].mxu0 %vm1655_vm1, %v17657_v38  ;;  %v8495_v25 = vcombine.low %v8487_v56, %v8494_v44  ;;  %v13842_v38 = vld.sshfl [vmem:[%s16010_s13 + $0xe9] sm:$0x3 pattern:$0x76325410]  ;;  %v5507_v56 = vrot.slane %v5493_v29, %v16005_v7  ;;  %v5510_v44 = vcombine.low %v5141_v0, %v17923_v41  ;;  %v14000_v0 = vld [vmem:[%s16010_s13 + $0x51] sm:$0xff] }
 0x160   : > { %14976 = vmatprep.mubr.msk.f32.mxu0 %vm15918_vm0, %v20268_v26  ;;  %v8497_v51 = vcombine.low %v8098_v1, %v8100_v53  ;;  %v5509_v46 = vcombine.low %v13842_v38, %v17898_v6  ;;  %v8123_v23 = vcombine.high %v8115_v34, %v8115_v34  ;;  %v8513_v29 = vcombine.low %v14026_v20, %v8115_v34  ;;  %v13932_v20 = vld [vmem:[%s16010_s13 + $0x30] sm:$0xff] }
 0x161   : > { %15163 = vmatmul.mubr.msk.f32.vlgmr.msra.gmra.mrb[90].mxu1 %vm1655_vm1, %v8495_v25  ;;  %v20368_v25 = vrot.slane %v17836_v33, %v16005_v7  ;;  %v17974_v10 = vcombine.low %v5500_v18, %v5507_v56  ;;  %v13832_v33 = vld [vmem:[%s16010_s13 + $0xf9] sm:$0xff]  ;;  %v5142_v18 = vcombine.high %v17923_v41, %v17923_v41  ;;  %v8125_v34 = vcombine.high %v14000_v0, %v14000_v0 }
 0x162   : > { %v2391_v27 = vpop.f32.mrb[52].mxu0  ;;  %v8511_v1 = vrot.slane %v8497_v51, %v16005_v7  ;;  %15165 = vmatprep.mubr.msk.f32.mxu1 %vm15918_vm0, %v20268_v26  ;;  %v8132_v40 = vrot.slane %v14000_v0, %v16005_v7  ;;  %v5143_v56 = vcombine.high %v13832_v33, %v13832_v33  ;;  %v5150_v41 = vrot.slane %v13832_v33, %v16005_v7 }
 0x163   : > { %v17934_v39 = vadd.f32 %v2391_v27, %v17375_v24  ;;  %v14747_v50 = vpop.f32.mrb[53].mxu0  ;;  %14977 = vmatmul.mubr.msk.f32.gmra.mrb[158].mxu0 %vm1655_vm1, %v17664_v45  ;;  %v8122_v24 = vrot.slane %v8108_v54, %v16005_v7  ;;  %v20366_v45 = vrot.slane %v17826_v55, %v16005_v7  ;;  %v17962_v11 = vcombine.low %v20368_v25, %v20367_v35  ;;  %v13933_v54 = vld [vmem:[%s16010_s13 + $0x38] sm:$0xff] }
 0x164   : > { %14979 = vmatprep.mubr.msk.f32.mxu0 %vm15918_vm0, %v20268_v26  ;;  %v8512_v12 = vcombine.low %v8504_v63, %v8511_v1  ;;  %v17954_v53 = vpop.f32.mrb[2].mxu1  ;;  %v17966_v55 = vcombine.low %v5483_v2, %v5490_v57  ;;  %v5524_v57 = vrot.slane %v5510_v44, %v16005_v7  ;;  %v6964_v1 = vcombine.high %v13932_v20, %v13932_v20 }
 0x165   : > { %v17951_v62 = vcombine.low %v20366_v45, %v17815_v37  ;;  %v17964_v37 = vcombine.low %v5466_v5, %v5473_v31  ;;  %v8514_v38 = vcombine.low %v8123_v23, %v8122_v24  ;;  %v14886_v51 = vpop.f32.mrb[3].mxu1  ;;  %v8521_v5 = vrot.slane %v8513_v29, %v16005_v7  ;;  %v17981_v31 = vld [vmem:[%s16010_s13 + $0x61] sm:$0xff] }
 0x166   : > { %v2396_v6 = vpop.f32.mrb[54].mxu0  ;;  %15166 = vmatmul.mubr.msk.f32.gmra.mrb[92].mxu1 %vm1655_vm1, %v8512_v12  ;;  %v8124_v2 = vcombine.high %v8122_v24, %v8122_v24  ;;  %v8156_v23 = vrot.slane %v17981_v31, %v16005_v7  ;;  %v8139_v12 = vrot.slane %v8125_v34, %v16005_v7  ;;  %v8140_v29 = vcombine.high %v8132_v40, %v8132_v40 }
 0x167   : > { %v17970_v27 = vadd.f32 %v2396_v6, %v17407_v60  ;;  %v14750_v63 = vpop.f32.mrb[55].mxu0  ;;  %14980 = vmatmul.mubr.msk.f32.gmra.mrb[160].mxu0 %vm1655_vm1, %v17776_v13  ;;  %v5517_v60 = vrot.slane %v5509_v46, %v16005_v7  ;;  %15168 = vmatprep.mubr.msk.f32.mxu1 %vm15918_vm0, %v20268_v26  ;;  %v8528_v13 = vrot.slane %v8514_v38, %v16005_v7  ;;  %v14027_v38 = vld.sshfl [vmem:[%s16010_s13 + $0x59] sm:$0x3 pattern:$0x76325410] }
 0x168   : > { %14982 = vmatprep.mubr.msk.f32.mxu0 %vm15918_vm0, %v20268_v26  ;;  %v17996_v45 = vpop.f32.mrb[4].mxu1  ;;  %v6971_v35 = vrot.slane %v13932_v20, %v16005_v7  ;;  %v6981_v25 = vcombine.high %v13933_v54, %v13933_v54  ;;  %v8141_v51 = vcombine.high %v8139_v12, %v8139_v12  ;;  %v8164_v63 = vcombine.high %v8156_v23, %v8156_v23 }
 0x169   : > { %v8529_v46 = vcombine.low %v8521_v5, %v8528_v13  ;;  %v14889_v6 = vpop.f32.mrb[5].mxu1  ;;  %v18010_v0 = vcombine.low %v5517_v60, %v5524_v57  ;;  %v5157_v5 = vrot.slane %v5143_v56, %v16005_v7  ;;  %v6978_v13 = vrot.slane %v6964_v1, %v16005_v7 }
 0x16a   : > { %v2401_v50 = vpop.f32.mrb[56].mxu0  ;;  %v6988_v20 = vrot.slane %v13933_v54, %v16005_v7  ;;  %v8547_v1 = vcombine.low %v8141_v51, %v14027_v38  ;;  %v13843_v51 = vld.sshfl [vmem:[%s16010_s13 + $0x101] sm:$0x3 pattern:$0x76325410] }
 0x16b   : > { %v17999_v24 = vadd.f32 %v2401_v50, %v17427_v59  ;;  %v14753_v44 = vpop.f32.mrb[57].mxu0  ;;  %14983 = vmatmul.mubr.msk.f32.gmra.mrb[162].mxu0 %vm1655_vm1, %v17778_v15  ;;  %15169 = vmatmul.mubr.msk.f32.gmra.mrb[94].mxu1 %vm1655_vm1, %v8529_v46  ;;  %v8530_v59 = vcombine.low %v8124_v2, %v8132_v40  ;;  %v8531_v15 = vcombine.low %v8140_v29, %v8139_v12  ;;  %v18019_v50 = vld [vmem:[%s16010_s13 + $0x69] sm:$0xff] }
 0x16c   : > { %14985 = vmatprep.mubr.msk.f32.mxu0 %vm15918_vm0, %v20268_v26  ;;  %15171 = vmatprep.mubr.msk.f32.mxu1 %vm15918_vm0, %v20268_v26  ;;  %v18021_v2 = vpop.f32.mrb[6].mxu1  ;;  %v5158_v40 = vcombine.high %v5150_v41, %v5150_v41  ;;  %v5159_v54 = vcombine.high %v5157_v5, %v5157_v5  ;;  %v6979_v44 = vcombine.high %v6971_v35, %v6971_v35 }
 0x16d   : > { %v8538_v34 = vrot.slane %v8530_v59, %v16005_v7  ;;  %v8545_v56 = vrot.slane %v8531_v15, %v16005_v7  ;;  %v14892_v46 = vpop.f32.mrb[7].mxu1  ;;  %v6995_v12 = vrot.slane %v6981_v25, %v16005_v7  ;;  %v8548_v29 = vcombine.low %v8156_v23, %v8164_v63 }
 0x16e   : > { %v2406_v33 = vpop.f32.mrb[58].mxu0  ;;  %v8555_v6 = vrot.slane %v8547_v1, %v16005_v7  ;;  %v8173_v59 = vrot.slane %v18019_v50, %v16005_v7  ;;  %v18037_v15 = vcombine.low %v5142_v18, %v5150_v41  ;;  %v18051_v41 = vld [vmem:[%s16010_s13 + $0x79] sm:$0xff] }
 0x16f   : > { %v18024_v60 = vadd.f32 %v2406_v33, %v17449_v28  ;;  %v14756_v57 = vpop.f32.mrb[59].mxu0  ;;  %14986 = vmatmul.mubr.msk.f32.gmra.mrb[164].mxu0 %vm1655_vm1, %v17789_v21  ;;  %v8546_v28 = vcombine.low %v8538_v34, %v8545_v56  ;;  %v8149_v21 = vcombine.high %v17981_v31, %v17981_v31  ;;  %v6980_v33 = vcombine.high %v6978_v13, %v6978_v13 }
 0x170   : > { %14988 = vmatprep.mubr.msk.f32.mxu0 %vm15918_vm0, %v20268_v26  ;;  %v6996_v57 = vcombine.high %v6988_v20, %v6988_v20  ;;  %v8562_v46 = vrot.slane %v8548_v29, %v16005_v7  ;;  %v18041_v25 = vpop.f32.mrb[8].mxu1  ;;  %v8181_v18 = vcombine.high %v8173_v59, %v8173_v59  ;;  %v5527_v56 = vcombine.low %v5158_v40, %v5157_v5 }
 0x171   : > { %20369 = vst [vmem:[#allocation8_spill] sm:$0xff] %v18024_v60  ;;  %15172 = vmatmul.mubr.msk.f32.gmra.mrb[96].mxu1 %vm1655_vm1, %v8546_v28  ;;  %v8163_v31 = vrot.slane %v8149_v21, %v16005_v7  ;;  %v14895_v34 = vpop.f32.mrb[9].mxu1  ;;  %v6997_v1 = vcombine.high %v6995_v12, %v6995_v12  ;;  %v18057_v29 = vcombine.low %v5159_v54, %v13843_v51  ;;  %v13935_v28 = vld [vmem:[%s16010_s13 + $0x48] sm:$0xff] }
 0x172   : > { %v2411_v38 = vpop.f32.mrb[60].mxu0  ;;  %15174 = vmatprep.mubr.msk.f32.mxu1 %vm15918_vm0, %v20268_v26  ;;  %v18062_v60 = vcombine.low %v6988_v20, %v6996_v57  ;;  %v14028_v34 = vld.sshfl [vmem:[%s16010_s13 + $0x71] sm:$0x3 pattern:$0x76325410]  ;;  %v8166_v5 = vcombine.high %v18019_v50, %v18019_v50  ;;  %v18069_v40 = vrot.slane %v18051_v41, %v16005_v7  ;;  %v7012_v51 = vrot.slane %v13935_v28, %v16005_v7 }
 0x173   : > { %v18044_v23 = vadd.f32 %v2411_v38, %v17467_v42  ;;  %v14759_v63 = vpop.f32.mrb[61].mxu0  ;;  %14989 = vmatmul.mubr.msk.f32.gmra.mrb[166].mxu0 %vm1655_vm1, %v17791_v4  ;;  %v8563_v42 = vcombine.low %v8555_v6, %v8562_v46  ;;  %v18059_v4 = vcombine.low %v6971_v35, %v6979_v44  ;;  %v8165_v21 = vcombine.high %v8163_v31, %v8163_v31 }
 0x174   : > { %14991 = vmatprep.mubr.msk.f32.mxu0 %vm15918_vm0, %v20268_v26  ;;  %v8565_v38 = vcombine.low %v8173_v59, %v8181_v18  ;;  %v18071_v6 = vpop.f32.mrb[10].mxu1  ;;  %v7394_v44 = vcombine.low %v6995_v12, %v6997_v1  ;;  %v7005_v59 = vcombine.high %v13935_v28, %v13935_v28  ;;  %v8582_v57 = vcombine.low %v14028_v34, %v18069_v40 }
 0x175   : > { %20370 = vst [vmem:[#allocation4_spill] sm:$0xff] %v18044_v23  ;;  %v7377_v23 = vcombine.low %v6978_v13, %v6980_v33  ;;  %15175 = vmatmul.mubr.msk.f32.gmra.mrb[98].mxu1 %vm1655_vm1, %v8563_v42  ;;  %v8564_v13 = vcombine.low %v8163_v31, %v8165_v21  ;;  %v14898_v50 = vpop.f32.mrb[11].mxu1  ;;  %v8180_v33 = vrot.slane %v8166_v5, %v16005_v7  ;;  %v13962_v42 = vld.sshfl [vmem:[%s16010_s13 + $0x40] sm:$0x3 pattern:$0x76325410] }
 0x176   : > { %v2416_v63 = vpop.f32.mrb[62].mxu0  ;;  %v8579_v20 = vrot.slane %v8565_v38, %v16005_v7  ;;  %15177 = vmatprep.mubr.msk.f32.mxu1 %vm15918_vm0, %v20268_v26  ;;  %v5541_v12 = vrot.slane %v5527_v56, %v16005_v7  ;;  %v7384_v18 = vrot.slane %v18059_v4, %v16005_v7  ;;  %v7401_v56 = vrot.slane %v18062_v60, %v16005_v7  ;;  %v13936_v38 = vld [vmem:[%s16010_s13 + $0x50] sm:$0xff]  ;;  %v14006_v5 = vld [vmem:[%s16010_s13 + $0x81] sm:$0xff] }
 0x177   : > { %v18074_v35 = vadd.f32 %v2416_v63, %v17497_v19  ;;  %v14762_v54 = vpop.f32.mrb[63].mxu0  ;;  %14992 = vmatmul.mubr.msk.f32.gmra.mrb[168].mxu0 %vm1655_vm1, %v17843_v58  ;;  %v5534_v19 = vrot.slane %v18037_v15, %v16005_v7  ;;  %v8572_v58 = vrot.slane %v8564_v13, %v16005_v7  ;;  %v7391_v1 = vrot.slane %v7377_v23, %v16005_v7 }
 0x178   : > { %14994 = vmatprep.mubr.msk.f32.mxu0 %vm15918_vm0, %v20268_v26  ;;  %v18097_v15 = vpop.f32.mrb[12].mxu1  ;;  %v8182_v34 = vcombine.high %v8180_v33, %v8180_v33  ;;  %v7408_v23 = vrot.slane %v7394_v44, %v16005_v7  ;;  %v7020_v54 = vcombine.high %v7012_v51, %v7012_v51  ;;  %v7410_v13 = vcombine.low %v13962_v42, %v7012_v51 }
 0x179   : > { %v8580_v63 = vcombine.low %v8572_v58, %v8579_v20  ;;  %v14901_v4 = vpop.f32.mrb[13].mxu1  ;;  %v8596_v20 = vrot.slane %v8582_v57, %v16005_v7  ;;  %v8205_v50 = vcombine.high %v18069_v40, %v18069_v40  ;;  %v7022_v44 = vcombine.high %v13936_v38, %v13936_v38 }
 0x17a   : > { %v2421_v46 = vpop.f32.mrb[64].mxu0  ;;  %v8581_v60 = vcombine.low %v8180_v33, %v8182_v34  ;;  %v18133_v40 = vcombine.low %v7384_v18, %v7391_v1  ;;  %v8207_v42 = vcombine.high %v14006_v5, %v14006_v5  ;;  %v18149_v18 = vld [vmem:[%s16010_s13 + $0x68] sm:$0xff] }
 0x17b   : > { %v18100_v28 = vadd.f32 %v2421_v46, %v17534_v47  ;;  %v14765_v21 = vpop.f32.mrb[65].mxu0  ;;  %14995 = vmatmul.mubr.msk.f32.gmra.mrb[170].mxu0 %vm1655_vm1, %v17951_v62  ;;  %v18112_v47 = vrot.slane %v7005_v59, %v16005_v7  ;;  %v8190_v62 = vcombine.high %v18051_v41, %v18051_v41  ;;  %15178 = vmatmul.mubr.msk.f32.gmra.mrb[100].mxu1 %vm1655_vm1, %v8580_v63 }
 0x17c   : > { %14997 = vmatprep.mubr.msk.f32.mxu0 %vm15918_vm0, %v20268_v26  ;;  %v18120_v46 = vcombine.low %v5534_v19, %v5541_v12  ;;  %15180 = vmatprep.mubr.msk.f32.mxu1 %vm15918_vm0, %v20268_v26  ;;  %v8214_v41 = vrot.slane %v14006_v5, %v16005_v7  ;;  %v18126_v51 = vpop.f32.mrb[14].mxu1  ;;  %v13938_v19 = vld [vmem:[%s16010_s13 + $0x60] sm:$0xff]  ;;  %v8589_v12 = vrot.slane %v8581_v60, %v16005_v7 }
 0x17d   : > { %v8204_v59 = vrot.slane %v8190_v62, %v16005_v7  ;;  %v14904_v21 = vpop.f32.mrb[15].mxu1  ;;  %v18139_v63 = vcombine.low %v7401_v56, %v7408_v23  ;;  %v18142_v34 = vcombine.low %v7020_v54, %v18112_v47  ;;  %v18145_v62 = vrot.slane %v7410_v13, %v16005_v7 }
 0x17e   : > { %v2426_v58 = vpop.f32.mrb[66].mxu0  ;;  %v8597_v1 = vcombine.low %v8589_v12, %v8596_v20  ;;  %v8221_v23 = vrot.slane %v8207_v42, %v16005_v7  ;;  %v8222_v54 = vcombine.high %v8214_v41, %v8214_v41 }
 0x17f   : > { %v18129_v33 = vadd.f32 %v2426_v58, %v17556_v61  ;;  %v14768_v57 = vpop.f32.mrb[67].mxu0  ;;  %14998 = vmatmul.mubr.msk.f32.gmra.mrb[172].mxu0 %vm1655_vm1, %v17962_v11  ;;  %v7046_v61 = vcombine.high %v13938_v19, %v13938_v19  ;;  %v8206_v4 = vcombine.high %v8204_v59, %v8204_v59  ;;  %v7029_v11 = vrot.slane %v13936_v38, %v16005_v7 }
 0x180   : > { %15000 = vmatprep.mubr.msk.f32.mxu0 %vm15918_vm0, %v20268_v26  ;;  %v8598_v5 = vcombine.low %v8205_v50, %v8204_v59  ;;  %v7036_v58 = vrot.slane %v7022_v44, %v16005_v7  ;;  %v18153_v57 = vpop.f32.mrb[16].mxu1  ;;  %v7053_v38 = vrot.slane %v13938_v19, %v16005_v7  ;;  %15181 = vmatmul.mubr.msk.f32.gmra.mrb[102].mxu1 %vm1655_vm1, %v8597_v1  ;;  %v14008_v50 = vld [vmem:[%s16010_s13 + $0x91] sm:$0xff] }
 0x181   : > { %20371 = vst [vmem:[#allocation10_spill] sm:$0xff] %v18129_v33  ;;  %v8599_v56 = vcombine.low %v8206_v4, %v8214_v41  ;;  %20372 = vst [vmem:[#allocation12_spill] sm:$0xff] %v18153_v57  ;;  %v14907_v44 = vpop.f32.mrb[17].mxu1  ;;  %v7060_v59 = vrot.slane %v7046_v61, %v16005_v7  ;;  %15183 = vmatprep.mubr.msk.f32.mxu1 %vm15918_vm0, %v20268_v26  ;;  %v7021_v19 = vcombine.high %v18112_v47, %v18112_v47 }
 0x182   : > { %v2431_v60 = vpop.f32.mrb[68].mxu0  ;;  %v8606_v20 = vrot.slane %v8598_v5, %v16005_v7  ;;  %v14029_v41 = vld.sshfl [vmem:[%s16010_s13 + $0x89] sm:$0x3 pattern:$0x76325410]  ;;  %v7037_v12 = vcombine.high %v7029_v11, %v7029_v11  ;;  %v8223_v42 = vcombine.high %v8221_v23, %v8221_v23  ;;  %v8615_v4 = vcombine.low %v8222_v54, %v8221_v23  ;;  %v14009_v54 = vld [vmem:[%s16010_s13 + $0x99] sm:$0xff] }
 0x183   : > { %v18156_v13 = vadd.f32 %v2431_v60, %v17576_v52  ;;  %v14771_v21 = vpop.f32.mrb[69].mxu0  ;;  %15001 = vmatmul.mubr.msk.f32.gmra.mrb[174].mxu0 %vm1655_vm1, %v17964_v37  ;;  %v7070_v52 = vrot.slane %v18149_v18, %v16005_v7  ;;  %v8613_v37 = vrot.slane %v8599_v56, %v16005_v7  ;;  %v13963_v5 = vld.sshfl [vmem:[%s16010_s13 + $0x58] sm:$0x3 pattern:$0x76325410]  ;;  %v7038_v60 = vcombine.high %v7036_v58, %v7036_v58 }
 0x184   : > { %15003 = vmatprep.mubr.msk.f32.mxu0 %vm15918_vm0, %v20268_v26  ;;  %v8231_v21 = vcombine.high %v14008_v50, %v14008_v50  ;;  %v8238_v44 = vrot.slane %v14008_v50, %v16005_v7  ;;  %v18177_v31 = vpop.f32.mrb[18].mxu1  ;;  %v7061_v47 = vcombine.high %v7053_v38, %v7053_v38  ;;  %v8616_v33 = vcombine.low %v8223_v42, %v14029_v41 }
 0x185   : > { %20373 = vst [vmem:[#allocation13_spill] sm:$0xff] %v18156_v13  ;;  %v8614_v61 = vcombine.low %v8606_v20, %v8613_v37  ;;  %20374 = vst [vmem:[#allocation5_spill] sm:$0xff] %v18177_v31  ;;  %v8623_v23 = vrot.slane %v8615_v4, %v16005_v7  ;;  %v14910_v57 = vpop.f32.mrb[19].mxu1  ;;  %v7062_v20 = vcombine.high %v7060_v59, %v7060_v59 }
 0x186   : > { %v2436_v1 = vpop.f32.mrb[70].mxu0  ;;  %v7078_v50 = vcombine.high %v7070_v52, %v7070_v52  ;;  %v7425_v37 = vrot.slane %v18142_v34, %v16005_v7  ;;  %v8630_v41 = vrot.slane %v8616_v33, %v16005_v7  ;;  %v8246_v42 = vcombine.high %v8238_v44, %v8238_v44 }
 0x187   : > { %v18180_v13 = vadd.f32 %v2436_v1, %v17594_v17  ;;  %v14774_v56 = vpop.f32.mrb[71].mxu0  ;;  %15004 = vmatmul.mubr.msk.f32.gmra.mrb[176].mxu0 %vm1655_vm1, %v17966_v55  ;;  %15184 = vmatmul.mubr.msk.f32.gmra.mrb[104].mxu1 %vm1655_vm1, %v8614_v61  ;;  %v8245_v17 = vrot.slane %v8231_v21, %v16005_v7  ;;  %v7427_v55 = vcombine.low %v7021_v19, %v7029_v11 }
 0x188   : > { %15006 = vmatprep.mubr.msk.f32.mxu0 %vm15918_vm0, %v20268_v26  ;;  %15186 = vmatprep.mubr.msk.f32.mxu1 %vm15918_vm0, %v20268_v26  ;;  %v7428_v4 = vcombine.low %v7037_v12, %v7036_v58  ;;  %v18195_v1 = vcombine.low %v7038_v60, %v13963_v5  ;;  %v18198_v56 = vld [vmem:[%s16010_s13 + $0x78] sm:$0xff]  ;;  %v8248_v61 = vcombine.high %v14009_v54, %v14009_v54  ;;  %v18200_v31 = vpop.f32.mrb[20].mxu1 }
 0x189   : > { %20375 = vst [vmem:[#allocation11_spill] sm:$0xff] %v18180_v13  ;;  %v8247_v13 = vcombine.high %v8245_v17, %v8245_v17  ;;  %20376 = vst [vmem:[#allocation6_spill] sm:$0xff] %v18200_v31  ;;  %v7063_v33 = vcombine.high %v18149_v18, %v18149_v18  ;;  %v8631_v11 = vcombine.low %v8623_v23, %v8630_v41  ;;  %v14913_v19 = vpop.f32.mrb[21].mxu1 }
 0x18a   : > { %v2441_v57 = vpop.f32.mrb[72].mxu0  ;;  %v8632_v58 = vcombine.low %v8238_v44, %v8246_v42  ;;  %v7445_v12 = vcombine.low %v7053_v38, %v7061_v47  ;;  %v7461_v5 = vcombine.low %v7060_v59, %v7062_v20  ;;  %v7462_v60 = vcombine.low %v7070_v52, %v7078_v50  ;;  %v13964_v59 = vld.sshfl [vmem:[%s16010_s13 + $0x70] sm:$0x3 pattern:$0x76325410] }
 0x18b   : > { %v18203_v21 = vadd.f32 %v2441_v57, %v17611_v8  ;;  %v14777_v34 = vpop.f32.mrb[73].mxu0  ;;  %15007 = vmatmul.mubr.msk.f32.gmra.mrb[178].mxu0 %vm1655_vm1, %v17974_v10  ;;  %v8633_v31 = vcombine.low %v8245_v17, %v8247_v13  ;;  %v18213_v8 = vrot.slane %v18198_v56, %v16005_v7  ;;  %15187 = vmatmul.mubr.msk.f32.gmra.mrb[106].mxu1 %vm1655_vm1, %v8631_v11  ;;  %v14011_v42 = vld [vmem:[%s16010_s13 + $0xa9] sm:$0xff] }
 0x18c   : > { %15009 = vmatprep.mubr.msk.f32.mxu0 %vm15918_vm0, %v20268_v26  ;;  %v8640_v10 = vrot.slane %v8632_v58, %v16005_v7  ;;  %v8255_v18 = vrot.slane %v14009_v54, %v16005_v7  ;;  %v8262_v44 = vrot.slane %v8248_v61, %v16005_v7  ;;  %v7435_v41 = vrot.slane %v7427_v55, %v16005_v7  ;;  %v18227_v47 = vpop.f32.mrb[22].mxu1 }
 0x18d   : > { %v7442_v38 = vrot.slane %v7428_v4, %v16005_v7  ;;  %v7452_v13 = vrot.slane %v18195_v1, %v16005_v7  ;;  %15189 = vmatprep.mubr.msk.f32.mxu1 %vm15918_vm0, %v20268_v26  ;;  %v8647_v52 = vrot.slane %v8633_v31, %v16005_v7  ;;  %v7077_v50 = vrot.slane %v7063_v33, %v16005_v7  ;;  %v14916_v57 = vpop.f32.mrb[23].mxu1 }
 0x18e   : > { %v2446_v23 = vpop.f32.mrb[74].mxu0  ;;  %v8263_v17 = vcombine.high %v8255_v18, %v8255_v18  ;;  %v8264_v55 = vcombine.high %v8262_v44, %v8262_v44  ;;  %v7459_v31 = vrot.slane %v7445_v12, %v16005_v7  ;;  %v7469_v4 = vrot.slane %v7461_v5, %v16005_v7  ;;  %v14030_v12 = vld.sshfl [vmem:[%s16010_s13 + $0xa1] sm:$0x3 pattern:$0x76325410] }
 0x18f   : > { %v18230_v54 = vadd.f32 %v2446_v23, %v17644_v30  ;;  %v14780_v20 = vpop.f32.mrb[75].mxu0  ;;  %15010 = vmatmul.mubr.msk.f32.gmra.mrb[180].mxu0 %vm1655_vm1, %v18010_v0  ;;  %v7476_v30 = vrot.slane %v7462_v60, %v16005_v7  ;;  %v8648_v1 = vcombine.low %v8640_v10, %v8647_v52  ;;  %v7479_v61 = vcombine.low %v13964_v59, %v18213_v8 }
 0x190   : > { %15012 = vmatprep.mubr.msk.f32.mxu0 %vm15918_vm0, %v20268_v26  ;;  %v7087_v0 = vcombine.high %v18198_v56, %v18198_v56  ;;  %v8649_v34 = vcombine.low %v8255_v18, %v8263_v17  ;;  %v8650_v33 = vcombine.low %v8262_v44, %v8264_v55  ;;  %v18245_v58 = vcombine.low %v18145_v62, %v7425_v37  ;;  %v18252_v10 = vpop.f32.mrb[24].mxu1  ;;  %v13942_v37 = vld [vmem:[%s16010_s13 + $0x80] sm:$0xff]  ;;  %v13944_v20 = vld [vmem:[%s16010_s13 + $0x90] sm:$0xff] }
 0x191   : > { %v18247_v19 = vcombine.low %v7435_v41, %v7442_v38  ;;  %15190 = vmatmul.mubr.msk.f32.gmra.mrb[108].mxu1 %vm1655_vm1, %v8648_v1  ;;  %v8272_v5 = vcombine.high %v14011_v42, %v14011_v42  ;;  %v8279_v60 = vrot.slane %v14011_v42, %v16005_v7  ;;  %v7079_v62 = vcombine.high %v7077_v50, %v7077_v50  ;;  %v14919_v44 = vpop.f32.mrb[25].mxu1 }
 0x192   : > { %v2451_v11 = vpop.f32.mrb[76].mxu0  ;;  %15192 = vmatprep.mubr.msk.f32.mxu1 %vm15918_vm0, %v20268_v26  ;;  %v8657_v18 = vrot.slane %v8649_v34, %v16005_v7  ;;  %v18265_v41 = vcombine.low %v7452_v13, %v7459_v31  ;;  %v8664_v38 = vrot.slane %v8650_v33, %v16005_v7  ;;  %v18272_v59 = vrot.slane %v7479_v61, %v16005_v7 }
 0x193   : > { %v18255_v23 = vadd.f32 %v2451_v11, %v17674_v36  ;;  %v14783_v56 = vpop.f32.mrb[77].mxu0  ;;  %15013 = vmatmul.mubr.msk.f32.gmra.mrb[182].mxu0 %vm1655_vm1, %v18120_v46  ;;  %v18267_v36 = vcombine.low %v7469_v4, %v7476_v30  ;;  %v8286_v46 = vrot.slane %v8272_v5, %v16005_v7  ;;  %v7101_v52 = vrot.slane %v7087_v0, %v16005_v7  ;;  %v14012_v30 = vld [vmem:[%s16010_s13 + $0xb1] sm:$0xff] }
 0x194   : > { %15015 = vmatprep.mubr.msk.f32.mxu0 %vm15918_vm0, %v20268_v26  ;;  %v8287_v17 = vcombine.high %v8279_v60, %v8279_v60  ;;  %v8666_v55 = vcombine.low %v14030_v12, %v8279_v60  ;;  %v7102_v13 = vcombine.high %v18213_v8, %v18213_v8  ;;  %v18279_v57 = vrot.slane %v13942_v37, %v16005_v7  ;;  %v18282_v1 = vpop.f32.mrb[26].mxu1  ;;  %v18295_v12 = vld [vmem:[%s16010_s13 + $0xc1] sm:$0xff] }
 0x195   : > { %v7104_v31 = vcombine.high %v13942_v37, %v13942_v37  ;;  %v8665_v4 = vcombine.low %v8657_v18, %v8664_v38  ;;  %v20377_v34 = vrot.slane %v18057_v29, %v16005_v7  ;;  %v18291_v33 = vcombine.low %v7077_v50, %v7079_v62  ;;  %v14922_v5 = vpop.f32.mrb[27].mxu1  ;;  %v14100_v50 = vld [vmem:[%s20184_s1 + $0x40] sm:$0xff]  ;;  %v13945_v62 = vld [vmem:[%s16010_s13 + $0x98] sm:$0xff] }
 0x196   : > { %v2456_v42 = vpop.f32.mrb[78].mxu0  ;;  %v8667_v8 = vcombine.low %v8287_v17, %v8286_v46  ;;  %v8674_v11 = vrot.slane %v8666_v55, %v16005_v7  ;;  %v7128_v60 = vcombine.high %v13944_v20, %v13944_v20  ;;  %v8288_v29 = vcombine.high %v8286_v46, %v8286_v46 }
 0x197   : > { %v18285_v61 = vadd.f32 %v2456_v42, %v17700_v43  ;;  %v14786_v0 = vpop.f32.mrb[79].mxu0  ;;  %15016 = vmatmul.mubr.msk.f32.gmra.mrb[184].mxu0 %vm1655_vm1, %v20377_v34  ;;  %v7119_v43 = vcombine.high %v18279_v57, %v18279_v57  ;;  %15193 = vmatmul.mubr.msk.f32.gmra.mrb[110].mxu1 %vm1655_vm1, %v8665_v4  ;;  %v7103_v56 = vcombine.high %v7101_v52, %v7101_v52 }
 0x198   : > { %15091 = vmatprep.mubr.msk.f32.mxu0 %vm15918_vm0, %v20268_v26  ;;  %15195 = vmatprep.mubr.msk.f32.mxu1 %vm15918_vm0, %v20268_v26  ;;  %v8681_v37 = vrot.slane %v8667_v8, %v16005_v7  ;;  %v8289_v18 = vcombine.high %v14012_v30, %v14012_v30  ;;  %v8296_v44 = vrot.slane %v14012_v30, %v16005_v7  ;;  %v18316_v4 = vpop.f32.mrb[28].mxu1 }
 0x199   : > { %v18310_v17 = vcombine.low %v7102_v13, %v7101_v52  ;;  %v7118_v55 = vrot.slane %v7104_v31, %v16005_v7  ;;  %v7135_v46 = vrot.slane %v13944_v20, %v16005_v7  ;;  %v8320_v42 = vrot.slane %v18295_v12, %v16005_v7  ;;  %v14925_v31 = vpop.f32.mrb[29].mxu1 }
 0x19a   : > { %v2461_v38 = vpop.f32.mrb[80].mxu0  ;;  %v8682_v30 = vcombine.low %v8674_v11, %v8681_v37  ;;  %v8303_v52 = vrot.slane %v8289_v18, %v16005_v7  ;;  %v8304_v13 = vcombine.high %v8296_v44, %v8296_v44  ;;  %v7142_v20 = vrot.slane %v7128_v60, %v16005_v7 }
 0x19b   : > { %v18319_v0 = vadd.f32 %v2461_v38, %v17725_v16  ;;  %v14789_v34 = vpop.f32.mrb[81].mxu0  ;;  %15092 = vmatmul.mubr.msk.f32.vlgmr.msra.gmra.mrb[186].mxu0 %vm1655_vm1, %v18133_v40  ;;  %v7145_v8 = vcombine.high %v13945_v62, %v13945_v62  ;;  %v8683_v5 = vcombine.low %v8288_v29, %v8296_v44  ;;  %v14031_v16 = vld.sshfl [vmem:[%s16010_s13 + $0xb9] sm:$0x3 pattern:$0x76325410]  ;;  %v8328_v37 = vcombine.high %v8320_v42, %v8320_v42  ;;  %v18340_v44 = vld [vmem:[%s16010_s13 + $0xc9] sm:$0xff] }
 0x19c   : > { %15232 = vmatpush3.msra.mxu0 %v14100_v50  ;;  %15094 = vmatprep.mubr.msk.f32.mxu0 %vm15918_vm0, %v20268_v26  ;;  %v8684_v40 = vcombine.low %v8304_v13, %v8303_v52  ;;  %v8305_v11 = vcombine.high %v8303_v52, %v8303_v52  ;;  %v18332_v50 = vcombine.low %v7103_v56, %v18279_v57  ;;  %v18342_v31 = vpop.f32.mrb[30].mxu1  ;;  %v13965_v57 = vld.sshfl [vmem:[%s16010_s13 + $0x88] sm:$0x3 pattern:$0x76325410] }
 0x19d   : > { %20378 = vst [vmem:[#allocation14_spill] sm:$0xff] %v18319_v0  ;;  %15196 = vmatmul.mubr.msk.f32.gmra.mrb[112].mxu1 %vm1655_vm1, %v8682_v30  ;;  %v7120_v60 = vcombine.high %v7118_v55, %v7118_v55  ;;  %v8691_v29 = vrot.slane %v8683_v5, %v16005_v7  ;;  %20379 = vst [vmem:[#allocation20_spill] sm:$0xff] %v18342_v31  ;;  %v7143_v56 = vcombine.high %v7135_v46, %v7135_v46  ;;  %v14928_v38 = vpop.f32.mrb[31].mxu1 }
 0x19e   : > { %v2466_v18 = vpop.f32.mrb[82].mxu0  ;;  %15198 = vmatprep.mubr.msk.f32.mxu1 %vm15918_vm0, %v20268_v26  ;;  %v8698_v13 = vrot.slane %v8684_v40, %v16005_v7  ;;  %v8700_v34 = vcombine.low %v8305_v11, %v14031_v16  ;;  %v7144_v5 = vcombine.high %v7142_v20, %v7142_v20  ;;  %v7152_v0 = vrot.slane %v13945_v62, %v16005_v7 }
 0x19f   : > { %v18345_v30 = vadd.f32 %v2466_v18, %v17744_v32  ;;  %v14792_v52 = vpop.f32.mrb[83].mxu0  ;;  %15095 = vmatmul.mubr.msk.f32.gmra.mrb[188].mxu0 %vm1655_vm1, %v18139_v63  ;;  %v7159_v32 = vrot.slane %v7145_v8, %v16005_v7  ;;  %v8701_v18 = vcombine.low %v8320_v42, %v8328_v37  ;;  %v8313_v63 = vcombine.high %v18295_v12, %v18295_v12  ;;  %v13947_v12 = vld [vmem:[%s16010_s13 + $0xa8] sm:$0xff] }
 0x1a0   : > { %15097 = vmatprep.mubr.msk.f32.mxu0 %vm15918_vm0, %v20268_v26  ;;  %v8699_v52 = vcombine.low %v8691_v29, %v8698_v13  ;;  %v8337_v16 = vrot.slane %v18340_v44, %v16005_v7  ;;  %v7510_v40 = vrot.slane %v18332_v50, %v16005_v7  ;;  %v7512_v11 = vcombine.low %v7119_v43, %v7118_v55  ;;  %v18363_v8 = vpop.f32.mrb[32].mxu1  ;;  %v18374_v43 = vld [vmem:[%s16010_s13 + $0xd9] sm:$0xff] }
 0x1a1   : > { %20380 = vst [vmem:[#allocation15_spill] sm:$0xff] %v18345_v30  ;;  %v8708_v30 = vrot.slane %v8700_v34, %v16005_v7  ;;  %v7513_v62 = vcombine.low %v7120_v60, %v13965_v57  ;;  %v8715_v31 = vrot.slane %v8701_v18, %v16005_v7  ;;  %v8327_v34 = vrot.slane %v8313_v63, %v16005_v7  ;;  %v14931_v55 = vpop.f32.mrb[33].mxu1 }
 0x1a2   : > { %v2471_v38 = vpop.f32.mrb[84].mxu0  ;;  %15199 = vmatmul.mubr.msk.f32.gmra.mrb[114].mxu1 %vm1655_vm1, %v8699_v52  ;;  %v8345_v50 = vcombine.high %v8337_v16, %v8337_v16  ;;  %v7529_v60 = vcombine.low %v7135_v46, %v7143_v56  ;;  %v7161_v57 = vcombine.high %v7159_v32, %v7159_v32  ;;  %v7169_v63 = vcombine.high %v13947_v12, %v13947_v12 }
 0x1a3   : > { %v18366_v42 = vadd.f32 %v2471_v38, %v17768_v49  ;;  %v14795_v37 = vpop.f32.mrb[85].mxu0  ;;  %15098 = vmatmul.mubr.msk.f32.gmra.mrb[190].mxu0 %vm1655_vm1, %v18245_v58  ;;  %v7530_v49 = vcombine.low %v7142_v20, %v7144_v5  ;;  %15201 = vmatprep.mubr.msk.f32.mxu1 %vm15918_vm0, %v20268_v26  ;;  %v8716_v29 = vcombine.low %v8708_v30, %v8715_v31 }
 0x1a4   : > { %15100 = vmatprep.mubr.msk.f32.mxu0 %vm15918_vm0, %v20268_v26  ;;  %v7160_v58 = vcombine.high %v7152_v0, %v7152_v0  ;;  %v8329_v13 = vcombine.high %v8327_v34, %v8327_v34  ;;  %v8718_v18 = vcombine.low %v8337_v16, %v8345_v50  ;;  %v7176_v38 = vrot.slane %v13947_v12, %v16005_v7  ;;  %v14032_v37 = vld.sshfl [vmem:[%s16010_s13 + $0xd1] sm:$0x3 pattern:$0x76325410] }
 0x1a5   : > { %v8330_v55 = vcombine.high %v18340_v44, %v18340_v44  ;;  %v18386_v46 = vrot.slane %v18374_v43, %v16005_v7  ;;  %v7520_v44 = vrot.slane %v7512_v11, %v16005_v7  ;;  %v7527_v5 = vrot.slane %v7513_v62, %v16005_v7 }
 0x1a6   : > { %v2476_v52 = vpop.f32.mrb[86].mxu0  ;;  %15202 = vmatmul.mubr.msk.f32.gmra.mrb[116].mxu1 %vm1655_vm1, %v8716_v29  ;;  %v8717_v30 = vcombine.low %v8327_v34, %v8329_v13  ;;  %v8732_v56 = vrot.slane %v8718_v18, %v16005_v7  ;;  %v7537_v16 = vrot.slane %v7529_v60, %v16005_v7  ;;  %v20382_v11 = vrot.slane %v18291_v33, %v16005_v7  ;;  %v14018_v33 = vld [vmem:[%s16010_s13 + $0xe1] sm:$0xff] }
 0x1a7   : > { %v18389_v20 = vadd.f32 %v2476_v52, %v17797_v22  ;;  %v14798_v31 = vpop.f32.mrb[87].mxu0  ;;  %15101 = vmatmul.mubr.msk.f32.gmra.mrb[192].mxu0 %vm1655_vm1, %v18247_v19  ;;  %15204 = vmatprep.mubr.msk.f32.mxu1 %vm15918_vm0, %v20268_v26  ;;  %v7544_v22 = vrot.slane %v7530_v49, %v16005_v7  ;;  %v13966_v19 = vld.sshfl [vmem:[%s16010_s13 + $0xa0] sm:$0x3 pattern:$0x76325410]  ;;  %v8344_v34 = vrot.slane %v8330_v55, %v16005_v7 }
 0x1a8   : > { %15103 = vmatprep.mubr.msk.f32.mxu0 %vm15918_vm0, %v20268_v26  ;;  %v8725_v12 = vrot.slane %v8717_v30, %v16005_v7  ;;  %v8735_v50 = vcombine.low %v14032_v37, %v18386_v46  ;;  %v7494_v62 = vcombine.low %v20382_v11, %v18272_v59  ;;  %v18411_v60 = vcombine.low %v7152_v0, %v7160_v58 }
 0x1a9   : > { %20381 = vst [vmem:[#allocation19_spill] sm:$0xff] %v18389_v20  ;;  %v18414_v13 = vrot.slane %v7169_v63, %v16005_v7  ;;  %v7184_v49 = vcombine.high %v7176_v38, %v7176_v38  ;;  %v18421_v37 = vcombine.low %v7159_v32, %v7161_v57  ;;  %v8346_v31 = vcombine.high %v8344_v34, %v8344_v34  ;;  %v13948_v57 = vld [vmem:[%s16010_s13 + $0xb0] sm:$0xff] }
 0x1aa   : > { %v2481_v29 = vpop.f32.mrb[88].mxu0  ;;  %v8733_v55 = vcombine.low %v8725_v12, %v8732_v56  ;;  %v20384_v59 = vrot.slane %v18310_v17, %v16005_v7  ;;  %v18431_v58 = vcombine.low %v7520_v44, %v7527_v5  ;;  %v8354_v63 = vcombine.high %v18374_v43, %v18374_v43 }
 0x1ab   : > { %v18417_v18 = vadd.f32 %v2481_v29, %v17820_v3  ;;  %v14801_v52 = vpop.f32.mrb[89].mxu0  ;;  %15104 = vmatmul.mubr.msk.f32.gmra.mrb[194].mxu0 %vm1655_vm1, %v18265_v41  ;;  %v7563_v3 = vcombine.low %v13966_v19, %v7176_v38  ;;  %v18435_v41 = vpop.f32.mrb[34].mxu1  ;;  %v18437_v32 = vcombine.low %v7537_v16, %v7544_v22  ;;  %v8734_v30 = vcombine.low %v8344_v34, %v8346_v31  ;;  %v20385_v22 = vld [vmem:[#allocation9_spill] sm:$0xff] }
 0x1ac   : > { %15106 = vmatprep.mubr.msk.f32.mxu0 %vm15918_vm0, %v20268_v26  ;;  %v18429_v0 = vcombine.low %v20384_v59, %v7510_v40  ;;  %15205 = vmatmul.mubr.msk.f32.gmra.mrb[118].mxu1 %vm1655_vm1, %v8733_v55  ;;  %v8749_v56 = vrot.slane %v8735_v50, %v16005_v7  ;;  %v8369_v17 = vcombine.high %v18386_v46, %v18386_v46  ;;  %v14934_v40 = vpop.f32.mrb[35].mxu1  ;;  %v13950_v34 = vld [vmem:[%s16010_s13 + $0xc0] sm:$0xff]  ;;  %v20387_v46 = vld [vmem:[#allocation7_spill] sm:$0xff] }
 0x1ad   : > { %20383 = vst [vmem:[#allocation22_spill] sm:$0xff] %v18417_v18  ;;  %v18447_v43 = vcombine.low %v7184_v49, %v18414_v13  ;;  %15207 = vmatprep.mubr.msk.f32.mxu1 %vm15918_vm0, %v20268_v26  ;;  %v8368_v5 = vrot.slane %v8354_v63, %v16005_v7  ;;  %v8378_v16 = vrot.slane %v14018_v33, %v16005_v7 }
 0x1ae   : > { %v2486_v44 = vpop.f32.mrb[90].mxu0  ;;  %v8742_v50 = vrot.slane %v8734_v30, %v16005_v7  ;;  %v8371_v29 = vcombine.high %v14018_v33, %v14018_v33  ;;  %v18465_v11 = vrot.slane %v7563_v3, %v16005_v7  ;;  %v7186_v49 = vcombine.high %v13948_v57, %v13948_v57  ;;  %v18467_v31 = vpop.f32.mrb[36].mxu1  ;;  %v18475_v3 = vld [vmem:[%s16010_s13 + $0xc8] sm:$0xff] }
 0x1af   : > { %v18454_v19 = vadd.f32 %v2486_v44, %v20385_v22  ;;  %v14804_v12 = vpop.f32.mrb[91].mxu0  ;;  %15107 = vmatmul.mubr.msk.f32.gmra.mrb[196].mxu0 %vm1655_vm1, %v18267_v36  ;;  %v7210_v52 = vcombine.high %v13950_v34, %v13950_v34  ;;  %v8370_v55 = vcombine.high %v8368_v5, %v8368_v5  ;;  %v7185_v36 = vcombine.high %v18414_v13, %v18414_v13  ;;  %v14937_v33 = vpop.f32.mrb[37].mxu1 }
 0x1b0   : > { %15109 = vmatprep.mubr.msk.f32.mxu0 %vm15918_vm0, %v20268_v26  ;;  %v7193_v59 = vrot.slane %v13948_v57, %v16005_v7  ;;  %v8750_v63 = vcombine.low %v8742_v50, %v8749_v56  ;;  %v8751_v30 = vcombine.low %v8369_v17, %v8368_v5  ;;  %v7578_v44 = vrot.slane %v18447_v43, %v16005_v7  ;;  %v14020_v17 = vld [vmem:[%s16010_s13 + $0xf1] sm:$0xff] }
 0x1b1   : > { %20386 = vst [vmem:[#allocation23_spill] sm:$0xff] %v18454_v19  ;;  %v8752_v22 = vcombine.low %v8370_v55, %v8378_v16  ;;  %v8385_v12 = vrot.slane %v8371_v29, %v16005_v7  ;;  %v8386_v38 = vcombine.high %v8378_v16, %v8378_v16  ;;  %v7217_v57 = vrot.slane %v13950_v34, %v16005_v7 }
 0x1b2   : > { %v3456_v40 = vpop.f32.mrb[92].mxu0  ;;  %15208 = vmatmul.mubr.msk.f32.gmra.mrb[120].mxu1 %vm1655_vm1, %v8750_v63  ;;  %v8759_v56 = vrot.slane %v8751_v30, %v16005_v7  ;;  %v7200_v43 = vrot.slane %v7186_v49, %v16005_v7  ;;  %v7224_v5 = vrot.slane %v7210_v52, %v16005_v7  ;;  %v7201_v34 = vcombine.high %v7193_v59, %v7193_v59 }
 0x1b3   : > { %v18479_v19 = vadd.f32 %v3456_v40, %v20387_v46  ;;  %v14809_v13 = vpop.f32.mrb[93].mxu0  ;;  %15110 = vmatmul.mubr.msk.f32.gmra.mrb[198].mxu0 %vm1655_vm1, %v7494_v62  ;;  %15210 = vmatprep.mubr.msk.f32.mxu1 %vm15918_vm0, %v20268_v26  ;;  %v8766_v16 = vrot.slane %v8752_v22, %v16005_v7  ;;  %v14033_v62 = vld.sshfl [vmem:[%s16010_s13 + $0xe9] sm:$0x3 pattern:$0x76325410]  ;;  %v18494_v46 = vpop.f32.mrb[38].mxu1  ;;  %v7234_v50 = vrot.slane %v18475_v3, %v16005_v7 }
 0x1b4   : > { %15112 = vmatprep.mubr.msk.f32.mxu0 %vm15918_vm0, %v20268_v26  ;;  %20389 = vst [vmem:[#allocation26_spill] sm:$0xff] %v18494_v46  ;;  %v8387_v29 = vcombine.high %v8385_v12, %v8385_v12  ;;  %v8768_v55 = vcombine.low %v8386_v38, %v8385_v12  ;;  %v14940_v63 = vpop.f32.mrb[39].mxu1  ;;  %v7202_v49 = vcombine.high %v7200_v43, %v7200_v43 }
 0x1b5   : > { %20388 = vst [vmem:[#allocation16_spill] sm:$0xff] %v18479_v19  ;;  %v8767_v33 = vcombine.low %v8759_v56, %v8766_v16  ;;  %v8395_v52 = vcombine.high %v14020_v17, %v14020_v17  ;;  %v8402_v40 = vrot.slane %v14020_v17, %v16005_v7  ;;  %v13967_v19 = vld.sshfl [vmem:[%s16010_s13 + $0xb8] sm:$0x3 pattern:$0x76325410]  ;;  %v7225_v18 = vcombine.high %v7217_v57, %v7217_v57 }
 0x1b6   : > { %v3461_v30 = vpop.f32.mrb[94].mxu0  ;;  %v8769_v46 = vcombine.low %v8387_v29, %v14033_v62  ;;  %v8776_v20 = vrot.slane %v8768_v55, %v16005_v7  ;;  %v18506_v38 = vcombine.low %v7185_v36, %v7193_v59  ;;  %v7226_v12 = vcombine.high %v7224_v5, %v7224_v5 }
 0x1b7   : > { %v3571_v13 = vadd.f32 %v3461_v30, %v17887_v14  ;;  %v14812_v22 = vpop.f32.mrb[95].mxu0  ;;  %15113 = vmatmul.mubr.msk.f32.gmra.mrb[200].mxu0 %vm1655_vm1, %v18429_v0  ;;  %15211 = vmatmul.mubr.msk.f32.gmra.mrb[122].mxu1 %vm1655_vm1, %v8767_v33  ;;  %v8409_v14 = vrot.slane %v8395_v52, %v16005_v7  ;;  %v7242_v0 = vcombine.high %v7234_v50, %v7234_v50  ;;  %v14021_v30 = vld [vmem:[%s16010_s13 + $0xf9] sm:$0xff]  ;;  %v18525_v33 = vpop.f32.mrb[40].mxu1 }
 0x1b8   : > { %15115 = vmatprep.mubr.msk.f32.mxu0 %vm15918_vm0, %v20268_v26  ;;  %15213 = vmatprep.mubr.msk.f32.mxu1 %vm15918_vm0, %v20268_v26  ;;  %v8783_v17 = vrot.slane %v8769_v46, %v16005_v7  ;;  %v8410_v16 = vcombine.high %v8402_v40, %v8402_v40  ;;  %v20391_v36 = vrot.slane %v18421_v37, %v16005_v7 }
 0x1b9   : > { %v18511_v56 = vadd.f32 %v17927_v9, %v3571_v13  ;;  %v20392_v59 = vrot.slane %v18411_v60, %v16005_v7  ;;  %v7581_v55 = vcombine.low %v7201_v34, %v7200_v43  ;;  %v18522_v63 = vcombine.low %v7202_v49, %v13967_v19 }
 0x1ba   : > { %v3466_v62 = vpop.f32.mrb[96].mxu0  ;;  %v8411_v9 = vcombine.high %v8409_v14, %v8409_v14  ;;  %v7598_v13 = vcombine.low %v7217_v57, %v7225_v18  ;;  %v8784_v37 = vcombine.low %v8776_v20, %v8783_v17  ;;  %v8785_v22 = vcombine.low %v8402_v40, %v8410_v16 }
 0x1bb   : > { %20390 = vst [vmem:[#allocation27_spill] sm:$0xff] %v18511_v56  ;;  %v7562_v29 = vcombine.low %v20392_v59, %v20391_v36  ;;  %v3572_v52 = vadd.f32 %v3466_v62, %v17908_v48  ;;  %v14815_v46 = vpop.f32.mrb[97].mxu0  ;;  %15116 = vmatmul.mubr.msk.f32.gmra.mrb[202].mxu0 %vm1655_vm1, %v18431_v58  ;;  %v14943_v56 = vpop.f32.mrb[41].mxu1  ;;  %v18533_v60 = vcombine.low %v18465_v11, %v7578_v44  ;;  %v13953_v58 = vld [vmem:[%s16010_s13 + $0xd8] sm:$0xff] }
 0x1bc   : > { %15118 = vmatprep.mubr.msk.f32.mxu0 %vm15918_vm0, %v20268_v26  ;;  %v7588_v19 = vrot.slane %v18506_v38, %v16005_v7  ;;  %v7614_v43 = vcombine.low %v7224_v5, %v7226_v12  ;;  %v8786_v34 = vcombine.low %v8409_v14, %v8411_v9  ;;  %v7615_v49 = vcombine.low %v7234_v50, %v7242_v0  ;;  %v18550_v50 = vpop.f32.mrb[42].mxu1  ;;  %v14023_v56 = vld [vmem:[%s16010_s13 + $0x109] sm:$0xff]  ;;  %v14034_v46 = vld.sshfl [vmem:[%s16010_s13 + $0x101] sm:$0x3 pattern:$0x76325410] }
 0x1bd   : > { %v18538_v48 = vadd.f32 %v17954_v53, %v3572_v52  ;;  %15214 = vmatmul.mubr.msk.f32.gmra.mrb[124].mxu1 %vm1655_vm1, %v8784_v37  ;;  %v8793_v20 = vrot.slane %v8785_v22, %v16005_v7  ;;  %v8412_v18 = vcombine.high %v14021_v30, %v14021_v30  ;;  %v7595_v11 = vrot.slane %v7581_v55, %v16005_v7  ;;  %v14946_v0 = vpop.f32.mrb[43].mxu1  ;;  %v13968_v55 = vld.sshfl [vmem:[%s16010_s13 + $0xd0] sm:$0x3 pattern:$0x76325410] }
 0x1be   : > { %v3471_v57 = vpop.f32.mrb[98].mxu0  ;;  %v7227_v44 = vcombine.high %v18475_v3, %v18475_v3  ;;  %15216 = vmatprep.mubr.msk.f32.mxu1 %vm15918_vm0, %v20268_v26  ;;  %v8800_v53 = vrot.slane %v8786_v34, %v16005_v7  ;;  %v8419_v5 = vrot.slane %v14021_v30, %v16005_v7  ;;  %v7605_v12 = vrot.slane %v18522_v63, %v16005_v7  ;;  %v13954_v34 = vld [vmem:[%s16010_s13 + $0xe0] sm:$0xff] }
 0x1bf   : > { %v3573_v40 = vadd.f32 %v3471_v57, %v17934_v39  ;;  %v14818_v38 = vpop.f32.mrb[99].mxu0  ;;  %15119 = vmatmul.mubr.msk.f32.gmra.mrb[204].mxu0 %vm1655_vm1, %v18437_v32  ;;  %v7612_v3 = vrot.slane %v7598_v13, %v16005_v7  ;;  %v8426_v14 = vrot.slane %v8412_v18, %v16005_v7  ;;  %v18563_v39 = vrot.slane %v13953_v58, %v16005_v7 }
 0x1c0   : > { %15121 = vmatprep.mubr.msk.f32.mxu0 %vm15918_vm0, %v20268_v26  ;;  %v7251_v17 = vcombine.high %v13953_v58, %v13953_v58  ;;  %v8801_v16 = vcombine.low %v8793_v20, %v8800_v53  ;;  %v8427_v62 = vcombine.high %v8419_v5, %v8419_v5  ;;  %v7622_v36 = vrot.slane %v7614_v43, %v16005_v7  ;;  %v18580_v58 = vpop.f32.mrb[44].mxu1 }
 0x1c1   : > { %v18566_v32 = vadd.f32 %v17996_v45, %v3573_v40  ;;  %v7629_v59 = vrot.slane %v7615_v49, %v16005_v7  ;;  %v8428_v63 = vcombine.high %v8426_v14, %v8426_v14  ;;  %v7241_v30 = vrot.slane %v7227_v44, %v16005_v7 }
 0x1c2   : > { %v3476_v9 = vpop.f32.mrb[100].mxu0  ;;  %15217 = vmatmul.mubr.msk.f32.gmra.mrb[126].mxu1 %vm1655_vm1, %v8801_v16  ;;  %v8802_v52 = vcombine.low %v8419_v5, %v8427_v62  ;;  %v8436_v13 = vcombine.high %v14023_v56, %v14023_v56  ;;  %v8443_v37 = vrot.slane %v14023_v56, %v16005_v7  ;;  %v7596_v43 = vcombine.low %v7588_v19, %v7595_v11  ;;  %v15022_v19 = vpop.f32.mrb[45].mxu1 }
 0x1c3   : > { %v3574_v45 = vadd.f32 %v3476_v9, %v17970_v27  ;;  %v14821_v22 = vpop.f32.mrb[101].mxu0  ;;  %15122 = vmatmul.mubr.msk.f32.gmra.mrb[206].mxu0 %vm1655_vm1, %v7562_v29  ;;  %15219 = vmatprep.mubr.msk.f32.mxu1 %vm15918_vm0, %v20268_v26  ;;  %v8803_v49 = vcombine.low %v8426_v14, %v8428_v63  ;;  %v18584_v20 = vcombine.low %v7605_v12, %v7612_v3  ;;  %v14024_v14 = vld [vmem:[%s16010_s13 + $0x111] sm:$0xff] }
 0x1c4   : > { %15124 = vmatprep.mubr.msk.f32.mxu0 %vm15918_vm0, %v20268_v26  ;;  %v7265_v18 = vrot.slane %v7251_v17, %v16005_v7  ;;  %v8810_v27 = vrot.slane %v8802_v52, %v16005_v7  ;;  %v8450_v29 = vrot.slane %v8436_v13, %v16005_v7  ;;  %v8451_v44 = vcombine.high %v8443_v37, %v8443_v37 }
 0x1c5   : > { %v18590_v57 = vadd.f32 %v18021_v2, %v3574_v45  ;;  %v8817_v11 = vrot.slane %v8803_v49, %v16005_v7  ;;  %v8819_v53 = vcombine.low %v14034_v46, %v8443_v37  ;;  %v18593_v40 = vcombine.low %v7622_v36, %v7629_v59  ;;  %v13956_v2 = vld [vmem:[%s16010_s13 + $0xf0] sm:$0xff]  ;;  %v18613_v46 = vpop.f32.mrb[46].mxu1  ;;  %v20393_v49 = vld [vmem:[#allocation8_spill] sm:$0xff] }
 0x1c6   : > { %v3481_v5 = vpop.f32.mrb[102].mxu0  ;;  %v7243_v38 = vcombine.high %v7241_v30, %v7241_v30  ;;  %v7632_v12 = vcombine.low %v13968_v55, %v18563_v39  ;;  %v7268_v3 = vcombine.high %v13954_v34, %v13954_v34  ;;  %v8820_v16 = vcombine.low %v8451_v44, %v8450_v29 }
 0x1c7   : > { %v3575_v56 = vadd.f32 %v3481_v5, %v17999_v24  ;;  %v14824_v0 = vpop.f32.mrb[103].mxu0  ;;  %15125 = vmatmul.mubr.msk.f32.gmra.mrb[208].mxu0 %vm1655_vm1, %v18533_v60  ;;  %v8818_v17 = vcombine.low %v8810_v27, %v8817_v11  ;;  %v8827_v62 = vrot.slane %v8819_v53, %v16005_v7  ;;  %v7266_v36 = vcombine.high %v18563_v39, %v18563_v39 }
 0x1c8   : > { %15127 = vmatprep.mubr.msk.f32.mxu0 %vm15918_vm0, %v20268_v26  ;;  %v7267_v59 = vcombine.high %v7265_v18, %v7265_v18  ;;  %v7275_v55 = vrot.slane %v13954_v34, %v16005_v7  ;;  %v8452_v24 = vcombine.high %v8450_v29, %v8450_v29  ;;  %v8834_v60 = vrot.slane %v8820_v16, %v16005_v7  ;;  %v13957_v34 = vld [vmem:[%s16010_s13 + $0xf8] sm:$0xff] }
 0x1c9   : > { %v18608_v63 = vadd.f32 %v18041_v25, %v3575_v56  ;;  %15220 = vmatmul.mubr.msk.f32.gmra.mrb[128].mxu1 %vm1655_vm1, %v8818_v17  ;;  %v8453_v9 = vcombine.high %v14024_v14, %v14024_v14  ;;  %v8460_v52 = vrot.slane %v14024_v14, %v16005_v7  ;;  %v7631_v37 = vcombine.low %v7241_v30, %v7243_v38  ;;  %v15025_v25 = vpop.f32.mrb[47].mxu1 }
 0x1ca   : > { %v3486_v13 = vpop.f32.mrb[104].mxu0  ;;  %v7646_v39 = vrot.slane %v7632_v12, %v16005_v7  ;;  %v7282_v45 = vrot.slane %v7268_v3, %v16005_v7  ;;  %v7292_v22 = vcombine.high %v13956_v2, %v13956_v2  ;;  %15222 = vmatprep.mubr.msk.f32.mxu1 %vm15918_vm0, %v20268_v26  ;;  %v8835_v19 = vcombine.low %v8827_v62, %v8834_v60  ;;  %v14035_v12 = vld.sshfl [vmem:[%s16010_s13 + $0x119] sm:$0x3 pattern:$0x76325410] }
 0x1cb   : > { %v3576_v27 = vadd.f32 %v3486_v13, %v20393_v49  ;;  %v14827_v29 = vpop.f32.mrb[105].mxu0  ;;  %15128 = vmatmul.mubr.msk.f32.gmra.mrb[210].mxu0 %vm1655_vm1, %v7596_v43  ;;  %v8467_v11 = vrot.slane %v8453_v9, %v16005_v7  ;;  %v8468_v30 = vcombine.high %v8460_v52, %v8460_v52  ;;  %v7648_v44 = vcombine.low %v7266_v36, %v7265_v18  ;;  %v18635_v36 = vpop.f32.mrb[48].mxu1 }
 0x1cc   : > { %15130 = vmatprep.mubr.msk.f32.mxu0 %vm15918_vm0, %v20268_v26  ;;  %v7649_v53 = vcombine.low %v7267_v59, %v7275_v55  ;;  %v7283_v5 = vcombine.high %v7275_v55, %v7275_v55  ;;  %v8836_v38 = vcombine.low %v8452_v24, %v8460_v52  ;;  %v7309_v14 = vcombine.high %v13957_v34, %v13957_v34  ;;  %v13969_v24 = vld.sshfl [vmem:[%s16010_s13 + $0xe8] sm:$0x3 pattern:$0x76325410] }
 0x1cd   : > { %v18627_v3 = vadd.f32 %v18071_v6, %v3576_v27  ;;  %15223 = vmatmul.mubr.msk.f32.gmra.mrb[130].mxu1 %vm1655_vm1, %v8835_v19  ;;  %v8837_v43 = vcombine.low %v8468_v30, %v8467_v11  ;;  %v8469_v56 = vcombine.high %v8467_v11, %v8467_v11  ;;  %v7639_v17 = vrot.slane %v7631_v37, %v16005_v7  ;;  %v20394_v6 = vld [vmem:[#allocation4_spill] sm:$0xff] }
 0x1ce   : > { %v3491_v0 = vpop.f32.mrb[106].mxu0  ;;  %v7284_v16 = vcombine.high %v7282_v45, %v7282_v45  ;;  %v7299_v62 = vrot.slane %v13956_v2, %v16005_v7  ;;  %15225 = vmatprep.mubr.msk.f32.mxu1 %vm15918_vm0, %v20268_v26  ;;  %v8844_v18 = vrot.slane %v8836_v38, %v16005_v7  ;;  %v7306_v60 = vrot.slane %v7292_v22, %v16005_v7  ;;  %v15028_v2 = vpop.f32.mrb[49].mxu1 }
 0x1cf   : > { %v3577_v59 = vadd.f32 %v3491_v0, %v20394_v6  ;;  %v14830_v55 = vpop.f32.mrb[107].mxu0  ;;  %15131 = vmatmul.mubr.msk.f32.gmra.mrb[212].mxu0 %vm1655_vm1, %v18584_v20  ;;  %v8851_v9 = vrot.slane %v8837_v43, %v16005_v7  ;;  %v8853_v52 = vcombine.low %v8469_v56, %v14035_v12  ;;  %v7656_v13 = vrot.slane %v7648_v44, %v16005_v7 }
 0x1d0   : > { %15133 = vmatprep.mubr.msk.f32.mxu0 %vm15918_vm0, %v20268_v26  ;;  %v7663_v37 = vrot.slane %v7649_v53, %v16005_v7  ;;  %v7316_v20 = vrot.slane %v13957_v34, %v16005_v7  ;;  %v7323_v49 = vrot.slane %v7309_v14, %v16005_v7  ;;  %v7647_v29 = vcombine.low %v7639_v17, %v7646_v39  ;;  %v13959_v53 = vld [vmem:[%s16010_s13 + $0x108] sm:$0xff]  ;;  %v18658_v34 = vpop.f32.mrb[50].mxu1 }
 0x1d1   : > { %v18648_v25 = vadd.f32 %v18097_v15, %v3577_v59  ;;  %v8852_v22 = vcombine.low %v8844_v18, %v8851_v9  ;;  %v7665_v19 = vcombine.low %v7283_v5, %v7282_v45  ;;  %v7666_v11 = vcombine.low %v7284_v16, %v13969_v24  ;;  %v13960_v59 = vld [vmem:[%s16010_s13 + $0x110] sm:$0xff]  ;;  %v20395_v9 = vld [vmem:[#allocation12_spill] sm:$0xff] }
 0x1d2   : > { %v3496_v27 = vpop.f32.mrb[108].mxu0  ;;  %v7307_v30 = vcombine.high %v7299_v62, %v7299_v62  ;;  %v7308_v44 = vcombine.high %v7306_v60, %v7306_v60  ;;  %v8860_v15 = vrot.slane %v8853_v52, %v16005_v7  ;;  %v7324_v45 = vcombine.high %v7316_v20, %v7316_v20 }
 0x1d3   : > { %v3578_v38 = vadd.f32 %v3496_v27, %v18074_v35  ;;  %v14833_v12 = vpop.f32.mrb[109].mxu0  ;;  %15134 = vmatmul.mubr.msk.f32.gmra.mrb[214].mxu0 %vm1655_vm1, %v18593_v40  ;;  %15226 = vmatmul.mubr.msk.f32.gmra.mrb[132].mxu1 %vm1655_vm1, %v8852_v22  ;;  %v15031_v35 = vpop.f32.mrb[51].mxu1  ;;  %v7664_v40 = vcombine.low %v7656_v13, %v7663_v37  ;;  %v7325_v5 = vcombine.high %v7323_v49, %v7323_v49  ;;  %v13970_v37 = vld.sshfl [vmem:[%s16010_s13 + $0x100] sm:$0x3 pattern:$0x76325410] }
 0x1d4   : > { %15136 = vmatprep.mubr.msk.f32.mxu0 %vm15918_vm0, %v20268_v26  ;;  %15228 = vmatprep.mubr.msk.f32.mxu1 %vm15918_vm0, %v20268_v26  ;;  %v7673_v43 = vrot.slane %v7665_v19, %v16005_v7  ;;  %v7680_v56 = vrot.slane %v7666_v11, %v16005_v7  ;;  %v7333_v0 = vcombine.high %v13959_v53, %v13959_v53  ;;  %v18674_v55 = vpop.f32.mrb[52].mxu1 }
 0x1d5   : > { %v18665_v39 = vadd.f32 %v18126_v51, %v3578_v38  ;;  %v7340_v17 = vrot.slane %v13959_v53, %v16005_v7  ;;  %v7682_v6 = vcombine.low %v7299_v62, %v7307_v30  ;;  %v7683_v51 = vcombine.low %v7306_v60, %v7308_v44  ;;  %v15034_v24 = vpop.f32.mrb[53].mxu1  ;;  %v20397_v44 = vld [vmem:[#allocation5_spill] sm:$0xff] }
 0x1d6   : > { %v3501_v14 = vpop.f32.mrb[110].mxu0  ;;  %v7699_v2 = vcombine.low %v7316_v20, %v7324_v45  ;;  %v7347_v62 = vrot.slane %v7333_v0, %v16005_v7  ;;  %v7350_v22 = vcombine.high %v13960_v59, %v13960_v59  ;;  %v7357_v27 = vrot.slane %v13960_v59, %v16005_v7  ;;  %v14060_v20 = vld [vmem:[%s16010_s13 + $0x32] sm:$0xff]  ;;  %v14061_v24 = vld [vmem:[%s16010_s13 + $0x3a] sm:$0xff] }
 0x1d7   : > { %v3579_v16 = vadd.f32 %v3501_v14, %v18100_v28  ;;  %v14836_v18 = vpop.f32.mrb[111].mxu0  ;;  %15137 = vmatmul.mubr.msk.f32.gmra.mrb[216].mxu0 %vm1655_vm1, %v7647_v29  ;;  %15229 = vmatmul.mubr.msk.f32.gmra.mrb[134].mxu1 %vm1655_vm1, %v8860_v15  ;;  %v7700_v28 = vcombine.low %v7323_v49, %v7325_v5  ;;  %v7348_v60 = vcombine.high %v7340_v17, %v7340_v17  ;;  %v20396_v29 = vld [vmem:[#allocation10_spill] sm:$0xff]  ;;  %v18691_v49 = vpop.f32.mrb[54].mxu1 }
 0x1d8   : > { %15139 = vmatprep.mubr.msk.f32.mxu0 %vm15918_vm0, %v20268_v26  ;;  %v7681_v30 = vcombine.low %v7673_v43, %v7680_v56  ;;  %v7690_v38 = vrot.slane %v7682_v6, %v16005_v7  ;;  %v7697_v12 = vrot.slane %v7683_v51, %v16005_v7  ;;  %v7707_v15 = vrot.slane %v7699_v2, %v16005_v7  ;;  %v15037_v45 = vpop.f32.mrb[55].mxu1 }
 0x1d9   : > { %v18679_v52 = vadd.f32 %v20395_v9, %v3579_v16  ;;  %v7714_v35 = vrot.slane %v7700_v28, %v16005_v7  ;;  %v7717_v14 = vcombine.low %v7348_v60, %v7347_v62  ;;  %v7349_v43 = vcombine.high %v7347_v62, %v7347_v62  ;;  %v20398_v16 = vld [vmem:[#allocation13_spill] sm:$0xff]  ;;  %v20399_v9 = vld [vmem:[#allocation6_spill] sm:$0xff] }
 0x1da   : > { %v3506_v13 = vpop.f32.mrb[112].mxu0  ;;  %v7364_v56 = vrot.slane %v7350_v22, %v16005_v7  ;;  %v7365_v0 = vcombine.high %v7357_v27, %v7357_v27  ;;  %v7698_v51 = vcombine.low %v7690_v38, %v7697_v12  ;;  %v9170_v59 = vcombine.high %v14060_v20, %v14060_v20 }
 0x1db   : > { %v3580_v19 = vadd.f32 %v3506_v13, %v20396_v29  ;;  %v14839_v11 = vpop.f32.mrb[113].mxu0  ;;  %15140 = vmatmul.mubr.msk.f32.gmra.mrb[218].mxu0 %vm1655_vm1, %v7664_v40  ;;  %v7716_v40 = vcombine.low %v13970_v37, %v7340_v17  ;;  %v7715_v2 = vcombine.low %v7707_v15, %v7714_v35  ;;  %v7731_v37 = vrot.slane %v7717_v14, %v16005_v7  ;;  %v18709_v22 = vpop.f32.mrb[56].mxu1  ;;  %v20400_v29 = vld [vmem:[#allocation11_spill] sm:$0xff] }
 0x1dc   : > { %15142 = vmatprep.mubr.msk.f32.mxu0 %vm15918_vm0, %v20268_v26  ;;  %v7733_v62 = vcombine.low %v7349_v43, %v7357_v27  ;;  %v7734_v60 = vcombine.low %v7365_v0, %v7364_v56  ;;  %v9184_v38 = vrot.slane %v9170_v59, %v16005_v7  ;;  %v9187_v12 = vcombine.high %v14061_v24, %v14061_v24  ;;  %v13971_v14 = vld.sshfl [vmem:[%s16010_s13 + $0x118] sm:$0x3 pattern:$0x76325410] }
 0x1dd   : > { %v18694_v53 = vadd.f32 %v20397_v44, %v3580_v19  ;;  %v7724_v13 = vrot.slane %v7716_v40, %v16005_v7  ;;  %v15040_v44 = vpop.f32.mrb[57].mxu1  ;;  %v7366_v15 = vcombine.high %v7364_v56, %v7364_v56  ;;  %v9194_v35 = vrot.slane %v14061_v24, %v16005_v7 }
 0x1de   : > { %v3511_v5 = vpop.f32.mrb[114].mxu0 }
 0x1df   : > { %v3581_v18 = vadd.f32 %v3511_v5, %v20398_v16  ;;  %v14842_v6 = vpop.f32.mrb[115].mxu0  ;;  %15143 = vmatmul.mubr.msk.f32.gmra.mrb[220].mxu0 %vm1655_vm1, %v7681_v30  ;;  %v9177_v30 = vrot.slane %v14060_v20, %v16005_v7  ;;  %v7732_v45 = vcombine.low %v7724_v13, %v7731_v37  ;;  %v7741_v5 = vrot.slane %v7733_v62, %v16005_v7 }
 0x1e0   : > { %15145 = vmatprep.mubr.msk.f32.mxu0 %vm15918_vm0, %v20268_v26  ;;  %v7748_v20 = vrot.slane %v7734_v60, %v16005_v7  ;;  %v14063_v6 = vld [vmem:[%s16010_s13 + $0x4a] sm:$0xff]  ;;  %v7750_v24 = vcombine.low %v7366_v15, %v13971_v14  ;;  %v14066_v14 = vld [vmem:[%s16010_s13 + $0x62] sm:$0xff] }
 0x1e1   : > { %v18705_v17 = vadd.f32 %v20399_v9, %v3581_v18  ;;  %v9185_v16 = vcombine.high %v9177_v30, %v9177_v30  ;;  %v9186_v18 = vcombine.high %v9184_v38, %v9184_v38  ;;  %v9218_v13 = vrot.slane %v14063_v6, %v16005_v7 }
 0x1e2   : > { %v3516_v28 = vpop.f32.mrb[116].mxu0  ;;  %v18728_v56 = vpop.f32.mrb[58].mxu1  ;;  %v7757_v15 = vrot.slane %v7750_v24, %v16005_v7 }
 0x1e3   : > { %v3582_v19 = vadd.f32 %v3516_v28, %v20400_v29  ;;  %v14845_v11 = vpop.f32.mrb[117].mxu0  ;;  %15146 = vmatmul.mubr.msk.f32.gmra.mrb[222].mxu0 %vm1655_vm1, %v7698_v51  ;;  %v15043_v51 = vpop.f32.mrb[59].mxu1  ;;  %v7749_v28 = vcombine.low %v7741_v5, %v7748_v20  ;;  %v9582_v60 = vcombine.low %v9177_v30, %v9185_v16  ;;  %v9583_v29 = vcombine.low %v9184_v38, %v9186_v18  ;;  %v14090_v5 = vld.sshfl [vmem:[%s16010_s13 + $0x42] sm:$0x3 pattern:$0x76325410] }
 0x1e4   : > { %15148 = vmatprep.mubr.msk.f32.mxu0 %vm15918_vm0, %v20268_v26  ;;  %v14064_v11 = vld [vmem:[%s16010_s13 + $0x52] sm:$0xff]  ;;  %v9616_v51 = vcombine.low %v14090_v5, %v9218_v13 }
 0x1e5   : > { %v18718_v27 = vadd.f32 %v18227_v47, %v3582_v19  ;;  %v9201_v47 = vrot.slane %v9187_v12, %v16005_v7  ;;  %v9228_v38 = vcombine.high %v14064_v11, %v14064_v11  ;;  %v9235_v20 = vrot.slane %v14064_v11, %v16005_v7  ;;  %v20401_v11 = vld [vmem:[#allocation20_spill] sm:$0xff] }
 0x1e6   : > { %v3521_v40 = vpop.f32.mrb[118].mxu0  ;;  %v9597_v16 = vrot.slane %v9583_v29, %v16005_v7  ;;  %v9252_v29 = vcombine.high %v14066_v14, %v14066_v14 }
 0x1e7   : > { %v3583_v43 = vadd.f32 %v3521_v40, %v18203_v21  ;;  %v14848_v0 = vpop.f32.mrb[119].mxu0  ;;  %15149 = vmatmul.mubr.msk.f32.gmra.mrb[224].mxu0 %vm1655_vm1, %v7715_v2  ;;  %v9202_v21 = vcombine.high %v9194_v35, %v9194_v35  ;;  %v9211_v2 = vcombine.high %v14063_v6, %v14063_v6  ;;  %v9203_v19 = vcombine.high %v9201_v47, %v9201_v47 }
 0x1e8   : > { %15151 = vmatprep.mubr.msk.f32.mxu0 %vm15918_vm0, %v20268_v26 }
 0x1e9   : > { %v18733_v59 = vadd.f32 %v18252_v10, %v3583_v43  ;;  %v18739_v10 = vpop.f32.mrb[60].mxu1  ;;  %v9225_v30 = vrot.slane %v9211_v2, %v16005_v7  ;;  %v9600_v18 = vcombine.low %v9201_v47, %v9203_v19  ;;  %v9242_v2 = vrot.slane %v9228_v38, %v16005_v7  ;;  %v14067_v19 = vld [vmem:[%s16010_s13 + $0x6a] sm:$0xff]  ;;  %v14091_v38 = vld.sshfl [vmem:[%s16010_s13 + $0x5a] sm:$0x3 pattern:$0x76325410] }
 0x1ea   : > { %v3526_v9 = vpop.f32.mrb[120].mxu0  ;;  %v15046_v12 = vpop.f32.mrb[61].mxu1  ;;  %v9243_v47 = vcombine.high %v9235_v20, %v9235_v20 }
 0x1eb   : > { %v3584_v37 = vadd.f32 %v3526_v9, %v18230_v54  ;;  %v14851_v62 = vpop.f32.mrb[121].mxu0  ;;  %15152 = vmatmul.mubr.msk.f32.gmra.mrb[226].mxu0 %vm1655_vm1, %v7732_v45  ;;  %v9599_v54 = vcombine.low %v9194_v35, %v9202_v21  ;;  %v9226_v45 = vcombine.high %v9218_v13, %v9218_v13  ;;  %v9614_v13 = vrot.slane %v9600_v18, %v16005_v7 }
 0x1ec   : > { %15154 = vmatprep.mubr.msk.f32.mxu0 %vm15918_vm0, %v20268_v26 }
 0x1ed   : > { %v18744_v44 = vadd.f32 %v18282_v1, %v3584_v37  ;;  %v9590_v1 = vrot.slane %v9582_v60, %v16005_v7  ;;  %v9607_v6 = vrot.slane %v9599_v54, %v16005_v7  ;;  %v9617_v9 = vcombine.low %v9226_v45, %v9225_v30 }
 0x1ee   : > { %v3531_v40 = vpop.f32.mrb[122].mxu0  ;;  %v9624_v54 = vrot.slane %v9616_v51, %v16005_v7  ;;  %v9634_v45 = vcombine.low %v9243_v47, %v9242_v2  ;;  %v9266_v51 = vrot.slane %v9252_v29, %v16005_v7 }
 0x1ef   : > { %v3585_v43 = vadd.f32 %v3531_v40, %v18255_v23  ;;  %v14854_v0 = vpop.f32.mrb[123].mxu0  ;;  %15155 = vmatmul.mubr.msk.f32.gmra.mrb[228].mxu0 %vm1655_vm1, %v7749_v28  ;;  %v9259_v23 = vrot.slane %v14066_v14, %v16005_v7  ;;  %v9227_v28 = vcombine.high %v9225_v30, %v9225_v30  ;;  %v9598_v60 = vcombine.low %v9590_v1, %v9597_v16 }
 0x1f0   : > { %15157 = vmatprep.mubr.msk.f32.mxu0 %vm15918_vm0, %v20268_v26  ;;  %v18762_v24 = vpop.f32.mrb[62].mxu1  ;;  %v9244_v40 = vcombine.high %v9242_v2, %v9242_v2  ;;  %v9631_v30 = vrot.slane %v9617_v9, %v16005_v7  ;;  %v20402_v0 = vld [vmem:[#allocation14_spill] sm:$0xff]  ;;  %v9615_v18 = vcombine.low %v9607_v6, %v9614_v13  ;;  %v9648_v6 = vrot.slane %v9634_v45, %v16005_v7  ;;  %v20403_v13 = vld [vmem:[#allocation15_spill] sm:$0xff] }
 0x1f1   : > { %v18758_v35 = vadd.f32 %v18316_v4, %v3585_v43  ;;  %v15049_v37 = vpop.f32.mrb[63].mxu1  ;;  %v9269_v43 = vcombine.high %v14067_v19, %v14067_v19 }
 0x1f2   : > { %v3536_v21 = vpop.f32.mrb[124].mxu0  ;;  %v14069_v37 = vld [vmem:[%s16010_s13 + $0x7a] sm:$0xff]  ;;  %v9650_v9 = vcombine.low %v9244_v40, %v14091_v38 }
 0x1f3   : > { %v3586_v62 = vadd.f32 %v3536_v21, %v18285_v61  ;;  %v14857_v4 = vpop.f32.mrb[125].mxu0  ;;  %15158 = vmatmul.mubr.msk.f32.gmra.mrb[230].mxu0 %vm1655_vm1, %v7757_v15  ;;  %v9267_v61 = vcombine.high %v9259_v23, %v9259_v23  ;;  %v9633_v15 = vcombine.low %v9227_v28, %v9235_v20  ;;  %v9276_v21 = vrot.slane %v14067_v19, %v16005_v7 }
 0x1f4   : > { %15233 = vmatprep.mubr.msk.f32.mxu0 %vm15918_vm0, %v20268_v26  ;;  %v18777_v14 = vpop.f32.mrb[64].mxu1  ;;  %v9283_v4 = vrot.slane %v9269_v43, %v16005_v7  ;;  %v9658_v45 = vrot.slane %v9650_v9, %v16005_v7  ;;  %v9300_v43 = vrot.slane %v14069_v37, %v16005_v7 }
 0x1f5   : > { %v18772_v12 = vadd.f32 %v20401_v11, %v3586_v62  ;;  %v15052_v62 = vpop.f32.mrb[65].mxu1  ;;  %v9651_v28 = vcombine.low %v9259_v23, %v9267_v61  ;;  %v9641_v47 = vrot.slane %v9633_v15, %v16005_v7  ;;  %v9632_v11 = vcombine.low %v9624_v54, %v9631_v30  ;;  %v14070_v23 = vld [vmem:[%s16010_s13 + $0x82] sm:$0xff] }
 0x1f6   : > { %v3541_v5 = vpop.f32.mrb[126].mxu0 }
 0x1f7   : > { %v3587_v1 = vadd.f32 %v3541_v5, %v20402_v0  ;;  %v14860_v16 = vpop.f32.mrb[127].mxu0  ;;  %15234 = vmatmul.mubr.msk.f32.vlgmr.msra.gmra.mrb[232].mxu0 %vm1655_vm1, %v9598_v60  ;;  %v9293_v60 = vcombine.high %v14069_v37, %v14069_v37  ;;  %v9284_v5 = vcombine.high %v9276_v21, %v9276_v21  ;;  %v9665_v38 = vrot.slane %v9651_v28, %v16005_v7  ;;  %v14092_v0 = vld.sshfl [vmem:[%s16010_s13 + $0x72] sm:$0x3 pattern:$0x76325410] }
 0x1f8   : > { %15236 = vmatprep.mubr.msk.f32.mxu0 %vm15918_vm0, %v20268_v26  ;;  %v18794_v40 = vpop.f32.mrb[66].mxu1  ;;  %v9649_v30 = vcombine.low %v9641_v47, %v9648_v6  ;;  %v9685_v47 = vcombine.low %v14092_v0, %v9300_v43 }
 0x1f9   : > { %v18787_v20 = vadd.f32 %v18363_v8, %v3587_v1  ;;  %v9268_v8 = vcombine.high %v9266_v51, %v9266_v51  ;;  %v15055_v61 = vpop.f32.mrb[67].mxu1  ;;  %v9285_v1 = vcombine.high %v9283_v4, %v9283_v4  ;;  %v9307_v16 = vrot.slane %v9293_v60, %v16005_v7 }
 0x1fa   : > { %v3546_v2 = vpop.f32.mrb[128].mxu0  ;;  %v9666_v28 = vcombine.low %v9658_v45, %v9665_v38  ;;  %v9308_v61 = vcombine.high %v9300_v43, %v9300_v43  ;;  %v14073_v38 = vld [vmem:[%s16010_s13 + $0x9a] sm:$0xff]  ;;  %v20405_v43 = vld [vmem:[#allocation26_spill] sm:$0xff] }
 0x1fb   : > { %v3588_v29 = vadd.f32 %v3546_v2, %v20403_v13  ;;  %v14863_v19 = vpop.f32.mrb[129].mxu0  ;;  %15237 = vmatmul.mubr.msk.f32.gmra.mrb[234].mxu0 %vm1655_vm1, %v9615_v18  ;;  %v14072_v18 = vld [vmem:[%s16010_s13 + $0x92] sm:$0xff]  ;;  %v9668_v13 = vcombine.low %v9276_v21, %v9284_v5 }
 0x1fc   : > { %15239 = vmatprep.mubr.msk.f32.mxu0 %vm15918_vm0, %v20268_v26  ;;  %v9334_v6 = vcombine.high %v14072_v18, %v14072_v18  ;;  %v9684_v19 = vcombine.low %v9283_v4, %v9285_v1  ;;  %v20404_v21 = vld [vmem:[#allocation19_spill] sm:$0xff] }
 0x1fd   : > { %v18800_v15 = vadd.f32 %v18435_v41, %v3588_v29  ;;  %v9667_v41 = vcombine.low %v9266_v51, %v9268_v8  ;;  %v9310_v29 = vcombine.high %v14070_v23, %v14070_v23  ;;  %v9317_v51 = vrot.slane %v14070_v23, %v16005_v7 }
 0x1fe   : > { %v3551_v54 = vpop.f32.mrb[130].mxu0  ;;  %v18812_v9 = vpop.f32.mrb[68].mxu1  ;;  %v9699_v23 = vrot.slane %v9685_v47, %v16005_v7  ;;  %v9348_v1 = vrot.slane %v9334_v6, %v16005_v7  ;;  %v9351_v47 = vcombine.high %v14073_v38, %v14073_v38 }
 0x1ff   : > { %v3589_v62 = vadd.f32 %v3551_v54, %v18366_v42  ;;  %v14866_v2 = vpop.f32.mrb[131].mxu0  ;;  %15240 = vmatmul.mubr.msk.f32.gmra.mrb[236].mxu0 %vm1655_vm1, %v9632_v11  ;;  %v15058_v60 = vpop.f32.mrb[69].mxu1  ;;  %v9309_v11 = vcombine.high %v9307_v16, %v9307_v16  ;;  %v9675_v54 = vrot.slane %v9667_v41, %v16005_v7  ;;  %v9324_v45 = vrot.slane %v9310_v29, %v16005_v7 }
 0x200   : > { %15242 = vmatprep.mubr.msk.f32.mxu0 %vm15918_vm0, %v20268_v26  ;;  %v9692_v41 = vrot.slane %v9684_v19, %v16005_v7  ;;  %v9325_v60 = vcombine.high %v9317_v51, %v9317_v51 }
 0x201   : > { %v18815_v37 = vadd.f32 %v18467_v31, %v3589_v62  ;;  %v9682_v31 = vrot.slane %v9668_v13, %v16005_v7  ;;  %v9701_v13 = vcombine.low %v9308_v61, %v9307_v16  ;;  %v9702_v29 = vcombine.low %v9309_v11, %v9317_v51 }
 0x202   : > { %v3556_v42 = vpop.f32.mrb[132].mxu0  ;;  %v18826_v4 = vpop.f32.mrb[70].mxu1  ;;  %v9350_v16 = vcombine.high %v9348_v1, %v9348_v1  ;;  %v9700_v51 = vcombine.low %v9692_v41, %v9699_v23 }
 0x203   : > { %v3590_v8 = vadd.f32 %v3556_v42, %v20404_v21  ;;  %v14869_v5 = vpop.f32.mrb[133].mxu0  ;;  %15243 = vmatmul.mubr.msk.f32.gmra.mrb[238].mxu0 %vm1655_vm1, %v9649_v30  ;;  %v9341_v30 = vrot.slane %v14072_v18, %v16005_v7  ;;  %v15061_v62 = vpop.f32.mrb[71].mxu1  ;;  %v20407_v42 = vld [vmem:[#allocation22_spill] sm:$0xff] }
 0x204   : > { %15245 = vmatprep.mubr.msk.f32.mxu0 %vm15918_vm0, %v20268_v26  ;;  %v14093_v18 = vld.sshfl [vmem:[%s16010_s13 + $0x8a] sm:$0x3 pattern:$0x76325410]  ;;  %v9709_v62 = vrot.slane %v9701_v13, %v16005_v7  ;;  %v9736_v41 = vcombine.low %v9348_v1, %v9350_v16 }
 0x205   : > { %v18829_v0 = vadd.f32 %v20405_v43, %v3590_v8  ;;  %v9683_v8 = vcombine.low %v9675_v54, %v9682_v31  ;;  %v9326_v43 = vcombine.high %v9324_v45, %v9324_v45  ;;  %v9349_v19 = vcombine.high %v9341_v30, %v9341_v30 }
 0x206   : > { %v3561_v2 = vpop.f32.mrb[134].mxu0  ;;  %v9718_v54 = vcombine.low %v9325_v60, %v9324_v45 }
 0x207   : > { %20406 = vst [vmem:[#allocation24_spill] sm:$0xff] %v18829_v0  ;;  %v3591_v21 = vadd.f32 %v3561_v2, %v20407_v42  ;;  %v14872_v5 = vpop.f32.mrb[135].mxu0  ;;  %15246 = vmatmul.mubr.msk.f32.gmra.mrb[240].mxu0 %vm1655_vm1, %v9666_v28  ;;  %v9716_v28 = vrot.slane %v9702_v29, %v16005_v7  ;;  %v20409_v2 = vld [vmem:[#allocation23_spill] sm:$0xff]  ;;  %v9735_v45 = vcombine.low %v9341_v30, %v9349_v19 }
 0x208   : > { %15248 = vmatprep.mubr.msk.f32.mxu0 %vm15918_vm0, %v20268_v26  ;;  %v18843_v61 = vpop.f32.mrb[72].mxu1  ;;  %v14075_v0 = vld [vmem:[%s16010_s13 + $0xaa] sm:$0xff]  ;;  %v9726_v60 = vrot.slane %v9718_v54, %v16005_v7  ;;  %v14076_v30 = vld [vmem:[%s16010_s13 + $0xb2] sm:$0xff] }
 0x209   : > { %v18841_v6 = vadd.f32 %v18525_v33, %v3591_v21  ;;  %v15064_v31 = vpop.f32.mrb[73].mxu1  ;;  %v9719_v33 = vcombine.low %v9326_v43, %v14093_v18  ;;  %v9358_v21 = vrot.slane %v14073_v38, %v16005_v7  ;;  %v9717_v29 = vcombine.low %v9709_v62, %v9716_v28  ;;  %v20411_v43 = vld [vmem:[#allocation16_spill] sm:$0xff]  ;;  %v14094_v28 = vld.sshfl [vmem:[%s16010_s13 + $0xa2] sm:$0x3 pattern:$0x76325410] }
 0x20a   : > { %v3566_v11 = vpop.f32.mrb[136].mxu0  ;;  %v9382_v38 = vrot.slane %v14075_v0, %v16005_v7  ;;  %v9743_v19 = vrot.slane %v9735_v45, %v16005_v7 }
 0x20b   : > { %20408 = vst [vmem:[#allocation18_spill] sm:$0xff] %v18841_v6  ;;  %v3592_v42 = vadd.f32 %v3566_v11, %v20409_v2  ;;  %v14875_v5 = vpop.f32.mrb[137].mxu0  ;;  %15249 = vmatmul.mubr.msk.f32.gmra.mrb[242].mxu0 %vm1655_vm1, %v9683_v8  ;;  %v9365_v6 = vrot.slane %v9351_v47, %v16005_v7  ;;  %v9375_v8 = vcombine.high %v14075_v0, %v14075_v0 }
 0x20c   : > { %15251 = vmatprep.mubr.msk.f32.mxu0 %vm15918_vm0, %v20268_v26  ;;  %v9733_v11 = vrot.slane %v9719_v33, %v16005_v7  ;;  %v18865_v1 = vpop.f32.mrb[74].mxu1  ;;  %v9750_v0 = vrot.slane %v9736_v41, %v16005_v7  ;;  %v9390_v54 = vcombine.high %v9382_v38, %v9382_v38  ;;  %v9392_v2 = vcombine.high %v14076_v30, %v14076_v30  ;;  %v14078_v5 = vld [vmem:[%s16010_s13 + $0xc2] sm:$0xff] }
 0x20d   : > { %v18855_v23 = vadd.f32 %v18550_v50, %v3592_v42  ;;  %v9366_v50 = vcombine.high %v9358_v21, %v9358_v21  ;;  %v9367_v31 = vcombine.high %v9365_v6, %v9365_v6  ;;  %v15067_v16 = vpop.f32.mrb[75].mxu1  ;;  %v9399_v42 = vrot.slane %v14076_v30, %v16005_v7 }
 0x20e   : > { %v4560_v13 = vpop.f32.mrb[138].mxu0  ;;  %v9769_v16 = vcombine.low %v14094_v28, %v9382_v38  ;;  %v9423_v30 = vrot.slane %v14078_v5, %v16005_v7  ;;  %v14079_v38 = vld [vmem:[%s16010_s13 + $0xca] sm:$0xff] }
 0x20f   : > { %20410 = vst [vmem:[#allocation29_spill] sm:$0xff] %v18855_v23  ;;  %v4674_v47 = vadd.f32 %v4560_v13, %v20411_v43  ;;  %v14880_v18 = vpop.f32.mrb[139].mxu0  ;;  %15252 = vmatmul.mubr.msk.f32.gmra.mrb[244].mxu0 %vm1655_vm1, %v9700_v51  ;;  %v9389_v51 = vrot.slane %v9375_v8, %v16005_v7  ;;  %v9734_v43 = vcombine.low %v9726_v60, %v9733_v11  ;;  %v20412_v60 = vld [vmem:[#allocation27_spill] sm:$0xff] }
 0x210   : > { %15254 = vmatprep.mubr.msk.f32.mxu0 %vm15918_vm0, %v20268_v26  ;;  %v9752_v18 = vcombine.low %v9358_v21, %v9366_v50  ;;  %v9753_v23 = vcombine.low %v9365_v6, %v9367_v31  ;;  %v18876_v45 = vpop.f32.mrb[76].mxu1  ;;  %v9751_v8 = vcombine.low %v9743_v19, %v9750_v0  ;;  %v9406_v6 = vrot.slane %v9392_v2, %v16005_v7  ;;  %v14095_v2 = vld.sshfl [vmem:[%s16010_s13 + $0xba] sm:$0x3 pattern:$0x76325410] }
 0x211   : > { %v9770_v21 = vcombine.low %v9390_v54, %v9389_v51  ;;  %v9416_v19 = vcombine.high %v14078_v5, %v14078_v5  ;;  %v9777_v54 = vrot.slane %v9769_v16, %v16005_v7 }
 0x212   : > { %v5663_v62 = vpop.f32.mrb[140].mxu0  ;;  %v9767_v31 = vrot.slane %v9753_v23, %v16005_v7  ;;  %v9408_v0 = vcombine.high %v9406_v6, %v9406_v6 }
 0x213   : > { %v5777_v33 = vadd.f32 %v5663_v62, %v4674_v47  ;;  %v14951_v13 = vpop.f32.mrb[141].mxu0  ;;  %15255 = vmatmul.mubr.msk.f32.gmra.mrb[246].mxu0 %vm1655_vm1, %v9717_v29  ;;  %v15070_v47 = vpop.f32.mrb[77].mxu1  ;;  %v9407_v29 = vcombine.high %v9399_v42, %v9399_v42  ;;  %v9784_v23 = vrot.slane %v9770_v21, %v16005_v7  ;;  %v9430_v16 = vrot.slane %v9416_v19, %v16005_v7 }
 0x214   : > { %15257 = vmatprep.mubr.msk.f32.mxu0 %vm15918_vm0, %v20268_v26  ;;  %v9391_v13 = vcombine.high %v9389_v51, %v9389_v51  ;;  %v18890_v28 = vpop.f32.mrb[78].mxu1 }
 0x215   : > { %v18879_v41 = vadd.f32 %v18580_v58, %v5777_v33  ;;  %v9760_v58 = vrot.slane %v9752_v18, %v16005_v7  ;;  %v9431_v33 = vcombine.high %v9423_v30, %v9423_v30  ;;  %v9787_v5 = vcombine.low %v9407_v29, %v9406_v6 }
 0x216   : > { %v5668_v62 = vpop.f32.mrb[142].mxu0  ;;  %v9786_v47 = vcombine.low %v9391_v13, %v9399_v42  ;;  %v9785_v21 = vcombine.low %v9777_v54, %v9784_v23 }
 0x217   : > { %v5778_v11 = vadd.f32 %v5668_v62, %v20412_v60  ;;  %v14954_v50 = vpop.f32.mrb[143].mxu0  ;;  %15258 = vmatmul.mubr.msk.f32.gmra.mrb[248].mxu0 %vm1655_vm1, %v9734_v43  ;;  %v15073_v43 = vpop.f32.mrb[79].mxu1  ;;  %v9440_v62 = vrot.slane %v14079_v38, %v16005_v7  ;;  %v9804_v13 = vcombine.low %v9423_v30, %v9431_v33  ;;  %v9801_v6 = vrot.slane %v9787_v5, %v16005_v7 }
 0x218   : > { %15260 = vmatprep.mubr.msk.f32.mxu0 %vm15918_vm0, %v20268_v26  ;;  %v9803_v43 = vcombine.low %v9408_v0, %v14095_v2  ;;  %v9432_v0 = vcombine.high %v9430_v16, %v9430_v16 }
 0x219   : > { %v18893_v51 = vadd.f32 %v18613_v46, %v5778_v11  ;;  %v9768_v46 = vcombine.low %v9760_v58, %v9767_v31  ;;  %v9433_v11 = vcombine.high %v14079_v38, %v14079_v38  ;;  %v14082_v58 = vld [vmem:[%s16010_s13 + $0xe2] sm:$0xff] }
 0x21a   : > { %v5673_v18 = vpop.f32.mrb[144].mxu0  ;;  %v9811_v54 = vrot.slane %v9803_v43, %v16005_v7  ;;  %v9474_v23 = vcombine.high %v14082_v58, %v14082_v58  ;;  %v9820_v43 = vcombine.low %v9430_v16, %v9432_v0 }
 0x21b   : > { %20413 = vst [vmem:[#allocation17_spill] sm:$0xff] %v18893_v51  ;;  %v5779_v60 = vadd.f32 %v5673_v18, %v18538_v48  ;;  %v14957_v50 = vpop.f32.mrb[145].mxu0  ;;  %15261 = vmatmul.mubr.msk.f32.gmra.mrb[250].mxu0 %vm1655_vm1, %v9751_v8  ;;  %v14081_v51 = vld [vmem:[%s16010_s13 + $0xda] sm:$0xff]  ;;  %v9794_v48 = vrot.slane %v9786_v47, %v16005_v7  ;;  %v9448_v8 = vcombine.high %v9440_v62, %v9440_v62 }
 0x21c   : > { %15263 = vmatprep.mubr.msk.f32.mxu0 %vm15918_vm0, %v20268_v26  ;;  %v18911_v31 = vpop.f32.mrb[80].mxu1  ;;  %v9457_v30 = vcombine.high %v14081_v51, %v14081_v51  ;;  %v9464_v18 = vrot.slane %v14081_v51, %v16005_v7  ;;  %v14096_v50 = vld.sshfl [vmem:[%s16010_s13 + $0xd2] sm:$0x3 pattern:$0x76325410] }
 0x21d   : > { %v18906_v42 = vadd.f32 %v18635_v36, %v5779_v60  ;;  %v9447_v36 = vrot.slane %v9433_v11, %v16005_v7  ;;  %v15076_v2 = vpop.f32.mrb[81].mxu1  ;;  %v9802_v5 = vcombine.low %v9794_v48, %v9801_v6  ;;  %v9821_v60 = vcombine.low %v9440_v62, %v9448_v8 }
 0x21e   : > { %v5678_v29 = vpop.f32.mrb[146].mxu0  ;;  %v9838_v48 = vcombine.low %v14096_v50, %v9464_v18  ;;  %v9472_v16 = vcombine.high %v9464_v18, %v9464_v18  ;;  %v9481_v8 = vrot.slane %v14082_v58, %v16005_v7 }
 0x21f   : > { %v5780_v38 = vadd.f32 %v5678_v29, %v18566_v32  ;;  %v14960_v19 = vpop.f32.mrb[147].mxu0  ;;  %15264 = vmatmul.mubr.msk.f32.gmra.mrb[252].mxu0 %vm1655_vm1, %v9768_v46  ;;  %v9818_v32 = vrot.slane %v9804_v13, %v16005_v7 }
 0x220   : > { %15266 = vmatprep.mubr.msk.f32.mxu0 %vm15918_vm0, %v20268_v26  ;;  %v18925_v46 = vpop.f32.mrb[82].mxu1  ;;  %v9449_v19 = vcombine.high %v9447_v36, %v9447_v36  ;;  %v9489_v18 = vcombine.high %v9481_v8, %v9481_v8 }
 0x221   : > { %v18920_v33 = vadd.f32 %v18658_v34, %v5780_v38  ;;  %v9471_v34 = vrot.slane %v9457_v30, %v16005_v7  ;;  %v14084_v38 = vld [vmem:[%s16010_s13 + $0xf2] sm:$0xff]  ;;  %v15079_v13 = vpop.f32.mrb[83].mxu1  ;;  %v9819_v62 = vcombine.low %v9811_v54, %v9818_v32  ;;  %v14085_v32 = vld [vmem:[%s16010_s13 + $0xfa] sm:$0xff] }
 0x222   : > { %v5683_v47 = vpop.f32.mrb[148].mxu0  ;;  %v9498_v0 = vcombine.high %v14084_v38, %v14084_v38 }
 0x223   : > { %v5781_v11 = vadd.f32 %v5683_v47, %v18590_v57  ;;  %v14963_v29 = vpop.f32.mrb[149].mxu0  ;;  %15267 = vmatmul.mubr.msk.f32.gmra.mrb[254].mxu0 %vm1655_vm1, %v9785_v21  ;;  %v9488_v57 = vrot.slane %v9474_v23, %v16005_v7  ;;  %v9835_v21 = vrot.slane %v9821_v60, %v16005_v7  ;;  %v9837_v47 = vcombine.low %v9447_v36, %v9449_v19  ;;  %v14097_v36 = vld.sshfl [vmem:[%s16010_s13 + $0xea] sm:$0x3 pattern:$0x76325410] }
 0x224   : > { %15269 = vmatprep.mubr.msk.f32.mxu0 %vm15918_vm0, %v20268_v26  ;;  %v9473_v54 = vcombine.high %v9471_v34, %v9471_v34  ;;  %v18943_v50 = vpop.f32.mrb[84].mxu1  ;;  %v9505_v60 = vrot.slane %v14084_v38, %v16005_v7  ;;  %v9854_v29 = vcombine.low %v9472_v16, %v9471_v34  ;;  %v9515_v19 = vcombine.high %v14085_v32, %v14085_v32 }
 0x225   : > { %v18934_v51 = vadd.f32 %v18674_v55, %v5781_v11  ;;  %v9828_v55 = vrot.slane %v9820_v43, %v16005_v7  ;;  %v15082_v23 = vpop.f32.mrb[85].mxu1  ;;  %v9512_v43 = vrot.slane %v9498_v0, %v16005_v7  ;;  %v9871_v38 = vcombine.low %v9489_v18, %v9488_v57 }
 0x226   : > { %v5688_v6 = vpop.f32.mrb[150].mxu0  ;;  %v9513_v16 = vcombine.high %v9505_v60, %v9505_v60 }
 0x227   : > { %v5782_v30 = vadd.f32 %v5688_v6, %v18608_v63  ;;  %v14966_v2 = vpop.f32.mrb[151].mxu0  ;;  %15270 = vmatmul.mubr.msk.f32.gmra.mrb[0].mxu0 %vm1655_vm1, %v9802_v5  ;;  %v9490_v63 = vcombine.high %v9488_v57, %v9488_v57  ;;  %v9852_v5 = vrot.slane %v9838_v48, %v16005_v7  ;;  %v9514_v23 = vcombine.high %v9512_v43, %v9512_v43 }
 0x228   : > { %15272 = vmatprep.mubr.msk.f32.mxu0 %vm15918_vm0, %v20268_v26  ;;  %v9836_v2 = vcombine.low %v9828_v55, %v9835_v21  ;;  %v9862_v57 = vrot.slane %v9854_v29, %v16005_v7 }
 0x229   : > { %v18948_v58 = vadd.f32 %v18691_v49, %v5782_v30  ;;  %v9845_v49 = vrot.slane %v9837_v47, %v16005_v7  ;;  %v9855_v30 = vcombine.low %v9473_v54, %v9481_v8  ;;  %v9872_v48 = vcombine.low %v9490_v63, %v14097_v36  ;;  %v18964_v21 = vpop.f32.mrb[86].mxu1  ;;  %v14087_v54 = vld [vmem:[%s16010_s13 + $0x10a] sm:$0xff] }
 0x22a   : > { %v5693_v11 = vpop.f32.mrb[152].mxu0  ;;  %v15085_v18 = vpop.f32.mrb[87].mxu1  ;;  %v9889_v36 = vcombine.low %v9512_v43, %v9514_v23  ;;  %v14088_v43 = vld [vmem:[%s16010_s13 + $0x112] sm:$0xff] }
 0x22b   : > { %v5783_v13 = vadd.f32 %v5693_v11, %v18627_v3  ;;  %v14969_v6 = vpop.f32.mrb[153].mxu0  ;;  %15273 = vmatmul.mubr.msk.f32.gmra.mrb[2].mxu0 %vm1655_vm1, %v9819_v62  ;;  %v9522_v3 = vrot.slane %v14085_v32, %v16005_v7  ;;  %v9529_v62 = vrot.slane %v9515_v19, %v16005_v7  ;;  %v9853_v47 = vcombine.low %v9845_v49, %v9852_v5  ;;  %v14130_v5 = vld [vmem:[%s20186_s3 + $0x4] sm:$0xf] }
 0x22c   : > { %15275 = vmatprep.mubr.msk.f32.mxu0 %vm15918_vm0, %v20268_v26  ;;  %v9879_v32 = vrot.slane %v9871_v38, %v16005_v7  ;;  %v9888_v11 = vcombine.low %v9505_v60, %v9513_v16  ;;  %v9539_v6 = vcombine.high %v14087_v54, %v14087_v54  ;;  %15302 = vmatprep.subr.msk.mxu1 %vm11477_vm2, %v14130_v5 }
 0x22d   : > { %v18960_v34 = vadd.f32 %v18709_v22, %v5783_v13  ;;  %v9869_v22 = vrot.slane %v9855_v30, %v16005_v7  ;;  %v9530_v19 = vcombine.high %v9522_v3, %v9522_v3  ;;  %v9531_v13 = vcombine.high %v9529_v62, %v9529_v62  ;;  %15303 = vmatpush3.msk.msra.mxu1 %vm11477_vm2, %v14130_v5 }
 0x22e   : > { %v5698_v0 = vpop.f32.mrb[154].mxu0  ;;  %v9546_v30 = vrot.slane %v14087_v54, %v16005_v7  ;;  %v9903_v23 = vrot.slane %v9889_v36, %v16005_v7  ;;  %v9556_v5 = vcombine.high %v14088_v43, %v14088_v43 }
 0x22f   : > { %v5784_v8 = vadd.f32 %v5698_v0, %v18648_v25  ;;  %v14972_v55 = vpop.f32.mrb[155].mxu0  ;;  %15276 = vmatmul.mubr.msk.f32.gmra.mrb[4].mxu0 %vm1655_vm1, %v9836_v2  ;;  %v9886_v25 = vrot.slane %v9872_v48, %v16005_v7  ;;  %v18981_v2 = vpop.f32.mrb[88].mxu1  ;;  %v9870_v60 = vcombine.low %v9862_v57, %v9869_v22  ;;  %v9553_v57 = vrot.slane %v9539_v6, %v16005_v7 }
 0x230   : > { %15278 = vmatprep.mubr.msk.f32.mxu0 %vm15918_vm0, %v20268_v26  ;;  %v15088_v38 = vpop.f32.mrb[89].mxu1  ;;  %v9906_v55 = vcombine.low %v9529_v62, %v9531_v13 }
 0x231   : > { %v18975_v63 = vadd.f32 %v18728_v56, %v5784_v8  ;;  %v9887_v16 = vcombine.low %v9879_v32, %v9886_v25  ;;  %v9905_v8 = vcombine.low %v9522_v3, %v9530_v19  ;;  %v9563_v32 = vrot.slane %v14088_v43, %v16005_v7 }
 0x232   : > { %v5703_v29 = vpop.f32.mrb[156].mxu0  ;;  %v9555_v19 = vcombine.high %v9553_v57, %v9553_v57 }
 0x233   : > { %v5785_v56 = vadd.f32 %v5703_v29, %v18665_v39  ;;  %v14975_v49 = vpop.f32.mrb[157].mxu0  ;;  %15279 = vmatmul.mubr.msk.f32.gmra.mrb[6].mxu0 %vm1655_vm1, %v9853_v47  ;;  %v9896_v39 = vrot.slane %v9888_v11, %v16005_v7  ;;  %v14098_v47 = vld.sshfl [vmem:[%s16010_s13 + $0x102] sm:$0x3 pattern:$0x76325410]  ;;  %v9913_v36 = vrot.slane %v9905_v8, %v16005_v7 }
 0x234   : > { %15281 = vmatprep.mubr.msk.f32.mxu0 %vm15918_vm0, %v20268_v26  ;;  %v18998_v22 = vpop.f32.mrb[90].mxu1  ;;  %v9922_v62 = vcombine.low %v14098_v47, %v9546_v30  ;;  %v9939_v8 = vcombine.low %v9555_v19, %v9563_v32 }
 0x235   : > { %v18992_v48 = vadd.f32 %v18739_v10, %v5785_v56  ;;  %v9554_v10 = vcombine.high %v9546_v30, %v9546_v30  ;;  %v15164_v25 = vpop.f32.mrb[91].mxu1  ;;  %v9904_v29 = vcombine.low %v9896_v39, %v9903_v23 }
 0x236   : > { %v5708_v0 = vpop.f32.mrb[158].mxu0 }
 0x237   : > { %v5786_v54 = vadd.f32 %v5708_v0, %v18679_v52  ;;  %v14978_v18 = vpop.f32.mrb[159].mxu0  ;;  %15282 = vmatmul.mubr.msk.f32.gmra.mrb[8].mxu0 %vm1655_vm1, %v9870_v60  ;;  %v9920_v52 = vrot.slane %v9906_v55, %v16005_v7  ;;  %v9923_v49 = vcombine.low %v9554_v10, %v9553_v57  ;;  %v9570_v60 = vrot.slane %v9556_v5, %v16005_v7 }
 0x238   : > { %15284 = vmatprep.mubr.msk.f32.mxu0 %vm15918_vm0, %v20268_v26  ;;  %v9930_v0 = vrot.slane %v9922_v62, %v16005_v7  ;;  %v14099_v62 = vld.sshfl [vmem:[%s16010_s13 + $0x11a] sm:$0x3 pattern:$0x76325410] }
 0x239   : > { %v19006_v3 = vadd.f32 %v18762_v24, %v5786_v54  ;;  %v19010_v13 = vpop.f32.mrb[92].mxu1  ;;  %v9571_v24 = vcombine.high %v9563_v32, %v9563_v32  ;;  %v9921_v39 = vcombine.low %v9913_v36, %v9920_v52  ;;  %v9572_v18 = vcombine.high %v9570_v60, %v9570_v60 }
 0x23a   : > { %v5713_v11 = vpop.f32.mrb[160].mxu0  ;;  %v15167_v38 = vpop.f32.mrb[93].mxu1  ;;  %v9947_v32 = vrot.slane %v9939_v8, %v16005_v7 }
 0x23b   : > { %v5787_v6 = vadd.f32 %v5713_v11, %v18694_v53  ;;  %v14981_v56 = vpop.f32.mrb[161].mxu0  ;;  %15285 = vmatmul.mubr.msk.f32.gmra.mrb[10].mxu0 %vm1655_vm1, %v9887_v16  ;;  %v9937_v16 = vrot.slane %v9923_v49, %v16005_v7  ;;  %v9940_v55 = vcombine.low %v9571_v24, %v9570_v60  ;;  %v9956_v19 = vcombine.low %v9572_v18, %v14099_v62 }
 0x23c   : > { %15287 = vmatprep.mubr.msk.f32.mxu0 %vm15918_vm0, %v20268_v26 }
 0x23d   : > { %v19018_v30 = vadd.f32 %v18777_v14, %v5787_v6  ;;  %v9938_v5 = vcombine.low %v9930_v0, %v9937_v16  ;;  %v9954_v25 = vrot.slane %v9940_v55, %v16005_v7 }
 0x23e   : > { %v5718_v43 = vpop.f32.mrb[162].mxu0  ;;  %v19024_v47 = vpop.f32.mrb[94].mxu1 }
 0x23f   : > { %v5788_v53 = vadd.f32 %v5718_v43, %v18705_v17  ;;  %v14984_v23 = vpop.f32.mrb[163].mxu0  ;;  %15288 = vmatmul.mubr.msk.f32.gmra.mrb[12].mxu0 %vm1655_vm1, %v9904_v29  ;;  %v15170_v14 = vpop.f32.mrb[95].mxu1  ;;  %v9955_v52 = vcombine.low %v9947_v32, %v9954_v25 }
 0x240   : > { %15290 = vmatprep.mubr.msk.f32.mxu0 %vm15918_vm0, %v20268_v26 }
 0x241   : > { %v19029_v57 = vadd.f32 %v18794_v40, %v5788_v53 }
 0x242   : > { %v5723_v54 = vpop.f32.mrb[164].mxu0 }
 0x243   : > { %v5789_v17 = vadd.f32 %v5723_v54, %v18718_v27  ;;  %v14987_v10 = vpop.f32.mrb[165].mxu0  ;;  %15291 = vmatmul.mubr.msk.f32.gmra.mrb[14].mxu0 %vm1655_vm1, %v9921_v39 }
 0x244   : > { %15293 = vmatprep.mubr.msk.f32.mxu0 %vm15918_vm0, %v20268_v26  ;;  %v19041_v29 = vpop.f32.mrb[96].mxu1 }
 0x245   : > { %v19039_v11 = vadd.f32 %v18812_v9, %v5789_v17  ;;  %v15173_v6 = vpop.f32.mrb[97].mxu1 }
 0x246   : > { %v5728_v40 = vpop.f32.mrb[166].mxu0 }
 0x247   : > { %v5790_v27 = vadd.f32 %v5728_v40, %v18733_v59  ;;  %v14990_v36 = vpop.f32.mrb[167].mxu0  ;;  %15294 = vmatmul.mubr.msk.f32.gmra.mrb[16].mxu0 %vm1655_vm1, %v9938_v5  ;;  %v9963_v59 = vrot.slane %v9956_v19, %v16005_v7 }
 0x248   : > { %15296 = vmatprep.mubr.msk.f32.mxu0 %vm15918_vm0, %v20268_v26  ;;  %v19050_v9 = vpop.f32.mrb[98].mxu1 }
 0x249   : > { %v19048_v56 = vadd.f32 %v18826_v4, %v5790_v27  ;;  %v15176_v38 = vpop.f32.mrb[99].mxu1 }
 0x24a   : > { %v5733_v49 = vpop.f32.mrb[168].mxu0 }
 0x24b   : > { %v5791_v60 = vadd.f32 %v5733_v49, %v18744_v44  ;;  %v14993_v24 = vpop.f32.mrb[169].mxu0  ;;  %15297 = vmatmul.mubr.msk.f32.gmra.mrb[18].mxu0 %vm1655_vm1, %v9955_v52  ;;  %v20414_v52 = vld [vmem:[#allocation24_spill] sm:$0xff] }
 0x24c   : > { %15299 = vmatprep.mubr.msk.f32.mxu0 %vm15918_vm0, %v20268_v26  ;;  %v20415_v24 = vld [vmem:[#allocation18_spill] sm:$0xff] }
 0x24d   : > { %v19058_v43 = vadd.f32 %v18843_v61, %v5791_v60 }
 0x24e   : > { %v5738_v39 = vpop.f32.mrb[170].mxu0  ;;  %v19062_v53 = vpop.f32.mrb[100].mxu1 }
 0x24f   : > { %v5792_v4 = vadd.f32 %v5738_v39, %v18758_v35  ;;  %v14996_v0 = vpop.f32.mrb[171].mxu0  ;;  %15300 = vmatmul.mubr.msk.f32.gmra.mrb[20].mxu0 %vm1655_vm1, %v9963_v59  ;;  %v15179_v23 = vpop.f32.mrb[101].mxu1  ;;  %v20416_v39 = vld [vmem:[#allocation29_spill] sm:$0xff] }
 0x251   : > { %v19065_v44 = vadd.f32 %v18865_v1, %v5792_v4 }
 0x252   : > { %v5743_v16 = vpop.f32.mrb[172].mxu0 }
 0x253   : > { %v5793_v8 = vadd.f32 %v5743_v16, %v18772_v12  ;;  %v14999_v55 = vpop.f32.mrb[173].mxu0  ;;  %v19071_v14 = vpop.f32.mrb[102].mxu1 }
 0x254   : > { %v15182_v18 = vpop.f32.mrb[103].mxu1 }
 0x255   : > { %v19069_v26 = vadd.f32 %v18876_v45, %v5793_v8 }
 0x256   : > { %v5748_v61 = vpop.f32.mrb[174].mxu0 }
 0x257   : > { %v5794_v35 = vadd.f32 %v5748_v61, %v18787_v20  ;;  %v15002_v54 = vpop.f32.mrb[175].mxu0 }
 0x259   : > { %v19075_v17 = vadd.f32 %v18890_v28, %v5794_v35 }
 0x25a   : > { %v5753_v1 = vpop.f32.mrb[176].mxu0  ;;  %v19078_v32 = vpop.f32.mrb[104].mxu1 }
 0x25b   : > { %v5795_v10 = vadd.f32 %v5753_v1, %v18800_v15  ;;  %v15005_v5 = vpop.f32.mrb[177].mxu0  ;;  %v15185_v12 = vpop.f32.mrb[105].mxu1  ;;  %v20417_v1 = vld [vmem:[#allocation17_spill] sm:$0xff] }
 0x25d   : > { %v19081_v45 = vadd.f32 %v18911_v31, %v5795_v10 }
 0x25e   : > { %v5758_v25 = vpop.f32.mrb[178].mxu0  ;;  %v19084_v20 = vpop.f32.mrb[106].mxu1 }
 0x25f   : > { %v5796_v62 = vadd.f32 %v5758_v25, %v18815_v37  ;;  %v15008_v40 = vpop.f32.mrb[179].mxu0  ;;  %v15188_v28 = vpop.f32.mrb[107].mxu1 }
 0x261   : > { %v19087_v27 = vadd.f32 %v18925_v46, %v5796_v62 }
 0x262   : > { %v5763_v36 = vpop.f32.mrb[180].mxu0 }
 0x263   : > { %v5797_v15 = vadd.f32 %v5763_v36, %v20414_v52  ;;  %v15011_v19 = vpop.f32.mrb[181].mxu0 }
 0x264   : > { %v19093_v49 = vpop.f32.mrb[108].mxu1 }
 0x265   : > { %v19091_v6 = vadd.f32 %v18943_v50, %v5797_v15  ;;  %v15191_v60 = vpop.f32.mrb[109].mxu1 }
 0x266   : > { %v5768_v31 = vpop.f32.mrb[182].mxu0 }
 0x267   : > { %v5798_v37 = vadd.f32 %v5768_v31, %v20415_v24  ;;  %v15014_v59 = vpop.f32.mrb[183].mxu0 }
 0x269   : > { %v19097_v38 = vadd.f32 %v18964_v21, %v5798_v37 }
 0x26a   : > { %v5773_v46 = vpop.f32.mrb[184].mxu0  ;;  %v9023_v23 = vpop.f32.mrb[110].mxu1 }
 0x26b   : > { %v5799_v4 = vadd.f32 %v5773_v46, %v20416_v39  ;;  %v15017_v0 = vpop.f32.mrb[185].mxu0  ;;  %v15194_v16 = vpop.f32.mrb[111].mxu1 }
 0x26d   : > { %v19101_v8 = vadd.f32 %v18981_v2, %v5799_v4 }
 0x26e   : > { %v7870_v50 = vpop.f32.mrb[186].mxu0 }
 0x26f   : > { %v7984_v55 = vadd.f32 %v7870_v50, %v18879_v41  ;;  %v15093_v61 = vpop.f32.mrb[187].mxu0 }
 0x270   : > { %v9028_v35 = vpop.f32.mrb[112].mxu1 }
 0x271   : > { %v19105_v54 = vadd.f32 %v18998_v22, %v7984_v55  ;;  %v15197_v18 = vpop.f32.mrb[113].mxu1 }
 0x272   : > { %v7875_v21 = vpop.f32.mrb[188].mxu0 }
 0x273   : > { %v7985_v10 = vadd.f32 %v7875_v21, %v20417_v1  ;;  %v15096_v5 = vpop.f32.mrb[189].mxu0 }
 0x275   : > { %v19109_v12 = vadd.f32 %v19010_v13, %v7985_v10  ;;  %v9033_v62 = vpop.f32.mrb[114].mxu1 }
 0x276   : > { %v7880_v25 = vpop.f32.mrb[190].mxu0  ;;  %v15200_v28 = vpop.f32.mrb[115].mxu1 }
 0x277   : > { %v7986_v2 = vadd.f32 %v7880_v25, %v18906_v42  ;;  %v15099_v40 = vpop.f32.mrb[191].mxu0 }
 0x279   : > { %v19113_v41 = vadd.f32 %v19024_v47, %v7986_v2  ;;  %v9038_v22 = vpop.f32.mrb[116].mxu1 }
 0x27a   : > { %v7885_v36 = vpop.f32.mrb[192].mxu0  ;;  %v15203_v19 = vpop.f32.mrb[117].mxu1 }
 0x27b   : > { %v7987_v52 = vadd.f32 %v7885_v36, %v18920_v33  ;;  %v15102_v15 = vpop.f32.mrb[193].mxu0 }
 0x27d   : > { %v19117_v31 = vadd.f32 %v19041_v29, %v7987_v52 }
 0x27e   : > { %v7890_v13 = vpop.f32.mrb[194].mxu0 }
 0x27f   : > { %v7988_v60 = vadd.f32 %v7890_v13, %v18934_v51  ;;  %v15105_v24 = vpop.f32.mrb[195].mxu0  ;;  %v9043_v37 = vpop.f32.mrb[118].mxu1 }
 0x280   : > { %v15206_v59 = vpop.f32.mrb[119].mxu1 }
 0x281   : > { %v19121_v42 = vadd.f32 %v19050_v9, %v7988_v60 }
 0x282   : > { %v7895_v47 = vpop.f32.mrb[196].mxu0 }
 0x283   : > { %v7989_v46 = vadd.f32 %v7895_v47, %v18948_v58  ;;  %v15108_v39 = vpop.f32.mrb[197].mxu0 }
 0x285   : > { %v19125_v33 = vadd.f32 %v19062_v53, %v7989_v46  ;;  %v9048_v0 = vpop.f32.mrb[120].mxu1  ;;  %v19153_v46 = vld [vmem:[%s20186_s3] sm:$0xf] }
 0x286   : > { %v7900_v4 = vpop.f32.mrb[198].mxu0  ;;  %v15209_v50 = vpop.f32.mrb[121].mxu1  ;;  %15328 = vmatprep.subr.msk.mxu1 %vm11477_vm2, %v19153_v46 }
 0x287   : > { %v7990_v29 = vadd.f32 %v7900_v4, %v18960_v34  ;;  %v15111_v16 = vpop.f32.mrb[199].mxu0 }
 0x289   : > { %v19129_v51 = vadd.f32 %v19071_v14, %v7990_v29 }
 0x28a   : > { %v7905_v55 = vpop.f32.mrb[200].mxu0  ;;  %v9053_v18 = vpop.f32.mrb[122].mxu1 }
 0x28b   : > { %v7991_v9 = vadd.f32 %v7905_v55, %v18975_v63  ;;  %v15114_v61 = vpop.f32.mrb[201].mxu0  ;;  %v15212_v21 = vpop.f32.mrb[123].mxu1 }
 0x28d   : > { %v19133_v58 = vadd.f32 %v19078_v32, %v7991_v9 }
 0x28e   : > { %v7910_v53 = vpop.f32.mrb[202].mxu0 }
 0x28f   : > { %v7992_v1 = vadd.f32 %v7910_v53, %v18992_v48  ;;  %v15117_v10 = vpop.f32.mrb[203].mxu0 }
 0x290   : > { %v9058_v5 = vpop.f32.mrb[124].mxu1 }
 0x291   : > { %v19137_v34 = vadd.f32 %v19084_v20, %v7992_v1  ;;  %v15215_v25 = vpop.f32.mrb[125].mxu1 }
 0x292   : > { %v7915_v14 = vpop.f32.mrb[204].mxu0 }
 0x293   : > { %v7993_v2 = vadd.f32 %v7915_v14, %v19006_v3  ;;  %v15120_v40 = vpop.f32.mrb[205].mxu0 }
 0x295   : > { %v19141_v63 = vadd.f32 %v19093_v49, %v7993_v2  ;;  %v9063_v28 = vpop.f32.mrb[126].mxu1 }
 0x296   : > { %v7920_v36 = vpop.f32.mrb[206].mxu0  ;;  %v15218_v32 = vpop.f32.mrb[127].mxu1 }
 0x297   : > { %v7994_v52 = vadd.f32 %v7920_v36, %v19018_v30  ;;  %v15123_v15 = vpop.f32.mrb[207].mxu0 }
 0x299   : > { %v19144_v48 = vadd.f32 %v9023_v23, %v7994_v52 }
 0x29a   : > { %v7925_v19 = vpop.f32.mrb[208].mxu0 }
 0x29b   : > { %v7995_v20 = vadd.f32 %v7925_v19, %v19029_v57  ;;  %v15126_v13 = vpop.f32.mrb[209].mxu0 }
 0x29c   : > { %v9068_v60 = vpop.f32.mrb[128].mxu1 }
 0x29d   : > { %v19147_v24 = vadd.f32 %v9028_v35, %v7995_v20  ;;  %v15221_v3 = vpop.f32.mrb[129].mxu1 }
 0x29e   : > { %v7930_v59 = vpop.f32.mrb[210].mxu0 }
 0x29f   : > { %v7996_v49 = vadd.f32 %v7930_v59, %v19039_v11  ;;  %v15129_v47 = vpop.f32.mrb[211].mxu0 }
 0x2a0   : > { %v9073_v30 = vpop.f32.mrb[130].mxu1 }
 0x2a1   : > { %v19157_v23 = vadd.f32 %v9033_v62, %v7996_v49  ;;  %v15224_v57 = vpop.f32.mrb[131].mxu1 }
 0x2a2   : > { %v7935_v39 = vpop.f32.mrb[212].mxu0 }
 0x2a3   : > { %v7997_v35 = vadd.f32 %v7935_v39, %v19048_v56  ;;  %v15132_v4 = vpop.f32.mrb[213].mxu0  ;;  %v20418_v39 = vld [vmem:[#allocation3_spill] sm:$0xff] }
 0x2a5   : > { %v19160_v29 = vadd.f32 %v9038_v22, %v7997_v35  ;;  %v10732_v35 = vadd.s32 16, %v20418_v39 }
 0x2a6   : > { %v7940_v11 = vpop.f32.mrb[214].mxu0  ;;  %v9078_v16 = vpop.f32.mrb[132].mxu1 }
 0x2a7   : > { %v7998_v50 = vadd.f32 %v7940_v11, %v19058_v43  ;;  %v15135_v55 = vpop.f32.mrb[215].mxu0  ;;  %v15227_v9 = vpop.f32.mrb[133].mxu1 }
 0x2a8   : > { %v19202_v55 = vstv %s14126_s29  ;;  %v19205_v9 = vadd.s32 4294967295, %v20418_v39  ;;  %s315_s29 = sadd.s32 %s13633_s28, %s13632_s20 }
 0x2a9   : > { %v19163_v61 = vadd.f32 %v9043_v37, %v7998_v50  ;;  %vm10736_vm4 = vcmp.ge.s32.totalorder %v19202_v55, 0  ;;  %vm10746_vm5 = vcmp.lt.s32.totalorder %v19202_v55, 16  ;;  %s13634_s21 = sshll.u32 %s315_s29, 3 }
 0x2aa   : > { %v7945_v21 = vpop.f32.mrb[216].mxu0  ;;  %v9083_v53 = vpop.f32.mrb[134].mxu1  ;;  %vm10766_vm7 = vcmp.ge.s32.totalorder %v19205_v9, 0  ;;  %vm19229_vm13 = vmand %vm10736_vm4, %vm10746_vm5  ;;  %v14183_v9 = vld [vmem:[%s20186_s3 + $0xc] sm:$0xf]  ;;  %s20092_s8 = scalar_lea.vmem %s20188_s5, %s13634_s21  ;;  %s20105_s11 = scalar_lea.vmem %s20189_s6, %s13634_s21 }
 0x2ab   : > { %v7999_v62 = vadd.f32 %v7945_v21, %v19065_v44  ;;  %v15138_v1 = vpop.f32.mrb[217].mxu0  ;;  %v15230_v10 = vpop.f32.mrb[135].mxu1  ;;  %v19207_v21 = vadd.s32 4294967295, %v10732_v35  ;;  %vm19245_vm15 = vmand %vm19229_vm13, %vm10766_vm7 }
 0x2ad   : > { %v19166_v25 = vadd.f32 %v9048_v0, %v7999_v62  ;;  %vm10801_vm8 = vcmp.lt.s32.totalorder %v19207_v21, 16 }
 0x2ae   : > { %v7950_v56 = vpop.f32.mrb[218].mxu0  ;;  %vm10804_vm1 = vmand %vm19229_vm13, %vm10801_vm8 }
 0x2af   : > { %v8000_v22 = vadd.f32 %v7950_v56, %v19069_v26  ;;  %v15141_v14 = vpop.f32.mrb[219].mxu0 }
 0x2b0   : > { %v19215_v14 = vadd.s32 1, %v19202_v55 }
 0x2b1   : > { %v19169_v2 = vadd.f32 %v9053_v18, %v8000_v22 }
 0x2b2   : > { %v7955_v40 = vpop.f32.mrb[220].mxu0  ;;  %vm10737_vm12 = vcmp.ge.s32.totalorder %v19215_v14, 0  ;;  %vm10747_vm14 = vcmp.lt.s32.totalorder %v19215_v14, 16 }
 0x2b3   : > { %v8001_v43 = vadd.f32 %v7955_v40, %v19075_v17  ;;  %v15144_v36 = vpop.f32.mrb[221].mxu0  ;;  %vm19271_vm4 = vmand %vm10737_vm12, %vm10747_vm14 }
 0x2b5   : > { %v19172_v37 = vadd.f32 %v9058_v5, %v8001_v43 }
 0x2b6   : > { %v7960_v32 = vpop.f32.mrb[222].mxu0 }
 0x2b7   : > { %v8002_v52 = vadd.f32 %v7960_v32, %v19081_v45  ;;  %v15147_v44 = vpop.f32.mrb[223].mxu0 }
 0x2b9   : > { %v19175_v15 = vadd.f32 %v9063_v28, %v8002_v52 }
 0x2ba   : > { %v7965_v0 = vpop.f32.mrb[224].mxu0 }
 0x2bb   : > { %v8003_v19 = vadd.f32 %v7965_v0, %v19087_v27  ;;  %v15150_v26 = vpop.f32.mrb[225].mxu0 }
 0x2bd   : > { %v19178_v20 = vadd.f32 %v9068_v60, %v8003_v19 }
 0x2be   : > { %v7970_v18 = vpop.f32.mrb[226].mxu0 }
 0x2bf   : > { %v8004_v13 = vadd.f32 %v7970_v18, %v19091_v6  ;;  %v15153_v17 = vpop.f32.mrb[227].mxu0  ;;  %v19195_v6 = vld [vmem:[%s20185_s2] ss:$0 sm:$0xff] }
 0x2c1   : > { %v19181_v3 = vadd.f32 %v9073_v30, %v8004_v13 }
 0x2c2   : > { %v7975_v5 = vpop.f32.mrb[228].mxu0 }
 0x2c3   : > { %v8005_v59 = vadd.f32 %v7975_v5, %v19097_v38  ;;  %v15156_v45 = vpop.f32.mrb[229].mxu0 }
 0x2c5   : > { %v19184_v49 = vadd.f32 %v9078_v16, %v8005_v59 }
 0x2c6   : > { %v7980_v28 = vpop.f32.mrb[230].mxu0 }
 0x2c7   : > { %v8006_v47 = vadd.f32 %v7980_v28, %v19101_v8  ;;  %v15159_v57 = vpop.f32.mrb[231].mxu0 }
 0x2c8   : > { %v19237_v57 = vadd.s32 2, %v19202_v55 }
 0x2c9   : > { %v19187_v27 = vadd.f32 %v9083_v53, %v8006_v47 }
 0x2ca   : > { %v10076_v60 = vpop.f32.mrb[232].mxu0  ;;  %vm10738_vm5 = vcmp.ge.s32.totalorder %v19237_v57, 0  ;;  %vm10748_vm12 = vcmp.lt.s32.totalorder %v19237_v57, 16 }
 0x2cb   : > { %v10190_v38 = vadd.f32 %v10076_v60, %v19105_v54  ;;  %v15235_v30 = vpop.f32.mrb[233].mxu0 }
 0x2cd   : > { %v10220_v8 = vadd.f32 %v19195_v6, %v10190_v38 }
 0x2ce   : > { %v10081_v4 = vpop.f32.mrb[234].mxu0 }
 0x2cf   : > { %vm10243_vm3 = vcmp.gt.f32.partialorder %v10220_v8, 0.0  ;;  %v10266_v11 = vmul.f32 0.2, %v10220_v8  ;;  %v10191_v16 = vadd.f32 %v10081_v4, %v19109_v12  ;;  %v15238_v50 = vpop.f32.mrb[235].mxu0 }
 0x2d1   : > { %v10289_v54 = vsel %vm10243_vm3, %v10220_v8, %v10266_v11  ;;  %v10221_v53 = vadd.f32 %v19195_v6, %v10191_v16 }
 0x2d2   : > { %v10335_v62 = vcombine.high %v10289_v54, %v10289_v54  ;;  %v10342_v1 = vrot.slane %v10289_v54, %v16005_v7  ;;  %v10086_v10 = vpop.f32.mrb[236].mxu0 }
 0x2d3   : > { %vm10244_vm6 = vcmp.gt.f32.partialorder %v10221_v53, 0.0  ;;  %v10267_v12 = vmul.f32 0.2, %v10221_v53  ;;  %v10192_v56 = vadd.f32 %v10086_v10, %v19113_v41  ;;  %v15241_v22 = vpop.f32.mrb[237].mxu0 }
 0x2d4   : > { %v10349_v40 = vrot.slane %v10335_v62, %v16005_v7  ;;  %v10350_v43 = vcombine.high %v10342_v1, %v10342_v1 }
 0x2d5   : > { %v10290_v36 = vsel %vm10244_vm6, %v10221_v53, %v10267_v12  ;;  %v10222_v32 = vadd.f32 %v19195_v6, %v10192_v56  ;;  %vm19286_vm6 = vmand %vm19271_vm4, %vm10766_vm7 }
 0x2d6   : > { %v10351_v52 = vcombine.high %v10349_v40, %v10349_v40  ;;  %v10892_v44 = vcombine.low %v10342_v1, %v10350_v43  ;;  %v10352_v0 = vcombine.high %v10290_v36, %v10290_v36  ;;  %v10359_v41 = vrot.slane %v10290_v36, %v16005_v7  ;;  %v10091_v19 = vpop.f32.mrb[238].mxu0 }
 0x2d7   : > { %vm10245_vm11 = vcmp.gt.f32.partialorder %v10222_v32, 0.0  ;;  %v10268_v26 = vmul.f32 0.2, %v10222_v32  ;;  %v10193_v18 = vadd.f32 %v10091_v19, %v19117_v31  ;;  %v15244_v13 = vpop.f32.mrb[239].mxu0 }
 0x2d8   : > { %v10893_v17 = vcombine.low %v10349_v40, %v10351_v52  ;;  %v10366_v5 = vrot.slane %v10352_v0, %v16005_v7  ;;  %v10367_v59 = vcombine.high %v10359_v41, %v10359_v41  ;;  %v10900_v28 = vrot.slane %v10892_v44, %v16005_v7 }
 0x2d9   : > { %v10291_v31 = vsel %vm10245_vm11, %v10222_v32, %v10268_v26  ;;  %v10223_v47 = vadd.f32 %v19195_v6, %v10193_v18 }
 0x2da   : > { %v10907_v60 = vrot.slane %v10893_v17, %v16005_v7  ;;  %v10368_v38 = vcombine.high %v10366_v5, %v10366_v5  ;;  %v10909_v30 = vcombine.low %v10359_v41, %v10367_v59  ;;  %v10369_v39 = vcombine.high %v10291_v31, %v10291_v31  ;;  %v10096_v35 = vpop.f32.mrb[240].mxu0 }
 0x2db   : > { %v10376_v8 = vrot.slane %v10291_v31, %v16005_v7  ;;  %vm10246_vm0 = vcmp.gt.f32.partialorder %v10223_v47, 0.0  ;;  %v10269_v11 = vmul.f32 0.2, %v10223_v47  ;;  %v10194_v16 = vadd.f32 %v10096_v35, %v19121_v42  ;;  %v15247_v50 = vpop.f32.mrb[241].mxu0 }
 0x2dc   : > { %v10908_v54 = vcombine.low %v10900_v28, %v10907_v60  ;;  %v10910_v53 = vcombine.low %v10366_v5, %v10368_v38  ;;  %v10917_v62 = vrot.slane %v10909_v30, %v16005_v7  ;;  %v10383_v1 = vrot.slane %v10369_v39, %v16005_v7 }
 0x2dd   : > { %v10384_v10 = vcombine.high %v10376_v8, %v10376_v8  ;;  %v10932_v12 = vrot.slane %v10376_v8, %v16005_v7  ;;  %v10292_v56 = vsel %vm10246_vm0, %v10223_v47, %v10269_v11  ;;  %v10224_v22 = vadd.f32 %v19195_v6, %v10194_v16 }
 0x2de   : > { %v10924_v42 = vrot.slane %v10910_v53, %v16005_v7  ;;  %v11332_v40 = vsel %vm19245_vm15, %v10908_v54, 0.0  ;;  %v10385_v43 = vcombine.high %v10383_v1, %v10383_v1  ;;  %v10386_v36 = vcombine.high %v10292_v56, %v10292_v56  ;;  %v10101_v32 = vpop.f32.mrb[242].mxu0 }
 0x2df   : > { %v10933_v52 = vcombine.low %v10384_v10, %v10383_v1  ;;  %v11334_v44 = vsel %vm10804_vm1, %v10932_v12, 0.0  ;;  %11363 = vst.msk [vmem:[#allocation2] sm:$0xff] %vm11362_vm9, %v11332_v40  ;;  %v10393_v0 = vrot.slane %v10292_v56, %v16005_v7  ;;  %vm10247_vm3 = vcmp.gt.f32.partialorder %v10224_v22, 0.0  ;;  %v15250_v41 = vpop.f32.mrb[243].mxu0  ;;  %vm19326_vm1 = vmand %vm10738_vm5, %vm10748_vm12 }
 0x2e0   : > { %v10925_v19 = vcombine.low %v10917_v62, %v10924_v42  ;;  %11366 = vst.msk [vmem:[#allocation2 + $0x10] sm:$0x3] %vm11365_vm10, %v11334_v44  ;;  %v10400_v26 = vrot.slane %v10386_v36, %v16005_v7  ;;  %v10270_v18 = vmul.f32 0.2, %v10224_v22  ;;  %v10195_v13 = vadd.f32 %v10101_v32, %v19125_v33  ;;  %vm19366_vm5 = vmand %vm19326_vm1, %vm10766_vm7 }
 0x2e1   : > { %v10941_v17 = vrot.slane %v10933_v52, %v16005_v7  ;;  %v10401_v5 = vcombine.high %v10393_v0, %v10393_v0  ;;  %v10934_v28 = vcombine.low %v10385_v43, %v10393_v0  ;;  %v19294_v53 = vadd.s32 3, %v19202_v55 }
 0x2e2   : > { %v11333_v31 = vsel %vm19229_vm13, %v10925_v19, 0.0  ;;  %v10293_v47 = vsel %vm10247_vm3, %v10224_v22, %v10270_v18  ;;  %v10402_v60 = vcombine.high %v10400_v26, %v10400_v26  ;;  %v10225_v33 = vadd.f32 %v19195_v6, %v10195_v13  ;;  %v10106_v38 = vpop.f32.mrb[244].mxu0  ;;  %vm19301_vm13 = vmand %vm19271_vm4, %vm10801_vm8 }
 0x2e3   : > { %11364 = vst.msk [vmem:[#allocation2 + $0x8] sm:$0xff] %vm11362_vm9, %v11333_v31  ;;  %v10948_v30 = vrot.slane %v10934_v28, %v16005_v7  ;;  %v10950_v14 = vcombine.low %v10401_v5, %v10400_v26  ;;  %v10403_v39 = vcombine.high %v10293_v47, %v10293_v47  ;;  %v10410_v35 = vrot.slane %v10293_v47, %v16005_v7  ;;  %v15253_v8 = vpop.f32.mrb[245].mxu0  ;;  %vm19355_vm3 = vmand %vm19326_vm1, %vm10801_vm8 }
 0x2e4   : > { %vm10248_vm11 = vcmp.gt.f32.partialorder %v10225_v33, 0.0  ;;  %v10271_v4 = vmul.f32 0.2, %v10225_v33  ;;  %v10196_v11 = vadd.f32 %v10106_v38, %v19129_v51  ;;  %vm10739_vm15 = vcmp.ge.s32.totalorder %v19294_v53, 0 }
 0x2e5   : > { %v10949_v16 = vcombine.low %v10941_v17, %v10948_v30  ;;  %v10417_v50 = vrot.slane %v10403_v39, %v16005_v7  ;;  %v10418_v54 = vcombine.high %v10410_v35, %v10410_v35  ;;  %v10958_v62 = vrot.slane %v10950_v14, %v16005_v7  ;;  %v19338_v39 = vld [vmem:[%s20186_s3 + $0x8] sm:$0xf] }
 0x2e6   : > { %v10951_v10 = vcombine.low %v10402_v60, %v10410_v35  ;;  %v10294_v12 = vsel %vm10248_vm11, %v10225_v33, %v10271_v4  ;;  %v10226_v51 = vadd.f32 %v19195_v6, %v10196_v11  ;;  %v10111_v56 = vpop.f32.mrb[246].mxu0  ;;  %vm10749_vm0 = vcmp.lt.s32.totalorder %v19294_v53, 16 }
 0x2e7   : > { %v11335_v22 = vsel %vm19286_vm6, %v10949_v16, 0.0  ;;  %v10419_v42 = vcombine.high %v10417_v50, %v10417_v50  ;;  %v10973_v40 = vrot.slane %v10418_v54, %v16005_v7  ;;  %v10420_v43 = vcombine.high %v10294_v12, %v10294_v12  ;;  %v15256_v36 = vpop.f32.mrb[247].mxu0 }
 0x2e8   : > { %11367 = vst.msk [vmem:[#allocation2 + $0x18] sm:$0xff] %vm11362_vm9, %v11335_v22  ;;  %v10965_v32 = vrot.slane %v10951_v10, %v16005_v7  ;;  %v10427_v52 = vrot.slane %v10294_v12, %v16005_v7  ;;  %vm10249_vm14 = vcmp.gt.f32.partialorder %v10226_v51, 0.0  ;;  %v10272_v44 = vmul.f32 0.2, %v10226_v51 }
 0x2e9   : > { %v10974_v0 = vcombine.low %v10417_v50, %v10419_v42  ;;  %v11337_v41 = vsel %vm19301_vm13, %v10973_v40, 0.0  ;;  %v10434_v19 = vrot.slane %v10420_v43, %v16005_v7  ;;  %v10197_v26 = vadd.f32 %v10111_v56, %v19133_v58  ;;  %vm19400_vm13 = vmand %vm10739_vm15, %vm10749_vm0 }
 0x2ea   : > { %v10966_v18 = vcombine.low %v10958_v62, %v10965_v32  ;;  %11369 = vst.msk [vmem:[#allocation2 + $0x28] sm:$0x3] %vm11365_vm10, %v11337_v41  ;;  %v10435_v13 = vcombine.high %v10427_v52, %v10427_v52  ;;  %v10295_v17 = vsel %vm10249_vm14, %v10226_v51, %v10272_v44  ;;  %v10116_v5 = vpop.f32.mrb[248].mxu0  ;;  %v11411_v28 = vld [vmem:[#allocation2 + $0x1] sm:$0xff]  ;;  %v11412_v31 = vld [vmem:[#allocation2 + $0x9] sm:$0xff]  ;;  %v19320_v47 = vadd.s32 4, %v19202_v55  ;;  %vm19418_vm15 = vmand %vm19400_vm13, %vm10766_vm7 }
 0x2eb   : > { %v10436_v60 = vcombine.high %v10434_v19, %v10434_v19  ;;  %v10437_v33 = vcombine.high %v10295_v17, %v10295_v17  ;;  %v10444_v38 = vrot.slane %v10295_v17, %v16005_v7  ;;  %v15259_v30 = vpop.f32.mrb[249].mxu0  ;;  %15304 = vmatprep.mubr.msk.f32.mxu1 %vm11362_vm9, %v11411_v28  ;;  %v19333_v14 = vadd.s32 5, %v19202_v55  ;;  %vm19429_vm0 = vmand %vm19400_vm13, %vm10801_vm8 }
 0x2ec   : > { %v11336_v57 = vsel %vm19271_vm4, %v10966_v18, 0.0  ;;  %v10975_v35 = vcombine.low %v10427_v52, %v10435_v13  ;;  %v10227_v8 = vadd.f32 %v19195_v6, %v10197_v26  ;;  %v10198_v45 = vadd.f32 %v10116_v5, %v19137_v34  ;;  %15305 = vmatmul.mubr.msk.f32.vlgmr.msra.gmra.mrb[136].mxu1 %vm11362_vm9, %v11412_v31 }
 0x2ed   : > { %v10982_v4 = vrot.slane %v10974_v0, %v16005_v7  ;;  %11368 = vst.msk [vmem:[#allocation2 + $0x20] sm:$0xff] %vm11362_vm9, %v11336_v57  ;;  %v10991_v11 = vcombine.low %v10434_v19, %v10436_v60  ;;  %v10451_v16 = vrot.slane %v10437_v33, %v16005_v7  ;;  %v10452_v50 = vcombine.high %v10444_v38, %v10444_v38 }
 0x2ee   : > { %15329 = vmatpush3.msk.msra.mxu1 %vm11477_vm2, %v19153_v46  ;;  %v10989_v59 = vrot.slane %v10975_v35, %v16005_v7  ;;  %vm10250_vm4 = vcmp.gt.f32.partialorder %v10227_v8, 0.0  ;;  %v10273_v54 = vmul.f32 0.2, %v10227_v8  ;;  %v10228_v62 = vadd.f32 %v19195_v6, %v10198_v45  ;;  %v10121_v1 = vpop.f32.mrb[250].mxu0 }
 0x2ef   : > { %15354 = vmatprep.subr.msk.mxu1 %vm11477_vm2, %v19338_v39  ;;  %v10999_v10 = vrot.slane %v10991_v11, %v16005_v7  ;;  %v10992_v12 = vcombine.low %v10444_v38, %v10452_v50  ;;  %v11014_v51 = vrot.slane %v10451_v16, %v16005_v7  ;;  %v10453_v56 = vcombine.high %v10451_v16, %v10451_v16  ;;  %v15262_v22 = vpop.f32.mrb[251].mxu0 }
 0x2f0   : > { %v10990_v42 = vcombine.low %v10982_v4, %v10989_v59  ;;  %v10296_v40 = vsel %vm10250_vm4, %v10227_v8, %v10273_v54  ;;  %vm10251_vm6 = vcmp.gt.f32.partialorder %v10228_v62, 0.0  ;;  %v10274_v43 = vmul.f32 0.2, %v10228_v62 }
 0x2f1   : > { %v11006_v36 = vrot.slane %v10992_v12, %v16005_v7  ;;  %v11340_v32 = vsel %vm19355_vm3, %v11014_v51, 0.0  ;;  %v10454_v52 = vcombine.high %v10296_v40, %v10296_v40  ;;  %v10461_v44 = vrot.slane %v10296_v40, %v16005_v7 }
 0x2f2   : > { %v11338_v0 = vsel %vm19366_vm5, %v10990_v42, 0.0  ;;  %11372 = vst.msk [vmem:[#allocation2 + $0x40] sm:$0x3] %vm11365_vm10, %v11340_v32  ;;  %v10297_v41 = vsel %vm10251_vm6, %v10228_v62, %v10274_v43  ;;  %v10199_v19 = vadd.f32 %v10121_v1, %v19141_v63  ;;  %v10126_v26 = vpop.f32.mrb[252].mxu0  ;;  %v19381_v18 = vadd.s32 6, %v19202_v55 }
 0x2f3   : > { %11370 = vst.msk [vmem:[#allocation2 + $0x30] sm:$0xff] %vm11362_vm9, %v11338_v0  ;;  %v11007_v13 = vcombine.low %v10999_v10, %v11006_v36  ;;  %v10468_v17 = vrot.slane %v10454_v52, %v16005_v7  ;;  %v10469_v5 = vcombine.high %v10461_v44, %v10461_v44  ;;  %v11015_v28 = vcombine.low %v10453_v56, %v10461_v44  ;;  %v15265_v31 = vpop.f32.mrb[253].mxu0 }
 0x2f4   : > { %v10471_v60 = vcombine.high %v10297_v41, %v10297_v41  ;;  %v10478_v33 = vrot.slane %v10297_v41, %v16005_v7  ;;  %v10229_v38 = vadd.f32 %v19195_v6, %v10199_v19  ;;  %v10200_v30 = vadd.f32 %v10126_v26, %v19144_v48  ;;  %v19388_v63 = vld [vmem:[#allocation2 + $0x19] sm:$0xff]  ;;  %v19390_v57 = vld [vmem:[#allocation2 + $0x21] sm:$0xff] }
 0x2f5   : > { %vm10740_vm11 = vcmp.ge.s32.totalorder %v19320_v47, 0  ;;  %vm10750_vm12 = vcmp.lt.s32.totalorder %v19320_v47, 16  ;;  %v11339_v35 = vsel %vm19326_vm1, %v11007_v13, 0.0  ;;  %v11016_v48 = vcombine.low %v10469_v5, %v10468_v17  ;;  %15307 = vmatprep.mubr.msk.f32.mxu1 %vm11362_vm9, %v19388_v63 }
 0x2f6   : > { %v11023_v45 = vrot.slane %v11015_v28, %v16005_v7  ;;  %v10470_v4 = vcombine.high %v10468_v17, %v10468_v17  ;;  %11371 = vst.msk [vmem:[#allocation2 + $0x38] sm:$0xff] %vm11362_vm9, %v11339_v35  ;;  %v10485_v58 = vrot.slane %v10471_v60, %v16005_v7  ;;  %v10486_v11 = vcombine.high %v10478_v33, %v10478_v33  ;;  %v10131_v53 = vpop.f32.mrb[254].mxu0  ;;  %vm19465_vm6 = vmand %vm10740_vm11, %vm10750_vm12 }
 0x2f7   : > { %vm10252_vm14 = vcmp.gt.f32.partialorder %v10229_v38, 0.0  ;;  %v10275_v16 = vmul.f32 0.2, %v10229_v38  ;;  %15308 = vmatmul.mubr.msk.f32.gmra.mrb[138].mxu1 %vm11362_vm9, %v19390_v57  ;;  %v11030_v50 = vrot.slane %v11016_v48, %v16005_v7  ;;  %v10230_v34 = vadd.f32 %v19195_v6, %v10200_v30  ;;  %v15268_v62 = vpop.f32.mrb[255].mxu0  ;;  %vm19478_vm11 = vmand %vm19465_vm6, %vm10766_vm7 }
 0x2f8   : > { %v11032_v59 = vcombine.low %v10470_v4, %v10478_v33  ;;  %v10201_v54 = vadd.f32 %v10131_v53, %v19147_v24  ;;  %v10487_v46 = vcombine.high %v10485_v58, %v10485_v58  ;;  %v11033_v10 = vcombine.low %v10486_v11, %v10485_v58  ;;  %vm10816_vm12 = vmand %vm19465_vm6, %vm10801_vm8 }
 0x2f9   : > { %v10298_v12 = vsel %vm10252_vm14, %v10229_v38, %v10275_v16  ;;  %v19423_v51 = vadd.s32 7, %v19202_v55  ;;  %v11031_v56 = vcombine.low %v11023_v45, %v11030_v50  ;;  %vm10253_vm1 = vcmp.gt.f32.partialorder %v10230_v34, 0.0 }
 0x2fa   : > { %v11040_v22 = vrot.slane %v11032_v59, %v16005_v7  ;;  %v10488_v42 = vcombine.high %v10298_v12, %v10298_v12  ;;  %v10495_v40 = vrot.slane %v10298_v12, %v16005_v7  ;;  %v11047_v43 = vrot.slane %v11033_v10, %v16005_v7  ;;  %v10136_v52 = vpop.f32.mrb[0].mxu0 }
 0x2fb   : > { %v11055_v36 = vrot.slane %v10487_v46, %v16005_v7  ;;  %v10276_v32 = vmul.f32 0.2, %v10230_v34  ;;  %v11341_v44 = vsel %vm19418_vm15, %v11031_v56, 0.0  ;;  %v10231_v19 = vadd.f32 %v19195_v6, %v10201_v54  ;;  %v15271_v26 = vpop.f32.mrb[1].mxu0 }
 0x2fc   : > { %v10502_v0 = vrot.slane %v10488_v42, %v16005_v7  ;;  %v10503_v41 = vcombine.high %v10495_v40, %v10495_v40  ;;  %11373 = vst.msk [vmem:[#allocation2 + $0x48] sm:$0xff] %vm11362_vm9, %v11341_v44  ;;  %v11048_v13 = vcombine.low %v11040_v22, %v11047_v43  ;;  %v10202_v28 = vadd.f32 %v10136_v52, %v19157_v23 }
 0x2fd   : > { %v11343_v17 = vsel %vm19429_vm0, %v11055_v36, 0.0  ;;  %v10299_v5 = vsel %vm10253_vm1, %v10230_v34, %v10276_v32  ;;  %vm10741_vm3 = vcmp.ge.s32.totalorder %v19333_v14, 0  ;;  %vm10751_vm4 = vcmp.lt.s32.totalorder %v19333_v14, 16  ;;  %v19449_v30 = vld [vmem:[#allocation2 + $0x31] sm:$0xff]  ;;  %v19451_v35 = vld [vmem:[#allocation2 + $0x39] sm:$0xff] }
 0x2fe   : > { %11375 = vst.msk [vmem:[#allocation2 + $0x58] sm:$0x3] %vm11365_vm10, %v11343_v17  ;;  %v10504_v31 = vcombine.high %v10502_v0, %v10502_v0  ;;  %v11056_v60 = vcombine.low %v10495_v40, %v10503_v41  ;;  %v10505_v33 = vcombine.high %v10299_v5, %v10299_v5  ;;  %v10512_v38 = vrot.slane %v10299_v5, %v16005_v7  ;;  %v10141_v4 = vpop.f32.mrb[2].mxu0  ;;  %vm19510_vm1 = vmand %vm10741_vm3, %vm10751_vm4 }
 0x2ff   : > { %v11342_v48 = vsel %vm19400_vm13, %v11048_v13, 0.0  ;;  %vm10254_vm5 = vcmp.gt.f32.partialorder %v10231_v19, 0.0  ;;  %v10277_v23 = vmul.f32 0.2, %v10231_v19  ;;  %v10232_v45 = vadd.f32 %v19195_v6, %v10202_v28  ;;  %15310 = vmatprep.mubr.msk.f32.mxu1 %vm11362_vm9, %v19449_v30  ;;  %v15274_v50 = vpop.f32.mrb[3].mxu0  ;;  %vm19531_vm3 = vmand %vm19510_vm1, %vm10766_vm7 }
 0x300   : > { %11374 = vst.msk [vmem:[#allocation2 + $0x50] sm:$0xff] %vm11362_vm9, %v11342_v48  ;;  %v11057_v58 = vcombine.low %v10502_v0, %v10504_v31  ;;  %v11064_v11 = vrot.slane %v11056_v60, %v16005_v7  ;;  %v10519_v16 = vrot.slane %v10505_v33, %v16005_v7  ;;  %v10520_v53 = vcombine.high %v10512_v38, %v10512_v38 }
 0x301   : > { %15311 = vmatmul.mubr.msk.f32.gmra.mrb[140].mxu1 %vm11362_vm9, %v19451_v35  ;;  %v10300_v59 = vsel %vm10254_vm5, %v10231_v19, %v10277_v23  ;;  %vm10255_vm13 = vcmp.gt.f32.partialorder %v10232_v45, 0.0  ;;  %v10278_v34 = vmul.f32 0.2, %v10232_v45  ;;  %v10203_v54 = vadd.f32 %v10141_v4, %v19160_v29 }
 0x302   : > { %v11071_v62 = vrot.slane %v11057_v58, %v16005_v7  ;;  %v10521_v1 = vcombine.high %v10519_v16, %v10519_v16  ;;  %v11073_v46 = vcombine.low %v10512_v38, %v10520_v53  ;;  %v10522_v10 = vcombine.high %v10300_v59, %v10300_v59  ;;  %v10146_v22 = vpop.f32.mrb[4].mxu0 }
 0x303   : > { %v10529_v47 = vrot.slane %v10300_v59, %v16005_v7  ;;  %v10301_v56 = vsel %vm10255_vm13, %v10232_v45, %v10278_v34  ;;  %v10233_v24 = vadd.f32 %v19195_v6, %v10203_v54  ;;  %v19484_v29 = vadd.s32 8, %v19202_v55  ;;  %v15277_v32 = vpop.f32.mrb[5].mxu0 }
 0x304   : > { %v11072_v42 = vcombine.low %v11064_v11, %v11071_v62  ;;  %v11074_v40 = vcombine.low %v10519_v16, %v10521_v1  ;;  %v11081_v43 = vrot.slane %v11073_v46, %v16005_v7  ;;  %v10536_v36 = vrot.slane %v10522_v10, %v16005_v7 }
 0x305   : > { %v10537_v52 = vcombine.high %v10529_v47, %v10529_v47  ;;  %v11096_v44 = vrot.slane %v10529_v47, %v16005_v7  ;;  %v10539_v0 = vcombine.high %v10301_v56, %v10301_v56  ;;  %v10546_v41 = vrot.slane %v10301_v56, %v16005_v7 }
 0x306   : > { %v11088_v19 = vrot.slane %v11074_v40, %v16005_v7  ;;  %v11344_v26 = vsel %vm19478_vm11, %v11072_v42, 0.0  ;;  %v10538_v13 = vcombine.high %v10536_v36, %v10536_v36  ;;  %vm10256_vm14 = vcmp.gt.f32.partialorder %v10233_v24, 0.0  ;;  %v10151_v33 = vpop.f32.mrb[6].mxu0 }
 0x307   : > { %v11097_v17 = vcombine.low %v10537_v52, %v10536_v36  ;;  %v11346_v5 = vsel %vm10816_vm12, %v11096_v44, 0.0  ;;  %11376 = vst.msk [vmem:[#allocation2 + $0x60] sm:$0xff] %vm11362_vm9, %v11344_v26  ;;  %v10553_v28 = vrot.slane %v10539_v0, %v16005_v7  ;;  %v10554_v31 = vcombine.high %v10546_v41, %v10546_v41  ;;  %v19501_v60 = vld [vmem:[#allocation2 + $0x49] sm:$0xff]  ;;  %v19503_v38 = vld [vmem:[#allocation2 + $0x51] sm:$0xff]  ;;  %v15280_v11 = vpop.f32.mrb[7].mxu0 }
 0x308   : > { %vm10742_vm15 = vcmp.ge.s32.totalorder %v19381_v18, 0  ;;  %vm10752_vm0 = vcmp.lt.s32.totalorder %v19381_v18, 16  ;;  %v11089_v48 = vcombine.low %v11081_v43, %v11088_v19  ;;  %11378 = vst.msk [vmem:[#allocation2 + $0x70] sm:$0x3] %vm11365_vm10, %v11346_v5  ;;  %v11098_v45 = vcombine.low %v10538_v13, %v10546_v41  ;;  %15313 = vmatprep.mubr.msk.f32.mxu1 %vm11362_vm9, %v19501_v60 }
 0x309   : > { %v10279_v4 = vmul.f32 0.2, %v10233_v24  ;;  %v10204_v58 = vadd.f32 %v10146_v22, %v19163_v61  ;;  %v11105_v16 = vrot.slane %v11097_v17, %v16005_v7  ;;  %v11114_v53 = vcombine.low %v10554_v31, %v10553_v28  ;;  %15314 = vmatmul.mubr.msk.f32.gmra.mrb[142].mxu1 %vm11362_vm9, %v19503_v38 }
 0x30a   : > { %v10555_v50 = vcombine.high %v10553_v28, %v10553_v28  ;;  %v10205_v59 = vadd.f32 %v10151_v33, %v19166_v25  ;;  %v11345_v14 = vsel %vm19465_vm6, %v11089_v48, 0.0  ;;  %v11112_v34 = vrot.slane %v11098_v45, %v16005_v7  ;;  %v10156_v10 = vpop.f32.mrb[8].mxu0  ;;  %vm19546_vm6 = vmand %vm19510_vm1, %vm10801_vm8 }
 0x30b   : > { %v10302_v61 = vsel %vm10256_vm14, %v10233_v24, %v10279_v4  ;;  %v10234_v54 = vadd.f32 %v19195_v6, %v10204_v58  ;;  %11377 = vst.msk [vmem:[#allocation2 + $0x68] sm:$0xff] %vm11362_vm9, %v11345_v14  ;;  %v11122_v62 = vrot.slane %v11114_v53, %v16005_v7  ;;  %v10206_v56 = vadd.f32 %v10156_v10, %v19169_v2  ;;  %v15283_v24 = vpop.f32.mrb[9].mxu0  ;;  %vm19565_vm14 = vmand %vm10742_vm15, %vm10752_vm0 }
 0x30c   : > { %v10556_v8 = vcombine.high %v10302_v61, %v10302_v61  ;;  %v10563_v1 = vrot.slane %v10302_v61, %v16005_v7  ;;  %v10235_v46 = vadd.f32 %v19195_v6, %v10205_v59  ;;  %v11113_v47 = vcombine.low %v11105_v16, %v11112_v34  ;;  %vm19588_vm15 = vmand %vm19565_vm14, %vm10801_vm8 }
 0x30d   : > { %vm10257_vm4 = vcmp.gt.f32.partialorder %v10234_v54, 0.0  ;;  %v10280_v12 = vmul.f32 0.2, %v10234_v54  ;;  %v10236_v2 = vadd.f32 %v19195_v6, %v10206_v56  ;;  %vm10743_vm13 = vcmp.ge.s32.totalorder %v19423_v51, 0  ;;  %vm19601_vm0 = vmand %vm19565_vm14, %vm10766_vm7 }
 0x30e   : > { %v10570_v22 = vrot.slane %v10556_v8, %v16005_v7  ;;  %v10571_v42 = vcombine.high %v10563_v1, %v10563_v1  ;;  %v11115_v40 = vcombine.low %v10555_v50, %v10563_v1  ;;  %vm10258_vm5 = vcmp.gt.f32.partialorder %v10235_v46, 0.0  ;;  %v10161_v26 = vpop.f32.mrb[10].mxu0 }
 0x30f   : > { %v11347_v43 = vsel %vm19531_vm3, %v11113_v47, 0.0  ;;  %v10303_v32 = vsel %vm10257_vm4, %v10234_v54, %v10280_v12  ;;  %v10281_v52 = vmul.f32 0.2, %v10235_v46  ;;  %vm10753_vm11 = vcmp.lt.s32.totalorder %v19423_v51, 16  ;;  %v15286_v28 = vpop.f32.mrb[11].mxu0 }
 0x310   : > { %11379 = vst.msk [vmem:[#allocation2 + $0x78] sm:$0xff] %vm11362_vm9, %v11347_v43  ;;  %v10572_v44 = vcombine.high %v10570_v22, %v10570_v22  ;;  %v11129_v0 = vrot.slane %v11115_v40, %v16005_v7  ;;  %v11137_v41 = vrot.slane %v10571_v42, %v16005_v7  ;;  %v10573_v19 = vcombine.high %v10303_v32, %v10303_v32 }
 0x311   : > { %v10580_v13 = vrot.slane %v10303_v32, %v16005_v7  ;;  %v10304_v17 = vsel %vm10258_vm5, %v10235_v46, %v10281_v52  ;;  %vm10259_vm12 = vcmp.gt.f32.partialorder %v10236_v2, 0.0  ;;  %v10282_v5 = vmul.f32 0.2, %v10236_v2 }
 0x312   : > { %v11130_v31 = vcombine.low %v11122_v62, %v11129_v0  ;;  %v11138_v33 = vcombine.low %v10570_v22, %v10572_v44  ;;  %v11349_v48 = vsel %vm19546_vm6, %v11137_v41, 0.0  ;;  %v10587_v45 = vrot.slane %v10573_v19, %v16005_v7  ;;  %v19570_v50 = vld [vmem:[#allocation2 + $0x61] sm:$0xff]  ;;  %v19572_v59 = vld [vmem:[#allocation2 + $0x69] sm:$0xff]  ;;  %v10166_v18 = vpop.f32.mrb[12].mxu0 }
 0x313   : > { %11381 = vst.msk [vmem:[#allocation2 + $0x88] sm:$0x3] %vm11365_vm10, %v11349_v48  ;;  %v10588_v4 = vcombine.high %v10580_v13, %v10580_v13  ;;  %v10590_v11 = vcombine.high %v10304_v17, %v10304_v17  ;;  %v10597_v16 = vrot.slane %v10304_v17, %v16005_v7  ;;  %v10305_v53 = vsel %vm10259_vm12, %v10236_v2, %v10282_v5  ;;  %v15289_v46 = vpop.f32.mrb[13].mxu0 }
 0x314   : > { %v11146_v14 = vrot.slane %v11138_v33, %v16005_v7  ;;  %v11348_v34 = vsel %vm19510_vm1, %v11130_v31, 0.0  ;;  %v10589_v61 = vcombine.high %v10587_v45, %v10587_v45  ;;  %v10607_v54 = vcombine.high %v10305_v53, %v10305_v53  ;;  %15316 = vmatprep.mubr.msk.f32.mxu1 %vm11362_vm9, %v19570_v50  ;;  %vm19615_vm1 = vmand %vm10743_vm13, %vm10753_vm11 }
 0x315   : > { %11380 = vst.msk [vmem:[#allocation2 + $0x80] sm:$0xff] %vm11362_vm9, %v11348_v34  ;;  %v11139_v25 = vcombine.low %v10580_v13, %v10588_v4  ;;  %v10604_v62 = vrot.slane %v10590_v11, %v16005_v7  ;;  %v10605_v8 = vcombine.high %v10597_v16, %v10597_v16  ;;  %v10614_v1 = vrot.slane %v10305_v53, %v16005_v7  ;;  %vm19638_vm13 = vmand %vm19615_vm1, %vm10766_vm7 }
 0x316   : > { %15317 = vmatmul.mubr.msk.f32.gmra.mrb[144].mxu1 %vm11362_vm9, %v19572_v59  ;;  %v11155_v23 = vcombine.low %v10587_v45, %v10589_v61  ;;  %v10621_v47 = vrot.slane %v10607_v54, %v16005_v7  ;;  %v10207_v12 = vadd.f32 %v10161_v26, %v19172_v37  ;;  %v10208_v56 = vadd.f32 %v10166_v18, %v19175_v15  ;;  %v10171_v52 = vpop.f32.mrb[14].mxu0  ;;  %vm19664_vm12 = vmand %vm19615_vm1, %vm10801_vm8 }
 0x317   : > { %v11153_v24 = vrot.slane %v11139_v25, %v16005_v7  ;;  %v11156_v22 = vcombine.low %v10597_v16, %v10605_v8  ;;  %v11178_v42 = vrot.slane %v10604_v62, %v16005_v7  ;;  %v10606_v40 = vcombine.high %v10604_v62, %v10604_v62  ;;  %v15292_v19 = vpop.f32.mrb[15].mxu0 }
 0x318   : > { %v11163_v36 = vrot.slane %v11155_v23, %v16005_v7  ;;  %v10622_v32 = vcombine.high %v10614_v1, %v10614_v1  ;;  %v10237_v37 = vadd.f32 %v19195_v6, %v10207_v12  ;;  %v10623_v15 = vcombine.high %v10621_v47, %v10621_v47 }
 0x319   : > { %v11154_v2 = vcombine.low %v11146_v14, %v11153_v24  ;;  %v11170_v44 = vrot.slane %v11156_v22, %v16005_v7  ;;  %v11352_v0 = vsel %vm19588_vm15, %v11178_v42, 0.0  ;;  %v11179_v41 = vcombine.low %v10606_v40, %v10614_v1 }
 0x31a   : > { %11384 = vst.msk [vmem:[#allocation2 + $0xa0] sm:$0x3] %vm11365_vm10, %v11352_v0  ;;  %v11180_v13 = vcombine.low %v10622_v32, %v10621_v47  ;;  %vm10260_vm3 = vcmp.gt.f32.partialorder %v10237_v37, 0.0  ;;  %v10283_v17 = vmul.f32 0.2, %v10237_v37  ;;  %v10238_v5 = vadd.f32 %v19195_v6, %v10208_v56  ;;  %v10176_v53 = vpop.f32.mrb[16].mxu0 }
 0x31b   : > { %vm10744_vm4 = vcmp.ge.s32.totalorder %v19484_v29, 0  ;;  %vm10754_vm5 = vcmp.lt.s32.totalorder %v19484_v29, 16  ;;  %v11350_v28 = vsel %vm19601_vm0, %v11154_v2, 0.0  ;;  %v11171_v31 = vcombine.low %v11163_v36, %v11170_v44  ;;  %v15295_v18 = vpop.f32.mrb[17].mxu0 }
 0x31c   : > { %v11187_v33 = vrot.slane %v11179_v41, %v16005_v7  ;;  %v10209_v51 = vadd.f32 %v10171_v52, %v19178_v20  ;;  %11382 = vst.msk [vmem:[#allocation2 + $0x90] sm:$0xff] %vm11362_vm9, %v11350_v28  ;;  %v11194_v48 = vrot.slane %v11180_v13, %v16005_v7  ;;  %v10306_v45 = vsel %vm10260_vm3, %v10237_v37, %v10283_v17  ;;  %v19628_v11 = vld [vmem:[#allocation2 + $0x79] sm:$0xff]  ;;  %v19630_v16 = vld [vmem:[#allocation2 + $0x81] sm:$0xff]  ;;  %vm19682_vm3 = vmand %vm10744_vm4, %vm10754_vm5 }
 0x31d   : > { %vm10261_vm6 = vcmp.gt.f32.partialorder %v10238_v5, 0.0  ;;  %v10284_v4 = vmul.f32 0.2, %v10238_v5  ;;  %v11351_v14 = vsel %vm19565_vm14, %v11171_v31, 0.0  ;;  %v10624_v34 = vcombine.high %v10306_v45, %v10306_v45  ;;  %15319 = vmatprep.mubr.msk.f32.mxu1 %vm11362_vm9, %v19628_v11  ;;  %vm19706_vm4 = vmand %vm19682_vm3, %vm10766_vm7 }
 0x31e   : > { %v10631_v61 = vrot.slane %v10306_v45, %v16005_v7  ;;  %v10239_v54 = vadd.f32 %v19195_v6, %v10209_v51  ;;  %11383 = vst.msk [vmem:[#allocation2 + $0x98] sm:$0xff] %vm11362_vm9, %v11351_v14  ;;  %v11195_v58 = vcombine.low %v11187_v33, %v11194_v48  ;;  %15320 = vmatmul.mubr.msk.f32.gmra.mrb[146].mxu1 %vm11362_vm9, %v19630_v16  ;;  %v19651_v8 = vadd.s32 9, %v19202_v55  ;;  %v10181_v24 = vpop.f32.mrb[18].mxu0  ;;  %vm10828_vm5 = vmand %vm19682_vm3, %vm10801_vm8 }
 0x31f   : > { %v10307_v25 = vsel %vm10261_vm6, %v10238_v5, %v10284_v4  ;;  %v10210_v62 = vadd.f32 %v10176_v53, %v19181_v3  ;;  %v10638_v1 = vrot.slane %v10624_v34, %v16005_v7  ;;  %v15298_v40 = vpop.f32.mrb[19].mxu0 }
 0x320   : > { %v10639_v46 = vcombine.high %v10631_v61, %v10631_v61  ;;  %v11196_v23 = vcombine.low %v10623_v15, %v10631_v61  ;;  %v10641_v10 = vcombine.high %v10307_v25, %v10307_v25  ;;  %v11353_v47 = vsel %vm19638_vm13, %v11195_v58, 0.0 }
 0x321   : > { %v10648_v12 = vrot.slane %v10307_v25, %v16005_v7  ;;  %vm10262_vm11 = vcmp.gt.f32.partialorder %v10239_v54, 0.0  ;;  %v10285_v56 = vmul.f32 0.2, %v10239_v54  ;;  %11385 = vst.msk [vmem:[#allocation2 + $0xa8] sm:$0xff] %vm11362_vm9, %v11353_v47  ;;  %v10640_v22 = vcombine.high %v10638_v1, %v10638_v1  ;;  %v19796_v25 = vld [vmem:[#allocation2 + $0x60] sm:$0xff] }
 0x322   : > { %v11197_v3 = vcombine.low %v10639_v46, %v10638_v1  ;;  %v11204_v55 = vrot.slane %v11196_v23, %v16005_v7  ;;  %v10655_v42 = vrot.slane %v10641_v10, %v16005_v7  ;;  %v10240_v37 = vadd.f32 %v19195_v6, %v10210_v62  ;;  %v10186_v17 = vpop.f32.mrb[20].mxu0 }
 0x323   : > { %v10656_v36 = vcombine.high %v10648_v12, %v10648_v12  ;;  %v10308_v32 = vsel %vm10262_vm11, %v10239_v54, %v10285_v56  ;;  %v10211_v15 = vadd.f32 %v10181_v24, %v19184_v49  ;;  %v11219_v2 = vrot.slane %v10640_v22, %v16005_v7  ;;  %v15301_v45 = vpop.f32.mrb[21].mxu0 }
 0x324   : > { %v11211_v52 = vrot.slane %v11197_v3, %v16005_v7  ;;  %v10657_v44 = vcombine.high %v10655_v42, %v10655_v42  ;;  %v10658_v0 = vcombine.high %v10308_v32, %v10308_v32  ;;  %vm10745_vm14 = vcmp.ge.s32.totalorder %v19651_v8, 0 }
 0x325   : > { %vm10755_vm15 = vcmp.lt.s32.totalorder %v19651_v8, 16  ;;  %v11220_v41 = vcombine.low %v10648_v12, %v10656_v36  ;;  %v10665_v19 = vrot.slane %v10308_v32, %v16005_v7  ;;  %vm10263_vm0 = vcmp.gt.f32.partialorder %v10240_v37, 0.0  ;;  %v19686_v51 = vld [vmem:[#allocation2 + $0x91] sm:$0xff]  ;;  %v19688_v48 = vld [vmem:[#allocation2 + $0x99] sm:$0xff] }
 0x326   : > { %v10286_v13 = vmul.f32 0.2, %v10240_v37  ;;  %v11212_v5 = vcombine.low %v11204_v55, %v11211_v52  ;;  %v11355_v49 = vsel %vm19664_vm12, %v11219_v2, 0.0  ;;  %v11221_v28 = vcombine.low %v10655_v42, %v10657_v44  ;;  %15322 = vmatprep.mubr.msk.f32.mxu1 %vm11362_vm9, %v19686_v51  ;;  %vm19730_vm6 = vmand %vm10745_vm14, %vm10755_vm15 }
 0x327   : > { %v10672_v31 = vrot.slane %v10658_v0, %v16005_v7  ;;  %11387 = vst.msk [vmem:[#allocation2 + $0xb8] sm:$0x3] %vm11365_vm10, %v11355_v49  ;;  %v11228_v4 = vrot.slane %v11220_v41, %v16005_v7  ;;  %v10673_v53 = vcombine.high %v10665_v19, %v10665_v19  ;;  %v10241_v20 = vadd.f32 %v19195_v6, %v10211_v15  ;;  %vm10796_vm11 = vmand %vm19730_vm6, %vm10766_vm7  ;;  %v19875_v15 = vld [vmem:[#allocation2 + $0x92] sm:$0xff] }
 0x328   : > { %v10309_v14 = vsel %vm10263_vm0, %v10240_v37, %v10286_v13  ;;  %v11354_v29 = vsel %vm19615_vm1, %v11212_v5, 0.0  ;;  %v11235_v34 = vrot.slane %v11221_v28, %v16005_v7  ;;  %15323 = vmatmul.mubr.msk.f32.gmra.mrb[148].mxu1 %vm11362_vm9, %v19688_v48  ;;  %v10212_v23 = vadd.f32 %v10186_v17, %v19187_v27  ;;  %v11394_v17 = vld [vmem:[#allocation2] sm:$0xff]  ;;  %vm10831_vm7 = vmand %vm19730_vm6, %vm10801_vm8 }
 0x329   : > { %v10674_v61 = vcombine.high %v10672_v31, %v10672_v31  ;;  %v10675_v54 = vcombine.high %v10309_v14, %v10309_v14  ;;  %11386 = vst.msk [vmem:[#allocation2 + $0xb0] sm:$0xff] %vm11362_vm9, %v11354_v29  ;;  %v11237_v18 = vcombine.low %v10665_v19, %v10673_v53  ;;  %v10682_v58 = vrot.slane %v10309_v14, %v16005_v7  ;;  %v19762_v53 = vld [vmem:[#allocation2 + $0x18] sm:$0xff] }
 0x32a   : > { %vm10264_vm1 = vcmp.gt.f32.partialorder %v10241_v20, 0.0  ;;  %v10287_v26 = vmul.f32 0.2, %v10241_v20  ;;  %v11236_v62 = vcombine.low %v11228_v4, %v11235_v34  ;;  %v10242_v27 = vadd.f32 %v19195_v6, %v10212_v23  ;;  %v11395_v4 = vld [vmem:[#allocation2 + $0x8] sm:$0xff]  ;;  %v19816_v23 = vld [vmem:[#allocation2 + $0x98] sm:$0xff] }
 0x32b   : > { %v11238_v1 = vcombine.low %v10672_v31, %v10674_v61  ;;  %v10689_v46 = vrot.slane %v10675_v54, %v16005_v7  ;;  %v11245_v10 = vrot.slane %v11237_v18, %v16005_v7  ;;  %v10690_v47 = vcombine.high %v10682_v58, %v10682_v58  ;;  %v19772_v61 = vld [vmem:[#allocation2 + $0x20] sm:$0xff]  ;;  %v19777_v54 = vld [vmem:[#allocation2 + $0x30] sm:$0xff]  ;;  %v19788_v18 = vld [vmem:[#allocation2 + $0x48] sm:$0xff] }
 0x32c   : > { %v11260_v12 = vrot.slane %v10682_v58, %v16005_v7  ;;  %v10310_v56 = vsel %vm10264_vm1, %v10241_v20, %v10287_v26  ;;  %v11356_v22 = vsel %vm19706_vm4, %v11236_v62, 0.0  ;;  %vm10265_vm13 = vcmp.gt.f32.partialorder %v10242_v27, 0.0  ;;  %v19792_v58 = vld [vmem:[#allocation2 + $0x50] sm:$0xff]  ;;  %v19800_v26 = vld [vmem:[#allocation2 + $0x68] sm:$0xff]  ;;  %v19804_v62 = vld [vmem:[#allocation2 + $0x78] sm:$0xff] }
 0x32d   : > { %v11252_v24 = vrot.slane %v11238_v1, %v16005_v7  ;;  %v10691_v3 = vcombine.high %v10689_v46, %v10689_v46  ;;  %v10692_v55 = vcombine.high %v10310_v56, %v10310_v56  ;;  %v11261_v42 = vcombine.low %v10690_v47, %v10689_v46  ;;  %11388 = vst.msk [vmem:[#allocation2 + $0xc0] sm:$0xff] %vm11362_vm9, %v11356_v22  ;;  %v19808_v1 = vld [vmem:[#allocation2 + $0x80] sm:$0xff]  ;;  %v19812_v46 = vld [vmem:[#allocation2 + $0x90] sm:$0xff] }
 0x32e   : > { %v11358_v40 = vsel %vm10828_vm5, %v11260_v12, 0.0  ;;  %v10699_v43 = vrot.slane %v10310_v56, %v16005_v7  ;;  %v10288_v6 = vmul.f32 0.2, %v10242_v27  ;;  %v11822_v12 = vld [vmem:[#allocation2 + $0x2] sm:$0xff]  ;;  %v11823_v56 = vld [vmem:[#allocation2 + $0xa] sm:$0xff]  ;;  %v19833_v22 = vld [vmem:[#allocation2 + $0x1a] sm:$0xff] }
 0x32f   : > { %v11253_v36 = vcombine.low %v11245_v10, %v11252_v24  ;;  %11390 = vst.msk [vmem:[#allocation2 + $0xd0] sm:$0x3] %vm11365_vm10, %v11358_v40  ;;  %v10706_v32 = vrot.slane %v10692_v55, %v16005_v7  ;;  %v11269_v41 = vrot.slane %v11261_v42, %v16005_v7  ;;  %v19820_v10 = vld [vmem:[#allocation2 + $0xa8] sm:$0xff]  ;;  %v14201_v24 = vld [vmem:[%s20186_s3 + $0x10] sm:$0xf]  ;;  %v19847_v42 = vld [vmem:[#allocation2 + $0x3a] sm:$0xff] }
 0x330   : > { %v10707_v37 = vcombine.high %v10699_v43, %v10699_v43  ;;  %v11262_v52 = vcombine.low %v10691_v3, %v10699_v43  ;;  %v19736_v44 = vld [vmem:[#allocation2 + $0xa9] sm:$0xff]  ;;  %v19738_v0 = vld [vmem:[#allocation2 + $0xb1] sm:$0xff]  ;;  %v10311_v13 = vsel %vm10265_vm13, %v10242_v27, %v10288_v6 }
 0x331   : > { %v11357_v2 = vsel %vm19682_vm3, %v11253_v36, 0.0  ;;  %v10708_v19 = vcombine.high %v10706_v32, %v10706_v32  ;;  %15325 = vmatprep.mubr.msk.f32.mxu1 %vm11362_vm9, %v19736_v44  ;;  %v10715_v28 = vrot.slane %v10311_v13, %v16005_v7  ;;  %v19824_v47 = vld [vmem:[#allocation2 + $0xb0] sm:$0xff]  ;;  %v19839_v3 = vld [vmem:[#allocation2 + $0x22] sm:$0xff]  ;;  %v14237_v13 = vld [vmem:[%s20186_s3 + $0x18] sm:$0xf] }
 0x332   : > { %11389 = vst.msk [vmem:[#allocation2 + $0xc8] sm:$0xff] %vm11362_vm9, %v11357_v2  ;;  %v11276_v8 = vrot.slane %v11262_v52, %v16005_v7  ;;  %15326 = vmatmul.mubr.msk.f32.gmra.mrb[150].mxu1 %vm11362_vm9, %v19738_v0  ;;  %v11278_v49 = vcombine.low %v10707_v37, %v10706_v32  ;;  %v19843_v55 = vld [vmem:[#allocation2 + $0x32] sm:$0xff]  ;;  %v19851_v40 = vld [vmem:[#allocation2 + $0x4a] sm:$0xff]  ;;  %v19859_v27 = vld [vmem:[#allocation2 + $0x62] sm:$0xff] }
 0x333   : > { %15330 = vmatprep.mubr.msk.f32.mxu1 %vm11362_vm9, %v11394_v17  ;;  %v10716_v33 = vcombine.high %v10715_v28, %v10715_v28  ;;  %v11279_v45 = vcombine.low %v10708_v19, %v10715_v28  ;;  %v19855_v43 = vld [vmem:[#allocation2 + $0x52] sm:$0xff]  ;;  %v19863_v36 = vld [vmem:[#allocation2 + $0x6a] sm:$0xff]  ;;  %v19867_v32 = vld [vmem:[#allocation2 + $0x7a] sm:$0xff] }
 0x334   : > { %v11277_v5 = vcombine.low %v11269_v41, %v11276_v8  ;;  %v11286_v14 = vrot.slane %v11278_v49, %v16005_v7  ;;  %v19871_v37 = vld [vmem:[#allocation2 + $0x82] sm:$0xff]  ;;  %v19879_v52 = vld [vmem:[#allocation2 + $0x9a] sm:$0xff]  ;;  %v19883_v2 = vld [vmem:[#allocation2 + $0xaa] sm:$0xff] }
 0x335   : > { %v11293_v20 = vrot.slane %v11279_v45, %v16005_v7  ;;  %v11301_v29 = vrot.slane %v10716_v33, %v16005_v7  ;;  %v19887_v6 = vld [vmem:[#allocation2 + $0xb2] sm:$0xff]  ;;  %v12067_v8 = vld [vmem:[#allocation2 + $0xc0] sm:$0xff]  ;;  %v14255_v17 = vld [vmem:[%s20186_s3 + $0x1c] sm:$0xf] }
 0x336   : > { %v11359_v31 = vsel %vm10796_vm11, %v11277_v5, 0.0  ;;  %15331 = vmatmul.mubr.msk.f32.vlgmr.msra.gmra.mrb[136].mxu1 %vm11362_vm9, %v11395_v4  ;;  %v14219_v41 = vld [vmem:[%s20186_s3 + $0x14] sm:$0xf]  ;;  %v14273_v28 = vld [vmem:[%s20186_s3 + $0x20] sm:$0xf] }
 0x337   : > { %11391 = vst.msk [vmem:[#allocation2 + $0xd8] sm:$0xff] %vm11362_vm9, %v11359_v31  ;;  %15355 = vmatpush3.msk.msra.mxu1 %vm11477_vm2, %v19338_v39  ;;  %15333 = vmatprep.mubr.msk.f32.mxu1 %vm11362_vm9, %v19762_v53  ;;  %v11294_v21 = vcombine.low %v11286_v14, %v11293_v20  ;;  %v11361_v34 = vsel %vm10831_vm7, %v11301_v29, 0.0  ;;  %v19784_v39 = vld [vmem:[#allocation2 + $0x38] sm:$0xff]  ;;  %v13459_v20 = vld [vmem:[%s20092_s8 + $0x10] sm:$0xff] }
 0x338   : > { %15380 = vmatprep.subr.msk.mxu1 %vm11477_vm2, %v14183_v9  ;;  %11393 = vst.msk [vmem:[#allocation2 + $0xe8] sm:$0x3] %vm11365_vm10, %v11361_v34 }
 0x339   : > { %v11360_v7 = vsel %vm19730_vm6, %v11294_v21, 0.0  ;;  %v12068_v19 = vld [vmem:[#allocation2 + $0xc8] sm:$0xff] }
 0x33a   : > { %15334 = vmatmul.mubr.msk.f32.gmra.mrb[138].mxu1 %vm11362_vm9, %v19772_v61  ;;  %11392 = vst.msk [vmem:[#allocation2 + $0xe0] sm:$0xff] %vm11362_vm9, %v11360_v7  ;;  %v12527_v5 = vld [vmem:[#allocation2 + $0xc2] sm:$0xff]  ;;  %v12528_v49 = vld [vmem:[#allocation2 + $0xca] sm:$0xff] }
 0x33b   : > { %15336 = vmatprep.mubr.msk.f32.mxu1 %vm11362_vm9, %v19777_v54 }
 0x33e   : > { %15337 = vmatmul.mubr.msk.f32.gmra.mrb[140].mxu1 %vm11362_vm9, %v19784_v39  ;;  %v12758_v31 = vld [vmem:[#allocation2 + $0xd8] sm:$0xff] }
 0x33f   : > { %15339 = vmatprep.mubr.msk.f32.mxu1 %vm11362_vm9, %v19788_v18 }
 0x341   : > { %v12759_v33 = vld [vmem:[#allocation2 + $0xe0] sm:$0xff] }
 0x342   : > { %15340 = vmatmul.mubr.msk.f32.gmra.mrb[142].mxu1 %vm11362_vm9, %v19792_v58 }
 0x343   : > { %15342 = vmatprep.mubr.msk.f32.mxu1 %vm11362_vm9, %v19796_v25 }
 0x346   : > { %15343 = vmatmul.mubr.msk.f32.gmra.mrb[144].mxu1 %vm11362_vm9, %v19800_v26 }
 0x347   : > { %15345 = vmatprep.mubr.msk.f32.mxu1 %vm11362_vm9, %v19804_v62 }
 0x34a   : > { %15346 = vmatmul.mubr.msk.f32.gmra.mrb[146].mxu1 %vm11362_vm9, %v19808_v1 }
 0x34b   : > { %15348 = vmatprep.mubr.msk.f32.mxu1 %vm11362_vm9, %v19812_v46 }
 0x34e   : > { %15349 = vmatmul.mubr.msk.f32.gmra.mrb[148].mxu1 %vm11362_vm9, %v19816_v23 }
 0x34f   : > { %15351 = vmatprep.mubr.msk.f32.mxu1 %vm11362_vm9, %v19820_v10 }
 0x352   : > { %15352 = vmatmul.mubr.msk.f32.gmra.mrb[150].mxu1 %vm11362_vm9, %v19824_v47 }
 0x353   : > { %15356 = vmatprep.mubr.msk.f32.mxu1 %vm11362_vm9, %v11822_v12 }
 0x356   : > { %15357 = vmatmul.mubr.msk.f32.vlgmr.msra.gmra.mrb[136].mxu1 %vm11362_vm9, %v11823_v56 }
 0x357   : > { %15381 = vmatpush3.msk.msra.mxu1 %vm11477_vm2, %v14183_v9  ;;  %15359 = vmatprep.mubr.msk.f32.mxu1 %vm11362_vm9, %v19833_v22  ;;  %v13460_v9 = vld [vmem:[%s20092_s8 + $0x18] sm:$0xff] }
 0x358   : > { %15406 = vmatprep.subr.msk.mxu1 %vm11477_vm2, %v14201_v24 }
 0x35a   : > { %15360 = vmatmul.mubr.msk.f32.gmra.mrb[138].mxu1 %vm11362_vm9, %v19839_v3 }
 0x35b   : > { %15362 = vmatprep.mubr.msk.f32.mxu1 %vm11362_vm9, %v19843_v55 }
 0x35e   : > { %15363 = vmatmul.mubr.msk.f32.gmra.mrb[140].mxu1 %vm11362_vm9, %v19847_v42 }
 0x35f   : > { %15365 = vmatprep.mubr.msk.f32.mxu1 %vm11362_vm9, %v19851_v40 }
 0x362   : > { %15366 = vmatmul.mubr.msk.f32.gmra.mrb[142].mxu1 %vm11362_vm9, %v19855_v43 }
 0x363   : > { %15368 = vmatprep.mubr.msk.f32.mxu1 %vm11362_vm9, %v19859_v27 }
 0x366   : > { %15369 = vmatmul.mubr.msk.f32.gmra.mrb[144].mxu1 %vm11362_vm9, %v19863_v36 }
 0x367   : > { %15371 = vmatprep.mubr.msk.f32.mxu1 %vm11362_vm9, %v19867_v32 }
 0x36a   : > { %15372 = vmatmul.mubr.msk.f32.gmra.mrb[146].mxu1 %vm11362_vm9, %v19871_v37 }
 0x36b   : > { %15374 = vmatprep.mubr.msk.f32.mxu1 %vm11362_vm9, %v19875_v15 }
 0x36e   : > { %15375 = vmatmul.mubr.msk.f32.gmra.mrb[148].mxu1 %vm11362_vm9, %v19879_v52 }
 0x36f   : > { %15377 = vmatprep.mubr.msk.f32.mxu1 %vm11362_vm9, %v19883_v2 }
 0x372   : > { %15378 = vmatmul.mubr.msk.f32.gmra.mrb[150].mxu1 %vm11362_vm9, %v19887_v6 }
 0x373   : > { %15382 = vmatprep.mubr.msk.f32.mxu1 %vm11362_vm9, %v19762_v53 }
 0x376   : > { %15383 = vmatmul.mubr.msk.f32.vlgmr.msra.gmra.mrb[136].mxu1 %vm11362_vm9, %v19772_v61 }
 0x377   : > { %15407 = vmatpush3.msk.msra.mxu1 %vm11477_vm2, %v14201_v24  ;;  %15385 = vmatprep.mubr.msk.f32.mxu1 %vm11362_vm9, %v19777_v54 }
 0x378   : > { %15432 = vmatprep.subr.msk.mxu1 %vm11477_vm2, %v14219_v41 }
 0x37a   : > { %15386 = vmatmul.mubr.msk.f32.gmra.mrb[138].mxu1 %vm11362_vm9, %v19784_v39 }
 0x37b   : > { %15388 = vmatprep.mubr.msk.f32.mxu1 %vm11362_vm9, %v19788_v18 }
 0x37e   : > { %15389 = vmatmul.mubr.msk.f32.gmra.mrb[140].mxu1 %vm11362_vm9, %v19792_v58 }
 0x37f   : > { %15391 = vmatprep.mubr.msk.f32.mxu1 %vm11362_vm9, %v19796_v25 }
 0x382   : > { %15392 = vmatmul.mubr.msk.f32.gmra.mrb[142].mxu1 %vm11362_vm9, %v19800_v26 }
 0x383   : > { %15394 = vmatprep.mubr.msk.f32.mxu1 %vm11362_vm9, %v19804_v62 }
 0x386   : > { %15395 = vmatmul.mubr.msk.f32.gmra.mrb[144].mxu1 %vm11362_vm9, %v19808_v1 }
 0x387   : > { %15397 = vmatprep.mubr.msk.f32.mxu1 %vm11362_vm9, %v19812_v46 }
 0x38a   : > { %15398 = vmatmul.mubr.msk.f32.gmra.mrb[146].mxu1 %vm11362_vm9, %v19816_v23 }
 0x38b   : > { %15400 = vmatprep.mubr.msk.f32.mxu1 %vm11362_vm9, %v19820_v10 }
 0x38e   : > { %15401 = vmatmul.mubr.msk.f32.gmra.mrb[148].mxu1 %vm11362_vm9, %v19824_v47 }
 0x38f   : > { %15403 = vmatprep.mubr.msk.f32.mxu1 %vm11362_vm9, %v12067_v8 }
 0x392   : > { %15404 = vmatmul.mubr.msk.f32.gmra.mrb[150].mxu1 %vm11362_vm9, %v12068_v19 }
 0x393   : > { %15408 = vmatprep.mubr.msk.f32.mxu1 %vm11362_vm9, %v19388_v63  ;;  %v12297_v63 = vld [vmem:[#allocation2 + $0xc1] sm:$0xff] }
 0x396   : > { %15409 = vmatmul.mubr.msk.f32.vlgmr.msra.gmra.mrb[136].mxu1 %vm11362_vm9, %v19390_v57  ;;  %v12298_v57 = vld [vmem:[#allocation2 + $0xc9] sm:$0xff] }
 0x397   : > { %15433 = vmatpush3.msk.msra.mxu1 %vm11477_vm2, %v14219_v41  ;;  %15411 = vmatprep.mubr.msk.f32.mxu1 %vm11362_vm9, %v19449_v30 }
 0x398   : > { %15458 = vmatprep.subr.msk.mxu1 %vm11477_vm2, %v14237_v13 }
 0x39a   : > { %15412 = vmatmul.mubr.msk.f32.gmra.mrb[138].mxu1 %vm11362_vm9, %v19451_v35 }
 0x39b   : > { %15414 = vmatprep.mubr.msk.f32.mxu1 %vm11362_vm9, %v19501_v60 }
 0x39e   : > { %15415 = vmatmul.mubr.msk.f32.gmra.mrb[140].mxu1 %vm11362_vm9, %v19503_v38 }
 0x39f   : > { %15417 = vmatprep.mubr.msk.f32.mxu1 %vm11362_vm9, %v19570_v50 }
 0x3a2   : > { %15418 = vmatmul.mubr.msk.f32.gmra.mrb[142].mxu1 %vm11362_vm9, %v19572_v59 }
 0x3a3   : > { %15420 = vmatprep.mubr.msk.f32.mxu1 %vm11362_vm9, %v19628_v11 }
 0x3a6   : > { %15421 = vmatmul.mubr.msk.f32.gmra.mrb[144].mxu1 %vm11362_vm9, %v19630_v16 }
 0x3a7   : > { %15423 = vmatprep.mubr.msk.f32.mxu1 %vm11362_vm9, %v19686_v51 }
 0x3aa   : > { %15424 = vmatmul.mubr.msk.f32.gmra.mrb[146].mxu1 %vm11362_vm9, %v19688_v48 }
 0x3ab   : > { %15426 = vmatprep.mubr.msk.f32.mxu1 %vm11362_vm9, %v19736_v44 }
 0x3ae   : > { %15427 = vmatmul.mubr.msk.f32.gmra.mrb[148].mxu1 %vm11362_vm9, %v19738_v0 }
 0x3af   : > { %15429 = vmatprep.mubr.msk.f32.mxu1 %vm11362_vm9, %v12297_v63 }
 0x3b2   : > { %15430 = vmatmul.mubr.msk.f32.gmra.mrb[150].mxu1 %vm11362_vm9, %v12298_v57 }
 0x3b3   : > { %15434 = vmatprep.mubr.msk.f32.mxu1 %vm11362_vm9, %v19833_v22  ;;  %v13466_v22 = vld [vmem:[%s20092_s8 + $0x48] sm:$0xff] }
 0x3b6   : > { %15435 = vmatmul.mubr.msk.f32.vlgmr.msra.gmra.mrb[136].mxu1 %vm11362_vm9, %v19839_v3 }
 0x3b7   : > { %15459 = vmatpush3.msk.msra.mxu1 %vm11477_vm2, %v14237_v13  ;;  %15437 = vmatprep.mubr.msk.f32.mxu1 %vm11362_vm9, %v19843_v55 }
 0x3b8   : > { %15484 = vmatprep.subr.msk.mxu1 %vm11477_vm2, %v14255_v17 }
 0x3ba   : > { %15438 = vmatmul.mubr.msk.f32.gmra.mrb[138].mxu1 %vm11362_vm9, %v19847_v42 }
 0x3bb   : > { %15440 = vmatprep.mubr.msk.f32.mxu1 %vm11362_vm9, %v19851_v40 }
 0x3be   : > { %15441 = vmatmul.mubr.msk.f32.gmra.mrb[140].mxu1 %vm11362_vm9, %v19855_v43 }
 0x3bf   : > { %15443 = vmatprep.mubr.msk.f32.mxu1 %vm11362_vm9, %v19859_v27 }
 0x3c2   : > { %15444 = vmatmul.mubr.msk.f32.gmra.mrb[142].mxu1 %vm11362_vm9, %v19863_v36 }
 0x3c3   : > { %15446 = vmatprep.mubr.msk.f32.mxu1 %vm11362_vm9, %v19867_v32 }
 0x3c6   : > { %15447 = vmatmul.mubr.msk.f32.gmra.mrb[144].mxu1 %vm11362_vm9, %v19871_v37 }
 0x3c7   : > { %15449 = vmatprep.mubr.msk.f32.mxu1 %vm11362_vm9, %v19875_v15 }
 0x3ca   : > { %15450 = vmatmul.mubr.msk.f32.gmra.mrb[146].mxu1 %vm11362_vm9, %v19879_v52 }
 0x3cb   : > { %15452 = vmatprep.mubr.msk.f32.mxu1 %vm11362_vm9, %v19883_v2 }
 0x3ce   : > { %15453 = vmatmul.mubr.msk.f32.gmra.mrb[148].mxu1 %vm11362_vm9, %v19887_v6 }
 0x3cf   : > { %15455 = vmatprep.mubr.msk.f32.mxu1 %vm11362_vm9, %v12527_v5 }
 0x3d2   : > { %15456 = vmatmul.mubr.msk.f32.gmra.mrb[150].mxu1 %vm11362_vm9, %v12528_v49 }
 0x3d3   : > { %15460 = vmatprep.mubr.msk.f32.mxu1 %vm11362_vm9, %v19777_v54  ;;  %v13462_v54 = vld [vmem:[%s20092_s8 + $0x28] sm:$0xff] }
 0x3d6   : > { %15461 = vmatmul.mubr.msk.f32.vlgmr.msra.gmra.mrb[136].mxu1 %vm11362_vm9, %v19784_v39 }
 0x3d7   : > { %15485 = vmatpush3.msk.msra.mxu1 %vm11477_vm2, %v14255_v17  ;;  %15463 = vmatprep.mubr.msk.f32.mxu1 %vm11362_vm9, %v19788_v18  ;;  %v13461_v18 = vld [vmem:[%s20092_s8 + $0x20] sm:$0xff] }
 0x3d8   : > { %15510 = vmatprep.subr.msk.mxu1 %vm11477_vm2, %v14273_v28 }
 0x3da   : > { %15464 = vmatmul.mubr.msk.f32.gmra.mrb[138].mxu1 %vm11362_vm9, %v19792_v58 }
 0x3db   : > { %15466 = vmatprep.mubr.msk.f32.mxu1 %vm11362_vm9, %v19796_v25 }
 0x3de   : > { %15467 = vmatmul.mubr.msk.f32.gmra.mrb[140].mxu1 %vm11362_vm9, %v19800_v26 }
 0x3df   : > { %15469 = vmatprep.mubr.msk.f32.mxu1 %vm11362_vm9, %v19804_v62 }
 0x3e2   : > { %15470 = vmatmul.mubr.msk.f32.gmra.mrb[142].mxu1 %vm11362_vm9, %v19808_v1  ;;  %v13464_v1 = vld [vmem:[%s20092_s8 + $0x38] sm:$0xff] }
 0x3e3   : > { %15472 = vmatprep.mubr.msk.f32.mxu1 %vm11362_vm9, %v19812_v46 }
 0x3e6   : > { %15473 = vmatmul.mubr.msk.f32.gmra.mrb[144].mxu1 %vm11362_vm9, %v19816_v23 }
 0x3e7   : > { %15475 = vmatprep.mubr.msk.f32.mxu1 %vm11362_vm9, %v19820_v10  ;;  %v13463_v10 = vld [vmem:[%s20092_s8 + $0x30] sm:$0xff] }
 0x3ea   : > { %15476 = vmatmul.mubr.msk.f32.gmra.mrb[146].mxu1 %vm11362_vm9, %v19824_v47 }
 0x3eb   : > { %15478 = vmatprep.mubr.msk.f32.mxu1 %vm11362_vm9, %v12067_v8 }
 0x3ee   : > { %15479 = vmatmul.mubr.msk.f32.gmra.mrb[148].mxu1 %vm11362_vm9, %v12068_v19  ;;  %v13470_v19 = vld [vmem:[%s20092_s8 + $0x68] sm:$0xff] }
 0x3ef   : > { %15481 = vmatprep.mubr.msk.f32.mxu1 %vm11362_vm9, %v12758_v31  ;;  %v13472_v31 = vld [vmem:[%s20092_s8 + $0x78] sm:$0xff] }
 0x3f2   : > { %15482 = vmatmul.mubr.msk.f32.gmra.mrb[150].mxu1 %vm11362_vm9, %v12759_v33 }
 0x3f3   : > { %15486 = vmatprep.mubr.msk.f32.mxu1 %vm11362_vm9, %v19449_v30  ;;  %v12988_v30 = vld [vmem:[#allocation2 + $0xd9] sm:$0xff] }
 0x3f6   : > { %15487 = vmatmul.mubr.msk.f32.vlgmr.msra.gmra.mrb[136].mxu1 %vm11362_vm9, %v19451_v35  ;;  %v12989_v35 = vld [vmem:[#allocation2 + $0xe1] sm:$0xff] }
 0x3f7   : > { %15511 = vmatpush3.msk.msra.mxu1 %vm11477_vm2, %v14273_v28  ;;  %15489 = vmatprep.mubr.msk.f32.mxu1 %vm11362_vm9, %v19501_v60  ;;  %v13218_v60 = vld [vmem:[#allocation2 + $0xda] sm:$0xff] }
 0x3fa   : > { %15490 = vmatmul.mubr.msk.f32.gmra.mrb[138].mxu1 %vm11362_vm9, %v19503_v38  ;;  %v13219_v38 = vld [vmem:[#allocation2 + $0xe2] sm:$0xff] }
 0x3fb   : > { %15492 = vmatprep.mubr.msk.f32.mxu1 %vm11362_vm9, %v19570_v50  ;;  %v20097_v50 = vld [vmem:[%s20187_s4] ss:$0 sm:$0xff] }
 0x3fe   : > { %15493 = vmatmul.mubr.msk.f32.gmra.mrb[140].mxu1 %vm11362_vm9, %v19572_v59 }
 0x3ff   : > { %15495 = vmatprep.mubr.msk.f32.mxu1 %vm11362_vm9, %v19628_v11  ;;  %v13458_v11 = vld [vmem:[%s20092_s8 + $0x8] sm:$0xff] }
 0x402   : > { %15496 = vmatmul.mubr.msk.f32.gmra.mrb[142].mxu1 %vm11362_vm9, %v19630_v16 }
 0x403   : > { %15498 = vmatprep.mubr.msk.f32.mxu1 %vm11362_vm9, %v19686_v51 }
 0x406   : > { %15499 = vmatmul.mubr.msk.f32.gmra.mrb[144].mxu1 %vm11362_vm9, %v19688_v48  ;;  %v13457_v48 = vld [vmem:[%s20092_s8] sm:$0xff] }
 0x407   : > { %15501 = vmatprep.mubr.msk.f32.mxu1 %vm11362_vm9, %v19736_v44 }
 0x40a   : > { %15502 = vmatmul.mubr.msk.f32.gmra.mrb[146].mxu1 %vm11362_vm9, %v19738_v0 }
 0x40b   : > { %15504 = vmatprep.mubr.msk.f32.mxu1 %vm11362_vm9, %v12297_v63 }
 0x40e   : > { %15505 = vmatmul.mubr.msk.f32.gmra.mrb[148].mxu1 %vm11362_vm9, %v12298_v57  ;;  %v13469_v57 = vld [vmem:[%s20092_s8 + $0x60] sm:$0xff] }
 0x40f   : > { %15507 = vmatprep.mubr.msk.f32.mxu1 %vm11362_vm9, %v12988_v30 }
 0x412   : > { %15508 = vmatmul.mubr.msk.f32.gmra.mrb[150].mxu1 %vm11362_vm9, %v12989_v35  ;;  %v13471_v35 = vld [vmem:[%s20092_s8 + $0x70] sm:$0xff] }
 0x413   : > { %15512 = vmatprep.mubr.msk.f32.mxu1 %vm11362_vm9, %v19843_v55 }
 0x416   : > { %15513 = vmatmul.mubr.msk.f32.vlgmr.msra.gmra.mrb[136].mxu1 %vm11362_vm9, %v19847_v42  ;;  %v13465_v42 = vld [vmem:[%s20092_s8 + $0x40] sm:$0xff] }
 0x417   : > { %15515 = vmatprep.mubr.msk.f32.mxu1 %vm11362_vm9, %v19851_v40 }
 0x41a   : > { %15516 = vmatmul.mubr.msk.f32.gmra.mrb[138].mxu1 %vm11362_vm9, %v19855_v43 }
 0x41b   : > { %15518 = vmatprep.mubr.msk.f32.mxu1 %vm11362_vm9, %v19859_v27 }
 0x41e   : > { %15519 = vmatmul.mubr.msk.f32.gmra.mrb[140].mxu1 %vm11362_vm9, %v19863_v36 }
 0x41f   : > { %15521 = vmatprep.mubr.msk.f32.mxu1 %vm11362_vm9, %v19867_v32  ;;  %v13468_v32 = vld [vmem:[%s20092_s8 + $0x58] sm:$0xff] }
 0x422   : > { %15522 = vmatmul.mubr.msk.f32.gmra.mrb[142].mxu1 %vm11362_vm9, %v19871_v37 }
 0x423   : > { %15524 = vmatprep.mubr.msk.f32.mxu1 %vm11362_vm9, %v19875_v15 }
 0x426   : > { %15525 = vmatmul.mubr.msk.f32.gmra.mrb[144].mxu1 %vm11362_vm9, %v19879_v52  ;;  %v13467_v52 = vld [vmem:[%s20092_s8 + $0x50] sm:$0xff] }
 0x427   : > { %15527 = vmatprep.mubr.msk.f32.mxu1 %vm11362_vm9, %v19883_v2 }
 0x42a   : > { %15528 = vmatmul.mubr.msk.f32.gmra.mrb[146].mxu1 %vm11362_vm9, %v19887_v6 }
 0x42b   : > { %15530 = vmatprep.mubr.msk.f32.mxu1 %vm11362_vm9, %v12527_v5 }
 0x42e   : > { %15531 = vmatmul.mubr.msk.f32.gmra.mrb[148].mxu1 %vm11362_vm9, %v12528_v49 }
 0x42f   : > { %15533 = vmatprep.mubr.msk.f32.mxu1 %vm11362_vm9, %v13218_v60 }
 0x432   : > { %15534 = vmatmul.mubr.msk.f32.gmra.mrb[150].mxu1 %vm11362_vm9, %v13219_v38 }
 0x4e9   : > { %v15514_v59 = vpop.f32.mrb[136].mxu1 }
 0x4ea   : > { %v13442_v16 = vadd.f32 %v15514_v59, %v20097_v50  ;;  %v13339_v51 = vpop.f32.mrb[137].mxu1 }
 0x4eb   : > { %v13441_v44 = vadd.f32 %v20097_v50, %v13339_v51 }
 0x4ec   : > { %v13474_v0 = vadd.f32 %v13458_v11, %v13442_v16 }
 0x4ed   : > { %v13473_v45 = vadd.f32 %v13457_v48, %v13441_v44  ;;  %v15517_v4 = vpop.f32.mrb[138].mxu1 }
 0x4ee   : > { %13490 = vst.msk [vmem:[%s20105_s11 + $0x8] sm:$0xff] %vm11362_vm9, %v13474_v0  ;;  %v13444_v53 = vadd.f32 %v15517_v4, %v20097_v50  ;;  %v13349_v14 = vpop.f32.mrb[139].mxu1 }
 0x4ef   : > { %13489 = vst.msk [vmem:[%s20105_s11] sm:$0xff] %vm11362_vm9, %v13473_v45  ;;  %v13443_v29 = vadd.f32 %v20097_v50, %v13349_v14 }
 0x4f0   : > { %v13476_v21 = vadd.f32 %v13460_v9, %v13444_v53 }
 0x4f1   : > { %v13475_v34 = vadd.f32 %v13459_v20, %v13443_v29  ;;  %v15520_v61 = vpop.f32.mrb[140].mxu1 }
 0x4f2   : > { %13492 = vst.msk [vmem:[%s20105_s11 + $0x18] sm:$0xff] %vm11362_vm9, %v13476_v21  ;;  %v13446_v7 = vadd.f32 %v15520_v61, %v20097_v50  ;;  %v13359_v39 = vpop.f32.mrb[141].mxu1 }
 0x4f3   : > { %13491 = vst.msk [vmem:[%s20105_s11 + $0x10] sm:$0xff] %vm11362_vm9, %v13475_v34  ;;  %v13445_v58 = vadd.f32 %v20097_v50, %v13359_v39 }
 0x4f4   : > { %v13478_v25 = vadd.f32 %v13462_v54, %v13446_v7 }
 0x4f5   : > { %v13477_v26 = vadd.f32 %v13461_v18, %v13445_v58  ;;  %v15523_v62 = vpop.f32.mrb[142].mxu1 }
 0x4f6   : > { %13494 = vst.msk [vmem:[%s20105_s11 + $0x28] sm:$0xff] %vm11362_vm9, %v13478_v25  ;;  %v13448_v46 = vadd.f32 %v15523_v62, %v20097_v50  ;;  %v13369_v23 = vpop.f32.mrb[143].mxu1 }
 0x4f7   : > { %13493 = vst.msk [vmem:[%s20105_s11 + $0x20] sm:$0xff] %vm11362_vm9, %v13477_v26  ;;  %v13447_v47 = vadd.f32 %v20097_v50, %v13369_v23 }
 0x4f8   : > { %v13480_v12 = vadd.f32 %v13464_v1, %v13448_v46 }
 0x4f9   : > { %v13479_v56 = vadd.f32 %v13463_v10, %v13447_v47  ;;  %v15526_v24 = vpop.f32.mrb[144].mxu1 }
 0x4fa   : > { %13496 = vst.msk [vmem:[%s20105_s11 + $0x38] sm:$0xff] %vm11362_vm9, %v13480_v12  ;;  %v13450_v3 = vadd.f32 %v15526_v24, %v20097_v50  ;;  %v13379_v55 = vpop.f32.mrb[145].mxu1 }
 0x4fb   : > { %13495 = vst.msk [vmem:[%s20105_s11 + $0x30] sm:$0xff] %vm11362_vm9, %v13479_v56  ;;  %v13449_v40 = vadd.f32 %v20097_v50, %v13379_v55 }
 0x4fc   : > { %v13482_v43 = vadd.f32 %v13466_v22, %v13450_v3 }
 0x4fd   : > { %v13481_v27 = vadd.f32 %v13465_v42, %v13449_v40  ;;  %v15529_v36 = vpop.f32.mrb[146].mxu1 }
 0x4fe   : > { %13498 = vst.msk [vmem:[%s20105_s11 + $0x48] sm:$0xff] %vm11362_vm9, %v13482_v43  ;;  %v13452_v37 = vadd.f32 %v15529_v36, %v20097_v50  ;;  %v13389_v15 = vpop.f32.mrb[147].mxu1 }
 0x4ff   : > { %13497 = vst.msk [vmem:[%s20105_s11 + $0x40] sm:$0xff] %vm11362_vm9, %v13481_v27  ;;  %v13451_v2 = vadd.f32 %v20097_v50, %v13389_v15 }
 0x500   : > { %v13484_v6 = vadd.f32 %v13468_v32, %v13452_v37 }
 0x501   : > { %v13483_v41 = vadd.f32 %v13467_v52, %v13451_v2  ;;  %v15532_v8 = vpop.f32.mrb[148].mxu1 }
 0x502   : > { %13500 = vst.msk [vmem:[%s20105_s11 + $0x58] sm:$0xff] %vm11362_vm9, %v13484_v6  ;;  %v13454_v13 = vadd.f32 %v15532_v8, %v20097_v50  ;;  %v13399_v63 = vpop.f32.mrb[149].mxu1 }
 0x503   : > { %13499 = vst.msk [vmem:[%s20105_s11 + $0x50] sm:$0xff] %vm11362_vm9, %v13483_v41  ;;  %v13453_v17 = vadd.f32 %v20097_v50, %v13399_v63 }
 0x504   : > { %v13486_v5 = vadd.f32 %v13470_v19, %v13454_v13 }
 0x505   : > { %v13485_v49 = vadd.f32 %v13469_v57, %v13453_v17  ;;  %v15535_v28 = vpop.f32.mrb[150].mxu1 }
 0x506   : > { %13502 = vst.msk [vmem:[%s20105_s11 + $0x68] sm:$0xff] %vm11362_vm9, %v13486_v5  ;;  %v13456_v33 = vadd.f32 %v15535_v28, %v20097_v50  ;;  %v13409_v30 = vpop.f32.mrb[151].mxu1 }
 0x507   : > { %13501 = vst.msk [vmem:[%s20105_s11 + $0x60] sm:$0xff] %vm11362_vm9, %v13485_v49  ;;  %v13455_v60 = vadd.f32 %v20097_v50, %v13409_v30 }
 0x508   : > { %v13488_v38 = vadd.f32 %v13472_v31, %v13456_v33 }
 0x509   : > { %v13487_v59 = vadd.f32 %v13471_v35, %v13455_v60 }
 0x50a   : > { %13504 = vst.msk [vmem:[%s20105_s11 + $0x78] sm:$0xff] %vm11362_vm9, %v13488_v38 }
 0x50b   : > { %13503 = vst.msk [vmem:[%s20105_s11 + $0x70] sm:$0xff] %vm11362_vm9, %v13487_v59 }
 0x50c PF: > { %s16_s25 = sadd.s32 1, %s15915_s25   ;;  %s20469_s21 = smov %s15907_s23 }
 0x50d   : > { %p13_p8 = scmp.ge.s32.totalorder %s16_s25, 6   ;;  %s20470_s22 = smov %s15911_s24 }
 0x50e   : > { %s20471_s23 = smov %s20474_s26  ;;  %s20472_s24 = smov %s20478_s27 }
 0x50f   :  { %15 = sbr.rel (!%p13_p8) target bundleno = 3 (0x3), region = 97 }

</bundles_post_ra>
